<compile_context>
chip_gen: v7x
topology: tpu7x:2x2x1
jax: 0.10.0
libtpu: 0.0.40
codegen_flags: <defaults>
</compile_context>

<pallas_src>
import functools

import jax
import jax.numpy as jnp
import numpy as np
from jax import lax
from jax.experimental import pallas as pl
from jax.experimental.pallas import tpu as pltpu

BF16 = jnp.bfloat16
_EPS = 1e-5
_VMEM_LIMIT_BYTES = 32 * 1024 * 1024   # safe default on v5e/v6e (128MiB) and v7x (64MiB)


# ----------------------------- in-kernel helpers -----------------------------

def _pad1_hw(x):
    """Zero-pad a (H, W, C) value by 1 on both spatial dims (VMEM-local)."""
    H, W, C = x.shape
    zc = jnp.zeros((H, 1, C), x.dtype)
    xp = jnp.concatenate([zc, x, zc], axis=1)            # (H, W+2, C)
    zr = jnp.zeros((1, W + 2, C), x.dtype)
    return jnp.concatenate([zr, xp, zr], axis=0)         # (H+2, W+2, C)


def _im2col3x3(xpad, H, W, C):
    """(H+2, W+2, C) -> (H*W, 9*C) patch matrix, tap-major (dy, dx), C minor.

    Matches a (3,3,Cin,Cout) HWIO weight reshaped to (9*Cin, Cout)."""
    cols = []
    for dy in range(3):
        for dx in range(3):
            cols.append(xpad[dy:dy + H, dx:dx + W, :].reshape(H * W, C))
    return jnp.concatenate(cols, axis=1)


# ------------------------------- Pallas kernels -------------------------------

def _make_mlp_kernel(H, W, Cs, nh, nsplit):
    """mlp_shared: fused 3x3 conv + ReLU; output pre-split into nsplit maps."""
    def kernel(seg_ref, w_ref, b_ref, o_ref):
        seg = seg_ref[0].astype(BF16)                        # (H, W, Cs)
        col = _im2col3x3(_pad1_hw(seg), H, W, Cs)            # (H*W, 9*Cs) bf16
        for s in range(nsplit):
            y = jnp.dot(col, w_ref[s], preferred_element_type=jnp.float32)
            y = jnp.maximum(y + b_ref[s], 0.0)
            o_ref[0, s] = y.reshape(H, W, nh).astype(o_ref.dtype)
    return kernel


def _make_stats_kernel(H, W, C, count):
    """Affine-free sync-batch-norm stats: accumulate sum / sumsq over (N,H,W);
    finalize (mean, inv_std) in-place at the last grid step."""
    inv_count = 1.0 / float(count)

    def kernel(x_ref, o_ref):
        @pl.when(pl.program_id(0) == 0)
        def _():
            o_ref[...] = jnp.zeros_like(o_ref)

        x = x_ref[0].astype(jnp.float32).reshape(H * W, C)
        o_ref[0:1, :] = o_ref[0:1, :] + jnp.sum(x, axis=0, keepdims=True)
        o_ref[1:2, :] = o_ref[1:2, :] + jnp.sum(x * x, axis=0, keepdims=True)

        @pl.when(pl.program_id(0) == pl.num_programs(0) - 1)
        def _():
            mean = o_ref[0:1, :] * inv_count
            var = jnp.maximum(o_ref[1:2, :] * inv_count - mean * mean, 0.0)
            o_ref[0:1, :] = mean
            o_ref[1:2, :] = lax.rsqrt(var + _EPS)
    return kernel


def _make_spade_conv3_kernel(H, W, C, Ch, Cout, residual):
    """Fused: SPADE(gamma/beta conv + normalize + modulate) + LeakyReLU(0.2)
    + 3x3 conv (+ optional residual add)."""
    def kernel(x_ref, a_ref, st_ref, wgb_ref, bgb_ref, wc_ref, bc_ref, *rest):
        if residual:
            res_ref, o_ref = rest
        else:
            (o_ref,) = rest

        # gamma & beta from ONE matmul over the shared im2col of the activation map.
        acol = _im2col3x3(_pad1_hw(a_ref[0, 0]), H, W, Ch)           # bf16
        gb = jnp.dot(acol, wgb_ref[...], preferred_element_type=jnp.float32)
        gb = gb + bgb_ref[...]                                        # (H*W, 2C) f32
        gamma = gb[:, :C]
        beta = gb[:, C:]

        # affine-free batch-norm + SPADE modulation + leaky ReLU (f32 VPU math).
        mean = st_ref[0:1, :]
        invstd = st_ref[1:2, :]
        xn = (x_ref[0].astype(jnp.float32).reshape(H * W, C) - mean) * invstd
        h = xn * (1.0 + gamma) + beta
        h = jnp.where(h >= 0.0, h, 0.2 * h)

        # 3x3 conv of h: single matmul (bf16 MXU inputs, f32 accumulate),
        # bias + residual fused into the epilogue.
        hcol = _im2col3x3(_pad1_hw(h.astype(BF16).reshape(H, W, C)), H, W, C)
        y = jnp.dot(hcol, wc_ref[...], preferred_element_type=jnp.float32)
        y = y + bc_ref[...]
        if residual:
            y = y + res_ref[0].astype(jnp.float32).reshape(H * W, Cout)
        o_ref[0] = y.reshape(H, W, Cout).astype(o_ref.dtype)
    return kernel


def _make_spade_conv1_kernel(H, W, C, Ch, Cout):
    """Fused shortcut: SPADE (no activation) + 1x1 conv (bias-free)."""
    def kernel(x_ref, a_ref, st_ref, wgb_ref, bgb_ref, ws_ref, o_ref):
        acol = _im2col3x3(_pad1_hw(a_ref[0, 0]), H, W, Ch)
        gb = jnp.dot(acol, wgb_ref[...], preferred_element_type=jnp.float32)
        gb = gb + bgb_ref[...]
        gamma = gb[:, :C]
        beta = gb[:, C:]
        mean = st_ref[0:1, :]
        invstd = st_ref[1:2, :]
        xn = (x_ref[0].astype(jnp.float32).reshape(H * W, C) - mean) * invstd
        xs = xn * (1.0 + gamma) + beta                       # conv_s has no actvn
        y = jnp.dot(xs.astype(BF16), ws_ref[...], preferred_element_type=jnp.float32)
        o_ref[0] = y.reshape(H, W, Cout).astype(o_ref.dtype)
    return kernel


# ------------------------------ pallas_call wrappers --------------------------

def _cparams(sem):
    return pltpu.CompilerParams(dimension_semantics=sem,
                                vmem_limit_bytes=_VMEM_LIMIT_BYTES)


def mlp_conv(seg, w, b):
    """seg (N,H,W,Cs), w (nsplit, 9*Cs, nh) bf16, b (nsplit,1,nh) f32
       -> actvs (N, nsplit, H, W, nh) bf16."""
    N, H, W, Cs = seg.shape
    nsplit, _, nh = w.shape
    return pl.pallas_call(
        _make_mlp_kernel(H, W, Cs, nh, nsplit),
        out_shape=jax.ShapeDtypeStruct((N, nsplit, H, W, nh), BF16),
        grid=(N,),
        in_specs=[
            pl.BlockSpec((1, H, W, Cs), lambda n: (n, 0, 0, 0)),
            pl.BlockSpec((nsplit, 9 * Cs, nh), lambda n: (0, 0, 0)),
            pl.BlockSpec((nsplit, 1, nh), lambda n: (0, 0, 0)),
        ],
        out_specs=pl.BlockSpec((1, nsplit, H, W, nh), lambda n: (n, 0, 0, 0, 0)),
        compiler_params=_cparams(("parallel",)),
    )(seg, w, b)


def channel_stats(x):
    """x (N,H,W,C) f32 -> (2, C) stacked (mean, inv_std)."""
    N, H, W, C = x.shape
    return pl.pallas_call(
        _make_stats_kernel(H, W, C, N * H * W),
        out_shape=jax.ShapeDtypeStruct((2, C), jnp.float32),
        grid=(N,),
        in_specs=[pl.BlockSpec((1, H, W, C), lambda n: (n, 0, 0, 0))],
        out_specs=pl.BlockSpec((2, C), lambda n: (0, 0)),
        compiler_params=_cparams(("arbitrary",)),   # reduction over the batch axis
    )(x)


def spade_conv3x3(x, actvs, split, stats, wgb, bgb, wc, bc, residual=None):
    N, H, W, C = x.shape
    nh = actvs.shape[-1]
    Cout = wc.shape[-1]
    in_specs = [
        pl.BlockSpec((1, H, W, C), lambda n: (n, 0, 0, 0)),
        pl.BlockSpec((1, 1, H, W, nh), lambda n, s=split: (n, s, 0, 0, 0)),
        pl.BlockSpec((2, C), lambda n: (0, 0)),
        pl.BlockSpec((9 * nh, 2 * C), lambda n: (0, 0)),
        pl.BlockSpec((1, 2 * C), lambda n: (0, 0)),
        pl.BlockSpec((9 * C, Cout), lambda n: (0, 0)),
        pl.BlockSpec((1, Cout), lambda n: (0, 0)),
    ]
    args = [x, actvs, stats, wgb, bgb, wc, bc]
    if residual is not None:
        in_specs.append(pl.BlockSpec((1, H, W, Cout), lambda n: (n, 0, 0, 0)))
        args.append(residual)
    return pl.pallas_call(
        _make_spade_conv3_kernel(H, W, C, nh, Cout, residual is not None),
        out_shape=jax.ShapeDtypeStruct((N, H, W, Cout), jnp.float32),
        grid=(N,),
        in_specs=in_specs,
        out_specs=pl.BlockSpec((1, H, W, Cout), lambda n: (n, 0, 0, 0)),
        compiler_params=_cparams(("parallel",)),
    )(*args)


def spade_conv1x1(x, actvs, split, stats, wgb, bgb, ws):
    N, H, W, C = x.shape
    nh = actvs.shape[-1]
    Cout = ws.shape[-1]
    return pl.pallas_call(
        _make_spade_conv1_kernel(H, W, C, nh, Cout),
        out_shape=jax.ShapeDtypeStruct((N, H, W, Cout), jnp.float32),
        grid=(N,),
        in_specs=[
            pl.BlockSpec((1, H, W, C), lambda n: (n, 0, 0, 0)),
            pl.BlockSpec((1, 1, H, W, nh), lambda n, s=split: (n, s, 0, 0, 0)),
            pl.BlockSpec((2, C), lambda n: (0, 0)),
            pl.BlockSpec((9 * nh, 2 * C), lambda n: (0, 0)),
            pl.BlockSpec((1, 2 * C), lambda n: (0, 0)),
            pl.BlockSpec((C, Cout), lambda n: (0, 0)),
        ],
        out_specs=pl.BlockSpec((1, H, W, Cout), lambda n: (n, 0, 0, 0)),
        compiler_params=_cparams(("parallel",)),
    )(x, actvs, stats, wgb, bgb, ws)


# --------------------------------- glue / wrapper ------------------------------

def nearest_resize_nhwc(seg, H, W):
    # PyTorch F.interpolate(mode='nearest'): src = floor(dst * in / out)
    hs, ws = seg.shape[1], seg.shape[2]
    hi = (jnp.arange(H) * hs) // H
    wi = (jnp.arange(W) * ws) // W
    return seg[:, hi][:, :, wi]


@jax.jit
def fused_block_forward(x_nchw, seg_nchw, kp):
    learned_shortcut = 'convs_w' in kp            # static (pytree structure)
    x = jnp.transpose(x_nchw, (0, 2, 3, 1)).astype(jnp.float32)
    seg = jnp.transpose(seg_nchw, (0, 2, 3, 1)).astype(jnp.float32)
    _, H, W, _ = x.shape
    seg = nearest_resize_nhwc(seg, H, W)

    # fused mlp_shared conv (+ReLU), pre-split SPADE activation maps.
    actvs = mlp_conv(seg, kp['mlp_w'], kp['mlp_b'])
    stats_x = channel_stats(x)

    if learned_shortcut:
        x_s = spade_conv1x1(x, actvs, 2, stats_x,
                            kp['wgb_s'], kp['bgb_s'], kp['convs_w'])
    else:
        x_s = x

    dx = spade_conv3x3(x, actvs, 0, stats_x,
                       kp['wgb_0'], kp['bgb_0'], kp['conv0_w'], kp['conv0_b'])
    stats_dx = channel_stats(dx)
    out = spade_conv3x3(dx, actvs, 1, stats_dx,
                        kp['wgb_1'], kp['bgb_1'], kp['conv1_w'], kp['conv1_b'],
                        residual=x_s)
    return jnp.transpose(out, (0, 3, 1, 2))


# ----------------------------- parameter handling ------------------------------

def init_params(key, ic, channel, hidden, semantic_nc, learned_shortcut):
    keys = iter(jax.random.split(key, 32))

    def w(shape, scale=0.1):
        return (scale * jax.random.normal(next(keys), shape)).astype(jnp.float32)

    nsplit = 3 if learned_shortcut else 2
    c1_out = channel if learned_shortcut else ic
    p = dict(
        nhidden=hidden,
        mlp_w=w((3, 3, semantic_nc, hidden * nsplit)),
        mlp_b=w((hidden * nsplit,)),
        g0_w=w((3, 3, hidden, ic)), g0_b=w((ic,)),
        b0_w=w((3, 3, hidden, ic)), b0_b=w((ic,)),
        conv0_w=w((3, 3, ic, channel)), conv0_b=w((channel,)),
        g1_w=w((3, 3, hidden, channel)), g1_b=w((channel,)),
        b1_w=w((3, 3, hidden, channel)), b1_b=w((channel,)),
        conv1_w=w((3, 3, channel, c1_out)), conv1_b=w((c1_out,)),
    )
    if learned_shortcut:
        p.update(
            gs_w=w((3, 3, hidden, ic)), gs_b=w((ic,)),
            bs_w=w((3, 3, hidden, ic)), bs_b=w((ic,)),
            convs_w=w((ic, channel)),
        )
    return p


def prepare_kernel_params(p, learned_shortcut):
    """PyTorch-layout params -> kernel-ready arrays (reshape / concat / bf16 cast)."""
    nsplit = 3 if learned_shortcut else 2
    _, _, cs, cmlp = p['mlp_w'].shape
    nh = cmlp // nsplit

    def cw(w):                         # (3,3,Cin,Cout) -> (9*Cin, Cout)
        _, _, ci, co = w.shape
        return w.reshape(9 * ci, co)

    def gb(wg, bg, wb, bb):            # fused gamma|beta weight / bias
        wgb = jnp.concatenate([cw(wg), cw(wb)], axis=1).astype(BF16)
        bgb = jnp.concatenate([bg, bb]).reshape(1, -1).astype(jnp.float32)
        return wgb, bgb

    kp = dict(
        mlp_w=p['mlp_w'].reshape(9 * cs, nsplit, nh).transpose(1, 0, 2).astype(BF16),
        mlp_b=p['mlp_b'].reshape(nsplit, 1, nh).astype(jnp.float32),
        conv0_w=cw(p['conv0_w']).astype(BF16),
        conv0_b=p['conv0_b'].reshape(1, -1).astype(jnp.float32),
        conv1_w=cw(p['conv1_w']).astype(BF16),
        conv1_b=p['conv1_b'].reshape(1, -1).astype(jnp.float32),
    )
    kp['wgb_0'], kp['bgb_0'] = gb(p['g0_w'], p['g0_b'], p['b0_w'], p['b0_b'])
    kp['wgb_1'], kp['bgb_1'] = gb(p['g1_w'], p['g1_b'], p['b1_w'], p['b1_b'])
    if learned_shortcut:
        kp['wgb_s'], kp['bgb_s'] = gb(p['gs_w'], p['gs_b'], p['bs_w'], p['bs_b'])
        kp['convs_w'] = p['convs_w'].astype(BF16)
    return kp


# ------------------------------ pure-JAX reference ------------------------------

def _bf16_conv3x3(x, w, b=None):
    y = lax.conv_general_dilated(
        x.astype(BF16), w.astype(BF16), (1, 1), 'SAME',
        dimension_numbers=('NHWC', 'HWIO', 'NHWC'),
        preferred_element_type=jnp.float32)
    return y if b is None else y + b


def _ref_spade(x, actv, wg, bg, wb, bb):
    mean = jnp.mean(x, axis=(0, 1, 2), keepdims=True)
    var = jnp.maximum(jnp.mean(x * x, axis=(0, 1, 2), keepdims=True) - mean * mean, 0.0)
    xn = (x - mean) * lax.rsqrt(var + _EPS)
    gamma = _bf16_conv3x3(actv, wg, bg)
    beta = _bf16_conv3x3(actv, wb, bb)
    return xn * (1.0 + gamma) + beta


def ref_forward(x_nchw, seg_nchw, p, learned_shortcut):
    x = jnp.transpose(x_nchw, (0, 2, 3, 1)).astype(jnp.float32)
    seg = jnp.transpose(seg_nchw, (0, 2, 3, 1)).astype(jnp.float32)
    _, H, W, _ = x.shape
    seg = nearest_resize_nhwc(seg, H, W)
    actvs = jnp.maximum(_bf16_conv3x3(seg, p['mlp_w'], p['mlp_b']), 0.0)
    nh = p['nhidden']
    actv_0, actv_1 = actvs[..., :nh], actvs[..., nh:2 * nh]
    lrelu = lambda v: jnp.where(v >= 0, v, 0.2 * v)
    if learned_shortcut:
        actv_s = actvs[..., 2 * nh:]
        xs_n = _ref_spade(x, actv_s, p['gs_w'], p['gs_b'], p['bs_w'], p['bs_b'])
        x_s = jnp.einsum('nhwc,cd->nhwd', xs_n.astype(BF16),
                         p['convs_w'].astype(BF16),
                         preferred_element_type=jnp.float32)
    else:
        x_s = x
    h0 = lrelu(_ref_spade(x, actv_0, p['g0_w'], p['g0_b'], p['b0_w'], p['b0_b']))
    dx = _bf16_conv3x3(h0, p['conv0_w'], p['conv0_b'])
    h1 = lrelu(_ref_spade(dx, actv_1, p['g1_w'], p['g1_b'], p['b1_w'], p['b1_b']))
    out = x_s + _bf16_conv3x3(h1, p['conv1_w'], p['conv1_b'])
    return jnp.transpose(out, (0, 3, 1, 2))


# ------------------------------------- main -------------------------------------

if __name__ == "__main__":
    key = jax.random.PRNGKey(0)
    kx, kseg, kp1, kp2 = jax.random.split(key, 4)

    N, ic, H, W = 2, 32, 16, 16
    channel, hidden, semantic_nc = 64, 32, 8
    x = jax.random.normal(kx, (N, ic, H, W), jnp.float32)
    seg = jax.random.normal(kseg, (N, semantic_nc, 8, 8), jnp.float32)

    # Exercise both branches: learned_shortcut=False (fin == fout) and True.
    for learned_shortcut, kp_key in ((False, kp1), (True, kp2)):
        params = init_params(kp_key, ic, channel, hidden, semantic_nc,
                             learned_shortcut)
        kparams = prepare_kernel_params(params, learned_shortcut)
        out = jax.block_until_ready(fused_block_forward(x, seg, kparams))
        ref = jax.block_until_ready(ref_forward(x, seg, params, learned_shortcut))
        np.testing.assert_allclose(np.asarray(out), np.asarray(ref),
                                   rtol=1e-2, atol=1e-2)

    print("KERNEL_OK")
</pallas_src>

<mosaic_0001>
module attributes {stable_mosaic.version = 11 : i64} {
  func.func @kernel(%arg0: i32, %arg1: memref<1x16x16x32xf32, #tpu.memory_space<vmem>>, %arg2: memref<2x32xf32, #tpu.memory_space<vmem>>) attributes {dimension_semantics = [#tpu.dimension_semantics<arbitrary>], iteration_bounds = array<i64: 2>, scalar_prefetch = 0 : i64, scratch_operands = 0 : i64, tpu.core_type = #tpu.core_type<tc>, window_params = [{transform_indices = @transform_0, window_bounds = array<i64: 1, 16, 16, 32>}, {pipeline_mode = #tpu.pipeline_mode<synchronous>, transform_indices = @transform_1, window_bounds = array<i64: 2, 32>}]} {
    %c0_i32 = arith.constant 0 : i32
    %0 = arith.cmpi eq, %arg0, %c0_i32 : i32
    %1 = arith.extui %0 : i1 to i32
    %c0_i32_0 = arith.constant 0 : i32
    %2 = arith.cmpi ne, %1, %c0_i32_0 : i32
    scf.if %2 {
      %cst_13 = arith.constant 0.000000e+00 : f32
      %20 = vector.broadcast %cst_13 : f32 to vector<2x32xf32>
      %c0_14 = arith.constant 0 : index
      %c0_15 = arith.constant 0 : index
      %21 = vector.load %arg2[%c0_14, %c0_15] : memref<2x32xf32, #tpu.memory_space<vmem>>, vector<2x32xf32>
      tpu.vector_store %arg2[%c0_14, %c0_15], %20 {strides = array<i32>} : memref<2x32xf32, #tpu.memory_space<vmem>>, vector<2x32xf32>,
    } else {
    }
    %c0 = arith.constant 0 : index
    %c0_1 = arith.constant 0 : index
    %c0_2 = arith.constant 0 : index
    %c0_3 = arith.constant 0 : index
    %3 = vector.load %arg1[%c0, %c0_1, %c0_2, %c0_3] : memref<1x16x16x32xf32, #tpu.memory_space<vmem>>, vector<1x16x16x32xf32>
    %4 = vector.shape_cast %3 : vector<1x16x16x32xf32> to vector<16x16x32xf32>
    %5 = vector.shape_cast %4 : vector<16x16x32xf32> to vector<256x32xf32>
    %c0_4 = arith.constant 0 : index
    %c0_5 = arith.constant 0 : index
    %6 = vector.load %arg2[%c0_4, %c0_5] : memref<2x32xf32, #tpu.memory_space<vmem>>, vector<1x32xf32>
    %cst = arith.constant dense<0.000000e+00> : vector<32xf32>
    %7 = vector.multi_reduction <add>, %5, %cst [0] : vector<256x32xf32> to vector<32xf32>
    %8 = vector.shape_cast %7 : vector<32xf32> to vector<1x32xf32>
    %9 = arith.addf %6, %8 : vector<1x32xf32>
    %c0_6 = arith.constant 0 : index
    %c0_7 = arith.constant 0 : index
    %10 = vector.load %arg2[%c0_6, %c0_7] : memref<2x32xf32, #tpu.memory_space<vmem>>, vector<1x32xf32>
    tpu.vector_store %arg2[%c0_6, %c0_7], %9 {strides = array<i32>} : memref<2x32xf32, #tpu.memory_space<vmem>>, vector<1x32xf32>,
    %c1 = arith.constant 1 : index
    %c0_8 = arith.constant 0 : index
    %11 = vector.load %arg2[%c1, %c0_8] : memref<2x32xf32, #tpu.memory_space<vmem>>, vector<1x32xf32>
    %12 = arith.mulf %5, %5 : vector<256x32xf32>
    %cst_9 = arith.constant dense<0.000000e+00> : vector<32xf32>
    %13 = vector.multi_reduction <add>, %12, %cst_9 [0] : vector<256x32xf32> to vector<32xf32>
    %14 = vector.shape_cast %13 : vector<32xf32> to vector<1x32xf32>
    %15 = arith.addf %11, %14 : vector<1x32xf32>
    %c1_10 = arith.constant 1 : index
    %c0_11 = arith.constant 0 : index
    %16 = vector.load %arg2[%c1_10, %c0_11] : memref<2x32xf32, #tpu.memory_space<vmem>>, vector<1x32xf32>
    tpu.vector_store %arg2[%c1_10, %c0_11], %15 {strides = array<i32>} : memref<2x32xf32, #tpu.memory_space<vmem>>, vector<1x32xf32>,
    %c1_i32 = arith.constant 1 : i32
    %17 = arith.cmpi eq, %arg0, %c1_i32 : i32
    %18 = arith.extui %17 : i1 to i32
    %c0_i32_12 = arith.constant 0 : i32
    %19 = arith.cmpi ne, %18, %c0_i32_12 : i32
    scf.if %19 {
      %c0_13 = arith.constant 0 : index
      %c0_14 = arith.constant 0 : index
      %20 = vector.load %arg2[%c0_13, %c0_14] : memref<2x32xf32, #tpu.memory_space<vmem>>, vector<1x32xf32>
      %cst_15 = arith.constant 0.001953125 : f32
      %21 = vector.broadcast %cst_15 : f32 to vector<1x32xf32>
      %22 = arith.mulf %20, %21 : vector<1x32xf32>
      %c1_16 = arith.constant 1 : index
      %c0_17 = arith.constant 0 : index
      %23 = vector.load %arg2[%c1_16, %c0_17] : memref<2x32xf32, #tpu.memory_space<vmem>>, vector<1x32xf32>
      %cst_18 = arith.constant 0.001953125 : f32
      %24 = vector.broadcast %cst_18 : f32 to vector<1x32xf32>
      %25 = arith.mulf %23, %24 : vector<1x32xf32>
      %26 = arith.mulf %22, %22 : vector<1x32xf32>
      %27 = arith.subf %25, %26 : vector<1x32xf32>
      %cst_19 = arith.constant 0.000000e+00 : f32
      %28 = vector.broadcast %cst_19 : f32 to vector<1x32xf32>
      %29 = arith.maximumf %27, %28 : vector<1x32xf32>
      %c0_20 = arith.constant 0 : index
      %c0_21 = arith.constant 0 : index
      %30 = vector.load %arg2[%c0_20, %c0_21] : memref<2x32xf32, #tpu.memory_space<vmem>>, vector<1x32xf32>
      tpu.vector_store %arg2[%c0_20, %c0_21], %22 {strides = array<i32>} : memref<2x32xf32, #tpu.memory_space<vmem>>, vector<1x32xf32>,
      %cst_22 = arith.constant 9.99999974E-6 : f32
      %31 = vector.broadcast %cst_22 : f32 to vector<1x32xf32>
      %32 = arith.addf %29, %31 : vector<1x32xf32>
      %33 = math.rsqrt %32 : vector<1x32xf32>
      %c1_23 = arith.constant 1 : index
      %c0_24 = arith.constant 0 : index
      %34 = vector.load %arg2[%c1_23, %c0_24] : memref<2x32xf32, #tpu.memory_space<vmem>>, vector<1x32xf32>
      tpu.vector_store %arg2[%c1_23, %c0_24], %33 {strides = array<i32>} : memref<2x32xf32, #tpu.memory_space<vmem>>, vector<1x32xf32>,
    } else {
    }
    return
  }
  func.func @transform_0(%arg0: i32) -> (i32, i32, i32, i32) {
    %c0_i32 = arith.constant 0 : i32
    %c0_i32_0 = arith.constant 0 : i32
    %c0_i32_1 = arith.constant 0 : i32
    %c0_i32_2 = arith.constant 0 : i32
    return %arg0, %c0_i32, %c0_i32_0, %c0_i32_1 : i32, i32, i32, i32
  }
  func.func @transform_1(%arg0: i32) -> (i32, i32) {
    %c0_i32 = arith.constant 0 : i32
    %c0_i32_0 = arith.constant 0 : i32
    %c0_i32_1 = arith.constant 0 : i32
    return %c0_i32, %c0_i32_0 : i32, i32
  }
}

module attributes {stable_mosaic.version = 11 : i64} {
  func.func @kernel(%arg0: i32, %arg1: memref<1x16x16x8xf32, #tpu.memory_space<vmem>>, %arg2: memref<2x72x32xbf16, #tpu.memory_space<vmem>>, %arg3: memref<2x1x32xf32, #tpu.memory_space<vmem>>, %arg4: memref<1x2x16x16x32xbf16, #tpu.memory_space<vmem>>) attributes {dimension_semantics = [#tpu.dimension_semantics<parallel>], iteration_bounds = array<i64: 2>, scalar_prefetch = 0 : i64, scratch_operands = 0 : i64, tpu.core_type = #tpu.core_type<tc>, window_params = [{transform_indices = @transform_0, window_bounds = array<i64: 1, 16, 16, 8>}, {pipeline_mode = #tpu.pipeline_mode<synchronous>, transform_indices = @transform_1, window_bounds = array<i64: 2, 72, 32>}, {pipeline_mode = #tpu.pipeline_mode<synchronous>, transform_indices = @transform_2, window_bounds = array<i64: 2, 1, 32>}, {transform_indices = @transform_3, window_bounds = array<i64: 1, 2, 16, 16, 32>}]} {
    %c0 = arith.constant 0 : index
    %c0_0 = arith.constant 0 : index
    %c0_1 = arith.constant 0 : index
    %c0_2 = arith.constant 0 : index
    %0 = vector.load %arg1[%c0, %c0_0, %c0_1, %c0_2] : memref<1x16x16x8xf32, #tpu.memory_space<vmem>>, vector<1x16x16x8xf32>
    %1 = vector.shape_cast %0 : vector<1x16x16x8xf32> to vector<16x16x8xf32>
    %2 = arith.truncf %1 : vector<16x16x8xf32> to vector<16x16x8xbf16>
    %cst = arith.constant 0.000000e+00 : bf16
    %3 = vector.broadcast %cst : bf16 to vector<16x1x8xbf16>
    %4 = tpu.concatenate %3, %2, %3 in 1 : vector<16x1x8xbf16>, vector<16x16x8xbf16>, vector<16x1x8xbf16> -> vector<16x18x8xbf16>
    %cst_3 = arith.constant 0.000000e+00 : bf16
    %5 = vector.broadcast %cst_3 : bf16 to vector<1x18x8xbf16>
    %6 = tpu.concatenate %5, %4, %5 in 0 : vector<1x18x8xbf16>, vector<16x18x8xbf16>, vector<1x18x8xbf16> -> vector<18x18x8xbf16>
    %7 = vector.extract_strided_slice %6 {offsets = [0, 0, 0], sizes = [16, 16, 8], strides = [1, 1, 1]} : vector<18x18x8xbf16> to vector<16x16x8xbf16>
    %8 = vector.shape_cast %7 : vector<16x16x8xbf16> to vector<256x8xbf16>
    %9 = vector.extract_strided_slice %6 {offsets = [0, 1, 0], sizes = [16, 16, 8], strides = [1, 1, 1]} : vector<18x18x8xbf16> to vector<16x16x8xbf16>
    %10 = vector.shape_cast %9 : vector<16x16x8xbf16> to vector<256x8xbf16>
    %11 = vector.extract_strided_slice %6 {offsets = [0, 2, 0], sizes = [16, 16, 8], strides = [1, 1, 1]} : vector<18x18x8xbf16> to vector<16x16x8xbf16>
    %12 = vector.shape_cast %11 : vector<16x16x8xbf16> to vector<256x8xbf16>
    %13 = vector.extract_strided_slice %6 {offsets = [1, 0, 0], sizes = [16, 16, 8], strides = [1, 1, 1]} : vector<18x18x8xbf16> to vector<16x16x8xbf16>
    %14 = vector.shape_cast %13 : vector<16x16x8xbf16> to vector<256x8xbf16>
    %15 = vector.extract_strided_slice %6 {offsets = [1, 1, 0], sizes = [16, 16, 8], strides = [1, 1, 1]} : vector<18x18x8xbf16> to vector<16x16x8xbf16>
    %16 = vector.shape_cast %15 : vector<16x16x8xbf16> to vector<256x8xbf16>
    %17 = vector.extract_strided_slice %6 {offsets = [1, 2, 0], sizes = [16, 16, 8], strides = [1, 1, 1]} : vector<18x18x8xbf16> to vector<16x16x8xbf16>
    %18 = vector.shape_cast %17 : vector<16x16x8xbf16> to vector<256x8xbf16>
    %19 = vector.extract_strided_slice %6 {offsets = [2, 0, 0], sizes = [16, 16, 8], strides = [1, 1, 1]} : vector<18x18x8xbf16> to vector<16x16x8xbf16>
    %20 = vector.shape_cast %19 : vector<16x16x8xbf16> to vector<256x8xbf16>
    %21 = vector.extract_strided_slice %6 {offsets = [2, 1, 0], sizes = [16, 16, 8], strides = [1, 1, 1]} : vector<18x18x8xbf16> to vector<16x16x8xbf16>
    %22 = vector.shape_cast %21 : vector<16x16x8xbf16> to vector<256x8xbf16>
    %23 = vector.extract_strided_slice %6 {offsets = [2, 2, 0], sizes = [16, 16, 8], strides = [1, 1, 1]} : vector<18x18x8xbf16> to vector<16x16x8xbf16>
    %24 = vector.shape_cast %23 : vector<16x16x8xbf16> to vector<256x8xbf16>
    %25 = tpu.concatenate %8, %10, %12, %14, %16, %18, %20, %22, %24 in 1 : vector<256x8xbf16>, vector<256x8xbf16>, vector<256x8xbf16>, vector<256x8xbf16>, vector<256x8xbf16>, vector<256x8xbf16>, vector<256x8xbf16>, vector<256x8xbf16>, vector<256x8xbf16> -> vector<256x72xbf16>
    %c0_4 = arith.constant 0 : index
    %c0_5 = arith.constant 0 : index
    %c0_6 = arith.constant 0 : index
    %26 = vector.load %arg2[%c0_4, %c0_5, %c0_6] : memref<2x72x32xbf16, #tpu.memory_space<vmem>>, vector<1x72x32xbf16>
    %27 = vector.shape_cast %26 : vector<1x72x32xbf16> to vector<72x32xbf16>
    %cst_7 = arith.constant dense<0.000000e+00> : vector<256x32xf32>
    %28 = tpu.matmul %25, %27, %cst_7 {dimension_numbers = #tpu.dot_dimension_numbers<[1], [0], [0], [1], [0, 0, 1, 1], [], []>} : vector<256x72xbf16>, vector<72x32xbf16>, vector<256x32xf32> -> vector<256x32xf32>
    %c0_8 = arith.constant 0 : index
    %c0_9 = arith.constant 0 : index
    %c0_10 = arith.constant 0 : index
    %29 = vector.load %arg3[%c0_8, %c0_9, %c0_10] : memref<2x1x32xf32, #tpu.memory_space<vmem>>, vector<1x1x32xf32>
    %30 = vector.shape_cast %29 : vector<1x1x32xf32> to vector<1x32xf32>
    %31 = vector.broadcast %30 : vector<1x32xf32> to vector<256x32xf32>
    %32 = arith.addf %28, %31 : vector<256x32xf32>
    %cst_11 = arith.constant 0.000000e+00 : f32
    %33 = vector.broadcast %cst_11 : f32 to vector<256x32xf32>
    %34 = arith.maximumf %32, %33 : vector<256x32xf32>
    %35 = vector.shape_cast %34 : vector<256x32xf32> to vector<16x16x32xf32>
    %36 = arith.truncf %35 : vector<16x16x32xf32> to vector<16x16x32xbf16>
    %c0_12 = arith.constant 0 : index
    %c0_13 = arith.constant 0 : index
    %c0_14 = arith.constant 0 : index
    %c0_15 = arith.constant 0 : index
    %c0_16 = arith.constant 0 : index
    %37 = vector.load %arg4[%c0_12, %c0_13, %c0_14, %c0_15, %c0_16] : memref<1x2x16x16x32xbf16, #tpu.memory_space<vmem>>, vector<1x1x16x16x32xbf16>
    %38 = vector.shape_cast %37 : vector<1x1x16x16x32xbf16> to vector<16x16x32xbf16>
    %39 = vector.shape_cast %36 : vector<16x16x32xbf16> to vector<1x1x16x16x32xbf16>
    tpu.vector_store %arg4[%c0_12, %c0_13, %c0_14, %c0_15, %c0_16], %39 {strides = array<i32>} : memref<1x2x16x16x32xbf16, #tpu.memory_space<vmem>>, vector<1x1x16x16x32xbf16>,
    %c1 = arith.constant 1 : index
    %c0_17 = arith.constant 0 : index
    %c0_18 = arith.constant 0 : index
    %40 = vector.load %arg2[%c1, %c0_17, %c0_18] : memref<2x72x32xbf16, #tpu.memory_space<vmem>>, vector<1x72x32xbf16>
    %41 = vector.shape_cast %40 : vector<1x72x32xbf16> to vector<72x32xbf16>
    %cst_19 = arith.constant dense<0.000000e+00> : vector<256x32xf32>
    %42 = tpu.matmul %25, %41, %cst_19 {dimension_numbers = #tpu.dot_dimension_numbers<[1], [0], [0], [1], [0, 0, 1, 1], [], []>} : vector<256x72xbf16>, vector<72x32xbf16>, vector<256x32xf32> -> vector<256x32xf32>
    %c1_20 = arith.constant 1 : index
    %c0_21 = arith.constant 0 : index
    %c0_22 = arith.constant 0 : index
    %43 = vector.load %arg3[%c1_20, %c0_21, %c0_22] : memref<2x1x32xf32, #tpu.memory_space<vmem>>, vector<1x1x32xf32>
    %44 = vector.shape_cast %43 : vector<1x1x32xf32> to vector<1x32xf32>
    %45 = vector.broadcast %44 : vector<1x32xf32> to vector<256x32xf32>
    %46 = arith.addf %42, %45 : vector<256x32xf32>
    %cst_23 = arith.constant 0.000000e+00 : f32
    %47 = vector.broadcast %cst_23 : f32 to vector<256x32xf32>
    %48 = arith.maximumf %46, %47 : vector<256x32xf32>
    %49 = vector.shape_cast %48 : vector<256x32xf32> to vector<16x16x32xf32>
    %50 = arith.truncf %49 : vector<16x16x32xf32> to vector<16x16x32xbf16>
    %c0_24 = arith.constant 0 : index
    %c1_25 = arith.constant 1 : index
    %c0_26 = arith.constant 0 : index
    %c0_27 = arith.constant 0 : index
    %c0_28 = arith.constant 0 : index
    %51 = vector.load %arg4[%c0_24, %c1_25, %c0_26, %c0_27, %c0_28] : memref<1x2x16x16x32xbf16, #tpu.memory_space<vmem>>, vector<1x1x16x16x32xbf16>
    %52 = vector.shape_cast %51 : vector<1x1x16x16x32xbf16> to vector<16x16x32xbf16>
    %53 = vector.shape_cast %50 : vector<16x16x32xbf16> to vector<1x1x16x16x32xbf16>
    tpu.vector_store %arg4[%c0_24, %c1_25, %c0_26, %c0_27, %c0_28], %53 {strides = array<i32>} : memref<1x2x16x16x32xbf16, #tpu.memory_space<vmem>>, vector<1x1x16x16x32xbf16>,
    return
  }
  func.func @transform_0(%arg0: i32) -> (i32, i32, i32, i32) {
    %c0_i32 = arith.constant 0 : i32
    %c0_i32_0 = arith.constant 0 : i32
    %c0_i32_1 = arith.constant 0 : i32
    %c0_i32_2 = arith.constant 0 : i32
    return %arg0, %c0_i32, %c0_i32_0, %c0_i32_1 : i32, i32, i32, i32
  }
  func.func @transform_1(%arg0: i32) -> (i32, i32, i32) {
    %c0_i32 = arith.constant 0 : i32
    %c0_i32_0 = arith.constant 0 : i32
    %c0_i32_1 = arith.constant 0 : i32
    %c0_i32_2 = arith.constant 0 : i32
    return %c0_i32, %c0_i32_0, %c0_i32_1 : i32, i32, i32
  }
  func.func @transform_2(%arg0: i32) -> (i32, i32, i32) {
    %c0_i32 = arith.constant 0 : i32
    %c0_i32_0 = arith.constant 0 : i32
    %c0_i32_1 = arith.constant 0 : i32
    %c0_i32_2 = arith.constant 0 : i32
    return %c0_i32, %c0_i32_0, %c0_i32_1 : i32, i32, i32
  }
  func.func @transform_3(%arg0: i32) -> (i32, i32, i32, i32, i32) {
    %c0_i32 = arith.constant 0 : i32
    %c0_i32_0 = arith.constant 0 : i32
    %c0_i32_1 = arith.constant 0 : i32
    %c0_i32_2 = arith.constant 0 : i32
    %c0_i32_3 = arith.constant 0 : i32
    return %arg0, %c0_i32, %c0_i32_0, %c0_i32_1, %c0_i32_2 : i32, i32, i32, i32, i32
  }
}

module attributes {stable_mosaic.version = 11 : i64} {
  func.func @kernel(%arg0: i32, %arg1: memref<1x16x16x32xf32, #tpu.memory_space<vmem>>, %arg2: memref<1x1x16x16x32xbf16, #tpu.memory_space<vmem>>, %arg3: memref<2x32xf32, #tpu.memory_space<vmem>>, %arg4: memref<288x64xbf16, #tpu.memory_space<vmem>>, %arg5: memref<1x64xf32, #tpu.memory_space<vmem>>, %arg6: memref<288x64xbf16, #tpu.memory_space<vmem>>, %arg7: memref<1x64xf32, #tpu.memory_space<vmem>>, %arg8: memref<1x16x16x64xf32, #tpu.memory_space<vmem>>) attributes {dimension_semantics = [#tpu.dimension_semantics<parallel>], iteration_bounds = array<i64: 2>, scalar_prefetch = 0 : i64, scratch_operands = 0 : i64, tpu.core_type = #tpu.core_type<tc>, window_params = [{transform_indices = @transform_0, window_bounds = array<i64: 1, 16, 16, 32>}, {transform_indices = @transform_1, window_bounds = array<i64: 1, 1, 16, 16, 32>}, {pipeline_mode = #tpu.pipeline_mode<synchronous>, transform_indices = @transform_2, window_bounds = array<i64: 2, 32>}, {pipeline_mode = #tpu.pipeline_mode<synchronous>, transform_indices = @transform_3, window_bounds = array<i64: 288, 64>}, {pipeline_mode = #tpu.pipeline_mode<synchronous>, transform_indices = @transform_4, window_bounds = array<i64: 1, 64>}, {pipeline_mode = #tpu.pipeline_mode<synchronous>, transform_indices = @transform_5, window_bounds = array<i64: 288, 64>}, {pipeline_mode = #tpu.pipeline_mode<synchronous>, transform_indices = @transform_6, window_bounds = array<i64: 1, 64>}, {transform_indices = @transform_7, window_bounds = array<i64: 1, 16, 16, 64>}]} {
    %c0 = arith.constant 0 : index
    %c0_0 = arith.constant 0 : index
    %c0_1 = arith.constant 0 : index
    %c0_2 = arith.constant 0 : index
    %c0_3 = arith.constant 0 : index
    %0 = vector.load %arg2[%c0, %c0_0, %c0_1, %c0_2, %c0_3] : memref<1x1x16x16x32xbf16, #tpu.memory_space<vmem>>, vector<1x1x16x16x32xbf16>
    %1 = vector.shape_cast %0 : vector<1x1x16x16x32xbf16> to vector<16x16x32xbf16>
    %cst = arith.constant 0.000000e+00 : bf16
    %2 = vector.broadcast %cst : bf16 to vector<16x1x32xbf16>
    %3 = tpu.concatenate %2, %1, %2 in 1 : vector<16x1x32xbf16>, vector<16x16x32xbf16>, vector<16x1x32xbf16> -> vector<16x18x32xbf16>
    %cst_4 = arith.constant 0.000000e+00 : bf16
    %4 = vector.broadcast %cst_4 : bf16 to vector<1x18x32xbf16>
    %5 = tpu.concatenate %4, %3, %4 in 0 : vector<1x18x32xbf16>, vector<16x18x32xbf16>, vector<1x18x32xbf16> -> vector<18x18x32xbf16>
    %6 = vector.extract_strided_slice %5 {offsets = [0, 0, 0], sizes = [16, 16, 32], strides = [1, 1, 1]} : vector<18x18x32xbf16> to vector<16x16x32xbf16>
    %7 = vector.shape_cast %6 : vector<16x16x32xbf16> to vector<256x32xbf16>
    %8 = vector.extract_strided_slice %5 {offsets = [0, 1, 0], sizes = [16, 16, 32], strides = [1, 1, 1]} : vector<18x18x32xbf16> to vector<16x16x32xbf16>
    %9 = vector.shape_cast %8 : vector<16x16x32xbf16> to vector<256x32xbf16>
    %10 = vector.extract_strided_slice %5 {offsets = [0, 2, 0], sizes = [16, 16, 32], strides = [1, 1, 1]} : vector<18x18x32xbf16> to vector<16x16x32xbf16>
    %11 = vector.shape_cast %10 : vector<16x16x32xbf16> to vector<256x32xbf16>
    %12 = vector.extract_strided_slice %5 {offsets = [1, 0, 0], sizes = [16, 16, 32], strides = [1, 1, 1]} : vector<18x18x32xbf16> to vector<16x16x32xbf16>
    %13 = vector.shape_cast %12 : vector<16x16x32xbf16> to vector<256x32xbf16>
    %14 = vector.extract_strided_slice %5 {offsets = [1, 1, 0], sizes = [16, 16, 32], strides = [1, 1, 1]} : vector<18x18x32xbf16> to vector<16x16x32xbf16>
    %15 = vector.shape_cast %14 : vector<16x16x32xbf16> to vector<256x32xbf16>
    %16 = vector.extract_strided_slice %5 {offsets = [1, 2, 0], sizes = [16, 16, 32], strides = [1, 1, 1]} : vector<18x18x32xbf16> to vector<16x16x32xbf16>
    %17 = vector.shape_cast %16 : vector<16x16x32xbf16> to vector<256x32xbf16>
    %18 = vector.extract_strided_slice %5 {offsets = [2, 0, 0], sizes = [16, 16, 32], strides = [1, 1, 1]} : vector<18x18x32xbf16> to vector<16x16x32xbf16>
    %19 = vector.shape_cast %18 : vector<16x16x32xbf16> to vector<256x32xbf16>
    %20 = vector.extract_strided_slice %5 {offsets = [2, 1, 0], sizes = [16, 16, 32], strides = [1, 1, 1]} : vector<18x18x32xbf16> to vector<16x16x32xbf16>
    %21 = vector.shape_cast %20 : vector<16x16x32xbf16> to vector<256x32xbf16>
    %22 = vector.extract_strided_slice %5 {offsets = [2, 2, 0], sizes = [16, 16, 32], strides = [1, 1, 1]} : vector<18x18x32xbf16> to vector<16x16x32xbf16>
    %23 = vector.shape_cast %22 : vector<16x16x32xbf16> to vector<256x32xbf16>
    %24 = tpu.concatenate %7, %9, %11, %13, %15, %17, %19, %21, %23 in 1 : vector<256x32xbf16>, vector<256x32xbf16>, vector<256x32xbf16>, vector<256x32xbf16>, vector<256x32xbf16>, vector<256x32xbf16>, vector<256x32xbf16>, vector<256x32xbf16>, vector<256x32xbf16> -> vector<256x288xbf16>
    %c0_5 = arith.constant 0 : index
    %c0_6 = arith.constant 0 : index
    %25 = vector.load %arg4[%c0_5, %c0_6] : memref<288x64xbf16, #tpu.memory_space<vmem>>, vector<288x64xbf16>
    %cst_7 = arith.constant dense<0.000000e+00> : vector<256x64xf32>
    %26 = tpu.matmul %24, %25, %cst_7 {dimension_numbers = #tpu.dot_dimension_numbers<[1], [0], [0], [1], [0, 0, 1, 1], [], []>} : vector<256x288xbf16>, vector<288x64xbf16>, vector<256x64xf32> -> vector<256x64xf32>
    %c0_8 = arith.constant 0 : index
    %c0_9 = arith.constant 0 : index
    %27 = vector.load %arg5[%c0_8, %c0_9] : memref<1x64xf32, #tpu.memory_space<vmem>>, vector<1x64xf32>
    %28 = vector.broadcast %27 : vector<1x64xf32> to vector<256x64xf32>
    %29 = arith.addf %26, %28 : vector<256x64xf32>
    %30 = vector.extract_strided_slice %29 {offsets = [0, 0], sizes = [256, 32], strides = [1, 1]} : vector<256x64xf32> to vector<256x32xf32>
    %31 = vector.extract_strided_slice %29 {offsets = [0, 32], sizes = [256, 32], strides = [1, 1]} : vector<256x64xf32> to vector<256x32xf32>
    %c0_10 = arith.constant 0 : index
    %c0_11 = arith.constant 0 : index
    %32 = vector.load %arg3[%c0_10, %c0_11] : memref<2x32xf32, #tpu.memory_space<vmem>>, vector<1x32xf32>
    %c1 = arith.constant 1 : index
    %c0_12 = arith.constant 0 : index
    %33 = vector.load %arg3[%c1, %c0_12] : memref<2x32xf32, #tpu.memory_space<vmem>>, vector<1x32xf32>
    %c0_13 = arith.constant 0 : index
    %c0_14 = arith.constant 0 : index
    %c0_15 = arith.constant 0 : index
    %c0_16 = arith.constant 0 : index
    %34 = vector.load %arg1[%c0_13, %c0_14, %c0_15, %c0_16] : memref<1x16x16x32xf32, #tpu.memory_space<vmem>>, vector<1x16x16x32xf32>
    %35 = vector.shape_cast %34 : vector<1x16x16x32xf32> to vector<16x16x32xf32>
    %36 = vector.shape_cast %35 : vector<16x16x32xf32> to vector<256x32xf32>
    %37 = vector.broadcast %32 : vector<1x32xf32> to vector<256x32xf32>
    %38 = arith.subf %36, %37 : vector<256x32xf32>
    %39 = vector.broadcast %33 : vector<1x32xf32> to vector<256x32xf32>
    %40 = arith.mulf %38, %39 : vector<256x32xf32>
    %cst_17 = arith.constant 1.000000e+00 : f32
    %41 = vector.broadcast %cst_17 : f32 to vector<256x32xf32>
    %42 = arith.addf %41, %30 : vector<256x32xf32>
    %43 = arith.mulf %40, %42 : vector<256x32xf32>
    %44 = arith.addf %43, %31 : vector<256x32xf32>
    %cst_18 = arith.constant 0.000000e+00 : f32
    %45 = vector.broadcast %cst_18 : f32 to vector<256x32xf32>
    %46 = arith.cmpf oge, %44, %45 : vector<256x32xf32>
    %cst_19 = arith.constant 2.000000e-01 : f32
    %47 = vector.broadcast %cst_19 : f32 to vector<256x32xf32>
    %48 = arith.mulf %47, %44 : vector<256x32xf32>
    %49 = arith.select %46, %44, %48 : vector<256x32xi1>, vector<256x32xf32>
    %50 = arith.truncf %49 : vector<256x32xf32> to vector<256x32xbf16>
    %51 = vector.shape_cast %50 : vector<256x32xbf16> to vector<16x16x32xbf16>
    %cst_20 = arith.constant 0.000000e+00 : bf16
    %52 = vector.broadcast %cst_20 : bf16 to vector<16x1x32xbf16>
    %53 = tpu.concatenate %52, %51, %52 in 1 : vector<16x1x32xbf16>, vector<16x16x32xbf16>, vector<16x1x32xbf16> -> vector<16x18x32xbf16>
    %cst_21 = arith.constant 0.000000e+00 : bf16
    %54 = vector.broadcast %cst_21 : bf16 to vector<1x18x32xbf16>
    %55 = tpu.concatenate %54, %53, %54 in 0 : vector<1x18x32xbf16>, vector<16x18x32xbf16>, vector<1x18x32xbf16> -> vector<18x18x32xbf16>
    %56 = vector.extract_strided_slice %55 {offsets = [0, 0, 0], sizes = [16, 16, 32], strides = [1, 1, 1]} : vector<18x18x32xbf16> to vector<16x16x32xbf16>
    %57 = vector.shape_cast %56 : vector<16x16x32xbf16> to vector<256x32xbf16>
    %58 = vector.extract_strided_slice %55 {offsets = [0, 1, 0], sizes = [16, 16, 32], strides = [1, 1, 1]} : vector<18x18x32xbf16> to vector<16x16x32xbf16>
    %59 = vector.shape_cast %58 : vector<16x16x32xbf16> to vector<256x32xbf16>
    %60 = vector.extract_strided_slice %55 {offsets = [0, 2, 0], sizes = [16, 16, 32], strides = [1, 1, 1]} : vector<18x18x32xbf16> to vector<16x16x32xbf16>
    %61 = vector.shape_cast %60 : vector<16x16x32xbf16> to vector<256x32xbf16>
    %62 = vector.extract_strided_slice %55 {offsets = [1, 0, 0], sizes = [16, 16, 32], strides = [1, 1, 1]} : vector<18x18x32xbf16> to vector<16x16x32xbf16>
    %63 = vector.shape_cast %62 : vector<16x16x32xbf16> to vector<256x32xbf16>
    %64 = vector.extract_strided_slice %55 {offsets = [1, 1, 0], sizes = [16, 16, 32], strides = [1, 1, 1]} : vector<18x18x32xbf16> to vector<16x16x32xbf16>
    %65 = vector.shape_cast %64 : vector<16x16x32xbf16> to vector<256x32xbf16>
    %66 = vector.extract_strided_slice %55 {offsets = [1, 2, 0], sizes = [16, 16, 32], strides = [1, 1, 1]} : vector<18x18x32xbf16> to vector<16x16x32xbf16>
    %67 = vector.shape_cast %66 : vector<16x16x32xbf16> to vector<256x32xbf16>
    %68 = vector.extract_strided_slice %55 {offsets = [2, 0, 0], sizes = [16, 16, 32], strides = [1, 1, 1]} : vector<18x18x32xbf16> to vector<16x16x32xbf16>
    %69 = vector.shape_cast %68 : vector<16x16x32xbf16> to vector<256x32xbf16>
    %70 = vector.extract_strided_slice %55 {offsets = [2, 1, 0], sizes = [16, 16, 32], strides = [1, 1, 1]} : vector<18x18x32xbf16> to vector<16x16x32xbf16>
    %71 = vector.shape_cast %70 : vector<16x16x32xbf16> to vector<256x32xbf16>
    %72 = vector.extract_strided_slice %55 {offsets = [2, 2, 0], sizes = [16, 16, 32], strides = [1, 1, 1]} : vector<18x18x32xbf16> to vector<16x16x32xbf16>
    %73 = vector.shape_cast %72 : vector<16x16x32xbf16> to vector<256x32xbf16>
    %74 = tpu.concatenate %57, %59, %61, %63, %65, %67, %69, %71, %73 in 1 : vector<256x32xbf16>, vector<256x32xbf16>, vector<256x32xbf16>, vector<256x32xbf16>, vector<256x32xbf16>, vector<256x32xbf16>, vector<256x32xbf16>, vector<256x32xbf16>, vector<256x32xbf16> -> vector<256x288xbf16>
    %c0_22 = arith.constant 0 : index
    %c0_23 = arith.constant 0 : index
    %75 = vector.load %arg6[%c0_22, %c0_23] : memref<288x64xbf16, #tpu.memory_space<vmem>>, vector<288x64xbf16>
    %cst_24 = arith.constant dense<0.000000e+00> : vector<256x64xf32>
    %76 = tpu.matmul %74, %75, %cst_24 {dimension_numbers = #tpu.dot_dimension_numbers<[1], [0], [0], [1], [0, 0, 1, 1], [], []>} : vector<256x288xbf16>, vector<288x64xbf16>, vector<256x64xf32> -> vector<256x64xf32>
    %c0_25 = arith.constant 0 : index
    %c0_26 = arith.constant 0 : index
    %77 = vector.load %arg7[%c0_25, %c0_26] : memref<1x64xf32, #tpu.memory_space<vmem>>, vector<1x64xf32>
    %78 = vector.broadcast %77 : vector<1x64xf32> to vector<256x64xf32>
    %79 = arith.addf %76, %78 : vector<256x64xf32>
    %80 = vector.shape_cast %79 : vector<256x64xf32> to vector<16x16x64xf32>
    %c0_27 = arith.constant 0 : index
    %c0_28 = arith.constant 0 : index
    %c0_29 = arith.constant 0 : index
    %c0_30 = arith.constant 0 : index
    %81 = vector.load %arg8[%c0_27, %c0_28, %c0_29, %c0_30] : memref<1x16x16x64xf32, #tpu.memory_space<vmem>>, vector<1x16x16x64xf32>
    %82 = vector.shape_cast %81 : vector<1x16x16x64xf32> to vector<16x16x64xf32>
    %83 = vector.shape_cast %80 : vector<16x16x64xf32> to vector<1x16x16x64xf32>
    tpu.vector_store %arg8[%c0_27, %c0_28, %c0_29, %c0_30], %83 {strides = array<i32>} : memref<1x16x16x64xf32, #tpu.memory_space<vmem>>, vector<1x16x16x64xf32>,
    return
  }
  func.func @transform_0(%arg0: i32) -> (i32, i32, i32, i32) {
    %c0_i32 = arith.constant 0 : i32
    %c0_i32_0 = arith.constant 0 : i32
    %c0_i32_1 = arith.constant 0 : i32
    %c0_i32_2 = arith.constant 0 : i32
    return %arg0, %c0_i32, %c0_i32_0, %c0_i32_1 : i32, i32, i32, i32
  }
  func.func @transform_1(%arg0: i32) -> (i32, i32, i32, i32, i32) {
    %c0_i32 = arith.constant 0 : i32
    %c0_i32_0 = arith.constant 0 : i32
    %c0_i32_1 = arith.constant 0 : i32
    %c0_i32_2 = arith.constant 0 : i32
    %c0_i32_3 = arith.constant 0 : i32
    return %arg0, %c0_i32, %c0_i32_0, %c0_i32_1, %c0_i32_2 : i32, i32, i32, i32, i32
  }
  func.func @transform_2(%arg0: i32) -> (i32, i32) {
    %c0_i32 = arith.constant 0 : i32
    %c0_i32_0 = arith.constant 0 : i32
    %c0_i32_1 = arith.constant 0 : i32
    return %c0_i32, %c0_i32_0 : i32, i32
  }
  func.func @transform_3(%arg0: i32) -> (i32, i32) {
    %c0_i32 = arith.constant 0 : i32
    %c0_i32_0 = arith.constant 0 : i32
    %c0_i32_1 = arith.constant 0 : i32
    return %c0_i32, %c0_i32_0 : i32, i32
  }
  func.func @transform_4(%arg0: i32) -> (i32, i32) {
    %c0_i32 = arith.constant 0 : i32
    %c0_i32_0 = arith.constant 0 : i32
    %c0_i32_1 = arith.constant 0 : i32
    return %c0_i32, %c0_i32_0 : i32, i32
  }
  func.func @transform_5(%arg0: i32) -> (i32, i32) {
    %c0_i32 = arith.constant 0 : i32
    %c0_i32_0 = arith.constant 0 : i32
    %c0_i32_1 = arith.constant 0 : i32
    return %c0_i32, %c0_i32_0 : i32, i32
  }
  func.func @transform_6(%arg0: i32) -> (i32, i32) {
    %c0_i32 = arith.constant 0 : i32
    %c0_i32_0 = arith.constant 0 : i32
    %c0_i32_1 = arith.constant 0 : i32
    return %c0_i32, %c0_i32_0 : i32, i32
  }
  func.func @transform_7(%arg0: i32) -> (i32, i32, i32, i32) {
    %c0_i32 = arith.constant 0 : i32
    %c0_i32_0 = arith.constant 0 : i32
    %c0_i32_1 = arith.constant 0 : i32
    %c0_i32_2 = arith.constant 0 : i32
    return %arg0, %c0_i32, %c0_i32_0, %c0_i32_1 : i32, i32, i32, i32
  }
}

module attributes {stable_mosaic.version = 11 : i64} {
  func.func @kernel(%arg0: i32, %arg1: memref<1x16x16x64xf32, #tpu.memory_space<vmem>>, %arg2: memref<2x64xf32, #tpu.memory_space<vmem>>) attributes {dimension_semantics = [#tpu.dimension_semantics<arbitrary>], iteration_bounds = array<i64: 2>, scalar_prefetch = 0 : i64, scratch_operands = 0 : i64, tpu.core_type = #tpu.core_type<tc>, window_params = [{transform_indices = @transform_0, window_bounds = array<i64: 1, 16, 16, 64>}, {pipeline_mode = #tpu.pipeline_mode<synchronous>, transform_indices = @transform_1, window_bounds = array<i64: 2, 64>}]} {
    %c0_i32 = arith.constant 0 : i32
    %0 = arith.cmpi eq, %arg0, %c0_i32 : i32
    %1 = arith.extui %0 : i1 to i32
    %c0_i32_0 = arith.constant 0 : i32
    %2 = arith.cmpi ne, %1, %c0_i32_0 : i32
    scf.if %2 {
      %cst_13 = arith.constant 0.000000e+00 : f32
      %20 = vector.broadcast %cst_13 : f32 to vector<2x64xf32>
      %c0_14 = arith.constant 0 : index
      %c0_15 = arith.constant 0 : index
      %21 = vector.load %arg2[%c0_14, %c0_15] : memref<2x64xf32, #tpu.memory_space<vmem>>, vector<2x64xf32>
      tpu.vector_store %arg2[%c0_14, %c0_15], %20 {strides = array<i32>} : memref<2x64xf32, #tpu.memory_space<vmem>>, vector<2x64xf32>,
    } else {
    }
    %c0 = arith.constant 0 : index
    %c0_1 = arith.constant 0 : index
    %c0_2 = arith.constant 0 : index
    %c0_3 = arith.constant 0 : index
    %3 = vector.load %arg1[%c0, %c0_1, %c0_2, %c0_3] : memref<1x16x16x64xf32, #tpu.memory_space<vmem>>, vector<1x16x16x64xf32>
    %4 = vector.shape_cast %3 : vector<1x16x16x64xf32> to vector<16x16x64xf32>
    %5 = vector.shape_cast %4 : vector<16x16x64xf32> to vector<256x64xf32>
    %c0_4 = arith.constant 0 : index
    %c0_5 = arith.constant 0 : index
    %6 = vector.load %arg2[%c0_4, %c0_5] : memref<2x64xf32, #tpu.memory_space<vmem>>, vector<1x64xf32>
    %cst = arith.constant dense<0.000000e+00> : vector<64xf32>
    %7 = vector.multi_reduction <add>, %5, %cst [0] : vector<256x64xf32> to vector<64xf32>
    %8 = vector.shape_cast %7 : vector<64xf32> to vector<1x64xf32>
    %9 = arith.addf %6, %8 : vector<1x64xf32>
    %c0_6 = arith.constant 0 : index
    %c0_7 = arith.constant 0 : index
    %10 = vector.load %arg2[%c0_6, %c0_7] : memref<2x64xf32, #tpu.memory_space<vmem>>, vector<1x64xf32>
    tpu.vector_store %arg2[%c0_6, %c0_7], %9 {strides = array<i32>} : memref<2x64xf32, #tpu.memory_space<vmem>>, vector<1x64xf32>,
    %c1 = arith.constant 1 : index
    %c0_8 = arith.constant 0 : index
    %11 = vector.load %arg2[%c1, %c0_8] : memref<2x64xf32, #tpu.memory_space<vmem>>, vector<1x64xf32>
    %12 = arith.mulf %5, %5 : vector<256x64xf32>
    %cst_9 = arith.constant dense<0.000000e+00> : vector<64xf32>
    %13 = vector.multi_reduction <add>, %12, %cst_9 [0] : vector<256x64xf32> to vector<64xf32>
    %14 = vector.shape_cast %13 : vector<64xf32> to vector<1x64xf32>
    %15 = arith.addf %11, %14 : vector<1x64xf32>
    %c1_10 = arith.constant 1 : index
    %c0_11 = arith.constant 0 : index
    %16 = vector.load %arg2[%c1_10, %c0_11] : memref<2x64xf32, #tpu.memory_space<vmem>>, vector<1x64xf32>
    tpu.vector_store %arg2[%c1_10, %c0_11], %15 {strides = array<i32>} : memref<2x64xf32, #tpu.memory_space<vmem>>, vector<1x64xf32>,
    %c1_i32 = arith.constant 1 : i32
    %17 = arith.cmpi eq, %arg0, %c1_i32 : i32
    %18 = arith.extui %17 : i1 to i32
    %c0_i32_12 = arith.constant 0 : i32
    %19 = arith.cmpi ne, %18, %c0_i32_12 : i32
    scf.if %19 {
      %c0_13 = arith.constant 0 : index
      %c0_14 = arith.constant 0 : index
      %20 = vector.load %arg2[%c0_13, %c0_14] : memref<2x64xf32, #tpu.memory_space<vmem>>, vector<1x64xf32>
      %cst_15 = arith.constant 0.001953125 : f32
      %21 = vector.broadcast %cst_15 : f32 to vector<1x64xf32>
      %22 = arith.mulf %20, %21 : vector<1x64xf32>
      %c1_16 = arith.constant 1 : index
      %c0_17 = arith.constant 0 : index
      %23 = vector.load %arg2[%c1_16, %c0_17] : memref<2x64xf32, #tpu.memory_space<vmem>>, vector<1x64xf32>
      %cst_18 = arith.constant 0.001953125 : f32
      %24 = vector.broadcast %cst_18 : f32 to vector<1x64xf32>
      %25 = arith.mulf %23, %24 : vector<1x64xf32>
      %26 = arith.mulf %22, %22 : vector<1x64xf32>
      %27 = arith.subf %25, %26 : vector<1x64xf32>
      %cst_19 = arith.constant 0.000000e+00 : f32
      %28 = vector.broadcast %cst_19 : f32 to vector<1x64xf32>
      %29 = arith.maximumf %27, %28 : vector<1x64xf32>
      %c0_20 = arith.constant 0 : index
      %c0_21 = arith.constant 0 : index
      %30 = vector.load %arg2[%c0_20, %c0_21] : memref<2x64xf32, #tpu.memory_space<vmem>>, vector<1x64xf32>
      tpu.vector_store %arg2[%c0_20, %c0_21], %22 {strides = array<i32>} : memref<2x64xf32, #tpu.memory_space<vmem>>, vector<1x64xf32>,
      %cst_22 = arith.constant 9.99999974E-6 : f32
      %31 = vector.broadcast %cst_22 : f32 to vector<1x64xf32>
      %32 = arith.addf %29, %31 : vector<1x64xf32>
      %33 = math.rsqrt %32 : vector<1x64xf32>
      %c1_23 = arith.constant 1 : index
      %c0_24 = arith.constant 0 : index
      %34 = vector.load %arg2[%c1_23, %c0_24] : memref<2x64xf32, #tpu.memory_space<vmem>>, vector<1x64xf32>
      tpu.vector_store %arg2[%c1_23, %c0_24], %33 {strides = array<i32>} : memref<2x64xf32, #tpu.memory_space<vmem>>, vector<1x64xf32>,
    } else {
    }
    return
  }
  func.func @transform_0(%arg0: i32) -> (i32, i32, i32, i32) {
    %c0_i32 = arith.constant 0 : i32
    %c0_i32_0 = arith.constant 0 : i32
    %c0_i32_1 = arith.constant 0 : i32
    %c0_i32_2 = arith.constant 0 : i32
    return %arg0, %c0_i32, %c0_i32_0, %c0_i32_1 : i32, i32, i32, i32
  }
  func.func @transform_1(%arg0: i32) -> (i32, i32) {
    %c0_i32 = arith.constant 0 : i32
    %c0_i32_0 = arith.constant 0 : i32
    %c0_i32_1 = arith.constant 0 : i32
    return %c0_i32, %c0_i32_0 : i32, i32
  }
}

module attributes {stable_mosaic.version = 11 : i64} {
  func.func @kernel(%arg0: i32, %arg1: memref<1x16x16x64xf32, #tpu.memory_space<vmem>>, %arg2: memref<1x1x16x16x32xbf16, #tpu.memory_space<vmem>>, %arg3: memref<2x64xf32, #tpu.memory_space<vmem>>, %arg4: memref<288x128xbf16, #tpu.memory_space<vmem>>, %arg5: memref<1x128xf32, #tpu.memory_space<vmem>>, %arg6: memref<576x32xbf16, #tpu.memory_space<vmem>>, %arg7: memref<1x32xf32, #tpu.memory_space<vmem>>, %arg8: memref<1x16x16x32xf32, #tpu.memory_space<vmem>>, %arg9: memref<1x16x16x32xf32, #tpu.memory_space<vmem>>) attributes {dimension_semantics = [#tpu.dimension_semantics<parallel>], iteration_bounds = array<i64: 2>, scalar_prefetch = 0 : i64, scratch_operands = 0 : i64, tpu.core_type = #tpu.core_type<tc>, window_params = [{transform_indices = @transform_0, window_bounds = array<i64: 1, 16, 16, 64>}, {transform_indices = @transform_1, window_bounds = array<i64: 1, 1, 16, 16, 32>}, {pipeline_mode = #tpu.pipeline_mode<synchronous>, transform_indices = @transform_2, window_bounds = array<i64: 2, 64>}, {pipeline_mode = #tpu.pipeline_mode<synchronous>, transform_indices = @transform_3, window_bounds = array<i64: 288, 128>}, {pipeline_mode = #tpu.pipeline_mode<synchronous>, transform_indices = @transform_4, window_bounds = array<i64: 1, 128>}, {pipeline_mode = #tpu.pipeline_mode<synchronous>, transform_indices = @transform_5, window_bounds = array<i64: 576, 32>}, {pipeline_mode = #tpu.pipeline_mode<synchronous>, transform_indices = @transform_6, window_bounds = array<i64: 1, 32>}, {transform_indices = @transform_7, window_bounds = array<i64: 1, 16, 16, 32>}, {transform_indices = @transform_8, window_bounds = array<i64: 1, 16, 16, 32>}]} {
    %c0 = arith.constant 0 : index
    %c0_0 = arith.constant 0 : index
    %c0_1 = arith.constant 0 : index
    %c0_2 = arith.constant 0 : index
    %c0_3 = arith.constant 0 : index
    %0 = vector.load %arg2[%c0, %c0_0, %c0_1, %c0_2, %c0_3] : memref<1x1x16x16x32xbf16, #tpu.memory_space<vmem>>, vector<1x1x16x16x32xbf16>
    %1 = vector.shape_cast %0 : vector<1x1x16x16x32xbf16> to vector<16x16x32xbf16>
    %cst = arith.constant 0.000000e+00 : bf16
    %2 = vector.broadcast %cst : bf16 to vector<16x1x32xbf16>
    %3 = tpu.concatenate %2, %1, %2 in 1 : vector<16x1x32xbf16>, vector<16x16x32xbf16>, vector<16x1x32xbf16> -> vector<16x18x32xbf16>
    %cst_4 = arith.constant 0.000000e+00 : bf16
    %4 = vector.broadcast %cst_4 : bf16 to vector<1x18x32xbf16>
    %5 = tpu.concatenate %4, %3, %4 in 0 : vector<1x18x32xbf16>, vector<16x18x32xbf16>, vector<1x18x32xbf16> -> vector<18x18x32xbf16>
    %6 = vector.extract_strided_slice %5 {offsets = [0, 0, 0], sizes = [16, 16, 32], strides = [1, 1, 1]} : vector<18x18x32xbf16> to vector<16x16x32xbf16>
    %7 = vector.shape_cast %6 : vector<16x16x32xbf16> to vector<256x32xbf16>
    %8 = vector.extract_strided_slice %5 {offsets = [0, 1, 0], sizes = [16, 16, 32], strides = [1, 1, 1]} : vector<18x18x32xbf16> to vector<16x16x32xbf16>
    %9 = vector.shape_cast %8 : vector<16x16x32xbf16> to vector<256x32xbf16>
    %10 = vector.extract_strided_slice %5 {offsets = [0, 2, 0], sizes = [16, 16, 32], strides = [1, 1, 1]} : vector<18x18x32xbf16> to vector<16x16x32xbf16>
    %11 = vector.shape_cast %10 : vector<16x16x32xbf16> to vector<256x32xbf16>
    %12 = vector.extract_strided_slice %5 {offsets = [1, 0, 0], sizes = [16, 16, 32], strides = [1, 1, 1]} : vector<18x18x32xbf16> to vector<16x16x32xbf16>
    %13 = vector.shape_cast %12 : vector<16x16x32xbf16> to vector<256x32xbf16>
    %14 = vector.extract_strided_slice %5 {offsets = [1, 1, 0], sizes = [16, 16, 32], strides = [1, 1, 1]} : vector<18x18x32xbf16> to vector<16x16x32xbf16>
    %15 = vector.shape_cast %14 : vector<16x16x32xbf16> to vector<256x32xbf16>
    %16 = vector.extract_strided_slice %5 {offsets = [1, 2, 0], sizes = [16, 16, 32], strides = [1, 1, 1]} : vector<18x18x32xbf16> to vector<16x16x32xbf16>
    %17 = vector.shape_cast %16 : vector<16x16x32xbf16> to vector<256x32xbf16>
    %18 = vector.extract_strided_slice %5 {offsets = [2, 0, 0], sizes = [16, 16, 32], strides = [1, 1, 1]} : vector<18x18x32xbf16> to vector<16x16x32xbf16>
    %19 = vector.shape_cast %18 : vector<16x16x32xbf16> to vector<256x32xbf16>
    %20 = vector.extract_strided_slice %5 {offsets = [2, 1, 0], sizes = [16, 16, 32], strides = [1, 1, 1]} : vector<18x18x32xbf16> to vector<16x16x32xbf16>
    %21 = vector.shape_cast %20 : vector<16x16x32xbf16> to vector<256x32xbf16>
    %22 = vector.extract_strided_slice %5 {offsets = [2, 2, 0], sizes = [16, 16, 32], strides = [1, 1, 1]} : vector<18x18x32xbf16> to vector<16x16x32xbf16>
    %23 = vector.shape_cast %22 : vector<16x16x32xbf16> to vector<256x32xbf16>
    %24 = tpu.concatenate %7, %9, %11, %13, %15, %17, %19, %21, %23 in 1 : vector<256x32xbf16>, vector<256x32xbf16>, vector<256x32xbf16>, vector<256x32xbf16>, vector<256x32xbf16>, vector<256x32xbf16>, vector<256x32xbf16>, vector<256x32xbf16>, vector<256x32xbf16> -> vector<256x288xbf16>
    %c0_5 = arith.constant 0 : index
    %c0_6 = arith.constant 0 : index
    %25 = vector.load %arg4[%c0_5, %c0_6] : memref<288x128xbf16, #tpu.memory_space<vmem>>, vector<288x128xbf16>
    %cst_7 = arith.constant dense<0.000000e+00> : vector<256x128xf32>
    %26 = tpu.matmul %24, %25, %cst_7 {dimension_numbers = #tpu.dot_dimension_numbers<[1], [0], [0], [1], [0, 0, 1, 1], [], []>} : vector<256x288xbf16>, vector<288x128xbf16>, vector<256x128xf32> -> vector<256x128xf32>
    %c0_8 = arith.constant 0 : index
    %c0_9 = arith.constant 0 : index
    %27 = vector.load %arg5[%c0_8, %c0_9] : memref<1x128xf32, #tpu.memory_space<vmem>>, vector<1x128xf32>
    %28 = vector.broadcast %27 : vector<1x128xf32> to vector<256x128xf32>
    %29 = arith.addf %26, %28 : vector<256x128xf32>
    %30 = vector.extract_strided_slice %29 {offsets = [0, 0], sizes = [256, 64], strides = [1, 1]} : vector<256x128xf32> to vector<256x64xf32>
    %31 = vector.extract_strided_slice %29 {offsets = [0, 64], sizes = [256, 64], strides = [1, 1]} : vector<256x128xf32> to vector<256x64xf32>
    %c0_10 = arith.constant 0 : index
    %c0_11 = arith.constant 0 : index
    %32 = vector.load %arg3[%c0_10, %c0_11] : memref<2x64xf32, #tpu.memory_space<vmem>>, vector<1x64xf32>
    %c1 = arith.constant 1 : index
    %c0_12 = arith.constant 0 : index
    %33 = vector.load %arg3[%c1, %c0_12] : memref<2x64xf32, #tpu.memory_space<vmem>>, vector<1x64xf32>
    %c0_13 = arith.constant 0 : index
    %c0_14 = arith.constant 0 : index
    %c0_15 = arith.constant 0 : index
    %c0_16 = arith.constant 0 : index
    %34 = vector.load %arg1[%c0_13, %c0_14, %c0_15, %c0_16] : memref<1x16x16x64xf32, #tpu.memory_space<vmem>>, vector<1x16x16x64xf32>
    %35 = vector.shape_cast %34 : vector<1x16x16x64xf32> to vector<16x16x64xf32>
    %36 = vector.shape_cast %35 : vector<16x16x64xf32> to vector<256x64xf32>
    %37 = vector.broadcast %32 : vector<1x64xf32> to vector<256x64xf32>
    %38 = arith.subf %36, %37 : vector<256x64xf32>
    %39 = vector.broadcast %33 : vector<1x64xf32> to vector<256x64xf32>
    %40 = arith.mulf %38, %39 : vector<256x64xf32>
    %cst_17 = arith.constant 1.000000e+00 : f32
    %41 = vector.broadcast %cst_17 : f32 to vector<256x64xf32>
    %42 = arith.addf %41, %30 : vector<256x64xf32>
    %43 = arith.mulf %40, %42 : vector<256x64xf32>
    %44 = arith.addf %43, %31 : vector<256x64xf32>
    %cst_18 = arith.constant 0.000000e+00 : f32
    %45 = vector.broadcast %cst_18 : f32 to vector<256x64xf32>
    %46 = arith.cmpf oge, %44, %45 : vector<256x64xf32>
    %cst_19 = arith.constant 2.000000e-01 : f32
    %47 = vector.broadcast %cst_19 : f32 to vector<256x64xf32>
    %48 = arith.mulf %47, %44 : vector<256x64xf32>
    %49 = arith.select %46, %44, %48 : vector<256x64xi1>, vector<256x64xf32>
    %50 = arith.truncf %49 : vector<256x64xf32> to vector<256x64xbf16>
    %51 = vector.shape_cast %50 : vector<256x64xbf16> to vector<16x16x64xbf16>
    %cst_20 = arith.constant 0.000000e+00 : bf16
    %52 = vector.broadcast %cst_20 : bf16 to vector<16x1x64xbf16>
    %53 = tpu.concatenate %52, %51, %52 in 1 : vector<16x1x64xbf16>, vector<16x16x64xbf16>, vector<16x1x64xbf16> -> vector<16x18x64xbf16>
    %cst_21 = arith.constant 0.000000e+00 : bf16
    %54 = vector.broadcast %cst_21 : bf16 to vector<1x18x64xbf16>
    %55 = tpu.concatenate %54, %53, %54 in 0 : vector<1x18x64xbf16>, vector<16x18x64xbf16>, vector<1x18x64xbf16> -> vector<18x18x64xbf16>
    %56 = vector.extract_strided_slice %55 {offsets = [0, 0, 0], sizes = [16, 16, 64], strides = [1, 1, 1]} : vector<18x18x64xbf16> to vector<16x16x64xbf16>
    %57 = vector.shape_cast %56 : vector<16x16x64xbf16> to vector<256x64xbf16>
    %58 = vector.extract_strided_slice %55 {offsets = [0, 1, 0], sizes = [16, 16, 64], strides = [1, 1, 1]} : vector<18x18x64xbf16> to vector<16x16x64xbf16>
    %59 = vector.shape_cast %58 : vector<16x16x64xbf16> to vector<256x64xbf16>
    %60 = vector.extract_strided_slice %55 {offsets = [0, 2, 0], sizes = [16, 16, 64], strides = [1, 1, 1]} : vector<18x18x64xbf16> to vector<16x16x64xbf16>
    %61 = vector.shape_cast %60 : vector<16x16x64xbf16> to vector<256x64xbf16>
    %62 = vector.extract_strided_slice %55 {offsets = [1, 0, 0], sizes = [16, 16, 64], strides = [1, 1, 1]} : vector<18x18x64xbf16> to vector<16x16x64xbf16>
    %63 = vector.shape_cast %62 : vector<16x16x64xbf16> to vector<256x64xbf16>
    %64 = vector.extract_strided_slice %55 {offsets = [1, 1, 0], sizes = [16, 16, 64], strides = [1, 1, 1]} : vector<18x18x64xbf16> to vector<16x16x64xbf16>
    %65 = vector.shape_cast %64 : vector<16x16x64xbf16> to vector<256x64xbf16>
    %66 = vector.extract_strided_slice %55 {offsets = [1, 2, 0], sizes = [16, 16, 64], strides = [1, 1, 1]} : vector<18x18x64xbf16> to vector<16x16x64xbf16>
    %67 = vector.shape_cast %66 : vector<16x16x64xbf16> to vector<256x64xbf16>
    %68 = vector.extract_strided_slice %55 {offsets = [2, 0, 0], sizes = [16, 16, 64], strides = [1, 1, 1]} : vector<18x18x64xbf16> to vector<16x16x64xbf16>
    %69 = vector.shape_cast %68 : vector<16x16x64xbf16> to vector<256x64xbf16>
    %70 = vector.extract_strided_slice %55 {offsets = [2, 1, 0], sizes = [16, 16, 64], strides = [1, 1, 1]} : vector<18x18x64xbf16> to vector<16x16x64xbf16>
    %71 = vector.shape_cast %70 : vector<16x16x64xbf16> to vector<256x64xbf16>
    %72 = vector.extract_strided_slice %55 {offsets = [2, 2, 0], sizes = [16, 16, 64], strides = [1, 1, 1]} : vector<18x18x64xbf16> to vector<16x16x64xbf16>
    %73 = vector.shape_cast %72 : vector<16x16x64xbf16> to vector<256x64xbf16>
    %74 = tpu.concatenate %57, %59, %61, %63, %65, %67, %69, %71, %73 in 1 : vector<256x64xbf16>, vector<256x64xbf16>, vector<256x64xbf16>, vector<256x64xbf16>, vector<256x64xbf16>, vector<256x64xbf16>, vector<256x64xbf16>, vector<256x64xbf16>, vector<256x64xbf16> -> vector<256x576xbf16>
    %c0_22 = arith.constant 0 : index
    %c0_23 = arith.constant 0 : index
    %75 = vector.load %arg6[%c0_22, %c0_23] : memref<576x32xbf16, #tpu.memory_space<vmem>>, vector<576x32xbf16>
    %cst_24 = arith.constant dense<0.000000e+00> : vector<256x32xf32>
    %76 = tpu.matmul %74, %75, %cst_24 {dimension_numbers = #tpu.dot_dimension_numbers<[1], [0], [0], [1], [0, 0, 1, 1], [], []>} : vector<256x576xbf16>, vector<576x32xbf16>, vector<256x32xf32> -> vector<256x32xf32>
    %c0_25 = arith.constant 0 : index
    %c0_26 = arith.constant 0 : index
    %77 = vector.load %arg7[%c0_25, %c0_26] : memref<1x32xf32, #tpu.memory_space<vmem>>, vector<1x32xf32>
    %78 = vector.broadcast %77 : vector<1x32xf32> to vector<256x32xf32>
    %79 = arith.addf %76, %78 : vector<256x32xf32>
    %c0_27 = arith.constant 0 : index
    %c0_28 = arith.constant 0 : index
    %c0_29 = arith.constant 0 : index
    %c0_30 = arith.constant 0 : index
    %80 = vector.load %arg8[%c0_27, %c0_28, %c0_29, %c0_30] : memref<1x16x16x32xf32, #tpu.memory_space<vmem>>, vector<1x16x16x32xf32>
    %81 = vector.shape_cast %80 : vector<1x16x16x32xf32> to vector<16x16x32xf32>
    %82 = vector.shape_cast %81 : vector<16x16x32xf32> to vector<256x32xf32>
    %83 = arith.addf %79, %82 : vector<256x32xf32>
    %84 = vector.shape_cast %83 : vector<256x32xf32> to vector<16x16x32xf32>
    %c0_31 = arith.constant 0 : index
    %c0_32 = arith.constant 0 : index
    %c0_33 = arith.constant 0 : index
    %c0_34 = arith.constant 0 : index
    %85 = vector.load %arg9[%c0_31, %c0_32, %c0_33, %c0_34] : memref<1x16x16x32xf32, #tpu.memory_space<vmem>>, vector<1x16x16x32xf32>
    %86 = vector.shape_cast %85 : vector<1x16x16x32xf32> to vector<16x16x32xf32>
    %87 = vector.shape_cast %84 : vector<16x16x32xf32> to vector<1x16x16x32xf32>
    tpu.vector_store %arg9[%c0_31, %c0_32, %c0_33, %c0_34], %87 {strides = array<i32>} : memref<1x16x16x32xf32, #tpu.memory_space<vmem>>, vector<1x16x16x32xf32>,
    return
  }
  func.func @transform_0(%arg0: i32) -> (i32, i32, i32, i32) {
    %c0_i32 = arith.constant 0 : i32
    %c0_i32_0 = arith.constant 0 : i32
    %c0_i32_1 = arith.constant 0 : i32
    %c0_i32_2 = arith.constant 0 : i32
    return %arg0, %c0_i32, %c0_i32_0, %c0_i32_1 : i32, i32, i32, i32
  }
  func.func @transform_1(%arg0: i32) -> (i32, i32, i32, i32, i32) {
    %c1_i32 = arith.constant 1 : i32
    %c0_i32 = arith.constant 0 : i32
    %c0_i32_0 = arith.constant 0 : i32
    %c0_i32_1 = arith.constant 0 : i32
    %c0_i32_2 = arith.constant 0 : i32
    return %arg0, %c1_i32, %c0_i32, %c0_i32_0, %c0_i32_1 : i32, i32, i32, i32, i32
  }
  func.func @transform_2(%arg0: i32) -> (i32, i32) {
    %c0_i32 = arith.constant 0 : i32
    %c0_i32_0 = arith.constant 0 : i32
    %c0_i32_1 = arith.constant 0 : i32
    return %c0_i32, %c0_i32_0 : i32, i32
  }
  func.func @transform_3(%arg0: i32) -> (i32, i32) {
    %c0_i32 = arith.constant 0 : i32
    %c0_i32_0 = arith.constant 0 : i32
    %c0_i32_1 = arith.constant 0 : i32
    return %c0_i32, %c0_i32_0 : i32, i32
  }
  func.func @transform_4(%arg0: i32) -> (i32, i32) {
    %c0_i32 = arith.constant 0 : i32
    %c0_i32_0 = arith.constant 0 : i32
    %c0_i32_1 = arith.constant 0 : i32
    return %c0_i32, %c0_i32_0 : i32, i32
  }
  func.func @transform_5(%arg0: i32) -> (i32, i32) {
    %c0_i32 = arith.constant 0 : i32
    %c0_i32_0 = arith.constant 0 : i32
    %c0_i32_1 = arith.constant 0 : i32
    return %c0_i32, %c0_i32_0 : i32, i32
  }
  func.func @transform_6(%arg0: i32) -> (i32, i32) {
    %c0_i32 = arith.constant 0 : i32
    %c0_i32_0 = arith.constant 0 : i32
    %c0_i32_1 = arith.constant 0 : i32
    return %c0_i32, %c0_i32_0 : i32, i32
  }
  func.func @transform_7(%arg0: i32) -> (i32, i32, i32, i32) {
    %c0_i32 = arith.constant 0 : i32
    %c0_i32_0 = arith.constant 0 : i32
    %c0_i32_1 = arith.constant 0 : i32
    %c0_i32_2 = arith.constant 0 : i32
    return %arg0, %c0_i32, %c0_i32_0, %c0_i32_1 : i32, i32, i32, i32
  }
  func.func @transform_8(%arg0: i32) -> (i32, i32, i32, i32) {
    %c0_i32 = arith.constant 0 : i32
    %c0_i32_0 = arith.constant 0 : i32
    %c0_i32_1 = arith.constant 0 : i32
    %c0_i32_2 = arith.constant 0 : i32
    return %arg0, %c0_i32, %c0_i32_0, %c0_i32_1 : i32, i32, i32, i32
  }
}

</mosaic_0001>

<bundles_post_ra>
// kernel: fused_block_forward.6
= control target key start
LH: loop header
LB: loop body
LE: loop exit
PB: predicated region body
PF: predicated region fallthrough
CT: control target
= control target key end

     0   :  { %6 = vsyncpa [#allocation3], 0  ;;  %s763_s0 = inlined_call_operand.hbm [shape: f32[2,16,16,32], index: 0, kind: input, shape index: {}]   ;;  %s764_s1 = inlined_call_operand.vmem [shape: f32[2,32], index: 1, kind: output, shape index: {}]  }
   0x1   :  { %8 = vsyncpa [#allocation3 + $0x1], 0  ;;  %s529_s6 = smov 0   ;;  %s531_s7 = smov 0  }
   0x2   :  { %s533_s8 = smov 0   ;;  %s535_s9 = smov 0  }
   0x3 LB: > { %s548_s10 = sadd.s32 4294967295, %s513_s9   ;;  %s551_s11 = sadd.s32 1, %s513_s9   ;;  %s513_s9 = sphi %s535_s9, %s771_s9   ;;  %s509_s8 = sphi %s533_s8, %s770_s8   ;;  %s505_s7 = sphi %s531_s7, %s769_s7   ;;  %s501_s6 = sphi %s529_s6, %s768_s6  }
   0x4   : > { %s18_s12 = ssub.s32 %s513_s9, %s551_s11  ;;  %s21_s13 = sadd.s32 1, %s509_s8 }
   0x5   : > { %p19_p0 = scmp.eq.s32.totalorder %s18_s12, 0  ;;  %p28_p1 = scmp.ne.s32.totalorder %s509_s8, %s505_s7 }
   0x6   : > { %p29_p2 = scmp.eq.s32.totalorder %s513_s9, 0  ;;  %p34_p3 = scmp.ne.s32.totalorder %s505_s7, %s501_s6 }
   0x7   : > { %s561_s14 = scalar_select %p19_p0, %s509_s8, %s21_s13  }
   0x8   : > { %p30_p4 = por %p29_p2, %p28_p1  ;;  %p35_p5 = scmp.eq.s32.totalorder %s548_s10, 0 }
   0x9   : > { %p411_p6 = scmp.lt.s32.totalorder %s513_s9, 2  ;;  %s79_s16 = sand.u32 1, %s509_s8  }
   0xa   : > { %p565_p7 = por %p35_p5, %p34_p3  ;;  %s395_s17 = sshll.u32 %s79_s16, 8 }
   0xb   : > { %s404_s18 = sshll.u32 %s513_s9, 12  ;;  %s83_s22 = scalar_lea.vmem [#allocation2], %s395_s17 }
   0xc   : > { %s574_s21 = scalar_lea.hbm %s763_s0, %s404_s18  ;;  %s90_s23 = sshll.u32 %s83_s22, 4  ;;  %s576_s23 = int_to_ptr.vmem [resolvable:$true] %s90_s23 }
   0xd   : > { %p578_p8 = pnand %p411_p6, %p30_p4  ;;  %s583_s25 = scalar_lea.sflag [#allocation3], %s79_s16 }
   0xe   : > { %s449_s26 = scalar_lea.hbm %s574_s21, 4096  ;;  %s454_s29 = scalar_lea.hbm %s763_s0, 8192 }
   0xf   : > { %p450_p10 = scmp.ne.s32.totalorder %s574_s21, %s449_s26  ;;  %p451_p11 = pneg %p578_p8 }
  0x10   : > { %p455_p0 = scmp.lt.u32.totalorder %s574_s21, %s763_s0  ;;  %p456_p1 = scmp.lt.u32.totalorder %s454_s29, %s449_s26 }
  0x11   : > { %p452_p12 = pnand %p451_p11, %p450_p10  ;;  %p458_p3 = scmp.lt.u32.totalorder %s449_s26, %s574_s21 }
  0x12   : > { %p457_p2 = por %p456_p1, %p455_p0 }
  0x13   : > { %p453_p13 = pneg %p452_p12 }
  0x14   : > { %p459_p4 = por %p458_p3, %p457_p2 }
  0x16   : > { %p460_p5 = pnand %p459_p4, %p453_p13 }
  0x18   : > { %463 = shalt.err (!%p460_p5)
}
  0x19   : > { %s464_s3 = scalar_lea.vmem %s576_s23, 4096  ;;  %s515_s4 = smov [#allocation2]  }
  0x1a   : > { %p465_p6 = scmp.ne.s32.totalorder %s576_s23, %s464_s3  ;;  %s469_s5 = sshll.u32 %s515_s4, 4  ;;  %s470_s5 = int_to_ptr.vmem [resolvable:$false] %s469_s5 }
  0x1b   : > { %s471_s6 = scalar_lea.vmem %s470_s5, 8192  ;;  %p472_p9 = scmp.lt.s32.totalorder %s576_s23, %s470_s5 }
  0x1c   : > { %p467_p10 = pnand %p465_p6, %p451_p11  ;;  %p473_p0 = scmp.lt.s32.totalorder %s471_s6, %s464_s3 }
  0x1e   : > { %p468_p12 = pneg %p467_p10  ;;  %p474_p1 = por %p473_p0, %p472_p9 }
  0x20   : > { %p475_p2 = pnand %p474_p1, %p468_p12 }
  0x22   : > { %478 = shalt.err (!%p475_p2)
}
  0x23   : > { %s516_s12 = smov 128   ;;  %s517_s13 = smov 8  }
  0x24   : > { %410 = dma.hbm_to_vmem [thread:$0]  (!%p578_p8), %s574_s21, 4096, %s576_s23, %s583_s25, %s516_s12, %s516_s12, %s517_s13  }
  0x25   : > { %p98_p11 = scmp.lt.s32.totalorder %s513_s9, 3  ;;  %p767_p13 = scmp.ge.s32.totalorder %s513_s9, 1 }
  0x27   : > { %p99_p3 = pnand %p767_p13, %p98_p11 }
  0x28   : > { %s104_s16 = sand.u32 (!%p99_p3), 1, %s505_s7  }
  0x29   : > { %102 = sbr.rel (%p99_p3) target bundleno = 169 (0xa9), region = 24  ;;  %s399_s17 = sshll.u32 (!%p99_p3), %s104_s16, 8 }
  0x2a   : > { %s105_s18 = scalar_lea.sflag (!%p99_p3), [#allocation3], %s104_s16  ;;  %s615_s19 = scalar_lea.vmem (!%p99_p3), [#allocation2], %s399_s17 }
  0x30   : > { %496 = dma.done.wait (%p565_p7), %s105_s18, 4096  }
  0x31   : > { %498 = vsyncadd (%p565_p7), %s105_s18, 4294963200  ;;  %p400_p9 = scmp.ne.s32.totalorder %s548_s10, 0 }
  0x32   : > { %vm126_vm0 = vcmask (!%p400_p9), 254976   ;;  %v518_v0 = vmov (!%p400_p9), 0.0  }
  0x33   : > { %125 = sbr.rel (%p400_p9) target bundleno = 58 (0x3a), region = 32  ;;  %127 = vst.msk [vmem:[%s764_s1] sm:$0x3] (!%p400_p9), %vm126_vm0, %v518_v0 }
  0x3a PF: > { %v128_v1 = vld [vmem:[%s615_s19] sm:$0xff]  ;;  %v129_v2 = vld [vmem:[%s615_s19 + $0x8] sm:$0xff]  ;;  %v130_v3 = vld [vmem:[%s615_s19 + $0x10] sm:$0xff]  ;;  %vm161_vm1 = vcmask 261120   ;;  %vm232_vm2 = vcmask 253952   ;;  %p401_p7 = scmp.ne.s32.totalorder %s548_s10, 1 }
  0x3b   : > { %v162_v4 = vsel %vm161_vm1, %v128_v1, 0.0  ;;  %v163_v5 = vsel %vm161_vm1, %v129_v2, 0.0  ;;  %v165_v6 = vsel %vm161_vm1, %v130_v3, 0.0  ;;  %v131_v7 = vld [vmem:[%s615_s19 + $0x18] sm:$0xff]  ;;  %v132_v10 = vld [vmem:[%s615_s19 + $0x20] sm:$0xff]  ;;  %v133_v13 = vld [vmem:[%s615_s19 + $0x28] sm:$0xff]  ;;  %v235_v28 = vmul.f32 %v128_v1, %v128_v1 }
  0x3c   : > { %v164_v8 = vadd.f32 %v163_v5, %v162_v4  ;;  %v167_v9 = vsel %vm161_vm1, %v131_v7, 0.0  ;;  %v169_v12 = vsel %vm161_vm1, %v132_v10, 0.0  ;;  %v171_v15 = vsel %vm161_vm1, %v133_v13, 0.0  ;;  %v134_v16 = vld [vmem:[%s615_s19 + $0x30] sm:$0xff]  ;;  %v135_v19 = vld [vmem:[%s615_s19 + $0x38] sm:$0xff]  ;;  %v136_v22 = vld [vmem:[%s615_s19 + $0x40] sm:$0xff] }
  0x3d   : > { %v173_v18 = vsel %vm161_vm1, %v134_v16, 0.0  ;;  %v175_v21 = vsel %vm161_vm1, %v135_v19, 0.0  ;;  %v177_v24 = vsel %vm161_vm1, %v136_v22, 0.0  ;;  %v137_v25 = vld [vmem:[%s615_s19 + $0x48] sm:$0xff]  ;;  %v236_v29 = vmul.f32 %v129_v2, %v129_v2  ;;  %v138_v31 = vld [vmem:[%s615_s19 + $0x50] sm:$0xff]  ;;  %v139_v33 = vld [vmem:[%s615_s19 + $0x58] sm:$0xff] }
  0x3e   : > { %v166_v11 = vadd.f32 %v165_v6, %v164_v8  ;;  %v179_v27 = vsel %vm161_vm1, %v137_v25, 0.0  ;;  %v237_v30 = vmul.f32 %v130_v3, %v130_v3  ;;  %v181_v34 = vsel %vm161_vm1, %v138_v31, 0.0  ;;  %v140_v42 = vld [vmem:[%s615_s19 + $0x60] sm:$0xff]  ;;  %v141_v48 = vld [vmem:[%s615_s19 + $0x68] sm:$0xff]  ;;  %v142_v54 = vld [vmem:[%s615_s19 + $0x70] sm:$0xff] }
  0x3f   : > { %v238_v35 = vmul.f32 %v131_v7, %v131_v7  ;;  %v183_v37 = vsel %vm161_vm1, %v139_v33, 0.0  ;;  %v239_v38 = vmul.f32 %v132_v10, %v132_v10  ;;  %v267_v39 = vsel %vm161_vm1, %v235_v28, 0.0  ;;  %v143_v60 = vld [vmem:[%s615_s19 + $0x78] sm:$0xff]  ;;  %v144_v2 = vld [vmem:[%s615_s19 + $0x80] sm:$0xff]  ;;  %v145_v8 = vld [vmem:[%s615_s19 + $0x88] sm:$0xff] }
  0x40   : > { %v168_v14 = vadd.f32 %v167_v9, %v166_v11  ;;  %v268_v40 = vsel %vm161_vm1, %v236_v29, 0.0  ;;  %v270_v41 = vsel %vm161_vm1, %v237_v30, 0.0  ;;  %v185_v45 = vsel %vm161_vm1, %v140_v42, 0.0 }
  0x41   : > { %v269_v44 = vadd.f32 %v268_v40, %v267_v39  ;;  %v240_v46 = vmul.f32 %v133_v13, %v133_v13  ;;  %v272_v47 = vsel %vm161_vm1, %v238_v35, 0.0  ;;  %v187_v51 = vsel %vm161_vm1, %v141_v48, 0.0 }
  0x42   : > { %v170_v17 = vadd.f32 %v169_v12, %v168_v14  ;;  %v241_v52 = vmul.f32 %v134_v16, %v134_v16  ;;  %v274_v53 = vsel %vm161_vm1, %v239_v38, 0.0  ;;  %v189_v57 = vsel %vm161_vm1, %v142_v54, 0.0  ;;  %v146_v14 = vld [vmem:[%s615_s19 + $0x90] sm:$0xff] }
  0x43   : > { %v271_v50 = vadd.f32 %v270_v41, %v269_v44  ;;  %v242_v58 = vmul.f32 %v135_v19, %v135_v19  ;;  %v276_v59 = vsel %vm161_vm1, %v240_v46, 0.0  ;;  %v191_v63 = vsel %vm161_vm1, %v143_v60, 0.0  ;;  %v150_v38 = vld [vmem:[%s615_s19 + $0xb0] sm:$0xff]  ;;  %v151_v44 = vld [vmem:[%s615_s19 + $0xb8] sm:$0xff] }
  0x44   : > { %v172_v20 = vadd.f32 %v171_v15, %v170_v17  ;;  %v243_v0 = vmul.f32 %v136_v22, %v136_v22  ;;  %v278_v1 = vsel %vm161_vm1, %v241_v52, 0.0  ;;  %v193_v5 = vsel %vm161_vm1, %v144_v2, 0.0 }
  0x45   : > { %v273_v56 = vadd.f32 %v272_v47, %v271_v50  ;;  %v244_v6 = vmul.f32 %v137_v25, %v137_v25  ;;  %v280_v7 = vsel %vm161_vm1, %v242_v58, 0.0  ;;  %v195_v11 = vsel %vm161_vm1, %v145_v8, 0.0  ;;  %v152_v50 = vld [vmem:[%s615_s19 + $0xc0] sm:$0xff] }
  0x46   : > { %v174_v23 = vadd.f32 %v173_v18, %v172_v20  ;;  %v245_v12 = vmul.f32 %v138_v31, %v138_v31  ;;  %v282_v13 = vsel %vm161_vm1, %v243_v0, 0.0  ;;  %v197_v17 = vsel %vm161_vm1, %v146_v14, 0.0  ;;  %v147_v20 = vld [vmem:[%s615_s19 + $0x98] sm:$0xff] }
  0x47   : > { %v275_v62 = vadd.f32 %v274_v53, %v273_v56  ;;  %v246_v18 = vmul.f32 %v139_v33, %v139_v33  ;;  %v284_v19 = vsel %vm161_vm1, %v244_v6, 0.0  ;;  %v248_v30 = vmul.f32 %v141_v48, %v141_v48  ;;  %v153_v56 = vld [vmem:[%s615_s19 + $0xc8] sm:$0xff] }
  0x48   : > { %v176_v26 = vadd.f32 %v175_v21, %v174_v23  ;;  %v199_v23 = vsel %vm161_vm1, %v147_v20, 0.0  ;;  %v286_v25 = vsel %vm161_vm1, %v245_v12, 0.0  ;;  %v205_v41 = vsel %vm161_vm1, %v150_v38, 0.0 }
  0x49   : > { %v277_v4 = vadd.f32 %v276_v59, %v275_v62  ;;  %v288_v31 = vsel %vm161_vm1, %v246_v18, 0.0  ;;  %v207_v47 = vsel %vm161_vm1, %v151_v44, 0.0  ;;  %v251_v48 = vmul.f32 %v144_v2, %v144_v2  ;;  %v154_v62 = vld [vmem:[%s615_s19 + $0xd0] sm:$0xff] }
  0x4a   : > { %v178_v32 = vadd.f32 %v177_v24, %v176_v26  ;;  %v247_v24 = vmul.f32 %v140_v42, %v140_v42  ;;  %v148_v26 = vld [vmem:[%s615_s19 + $0xa0] sm:$0xff]  ;;  %v250_v42 = vmul.f32 %v143_v60, %v143_v60  ;;  %v209_v53 = vsel %vm161_vm1, %v152_v50, 0.0 }
  0x4b   : > { %v279_v10 = vadd.f32 %v278_v1, %v277_v4  ;;  %v201_v29 = vsel %vm161_vm1, %v148_v26, 0.0  ;;  %v211_v59 = vsel %vm161_vm1, %v153_v56, 0.0  ;;  %v253_v60 = vmul.f32 %v146_v14, %v146_v14  ;;  %v155_v4 = vld [vmem:[%s615_s19 + $0xd8] sm:$0xff] }
  0x4c   : > { %v180_v36 = vadd.f32 %v179_v27, %v178_v32  ;;  %v149_v32 = vld [vmem:[%s615_s19 + $0xa8] sm:$0xff]  ;;  %v213_v1 = vsel %vm161_vm1, %v154_v62, 0.0  ;;  %v254_v2 = vmul.f32 %v147_v20, %v147_v20  ;;  %v257_v20 = vmul.f32 %v150_v38, %v150_v38 }
  0x4d   : > { %v281_v16 = vadd.f32 %v280_v7, %v279_v10  ;;  %v203_v35 = vsel %vm161_vm1, %v149_v32, 0.0  ;;  %v215_v7 = vsel %vm161_vm1, %v155_v4, 0.0  ;;  %v156_v10 = vld [vmem:[%s615_s19 + $0xe0] sm:$0xff]  ;;  %v256_v14 = vmul.f32 %v149_v32, %v149_v32 }
  0x4e   : > { %v182_v43 = vadd.f32 %v181_v34, %v180_v36  ;;  %v249_v36 = vmul.f32 %v142_v54, %v142_v54  ;;  %v252_v54 = vmul.f32 %v145_v8, %v145_v8  ;;  %v255_v8 = vmul.f32 %v148_v26, %v148_v26 }
  0x4f   : > { %v283_v22 = vadd.f32 %v282_v13, %v281_v16  ;;  %v217_v13 = vsel %vm161_vm1, %v156_v10, 0.0  ;;  %v157_v16 = vld [vmem:[%s615_s19 + $0xe8] sm:$0xff]  ;;  %v258_v26 = vmul.f32 %v151_v44, %v151_v44  ;;  %v259_v32 = vmul.f32 %v152_v50, %v152_v50 }
  0x50   : > { %v184_v49 = vadd.f32 %v183_v37, %v182_v43  ;;  %v290_v37 = vsel %vm161_vm1, %v247_v24, 0.0  ;;  %v292_v43 = vsel %vm161_vm1, %v248_v30, 0.0  ;;  %v262_v44 = vmul.f32 %v155_v4, %v155_v4 }
  0x51   : > { %v285_v28 = vadd.f32 %v284_v19, %v283_v22  ;;  %v219_v19 = vsel %vm161_vm1, %v157_v16, 0.0  ;;  %v158_v22 = vld [vmem:[%s615_s19 + $0xf0] sm:$0xff] }
  0x52   : > { %v186_v55 = vadd.f32 %v185_v45, %v184_v49  ;;  %v294_v49 = vsel %vm161_vm1, %v249_v36, 0.0  ;;  %v260_v36 = vmul.f32 %v153_v56, %v153_v56  ;;  %v265_v56 = vmul.f32 %v158_v22, %v158_v22 }
  0x53   : > { %v287_v34 = vadd.f32 %v286_v25, %v285_v28  ;;  %v221_v25 = vsel %vm161_vm1, %v158_v22, 0.0  ;;  %v159_v28 = vld [vmem:[%s615_s19 + $0xf8] sm:$0xff] }
  0x54   : > { %v188_v61 = vadd.f32 %v187_v51, %v186_v55  ;;  %v296_v55 = vsel %vm161_vm1, %v250_v42, 0.0 }
  0x55   : > { %v289_v40 = vadd.f32 %v288_v31, %v287_v34  ;;  %v223_v31 = vsel %vm161_vm1, %v159_v28, 0.0 }
  0x56   : > { %v190_v3 = vadd.f32 %v189_v57, %v188_v61  ;;  %v298_v61 = vsel %vm161_vm1, %v251_v48, 0.0  ;;  %v263_v48 = vmul.f32 %v156_v10, %v156_v10 }
  0x57   : > { %v291_v46 = vadd.f32 %v290_v37, %v289_v40  ;;  %v312_v37 = vsel %vm161_vm1, %v258_v26, 0.0  ;;  %v261_v40 = vmul.f32 %v154_v62, %v154_v62 }
  0x58   : > { %v192_v9 = vadd.f32 %v191_v63, %v190_v3  ;;  %v300_v3 = vsel %vm161_vm1, %v252_v54, 0.0 }
  0x59   : > { %v293_v52 = vadd.f32 %v292_v43, %v291_v46 }
  0x5a   : > { %v194_v15 = vadd.f32 %v193_v5, %v192_v9  ;;  %v302_v9 = vsel %vm161_vm1, %v253_v60, 0.0  ;;  %v160_v60 = vld [vmem:[%s764_s1] sm:$0x1] }
  0x5b   : > { %v295_v58 = vadd.f32 %v294_v49, %v293_v52  ;;  %v318_v49 = vsel %vm161_vm1, %v261_v40, 0.0  ;;  %v264_v52 = vmul.f32 %v157_v16, %v157_v16 }
  0x5c   : > { %v196_v21 = vadd.f32 %v195_v11, %v194_v15  ;;  %v304_v15 = vsel %vm161_vm1, %v254_v2, 0.0 }
  0x5d   : > { %v297_v0 = vadd.f32 %v296_v55, %v295_v58  ;;  %v324_v62 = vsel %vm161_vm1, %v264_v52, 0.0 }
  0x5e   : > { %v198_v27 = vadd.f32 %v197_v17, %v196_v21  ;;  %v306_v21 = vsel %vm161_vm1, %v255_v8, 0.0 }
  0x5f   : > { %v299_v6 = vadd.f32 %v298_v61, %v297_v0  ;;  %v266_v61 = vmul.f32 %v159_v28, %v159_v28 }
  0x60   : > { %v200_v33 = vadd.f32 %v199_v23, %v198_v27  ;;  %v308_v27 = vsel %vm161_vm1, %v256_v14, 0.0 }
  0x61   : > { %v301_v12 = vadd.f32 %v300_v3, %v299_v6  ;;  %v328_v4 = vsel %vm161_vm1, %v266_v61, 0.0 }
  0x62   : > { %v202_v39 = vadd.f32 %v201_v29, %v200_v33  ;;  %v310_v33 = vsel %vm161_vm1, %v257_v20, 0.0 }
  0x63   : > { %v303_v18 = vadd.f32 %v302_v9, %v301_v12  ;;  %v234_v12 = vld [vmem:[%s764_s1 + $0x1] sm:$0x1] }
  0x64   : > { %v204_v45 = vadd.f32 %v203_v35, %v202_v39 }
  0x65   : > { %v305_v24 = vadd.f32 %v304_v15, %v303_v18 }
  0x66   : > { %v206_v51 = vadd.f32 %v205_v41, %v204_v45  ;;  %v314_v41 = vsel %vm161_vm1, %v259_v32, 0.0  ;;  %v316_v45 = vsel %vm161_vm1, %v260_v36, 0.0 }
  0x67   : > { %v307_v30 = vadd.f32 %v306_v21, %v305_v24 }
  0x68   : > { %v208_v57 = vadd.f32 %v207_v47, %v206_v51 }
  0x69   : > { %v309_v35 = vadd.f32 %v308_v27, %v307_v30 }
  0x6a   : > { %v210_v63 = vadd.f32 %v209_v53, %v208_v57  ;;  %v320_v53 = vsel %vm161_vm1, %v262_v44, 0.0  ;;  %v322_v57 = vsel %vm161_vm1, %v263_v48, 0.0 }
  0x6b   : > { %v311_v39 = vadd.f32 %v310_v33, %v309_v35 }
  0x6c   : > { %v212_v5 = vadd.f32 %v211_v59, %v210_v63 }
  0x6d   : > { %v313_v43 = vadd.f32 %v312_v37, %v311_v39 }
  0x6e   : > { %v214_v11 = vadd.f32 %v213_v1, %v212_v5  ;;  %v326_v1 = vsel %vm161_vm1, %v265_v56, 0.0 }
  0x6f   : > { %v315_v47 = vadd.f32 %v314_v41, %v313_v43 }
  0x70   : > { %v216_v17 = vadd.f32 %v215_v7, %v214_v11 }
  0x71   : > { %v317_v51 = vadd.f32 %v316_v45, %v315_v47 }
  0x72   : > { %v218_v23 = vadd.f32 %v217_v13, %v216_v17 }
  0x73   : > { %v319_v55 = vadd.f32 %v318_v49, %v317_v51 }
  0x74   : > { %v220_v29 = vadd.f32 %v219_v19, %v218_v23 }
  0x75   : > { %v321_v59 = vadd.f32 %v320_v53, %v319_v55 }
  0x76   : > { %v222_v34 = vadd.f32 %v221_v25, %v220_v29 }
  0x77   : > { %v323_v0 = vadd.f32 %v322_v57, %v321_v59 }
  0x78   : > { %v224_v38 = vadd.f32 %v223_v31, %v222_v34 }
  0x79   : > { %v325_v3 = vadd.f32 %v324_v62, %v323_v0 }
  0x7a   : > { %v225_v42 = vrot.slane %v224_v38, 4 }
  0x7b   : > { %v327_v5 = vadd.f32 %v326_v1, %v325_v3 }
  0x7c   : > { %v226_v46 = vadd.f32 %v225_v42, %v224_v38 }
  0x7d   : > { %v329_v6 = vadd.f32 %v328_v4, %v327_v5 }
  0x7e   : > { %v227_v50 = vrot.slane %v226_v46, 2 }
  0x7f   : > { %v330_v7 = vrot.slane %v329_v6, 4 }
  0x80   : > { %v228_v54 = vadd.f32 %v227_v50, %v226_v46 }
  0x81   : > { %v331_v8 = vadd.f32 %v330_v7, %v329_v6 }
  0x82   : > { %v229_v58 = vrot.slane %v228_v54, 1 }
  0x83   : > { %v332_v9 = vrot.slane %v331_v8, 2 }
  0x84   : > { %v230_v63 = vadd.f32 %v229_v58, %v228_v54 }
  0x85   : > { %v333_v10 = vadd.f32 %v332_v9, %v331_v8 }
  0x86   : > { %v231_v2 = vadd.f32 %v230_v63, %v160_v60 }
  0x87   : > { %v334_v11 = vrot.slane %v333_v10, 1  ;;  %341 = sbr.rel (%p401_p7) target bundleno = 169 (0xa9), region = 36 }
  0x88   : > { %233 = vst.msk [vmem:[%s764_s1] sm:$0x1] %vm232_vm2, %v231_v2 }
  0x89   : > { %v335_v13 = vadd.f32 %v334_v11, %v333_v10 }
  0x8b   : > { %v336_v14 = vadd.f32 %v335_v13, %v234_v12 }
  0x8d   : > { %337 = vst.msk [vmem:[%s764_s1 + $0x1] sm:$0x1] %vm232_vm2, %v336_v14 }
  0x8f   : > { %v342_v15 = vld [vmem:[%s764_s1] sm:$0x1] }
  0x90   : > { %v343_v17 = vmul.f32 0.001953125, %v342_v15 }
  0x92   : > { %v346_v19 = vmul.f32 %v343_v17, %v343_v17  ;;  %349 = vst.msk [vmem:[%s764_s1] sm:$0x1] %vm232_vm2, %v343_v17 }
  0x94   : > { %v344_v16 = vld [vmem:[%s764_s1 + $0x1] sm:$0x1] }
  0x95   : > { %v345_v18 = vmul.f32 0.001953125, %v344_v16 }
  0x97   : > { %v347_v20 = vsub.f32 %v345_v18, %v346_v19 }
  0x99   : > { %v348_v21 = vmax.f32 %v347_v20, 0.0 }
  0x9b   : > { %v350_v22 = vadd.f32 1e-05, %v348_v21 }
  0x9d   : > { %447 = vrsqrt.f32 %v350_v22 }
  0xa7   : > { %v448_v23 = vpop.eup %447 }
  0xa8   : > { %352 = vst.msk [vmem:[%s764_s1 + $0x1] sm:$0x1] %vm232_vm2, %v448_v23 }
  0xa9 PF: > { %p11_p8 = scmp.ge.s32.totalorder %s551_s11, 4   ;;  %s768_s6 = smov %s505_s7 }
  0xaa   : > { %s769_s7 = smov %s509_s8  ;;  %s770_s8 = smov %s561_s14 }
  0xab   : > { %s771_s9 = smov %s551_s11  ;;  %13 = sbr.rel (!%p11_p8) target bundleno = 3 (0x3), region = 68 }
  0xb2   :  { %364 = vsyncpa [#allocation3], 1 }
  0xb3   :  { %366 = vsyncpa [#allocation3 + $0x1], 1 }

// kernel: fused_block_forward.8
= control target key start
LH: loop header
LB: loop body
LE: loop exit
PB: predicated region body
PF: predicated region fallthrough
CT: control target
= control target key end

     0   :  { %s402_s6 = smov 0   ;;  %s551_s0 = inlined_call_operand.vmem [shape: f32[2,16,16,64], index: 0, kind: input, shape index: {}]   ;;  %s552_s1 = inlined_call_operand.vmem [shape: f32[2,64], index: 1, kind: output, shape index: {}]  }
   0x1 LB: > { %s408_s7 = sadd.s32 4294967295, %s389_s6   ;;  %p364_p0 = scmp.ge.s32.totalorder %s389_s6, 1  ;;  %s389_s6 = sphi %s402_s6, %s11_s6  }
   0x2   : > { %p82_p1 = scmp.lt.s32.totalorder %s389_s6, 3 }
   0x4   : > { %p83_p2 = pnand %p364_p0, %p82_p1 }
   0x5   : > { %p97_p3 = scmp.lt.s32.totalorder (!%p83_p2), %s408_s7, 1  ;;  %p367_p4 = scmp.ne.s32.totalorder (!%p83_p2), %s408_s7, 0 }
   0x6   : > { %86 = sbr.rel (%p83_p2) target bundleno = 132 (0x84), region = 24 }
   0xd   : > { %s98_s8 = scalar_select %p97_p3, %s408_s7, 1 }
   0xe   : > { %105 = sbr.rel (%p367_p4) target bundleno = 21 (0x15), region = 28  ;;  %vm106_vm0 = vcmask (!%p367_p4), 517120   ;;  %v391_v0 = vmov (!%p367_p4), 0.0  }
   0xf   : > { %s371_s9 = sshll.u32 %s98_s8, 8  ;;  %107 = vst.msk [vmem:[%s552_s1] sm:$0x3] (!%p367_p4), %vm106_vm0, %v391_v0 }
  0x10   : > { %s417_s12 = scalar_lea.vmem %s551_s0, %s371_s9 }
  0x15 PF: > { %v108_v1 = vld [vmem:[%s417_s12] sm:$0xff]  ;;  %v109_v2 = vld [vmem:[%s417_s12 + $0x8] sm:$0xff]  ;;  %v110_v3 = vld [vmem:[%s417_s12 + $0x10] sm:$0xff]  ;;  %vm141_vm1 = vcmask 523264   ;;  %vm212_vm2 = vcmask 516096   ;;  %p368_p5 = scmp.ne.s32.totalorder %s408_s7, 1 }
  0x16   : > { %v142_v4 = vsel %vm141_vm1, %v108_v1, 0.0  ;;  %v143_v5 = vsel %vm141_vm1, %v109_v2, 0.0  ;;  %v145_v6 = vsel %vm141_vm1, %v110_v3, 0.0  ;;  %v111_v7 = vld [vmem:[%s417_s12 + $0x18] sm:$0xff]  ;;  %v112_v10 = vld [vmem:[%s417_s12 + $0x20] sm:$0xff]  ;;  %v113_v13 = vld [vmem:[%s417_s12 + $0x28] sm:$0xff]  ;;  %v215_v28 = vmul.f32 %v108_v1, %v108_v1 }
  0x17   : > { %v144_v8 = vadd.f32 %v143_v5, %v142_v4  ;;  %v147_v9 = vsel %vm141_vm1, %v111_v7, 0.0  ;;  %v149_v12 = vsel %vm141_vm1, %v112_v10, 0.0  ;;  %v151_v15 = vsel %vm141_vm1, %v113_v13, 0.0  ;;  %v114_v16 = vld [vmem:[%s417_s12 + $0x30] sm:$0xff]  ;;  %v115_v19 = vld [vmem:[%s417_s12 + $0x38] sm:$0xff]  ;;  %v116_v22 = vld [vmem:[%s417_s12 + $0x40] sm:$0xff] }
  0x18   : > { %v153_v18 = vsel %vm141_vm1, %v114_v16, 0.0  ;;  %v155_v21 = vsel %vm141_vm1, %v115_v19, 0.0  ;;  %v157_v24 = vsel %vm141_vm1, %v116_v22, 0.0  ;;  %v117_v25 = vld [vmem:[%s417_s12 + $0x48] sm:$0xff]  ;;  %v216_v29 = vmul.f32 %v109_v2, %v109_v2  ;;  %v118_v31 = vld [vmem:[%s417_s12 + $0x50] sm:$0xff]  ;;  %v119_v33 = vld [vmem:[%s417_s12 + $0x58] sm:$0xff] }
  0x19   : > { %v146_v11 = vadd.f32 %v145_v6, %v144_v8  ;;  %v159_v27 = vsel %vm141_vm1, %v117_v25, 0.0  ;;  %v217_v30 = vmul.f32 %v110_v3, %v110_v3  ;;  %v161_v34 = vsel %vm141_vm1, %v118_v31, 0.0  ;;  %v120_v42 = vld [vmem:[%s417_s12 + $0x60] sm:$0xff]  ;;  %v121_v48 = vld [vmem:[%s417_s12 + $0x68] sm:$0xff]  ;;  %v122_v54 = vld [vmem:[%s417_s12 + $0x70] sm:$0xff] }
  0x1a   : > { %v218_v35 = vmul.f32 %v111_v7, %v111_v7  ;;  %v163_v37 = vsel %vm141_vm1, %v119_v33, 0.0  ;;  %v219_v38 = vmul.f32 %v112_v10, %v112_v10  ;;  %v247_v39 = vsel %vm141_vm1, %v215_v28, 0.0  ;;  %v123_v60 = vld [vmem:[%s417_s12 + $0x78] sm:$0xff]  ;;  %v124_v2 = vld [vmem:[%s417_s12 + $0x80] sm:$0xff]  ;;  %v125_v8 = vld [vmem:[%s417_s12 + $0x88] sm:$0xff] }
  0x1b   : > { %v148_v14 = vadd.f32 %v147_v9, %v146_v11  ;;  %v248_v40 = vsel %vm141_vm1, %v216_v29, 0.0  ;;  %v250_v41 = vsel %vm141_vm1, %v217_v30, 0.0  ;;  %v165_v45 = vsel %vm141_vm1, %v120_v42, 0.0 }
  0x1c   : > { %v249_v44 = vadd.f32 %v248_v40, %v247_v39  ;;  %v220_v46 = vmul.f32 %v113_v13, %v113_v13  ;;  %v252_v47 = vsel %vm141_vm1, %v218_v35, 0.0  ;;  %v167_v51 = vsel %vm141_vm1, %v121_v48, 0.0 }
  0x1d   : > { %v150_v17 = vadd.f32 %v149_v12, %v148_v14  ;;  %v221_v52 = vmul.f32 %v114_v16, %v114_v16  ;;  %v254_v53 = vsel %vm141_vm1, %v219_v38, 0.0  ;;  %v169_v57 = vsel %vm141_vm1, %v122_v54, 0.0  ;;  %v126_v14 = vld [vmem:[%s417_s12 + $0x90] sm:$0xff] }
  0x1e   : > { %v251_v50 = vadd.f32 %v250_v41, %v249_v44  ;;  %v222_v58 = vmul.f32 %v115_v19, %v115_v19  ;;  %v256_v59 = vsel %vm141_vm1, %v220_v46, 0.0  ;;  %v171_v63 = vsel %vm141_vm1, %v123_v60, 0.0  ;;  %v130_v38 = vld [vmem:[%s417_s12 + $0xb0] sm:$0xff]  ;;  %v131_v44 = vld [vmem:[%s417_s12 + $0xb8] sm:$0xff] }
  0x1f   : > { %v152_v20 = vadd.f32 %v151_v15, %v150_v17  ;;  %v223_v0 = vmul.f32 %v116_v22, %v116_v22  ;;  %v258_v1 = vsel %vm141_vm1, %v221_v52, 0.0  ;;  %v173_v5 = vsel %vm141_vm1, %v124_v2, 0.0 }
  0x20   : > { %v253_v56 = vadd.f32 %v252_v47, %v251_v50  ;;  %v224_v6 = vmul.f32 %v117_v25, %v117_v25  ;;  %v260_v7 = vsel %vm141_vm1, %v222_v58, 0.0  ;;  %v175_v11 = vsel %vm141_vm1, %v125_v8, 0.0  ;;  %v132_v50 = vld [vmem:[%s417_s12 + $0xc0] sm:$0xff] }
  0x21   : > { %v154_v23 = vadd.f32 %v153_v18, %v152_v20  ;;  %v225_v12 = vmul.f32 %v118_v31, %v118_v31  ;;  %v262_v13 = vsel %vm141_vm1, %v223_v0, 0.0  ;;  %v177_v17 = vsel %vm141_vm1, %v126_v14, 0.0  ;;  %v127_v20 = vld [vmem:[%s417_s12 + $0x98] sm:$0xff] }
  0x22   : > { %v255_v62 = vadd.f32 %v254_v53, %v253_v56  ;;  %v226_v18 = vmul.f32 %v119_v33, %v119_v33  ;;  %v264_v19 = vsel %vm141_vm1, %v224_v6, 0.0  ;;  %v228_v30 = vmul.f32 %v121_v48, %v121_v48  ;;  %v133_v56 = vld [vmem:[%s417_s12 + $0xc8] sm:$0xff] }
  0x23   : > { %v156_v26 = vadd.f32 %v155_v21, %v154_v23  ;;  %v179_v23 = vsel %vm141_vm1, %v127_v20, 0.0  ;;  %v266_v25 = vsel %vm141_vm1, %v225_v12, 0.0  ;;  %v185_v41 = vsel %vm141_vm1, %v130_v38, 0.0 }
  0x24   : > { %v257_v4 = vadd.f32 %v256_v59, %v255_v62  ;;  %v268_v31 = vsel %vm141_vm1, %v226_v18, 0.0  ;;  %v187_v47 = vsel %vm141_vm1, %v131_v44, 0.0  ;;  %v231_v48 = vmul.f32 %v124_v2, %v124_v2  ;;  %v134_v62 = vld [vmem:[%s417_s12 + $0xd0] sm:$0xff] }
  0x25   : > { %v158_v32 = vadd.f32 %v157_v24, %v156_v26  ;;  %v227_v24 = vmul.f32 %v120_v42, %v120_v42  ;;  %v128_v26 = vld [vmem:[%s417_s12 + $0xa0] sm:$0xff]  ;;  %v230_v42 = vmul.f32 %v123_v60, %v123_v60  ;;  %v189_v53 = vsel %vm141_vm1, %v132_v50, 0.0 }
  0x26   : > { %v259_v10 = vadd.f32 %v258_v1, %v257_v4  ;;  %v181_v29 = vsel %vm141_vm1, %v128_v26, 0.0  ;;  %v191_v59 = vsel %vm141_vm1, %v133_v56, 0.0  ;;  %v233_v60 = vmul.f32 %v126_v14, %v126_v14  ;;  %v135_v4 = vld [vmem:[%s417_s12 + $0xd8] sm:$0xff] }
  0x27   : > { %v160_v36 = vadd.f32 %v159_v27, %v158_v32  ;;  %v129_v32 = vld [vmem:[%s417_s12 + $0xa8] sm:$0xff]  ;;  %v193_v1 = vsel %vm141_vm1, %v134_v62, 0.0  ;;  %v234_v2 = vmul.f32 %v127_v20, %v127_v20  ;;  %v237_v20 = vmul.f32 %v130_v38, %v130_v38 }
  0x28   : > { %v261_v16 = vadd.f32 %v260_v7, %v259_v10  ;;  %v183_v35 = vsel %vm141_vm1, %v129_v32, 0.0  ;;  %v195_v7 = vsel %vm141_vm1, %v135_v4, 0.0  ;;  %v136_v10 = vld [vmem:[%s417_s12 + $0xe0] sm:$0xff]  ;;  %v236_v14 = vmul.f32 %v129_v32, %v129_v32 }
  0x29   : > { %v162_v43 = vadd.f32 %v161_v34, %v160_v36  ;;  %v229_v36 = vmul.f32 %v122_v54, %v122_v54  ;;  %v232_v54 = vmul.f32 %v125_v8, %v125_v8  ;;  %v235_v8 = vmul.f32 %v128_v26, %v128_v26 }
  0x2a   : > { %v263_v22 = vadd.f32 %v262_v13, %v261_v16  ;;  %v197_v13 = vsel %vm141_vm1, %v136_v10, 0.0  ;;  %v137_v16 = vld [vmem:[%s417_s12 + $0xe8] sm:$0xff]  ;;  %v238_v26 = vmul.f32 %v131_v44, %v131_v44  ;;  %v239_v32 = vmul.f32 %v132_v50, %v132_v50 }
  0x2b   : > { %v164_v49 = vadd.f32 %v163_v37, %v162_v43  ;;  %v270_v37 = vsel %vm141_vm1, %v227_v24, 0.0  ;;  %v272_v43 = vsel %vm141_vm1, %v228_v30, 0.0  ;;  %v242_v44 = vmul.f32 %v135_v4, %v135_v4 }
  0x2c   : > { %v265_v28 = vadd.f32 %v264_v19, %v263_v22  ;;  %v199_v19 = vsel %vm141_vm1, %v137_v16, 0.0  ;;  %v138_v22 = vld [vmem:[%s417_s12 + $0xf0] sm:$0xff] }
  0x2d   : > { %v166_v55 = vadd.f32 %v165_v45, %v164_v49  ;;  %v274_v49 = vsel %vm141_vm1, %v229_v36, 0.0  ;;  %v240_v36 = vmul.f32 %v133_v56, %v133_v56  ;;  %v245_v56 = vmul.f32 %v138_v22, %v138_v22 }
  0x2e   : > { %v267_v34 = vadd.f32 %v266_v25, %v265_v28  ;;  %v201_v25 = vsel %vm141_vm1, %v138_v22, 0.0  ;;  %v139_v28 = vld [vmem:[%s417_s12 + $0xf8] sm:$0xff] }
  0x2f   : > { %v168_v61 = vadd.f32 %v167_v51, %v166_v55  ;;  %v276_v55 = vsel %vm141_vm1, %v230_v42, 0.0 }
  0x30   : > { %v269_v40 = vadd.f32 %v268_v31, %v267_v34  ;;  %v203_v31 = vsel %vm141_vm1, %v139_v28, 0.0 }
  0x31   : > { %v170_v3 = vadd.f32 %v169_v57, %v168_v61  ;;  %v278_v61 = vsel %vm141_vm1, %v231_v48, 0.0  ;;  %v243_v48 = vmul.f32 %v136_v10, %v136_v10 }
  0x32   : > { %v271_v46 = vadd.f32 %v270_v37, %v269_v40  ;;  %v292_v37 = vsel %vm141_vm1, %v238_v26, 0.0  ;;  %v241_v40 = vmul.f32 %v134_v62, %v134_v62 }
  0x33   : > { %v172_v9 = vadd.f32 %v171_v63, %v170_v3  ;;  %v280_v3 = vsel %vm141_vm1, %v232_v54, 0.0 }
  0x34   : > { %v273_v52 = vadd.f32 %v272_v43, %v271_v46 }
  0x35   : > { %v174_v15 = vadd.f32 %v173_v5, %v172_v9  ;;  %v282_v9 = vsel %vm141_vm1, %v233_v60, 0.0  ;;  %v140_v60 = vld [vmem:[%s552_s1] sm:$0x1] }
  0x36   : > { %v275_v58 = vadd.f32 %v274_v49, %v273_v52  ;;  %v298_v49 = vsel %vm141_vm1, %v241_v40, 0.0  ;;  %v244_v52 = vmul.f32 %v137_v16, %v137_v16 }
  0x37   : > { %v176_v21 = vadd.f32 %v175_v11, %v174_v15  ;;  %v284_v15 = vsel %vm141_vm1, %v234_v2, 0.0 }
  0x38   : > { %v277_v0 = vadd.f32 %v276_v55, %v275_v58  ;;  %v304_v62 = vsel %vm141_vm1, %v244_v52, 0.0 }
  0x39   : > { %v178_v27 = vadd.f32 %v177_v17, %v176_v21  ;;  %v286_v21 = vsel %vm141_vm1, %v235_v8, 0.0 }
  0x3a   : > { %v279_v6 = vadd.f32 %v278_v61, %v277_v0  ;;  %v246_v61 = vmul.f32 %v139_v28, %v139_v28 }
  0x3b   : > { %v180_v33 = vadd.f32 %v179_v23, %v178_v27  ;;  %v288_v27 = vsel %vm141_vm1, %v236_v14, 0.0 }
  0x3c   : > { %v281_v12 = vadd.f32 %v280_v3, %v279_v6  ;;  %v308_v4 = vsel %vm141_vm1, %v246_v61, 0.0 }
  0x3d   : > { %v182_v39 = vadd.f32 %v181_v29, %v180_v33  ;;  %v290_v33 = vsel %vm141_vm1, %v237_v20, 0.0 }
  0x3e   : > { %v283_v18 = vadd.f32 %v282_v9, %v281_v12  ;;  %v214_v12 = vld [vmem:[%s552_s1 + $0x1] sm:$0x1] }
  0x3f   : > { %v184_v45 = vadd.f32 %v183_v35, %v182_v39 }
  0x40   : > { %v285_v24 = vadd.f32 %v284_v15, %v283_v18 }
  0x41   : > { %v186_v51 = vadd.f32 %v185_v41, %v184_v45  ;;  %v294_v41 = vsel %vm141_vm1, %v239_v32, 0.0  ;;  %v296_v45 = vsel %vm141_vm1, %v240_v36, 0.0 }
  0x42   : > { %v287_v30 = vadd.f32 %v286_v21, %v285_v24 }
  0x43   : > { %v188_v57 = vadd.f32 %v187_v47, %v186_v51 }
  0x44   : > { %v289_v35 = vadd.f32 %v288_v27, %v287_v30 }
  0x45   : > { %v190_v63 = vadd.f32 %v189_v53, %v188_v57  ;;  %v300_v53 = vsel %vm141_vm1, %v242_v44, 0.0  ;;  %v302_v57 = vsel %vm141_vm1, %v243_v48, 0.0 }
  0x46   : > { %v291_v39 = vadd.f32 %v290_v33, %v289_v35 }
  0x47   : > { %v192_v5 = vadd.f32 %v191_v59, %v190_v63 }
  0x48   : > { %v293_v43 = vadd.f32 %v292_v37, %v291_v39 }
  0x49   : > { %v194_v11 = vadd.f32 %v193_v1, %v192_v5  ;;  %v306_v1 = vsel %vm141_vm1, %v245_v56, 0.0 }
  0x4a   : > { %v295_v47 = vadd.f32 %v294_v41, %v293_v43 }
  0x4b   : > { %v196_v17 = vadd.f32 %v195_v7, %v194_v11 }
  0x4c   : > { %v297_v51 = vadd.f32 %v296_v45, %v295_v47 }
  0x4d   : > { %v198_v23 = vadd.f32 %v197_v13, %v196_v17 }
  0x4e   : > { %v299_v55 = vadd.f32 %v298_v49, %v297_v51 }
  0x4f   : > { %v200_v29 = vadd.f32 %v199_v19, %v198_v23 }
  0x50   : > { %v301_v59 = vadd.f32 %v300_v53, %v299_v55 }
  0x51   : > { %v202_v34 = vadd.f32 %v201_v25, %v200_v29 }
  0x52   : > { %v303_v0 = vadd.f32 %v302_v57, %v301_v59 }
  0x53   : > { %v204_v38 = vadd.f32 %v203_v31, %v202_v34 }
  0x54   : > { %v305_v3 = vadd.f32 %v304_v62, %v303_v0 }
  0x55   : > { %v205_v42 = vrot.slane %v204_v38, 4 }
  0x56   : > { %v307_v5 = vadd.f32 %v306_v1, %v305_v3 }
  0x57   : > { %v206_v46 = vadd.f32 %v205_v42, %v204_v38 }
  0x58   : > { %v309_v6 = vadd.f32 %v308_v4, %v307_v5 }
  0x59   : > { %v207_v50 = vrot.slane %v206_v46, 2 }
  0x5a   : > { %v310_v7 = vrot.slane %v309_v6, 4 }
  0x5b   : > { %v208_v54 = vadd.f32 %v207_v50, %v206_v46 }
  0x5c   : > { %v311_v8 = vadd.f32 %v310_v7, %v309_v6 }
  0x5d   : > { %v209_v58 = vrot.slane %v208_v54, 1 }
  0x5e   : > { %v312_v9 = vrot.slane %v311_v8, 2 }
  0x5f   : > { %v210_v63 = vadd.f32 %v209_v58, %v208_v54 }
  0x60   : > { %v313_v10 = vadd.f32 %v312_v9, %v311_v8 }
  0x61   : > { %v211_v2 = vadd.f32 %v210_v63, %v140_v60 }
  0x62   : > { %v314_v11 = vrot.slane %v313_v10, 1  ;;  %321 = sbr.rel (%p368_p5) target bundleno = 132 (0x84), region = 32 }
  0x63   : > { %213 = vst.msk [vmem:[%s552_s1] sm:$0x1] %vm212_vm2, %v211_v2 }
  0x64   : > { %v315_v13 = vadd.f32 %v314_v11, %v313_v10 }
  0x66   : > { %v316_v14 = vadd.f32 %v315_v13, %v214_v12 }
  0x68   : > { %317 = vst.msk [vmem:[%s552_s1 + $0x1] sm:$0x1] %vm212_vm2, %v316_v14 }
  0x6a   : > { %v322_v15 = vld [vmem:[%s552_s1] sm:$0x1] }
  0x6b   : > { %v323_v17 = vmul.f32 0.001953125, %v322_v15 }
  0x6d   : > { %v326_v19 = vmul.f32 %v323_v17, %v323_v17  ;;  %329 = vst.msk [vmem:[%s552_s1] sm:$0x1] %vm212_vm2, %v323_v17 }
  0x6f   : > { %v324_v16 = vld [vmem:[%s552_s1 + $0x1] sm:$0x1] }
  0x70   : > { %v325_v18 = vmul.f32 0.001953125, %v324_v16 }
  0x72   : > { %v327_v20 = vsub.f32 %v325_v18, %v326_v19 }
  0x74   : > { %v328_v21 = vmax.f32 %v327_v20, 0.0 }
  0x76   : > { %v330_v22 = vadd.f32 1e-05, %v328_v21 }
  0x78   : > { %381 = vrsqrt.f32 %v330_v22 }
  0x82   : > { %v382_v23 = vpop.eup %381 }
  0x83   : > { %332 = vst.msk [vmem:[%s552_s1 + $0x1] sm:$0x1] %vm212_vm2, %v382_v23 }
  0x84 PF: > { %s11_s6 = sadd.s32 1, %s389_s6  }
  0x85   : > { %p8_p6 = scmp.ge.s32.totalorder %s11_s6, 4  }
  0x87   :  { %10 = sbr.rel (!%p8_p6) target bundleno = 1 (0x1), region = 58 }

// kernel: fused_block_forward.5
= control target key start
LH: loop header
LB: loop body
LE: loop exit
PB: predicated region body
PF: predicated region fallthrough
CT: control target
= control target key end

     0   :  { %s2514_s12 = smov 0   ;;  %s3355_s0 = inlined_call_operand.vmem [shape: f32[2,16,16,8], index: 0, kind: input, shape index: {}]   ;;  %s3356_s1 = inlined_call_operand.vmem [shape: bf16[2,72,32], index: 1, kind: input, shape index: {}]   ;;  %s3357_s2 = inlined_call_operand.vmem [shape: f32[2,1,32], index: 2, kind: input, shape index: {}]   ;;  %s3358_s3 = inlined_call_operand.vmem [shape: bf16[2,2,16,16,32], index: 3, kind: output, shape index: {}]  }
   0x1 LB: > { %s2095_s13 = sadd.s32 4294967295, %s2483_s12   ;;  %p2099_p0 = scmp.ge.s32.totalorder %s2483_s12, 1  ;;  %s2483_s12 = sphi %s2514_s12, %s13_s12  }
   0x2   : > { %p137_p1 = scmp.lt.s32.totalorder %s2483_s12, 3 }
   0x4   : > { %p138_p2 = pnand %p2099_p0, %p137_p1 }
   0x5   : > { %v2485_v0 = vmov (!%p138_p2), 0   ;;  %p161_p3 = scmp.lt.s32.totalorder (!%p138_p2), %s2095_s13, 1  ;;  %s2486_s14 = smov (!%p138_p2), 16   ;;  %vm364_vm0 = vcmask (!%p138_p2), 1040384   ;;  %vm365_vm1 = vsmask.f32 (!%p138_p2), 256 }
   0x6   : > { %141 = sbr.rel (%p138_p2) target bundleno = 616 (0x268), region = 32  ;;  %v2523_v1 = vrot.slane (!%p138_p2), %v2485_v0, 1  ;;  %s2487_s15 = smov (!%p138_p2), 8   ;;  %vm2545_vm2 = vmand (!%p138_p2), %vm364_vm0, %vm365_vm1  ;;  %v2467_v21 = vld [vmem:[%s3356_s1] sm:$0xff] (!%p138_p2)   ;;  %v2469_v28 = vld [vmem:[%s3356_s1 + $0x8] sm:$0xff] (!%p138_p2)   ;;  %vm619_vm3 = vcmask (!%p138_p2), 1046528  }
   0x7   : > { %v2468_v22 = vld [vmem:[%s3356_s1 + $0x24] sm:$0xff] (!%p138_p2)   ;;  %2364 = vmatprep.subr.bf16.mxu0 (!%p138_p2), %v2467_v21  ;;  %v2470_v29 = vld [vmem:[%s3356_s1 + $0x2c] sm:$0xff] (!%p138_p2)   ;;  %s2488_s28 = smov (!%p138_p2), 24   ;;  %v2472_v43 = vld [vmem:[%s3356_s1 + $0x34] sm:$0xff] (!%p138_p2)   ;;  %s2489_s6 = smov (!%p138_p2), 48   ;;  %vm1280_vm5 = vcmask (!%p138_p2), 1043456  }
   0x8   : > { %716 = vrot.lane.b32.xlu1 (!%p138_p2), %v2523_v1, %s2486_s14  ;;  %684 = vrot.lane.b32.xlu0 (!%p138_p2), %v2523_v1, %s2487_s15  ;;  %v2471_v42 = vld [vmem:[%s3356_s1 + $0x10] sm:$0xff] (!%p138_p2)   ;;  %vm399_vm4 = vsmask.f32 (!%p138_p2), 7424  ;;  %v2473_v55 = vld [vmem:[%s3356_s1 + $0x18] sm:$0xff] (!%p138_p2)   ;;  %s2490_s11 = smov (!%p138_p2), 40   ;;  %s2491_s17 = smov (!%p138_p2), 32  }
   0x9   : > { %2406 = vmatprep.subr.bf16.mxu1 (!%p138_p2), %v2468_v22  ;;  %2365 = vmatpush3.bf16.msra.mxu0 (!%p138_p2), %v2467_v21  ;;  %v2474_v56 = vld [vmem:[%s3356_s1 + $0x3c] sm:$0xff] (!%p138_p2)   ;;  %s2492_s18 = smov (!%p138_p2), 56   ;;  %s2493_s20 = smov (!%p138_p2), 64   ;;  %vm940_vm6 = vcmask (!%p138_p2), 64512   ;;  %vm973_vm7 = vcmask (!%p138_p2), 130048   ;;  %vm1006_vm8 = vcmask (!%p138_p2), 195584  }
   0xa   : > { %2407 = vmatpush3.bf16.msra.mxu1 (!%p138_p2), %v2468_v22  ;;  %2366 = vmatprep.subr.bf16.mxu0 (!%p138_p2), %v2469_v28  ;;  %vm1039_vm9 = vcmask (!%p138_p2), 261120   ;;  %vm1072_vm10 = vcmask (!%p138_p2), 326656   ;;  %vm1105_vm11 = vcmask (!%p138_p2), 392192   ;;  %vm1138_vm12 = vcmask (!%p138_p2), 457728  }
   0xb   : > { %2408 = vmatprep.subr.bf16.mxu1 (!%p138_p2), %v2470_v29  ;;  %vm1171_vm13 = vcmask (!%p138_p2), 523264   ;;  %vm1247_vm14 = vcmask (!%p138_p2), 588800   ;;  %vm1605_vm15 = vcmask (!%p138_p2), 257024  }
   0xd   : > { %s3362_s13 = smov (!%p161_p3, %s2095_s13), 1  ;;  %2367 = vmatpush3.bf16.msra.mxu0 %v2469_v28  ;;  %v2476_v28 = vld [vmem:[%s3356_s1 + $0x44] ss:$0 sps:$4 sm:$0xff]  }
   0xe   : > { %s2256_s16 = sshll.u32 %s3362_s13, 8  ;;  %2409 = vmatpush3.bf16.msra.mxu1 %v2470_v29  ;;  %2368 = vmatprep.subr.bf16.mxu0 %v2471_v42 }
   0xf   : > { %s2537_s19 = scalar_lea.vmem %s3355_s0, %s2256_s16  ;;  %2410 = vmatprep.subr.bf16.mxu1 %v2472_v43 }
  0x10   : > { %v174_v2 = vld [vmem:[%s2537_s19 + $0x10] sm:$0xff]  ;;  %v175_v3 = vld [vmem:[%s2537_s19 + $0x18] sm:$0xff]  ;;  %v172_v4 = vld [vmem:[%s2537_s19] sm:$0xff] }
  0x11   : > { %v205_v5 = vpack.c.bf16 %v175_v3, %v174_v2  ;;  %v173_v6 = vld [vmem:[%s2537_s19 + $0x8] sm:$0xff]  ;;  %v176_v7 = vld [vmem:[%s2537_s19 + $0x20] sm:$0xff]  ;;  %v178_v39 = vld [vmem:[%s2537_s19 + $0x30] sm:$0xff]  ;;  %2369 = vmatpush3.bf16.msra.mxu0 %v2471_v42 }
  0x12   : > { %v177_v8 = vld [vmem:[%s2537_s19 + $0x28] sm:$0xff]  ;;  %v204_v9 = vpack.c.bf16 %v173_v6, %v172_v4  ;;  %v179_v41 = vld [vmem:[%s2537_s19 + $0x38] sm:$0xff]  ;;  %2411 = vmatpush3.bf16.msra.mxu1 %v2472_v43  ;;  %2370 = vmatprep.subr.bf16.mxu0 %v2473_v55 }
  0x13   : > { %v206_v10 = vpack.c.bf16 %v177_v8, %v176_v7  ;;  %v228_v11 = vshrl.u32 %v205_v5, 16  ;;  %v231_v12 = vshll.u32 %v205_v5, 16  ;;  %v207_v54 = vpack.c.bf16 %v179_v41, %v178_v39  ;;  %2412 = vmatprep.subr.bf16.mxu1 %v2474_v56  ;;  %v180_v8 = vld [vmem:[%s2537_s19 + $0x40] sm:$0xff] }
  0x14   : > { %v221_v13 = vshrl.u32 %v204_v9, 16  ;;  %v224_v14 = vshll.u32 %v204_v9, 16  ;;  %v181_v9 = vld [vmem:[%s2537_s19 + $0x48] sm:$0xff] }
  0x15   : > { %v235_v15 = vshrl.u32 %v206_v10, 16  ;;  %v238_v16 = vshll.u32 %v206_v10, 16  ;;  %v230_v17 = vrot.slane %v228_v11, 7  ;;  %v242_v2 = vshrl.u32 %v207_v54, 16  ;;  %2371 = vmatpush3.bf16.msra.mxu0 %v2473_v55  ;;  %v185_v55 = vld [vmem:[%s2537_s19 + $0x68] sm:$0xff] }
  0x16   : > { %v223_v19 = vrot.slane %v221_v13, 7  ;;  %2413 = vmatpush3.bf16.msra.mxu1 %v2474_v56  ;;  %v245_v7 = vshll.u32 %v207_v54, 16  ;;  %v184_v54 = vld [vmem:[%s2537_s19 + $0x60] sm:$0xff] }
  0x17   : > { %v237_v20 = vrot.slane %v235_v15, 7  ;;  %v233_v23 = vor.u32 %v231_v12, %v230_v17  ;;  %v384_v31 = vsel %vm2545_vm2, %v230_v17, 0  ;;  %v244_v6 = vrot.slane %v242_v2, 7  ;;  %2449 = vmatprep.subr.msk.bf16.mxu1 %vm1280_vm5, %v2476_v28 }
  0x18   : > { %v226_v24 = vor.u32 %v224_v14, %v223_v19  ;;  %v383_v26 = vsel %vm2545_vm2, %v223_v19, 0  ;;  %v626_v45 = vrot.slane %v384_v31, 1  ;;  %v428_v47 = vshll.u32 %v384_v31, 16 }
  0x19   : > { %v240_v25 = vor.u32 %v238_v16, %v237_v20  ;;  %v2559_v27 = vsel %vm2545_vm2, 0, %v233_v23  ;;  %v623_v34 = vrot.slane %v383_v26, 1  ;;  %v416_v37 = vshll.u32 %v383_v26, 16  ;;  %v2475_v23 = vld [vmem:[%s3356_s1 + $0x20] ss:$0 sps:$4 sm:$0xff]  }
  0x1a   : > { %750 = vrot.lane.b32.xlu1 %v2559_v27, %s2488_s28  ;;  %v2571_v30 = vsel %vm2545_vm2, 0, %v226_v24  ;;  %v423_v38 = vshll.u32 %v2559_v27, 16  ;;  %v625_v44 = vrot.slane %v2559_v27, 1  ;;  %v421_v46 = vshrl.u32 %v2559_v27, 16  ;;  %2448 = vmatprep.subr.msk.bf16.mxu0 %vm1280_vm5, %v2475_v23 }
  0x1b   : > { %748 = vrot.lane.b32.xlu0 %v2571_v30, %s2488_s28  ;;  %v2579_v32 = vsel %vm2545_vm2, 0, %v240_v25  ;;  %v622_v33 = vrot.slane %v2571_v30, 1  ;;  %v411_v35 = vshll.u32 %v2571_v30, 16  ;;  %v409_v36 = vshrl.u32 %v2571_v30, 16 }
  0x1c   : > { %v425_v49 = vrot.slane %v423_v38, 1  ;;  %v435_v50 = vshll.u32 %v2579_v32, 16  ;;  %v418_v52 = vrot.slane %v416_v37, 1  ;;  %v385_v53 = vsel %vm2545_vm2, %v237_v20, 0 }
  0x1d   : > { %v413_v40 = vrot.slane %v411_v35, 1  ;;  %v624_v48 = vsel %vm619_vm3, %v622_v33, %v623_v34  ;;  %v627_v57 = vsel %vm619_vm3, %v625_v44, %v626_v45  ;;  %v430_v58 = vrot.slane %v428_v47, 1  ;;  %v182_v35 = vld [vmem:[%s2537_s19 + $0x50] sm:$0xff] }
  0x1e   : > { %846 = vrot.lane.b32.xlu1 %v2579_v32, %s2489_s6  ;;  %v426_v59 = vor.u32 %v425_v49, %v421_v46  ;;  %v433_v60 = vshrl.u32 %v2579_v32, 16  ;;  %v437_v61 = vrot.slane %v435_v50, 1  ;;  %v440_v62 = vshll.u32 %v385_v53, 16 }
  0x1f   : > { %844 = vrot.lane.b32.xlu0 %v2559_v27, %s2489_s6  ;;  %v414_v51 = vor.u32 %v413_v40, %v409_v36  ;;  %v247_v11 = vor.u32 %v245_v7, %v244_v6  ;;  %v208_v12 = vpack.c.bf16 %v181_v9, %v180_v8  ;;  %v628_v13 = vrot.slane %v2579_v32, 1  ;;  %v183_v36 = vld [vmem:[%s2537_s19 + $0x58] sm:$0xff] }
  0x20   : > { %v431_v3 = vsel %vm399_vm4, %v426_v59, %v430_v58  ;;  %v438_v4 = vor.u32 %v437_v61, %v433_v60  ;;  %v442_v5 = vrot.slane %v440_v62, 1  ;;  %v629_v14 = vrot.slane %v385_v53, 1 }
  0x21   : > { %v419_v63 = vsel %vm399_vm4, %v414_v51, %v418_v52  ;;  %v2627_v15 = vsel %vm2545_vm2, 0, %v247_v11  ;;  %v249_v16 = vshrl.u32 %v208_v12, 16  ;;  %v386_v20 = vsel %vm2545_vm2, %v244_v6, 0 }
  0x22   : > { %718 = vrot.lane.b32.xlu1 %v624_v48, %s2486_s14  ;;  %v443_v10 = vsel %vm399_vm4, %v438_v4, %v442_v5  ;;  %v447_v17 = vshll.u32 %v2627_v15, 16  ;;  %v630_v19 = vsel %vm619_vm3, %v628_v13, %v629_v14  ;;  %v252_v22 = vshll.u32 %v208_v12, 16  ;;  %v186_v13 = vld [vmem:[%s2537_s19 + $0x70] sm:$0xff]  ;;  %v187_v14 = vld [vmem:[%s2537_s19 + $0x78] sm:$0xff] }
  0x23   : > { %812 = vrot.lane.b32.xlu0 %v624_v48, %s2490_s11  ;;  %v251_v21 = vrot.slane %v249_v16, 7  ;;  %v445_v24 = vshrl.u32 %v2627_v15, 16  ;;  %v452_v26 = vshll.u32 %v386_v20, 16  ;;  %v1282_v37 = vsel %vm1280_vm5, %v2475_v23, 0 }
  0x24   : > { %v449_v25 = vrot.slane %v447_v17, 1  ;;  %v1684_v38 = vsel %vm1280_vm5, %v2476_v28, 0  ;;  %2373 = vmatpush3.bf16.msra.mxu0 %v1282_v37  ;;  %v631_v40 = vrot.slane %v2627_v15, 1  ;;  %v632_v41 = vrot.slane %v386_v20, 1  ;;  %v189_v37 = vld [vmem:[%s2537_s19 + $0x88] sm:$0xff] }
  0x25   : > { %v254_v29 = vor.u32 %v252_v22, %v251_v21  ;;  %v454_v33 = vrot.slane %v452_v26, 1  ;;  %2415 = vmatpush3.bf16.msra.mxu1 %v1684_v38  ;;  %v387_v43 = vsel %vm2545_vm2, %v251_v21, 0  ;;  %v209_v44 = vpack.c.bf16 %v183_v36, %v182_v35  ;;  %v188_v36 = vld [vmem:[%s2537_s19 + $0x80] sm:$0xff] }
  0x26   : > { %814 = vrot.lane.b32.xlu1 %v627_v57, %s2490_s11  ;;  %v450_v31 = vor.u32 %v449_v25, %v445_v24  ;;  %v633_v45 = vsel %vm619_vm3, %v631_v40, %v632_v41  ;;  %v464_v48 = vshll.u32 %v387_v43, 16  ;;  %v210_v58 = vpack.c.bf16 %v185_v55, %v184_v54 }
  0x27   : > { %686 = vrot.lane.b32.xlu0 %v419_v63, %s2487_s15  ;;  %v2648_v34 = vsel %vm2545_vm2, 0, %v254_v29  ;;  %v256_v49 = vshrl.u32 %v209_v44, 16  ;;  %v259_v53 = vshll.u32 %v209_v44, 16  ;;  %v635_v60 = vrot.slane %v387_v43, 1 }
  0x28   : > { %v455_v39 = vsel %vm399_vm4, %v450_v31, %v454_v33  ;;  %v459_v42 = vshll.u32 %v2648_v34, 16  ;;  %v457_v46 = vshrl.u32 %v2648_v34, 16  ;;  %v466_v51 = vrot.slane %v464_v48, 1 }
  0x29   : > { %v258_v52 = vrot.slane %v256_v49, 7  ;;  %v634_v59 = vrot.slane %v2648_v34, 1  ;;  %v263_v62 = vshrl.u32 %v210_v58, 16  ;;  %v266_v5 = vshll.u32 %v210_v58, 16  ;;  %v191_v58 = vld [vmem:[%s2537_s19 + $0x98] sm:$0xff] }
  0x2a   : > { %782 = vrot.lane.b32.xlu1 %v431_v3, %s2491_s17  ;;  %v461_v47 = vrot.slane %v459_v42, 1  ;;  %v211_v22 = vpack.c.bf16 %v187_v14, %v186_v13  ;;  %v212_v40 = vpack.c.bf16 %v189_v37, %v188_v36 }
  0x2b   : > { %780 = vrot.lane.b32.xlu0 %v419_v63, %s2491_s17  ;;  %v636_v2 = vsel %vm619_vm3, %v634_v59, %v635_v60  ;;  %v265_v4 = vrot.slane %v263_v62, 7 }
  0x2c   : > { %v462_v50 = vor.u32 %v461_v47, %v457_v46  ;;  %v270_v28 = vshrl.u32 %v211_v22, 16  ;;  %v273_v35 = vshll.u32 %v211_v22, 16  ;;  %v277_v44 = vshrl.u32 %v212_v40, 16 }
  0x2d   : > { %v268_v9 = vor.u32 %v266_v5, %v265_v4  ;;  %v389_v21 = vsel %vm2545_vm2, %v265_v4, 0  ;;  %v280_v49 = vshll.u32 %v212_v40, 16 }
  0x2e   : > { %878 = vrot.lane.b32.xlu1 %v443_v10, %s2492_s18  ;;  %v467_v56 = vsel %vm399_vm4, %v462_v50, %v466_v51  ;;  %v488_v26 = vshll.u32 %v389_v21, 16  ;;  %v272_v33 = vrot.slane %v270_v28, 7  ;;  %v641_v42 = vrot.slane %v389_v21, 1 }
  0x2f   : > { %876 = vrot.lane.b32.xlu0 %v431_v3, %s2492_s18  ;;  %v2694_v12 = vsel %vm2545_vm2, 0, %v268_v9  ;;  %v279_v48 = vrot.slane %v277_v44, 7 }
  0x30   : > { %v483_v20 = vshll.u32 %v2694_v12, 16  ;;  %v481_v24 = vshrl.u32 %v2694_v12, 16  ;;  %v490_v31 = vrot.slane %v488_v26, 1  ;;  %v640_v41 = vrot.slane %v2694_v12, 1 }
  0x31   : > { %v390_v47 = vsel %vm2545_vm2, %v272_v33, 0 }
  0x32   : > { %688 = vrot.lane.b32.xlu1 %v431_v3, %s2487_s15  ;;  %v388_v3 = vsel %vm2545_vm2, %v258_v52, 0  ;;  %v485_v25 = vrot.slane %v483_v20, 1  ;;  %v642_v46 = vsel %vm619_vm3, %v640_v41, %v641_v42  ;;  %v644_v62 = vrot.slane %v390_v47, 1 }
  0x33   : > { %908 = vrot.lane.b32.xlu0 %v627_v57, %s2493_s20  ;;  %v476_v8 = vshll.u32 %v388_v3, 16 }
  0x34   : > { %v486_v29 = vor.u32 %v485_v25, %v481_v24 }
  0x35   : > { %v478_v11 = vrot.slane %v476_v8, 1 }
  0x36   : > { %690 = vrot.lane.b32.xlu1 %v443_v10, %s2487_s15  ;;  %v491_v38 = vsel %vm399_vm4, %v486_v29, %v490_v31 }
  0x37   : > { %910 = vrot.lane.b32.xlu0 %v630_v19, %s2493_s20 }
  0x3a   : > { %722 = vrot.lane.b32.xlu1 %v630_v19, %s2486_s14 }
  0x3b   : > { %720 = vrot.lane.b32.xlu0 %v627_v57, %s2486_s14  ;;  %v261_v57 = vor.u32 %v259_v53, %v258_v52  ;;  %v500_v52 = vshll.u32 %v390_v47, 16  ;;  %v282_v53 = vor.u32 %v280_v49, %v279_v48 }
  0x3d   : > { %v2679_v61 = vsel %vm2545_vm2, 0, %v261_v57  ;;  %v502_v55 = vrot.slane %v500_v52, 1  ;;  %v190_v57 = vld [vmem:[%s2537_s19 + $0x90] sm:$0xff] }
  0x3e   : > { %754 = vrot.lane.b32.xlu1 %v2627_v15, %s2488_s28  ;;  %v471_v63 = vshll.u32 %v2679_v61, 16  ;;  %v469_v6 = vshrl.u32 %v2679_v61, 16  ;;  %v637_v17 = vrot.slane %v2679_v61, 1 }
  0x3f   : > { %752 = vrot.lane.b32.xlu0 %v2579_v32, %s2488_s28 }
  0x40   : > { %v473_v7 = vrot.slane %v471_v63, 1 }
  0x42   : > { %786 = vrot.lane.b32.xlu1 %v455_v39, %s2491_s17 }
  0x43   : > { %784 = vrot.lane.b32.xlu0 %v443_v10, %s2491_s17  ;;  %v474_v10 = vor.u32 %v473_v7, %v469_v6 }
  0x45   : > { %v479_v16 = vsel %vm399_vm4, %v474_v10, %v478_v11 }
  0x46   : > { %818 = vrot.lane.b32.xlu1 %v633_v45, %s2490_s11 }
  0x47   : > { %816 = vrot.lane.b32.xlu0 %v630_v19, %s2490_s11  ;;  %v638_v19 = vrot.slane %v388_v3, 1  ;;  %v213_v3 = vpack.c.bf16 %v191_v58, %v190_v57 }
  0x49   : > { %v639_v23 = vsel %vm619_vm3, %v637_v17, %v638_v19  ;;  %v284_v8 = vshrl.u32 %v213_v3, 16  ;;  %v192_v17 = vld [vmem:[%s2537_s19 + $0xa0] sm:$0xff]  ;;  %v193_v19 = vld [vmem:[%s2537_s19 + $0xa8] sm:$0xff] }
  0x4a   : > { %850 = vrot.lane.b32.xlu1 %v2648_v34, %s2489_s6 }
  0x4b   : > { %848 = vrot.lane.b32.xlu0 %v2627_v15, %s2489_s6  ;;  %v286_v14 = vrot.slane %v284_v8, 7 }
  0x4e   : > { %882 = vrot.lane.b32.xlu1 %v467_v56, %s2492_s18 }
  0x4f   : > { %880 = vrot.lane.b32.xlu0 %v455_v39, %s2492_s18 }
  0x52   : > { %692 = vrot.lane.b32.xlu1 %v455_v39, %s2487_s15  ;;  %v275_v39 = vor.u32 %v273_v35, %v272_v33 }
  0x53   : > { %912 = vrot.lane.b32.xlu0 %v633_v45, %s2493_s20 }
  0x54   : > { %v2725_v43 = vsel %vm2545_vm2, 0, %v275_v39 }
  0x55   : > { %v493_v50 = vshrl.u32 %v2725_v43, 16  ;;  %v643_v60 = vrot.slane %v2725_v43, 1 }
  0x56   : > { %694 = vrot.lane.b32.xlu1 %v467_v56, %s2487_s15 }
  0x57   : > { %914 = vrot.lane.b32.xlu0 %v636_v2, %s2493_s20  ;;  %v645_v4 = vsel %vm619_vm3, %v643_v60, %v644_v62  ;;  %v194_v60 = vld [vmem:[%s2537_s19 + $0xb0] sm:$0xff]  ;;  %v195_v62 = vld [vmem:[%s2537_s19 + $0xb8] sm:$0xff] }
  0x5a   : > { %726 = vrot.lane.b32.xlu1 %v636_v2, %s2486_s14 }
  0x5b   : > { %724 = vrot.lane.b32.xlu0 %v633_v45, %s2486_s14  ;;  %v495_v45 = vshll.u32 %v2725_v43, 16 }
  0x5d   : > { %v497_v51 = vrot.slane %v495_v45, 1 }
  0x5e   : > { %758 = vrot.lane.b32.xlu1 %v2679_v61, %s2488_s28 }
  0x5f   : > { %756 = vrot.lane.b32.xlu0 %v2648_v34, %s2488_s28  ;;  %v498_v54 = vor.u32 %v497_v51, %v493_v50 }
  0x61   : > { %v503_v59 = vsel %vm399_vm4, %v498_v54, %v502_v55 }
  0x62   : > { %790 = vrot.lane.b32.xlu1 %v479_v16, %s2491_s17 }
  0x63   : > { %788 = vrot.lane.b32.xlu0 %v467_v56, %s2491_s17  ;;  %v2740_v56 = vsel %vm2545_vm2, 0, %v282_v53 }
  0x64   : > { %v507_v63 = vshll.u32 %v2740_v56, 16  ;;  %v505_v5 = vshrl.u32 %v2740_v56, 16  ;;  %v646_v26 = vrot.slane %v2740_v56, 1 }
  0x66   : > { %822 = vrot.lane.b32.xlu1 %v639_v23, %s2490_s11  ;;  %v509_v6 = vrot.slane %v507_v63, 1 }
  0x67   : > { %820 = vrot.lane.b32.xlu0 %v636_v2, %s2490_s11  ;;  %v391_v2 = vsel %vm2545_vm2, %v279_v48, 0 }
  0x68   : > { %v512_v7 = vshll.u32 %v391_v2, 16  ;;  %v510_v11 = vor.u32 %v509_v6, %v505_v5  ;;  %v647_v28 = vrot.slane %v391_v2, 1 }
  0x6a   : > { %854 = vrot.lane.b32.xlu1 %v2694_v12, %s2489_s6  ;;  %v514_v13 = vrot.slane %v512_v7, 1  ;;  %v2782_v37 = vsel %vm619_vm3, %v646_v26, %v647_v28 }
  0x6b   : > { %852 = vrot.lane.b32.xlu0 %v2679_v61, %s2489_s6 }
  0x6c   : > { %v2766_v20 = vsel %vm399_vm4, %v510_v11, %v514_v13 }
  0x6e   : > { %886 = vrot.lane.b32.xlu1 %v491_v38, %s2492_s18 }
  0x6f   : > { %884 = vrot.lane.b32.xlu0 %v479_v16, %s2492_s18 }
  0x72   : > { %696 = vrot.lane.b32.xlu1 %v479_v16, %s2487_s15  ;;  %v287_v16 = vshll.u32 %v213_v3, 16 }
  0x73   : > { %916 = vrot.lane.b32.xlu0 %v639_v23, %s2493_s20 }
  0x74   : > { %v289_v22 = vor.u32 %v287_v16, %v286_v14 }
  0x76   : > { %698 = vrot.lane.b32.xlu1 %v491_v38, %s2487_s15  ;;  %v2776_v29 = vsel %vm2545_vm2, 0, %v289_v22 }
  0x77   : > { %918 = vrot.lane.b32.xlu0 %v642_v46, %s2493_s20  ;;  %v519_v35 = vshll.u32 %v2776_v29, 16  ;;  %v517_v42 = vshrl.u32 %v2776_v29, 16  ;;  %v649_v2 = vrot.slane %v2776_v29, 1 }
  0x79   : > { %v521_v44 = vrot.slane %v519_v35, 1 }
  0x7a   : > { %730 = vrot.lane.b32.xlu1 %v642_v46, %s2486_s14  ;;  %v717_v9 = vpop.permute.xlu1 %716  ;;  %v685_v10 = vpop.permute.xlu0 %684 }
  0x7b   : > { %728 = vrot.lane.b32.xlu0 %v639_v23, %s2486_s14  ;;  %v214_v23 = vpack.c.bf16 %v193_v19, %v192_v17  ;;  %v942_v48 = vsel %vm940_vm6, 0, %v685_v10  ;;  %v522_v52 = vor.u32 %v521_v44, %v517_v42  ;;  %v215_v10 = vpack.c.bf16 %v195_v62, %v194_v60 }
  0x7c   : > { %v975_v54 = vsel %vm973_vm7, %v942_v48, %v717_v9 }
  0x7d   : > { %v291_v31 = vshrl.u32 %v214_v23, 16  ;;  %v294_v40 = vshll.u32 %v214_v23, 16  ;;  %v298_v23 = vshrl.u32 %v215_v10, 16 }
  0x7e   : > { %762 = vrot.lane.b32.xlu1 %v2725_v43, %s2488_s28 }
  0x7f   : > { %760 = vrot.lane.b32.xlu0 %v2694_v12, %s2488_s28  ;;  %v293_v39 = vrot.slane %v291_v31, 7 }
  0x81   : > { %v296_v47 = vor.u32 %v294_v40, %v293_v39  ;;  %v393_v9 = vsel %vm2545_vm2, %v293_v39, 0  ;;  %v196_v40 = vld [vmem:[%s2537_s19 + $0xc0] sm:$0xff] }
  0x82   : > { %794 = vrot.lane.b32.xlu1 %v503_v59, %s2491_s17 }
  0x83   : > { %792 = vrot.lane.b32.xlu0 %v491_v38, %s2491_s17  ;;  %v392_v38 = vsel %vm2545_vm2, %v286_v14, 0  ;;  %v2801_v57 = vsel %vm2545_vm2, 0, %v296_v47 }
  0x84   : > { %v524_v45 = vshll.u32 %v392_v38, 16  ;;  %v650_v3 = vrot.slane %v392_v38, 1  ;;  %v531_v6 = vshll.u32 %v2801_v57, 16  ;;  %v529_v17 = vshrl.u32 %v2801_v57, 16 }
  0x85   : > { %v301_v38 = vshll.u32 %v215_v10, 16 }
  0x86   : > { %826 = vrot.lane.b32.xlu1 %v645_v4, %s2490_s11  ;;  %v526_v53 = vrot.slane %v524_v45, 1  ;;  %v651_v14 = vsel %vm619_vm3, %v649_v2, %v650_v3  ;;  %v533_v19 = vrot.slane %v531_v6, 1 }
  0x87   : > { %824 = vrot.lane.b32.xlu0 %v642_v46, %s2490_s11 }
  0x88   : > { %v527_v5 = vsel %vm399_vm4, %v522_v52, %v526_v53  ;;  %v534_v31 = vor.u32 %v533_v19, %v529_v17 }
  0x8a   : > { %858 = vrot.lane.b32.xlu1 %v2740_v56, %s2489_s6 }
  0x8b   : > { %856 = vrot.lane.b32.xlu0 %v2725_v43, %s2489_s6 }
  0x8c   : > { %v751_v21 = vpop.permute.xlu1 %750 }
  0x8d   : > { %v749_v24 = vpop.permute.xlu0 %748 }
  0x8e   : > { %890 = vrot.lane.b32.xlu1 %v2766_v20, %s2492_s18 }
  0x8f   : > { %888 = vrot.lane.b32.xlu0 %v503_v59, %s2492_s18 }
  0x90   : > { %v2771_v25 = vpop.permute.xlu1 %846 }
  0x91   : > { %v845_v33 = vpop.permute.xlu0 %844 }
  0x92   : > { %700 = vrot.lane.b32.xlu1 %v503_v59, %s2487_s15 }
  0x93   : > { %920 = vrot.lane.b32.xlu0 %v645_v4, %s2493_s20 }
  0x94   : > { %v719_v36 = vpop.permute.xlu1 %718 }
  0x95   : > { %v813_v41 = vpop.permute.xlu0 %812 }
  0x96   : > { %702 = vrot.lane.b32.xlu1 %v2766_v20, %s2487_s15 }
  0x97   : > { %922 = vrot.lane.b32.xlu0 %v2782_v37, %s2493_s20 }
  0x98   : > { %v815_v46 = vpop.permute.xlu1 %814 }
  0x99   : > { %v687_v49 = vpop.permute.xlu0 %686 }
  0x9a   : > { %v944_v50 = vsel %vm940_vm6, %v2571_v30, %v687_v49  ;;  %734 = vrot.lane.b32.xlu1 %v2782_v37, %s2486_s14  ;;  %v1008_v30 = vsel %vm1006_vm8, %v975_v54, %v749_v24  ;;  %v652_v49 = vrot.slane %v2801_v57, 1 }
  0x9b   : > { %v977_v51 = vsel %vm973_vm7, %v944_v50, %v719_v36  ;;  %732 = vrot.lane.b32.xlu0 %v645_v4, %s2486_s14  ;;  %v300_v36 = vrot.slane %v298_v23, 7  ;;  %v653_v50 = vrot.slane %v393_v9, 1 }
  0x9c   : > { %v783_v55 = vpop.permute.xlu1 %782  ;;  %v1010_v58 = vsel %vm1006_vm8, %v977_v51, %v751_v21  ;;  %v536_v21 = vshll.u32 %v393_v9, 16 }
  0x9d   : > { %v781_v59 = vpop.permute.xlu0 %780  ;;  %v1043_v7 = vsel %vm1039_vm9, %v1010_v58, %v783_v55  ;;  %v303_v45 = vor.u32 %v301_v38, %v300_v36  ;;  %v394_v58 = vsel %vm2545_vm2, %v300_v36, 0 }
  0x9e   : > { %v1041_v63 = vsel %vm1039_vm9, %v1008_v30, %v781_v59  ;;  %766 = vrot.lane.b32.xlu1 %v2776_v29, %s2488_s28  ;;  %v1076_v16 = vsel %vm1072_vm10, %v1043_v7, %v815_v46  ;;  %v654_v30 = vsel %vm619_vm3, %v652_v49, %v653_v50  ;;  %v548_v3 = vshll.u32 %v394_v58, 16 }
  0x9f   : > { %v1074_v4 = vsel %vm1072_vm10, %v1041_v63, %v813_v41  ;;  %764 = vrot.lane.b32.xlu0 %v2740_v56, %s2488_s28  ;;  %v1109_v28 = vsel %vm1105_vm11, %v1076_v16, %v2771_v25  ;;  %v197_v41 = vld [vmem:[%s2537_s19 + $0xc8] sm:$0xff]  ;;  %v2855_v51 = vsel %vm2545_vm2, 0, %v303_v45  ;;  %v199_v16 = vld [vmem:[%s2537_s19 + $0xd8] sm:$0xff]  ;;  %v656_v19 = vrot.slane %v394_v58, 1 }
  0xa0   : > { %v879_v8 = vpop.permute.xlu1 %878  ;;  %v1107_v13 = vsel %vm1105_vm11, %v1074_v4, %v845_v33  ;;  %v538_v33 = vrot.slane %v536_v21, 1  ;;  %v216_v46 = vpack.c.bf16 %v197_v41, %v196_v40  ;;  %v543_v54 = vshll.u32 %v2855_v51, 16 }
  0xa1   : > { %v877_v11 = vpop.permute.xlu0 %876  ;;  %v1142_v39 = vsel %vm1138_vm12, %v1109_v28, %v879_v8  ;;  %v541_v63 = vshrl.u32 %v2855_v51, 16  ;;  %v550_v8 = vrot.slane %v548_v3, 1  ;;  %v655_v17 = vrot.slane %v2855_v51, 1 }
  0xa2   : > { %798 = vrot.lane.b32.xlu1 %v527_v5, %s2491_s17  ;;  %v1140_v24 = vsel %vm1138_vm12, %v1107_v13, %v877_v11  ;;  %v305_v52 = vshrl.u32 %v216_v46, 16  ;;  %v308_v60 = vshll.u32 %v216_v46, 16  ;;  %v545_v2 = vrot.slane %v543_v54, 1  ;;  %v198_v13 = vld [vmem:[%s2537_s19 + $0xd0] sm:$0xff] }
  0xa3   : > { %796 = vrot.lane.b32.xlu0 %v2766_v20, %s2491_s17 }
  0xa4   : > { %v2826_v22 = vpop.permute.xlu1 %688  ;;  %v307_v59 = vrot.slane %v305_v52, 7  ;;  %v546_v7 = vor.u32 %v545_v2, %v541_v63 }
  0xa5   : > { %v909_v26 = vpop.permute.xlu0 %908 }
  0xa6   : > { %830 = vrot.lane.b32.xlu1 %v651_v14, %s2490_s11  ;;  %v1173_v20 = vsel %vm1171_vm13, %v1140_v24, %v909_v26  ;;  %v551_v21 = vsel %vm399_vm4, %v546_v7, %v550_v8  ;;  %v2885_v23 = vsel %vm2545_vm2, %v307_v59, 0 }
  0xa7   : > { %828 = vrot.lane.b32.xlu0 %v2782_v37, %s2490_s11  ;;  %2374 = vmatprep.mubr.msk.bf16.mxu0 %vm1247_vm14, %v1173_v20  ;;  %v539_v37 = vsel %vm399_vm4, %v534_v31, %v538_v33  ;;  %v560_v36 = vshll.u32 %v2885_v23, 16  ;;  %v659_v8 = vrot.slane %v2885_v23, 1 }
  0xa8   : > { %2416 = vmatprep.mubr.msk.bf16.mxu1 %vm1247_vm14, %v1173_v20  ;;  %v2837_v35 = vpop.permute.xlu1 %690  ;;  %v217_v20 = vpack.c.bf16 %v199_v16, %v198_v13 }
  0xa9   : > { %v911_v25 = vpop.permute.xlu0 %910  ;;  %v948_v38 = vsel %vm940_vm6, %v2579_v32, %v2837_v35 }
  0xaa   : > { %v1175_v42 = vsel %vm1171_vm13, %v1142_v39, %v911_v25  ;;  %862 = vrot.lane.b32.xlu1 %v2801_v57, %s2489_s6  ;;  %v312_v46 = vshrl.u32 %v217_v20, 16 }
  0xab   : > { %860 = vrot.lane.b32.xlu0 %v2776_v29, %s2489_s6  ;;  %2375 = vmatmul.mubr.msk.bf16.vlgmr.msra.gmra.mrb[0].mxu0 %vm1247_vm14, %v1175_v42 }
  0xac   : > { %2417 = vmatmul.mubr.msk.bf16.vlgmr.msra.gmra.mrb[0].mxu1 %vm1247_vm14, %v1175_v42  ;;  %v723_v44 = vpop.permute.xlu1 %722  ;;  %v314_v54 = vrot.slane %v312_v46, 7 }
  0xad   : > { %v721_v47 = vpop.permute.xlu0 %720  ;;  %v981_v41 = vsel %vm973_vm7, %v948_v38, %v723_v44 }
  0xae   : > { %894 = vrot.lane.b32.xlu1 %v539_v37, %s2492_s18 }
  0xaf   : > { %892 = vrot.lane.b32.xlu0 %v527_v5, %s2492_s18 }
  0xb0   : > { %v755_v48 = vpop.permute.xlu1 %754 }
  0xb1   : > { %v753_v53 = vpop.permute.xlu0 %752 }
  0xb2   : > { %704 = vrot.lane.b32.xlu1 %v527_v5, %s2487_s15  ;;  %v310_v5 = vor.u32 %v308_v60, %v307_v59  ;;  %v200_v60 = vld [vmem:[%s2537_s19 + $0xe0] sm:$0xff] }
  0xb3   : > { %924 = vrot.lane.b32.xlu0 %v651_v14, %s2493_s20 }
  0xb4   : > { %v787_v55 = vpop.permute.xlu1 %786  ;;  %v2870_v10 = vsel %vm2545_vm2, 0, %v310_v5 }
  0xb5   : > { %v785_v62 = vpop.permute.xlu0 %784  ;;  %v555_v24 = vshll.u32 %v2870_v10, 16  ;;  %v553_v25 = vshrl.u32 %v2870_v10, 16  ;;  %v658_v7 = vrot.slane %v2870_v10, 1 }
  0xb6   : > { %706 = vrot.lane.b32.xlu1 %v539_v37, %s2487_s15 }
  0xb7   : > { %926 = vrot.lane.b32.xlu0 %v654_v30, %s2493_s20  ;;  %v557_v40 = vrot.slane %v555_v24, 1 }
  0xb8   : > { %v819_v4 = vpop.permute.xlu1 %818 }
  0xb9   : > { %v817_v6 = vpop.permute.xlu0 %816  ;;  %v558_v44 = vor.u32 %v557_v40, %v553_v25 }
  0xba   : > { %738 = vrot.lane.b32.xlu1 %v654_v30, %s2486_s14 }
  0xbb   : > { %736 = vrot.lane.b32.xlu0 %v651_v14, %s2486_s14  ;;  %v946_v14 = vsel %vm940_vm6, %v2559_v27, %v2826_v22  ;;  %v2893_v22 = vsel %vm619_vm3, %v655_v17, %v656_v19  ;;  %v660_v19 = vsel %vm619_vm3, %v658_v7, %v659_v8 }
  0xbc   : > { %v851_v9 = vpop.permute.xlu1 %850  ;;  %v979_v26 = vsel %vm973_vm7, %v946_v14, %v721_v47  ;;  %v1014_v47 = vsel %vm1006_vm8, %v981_v41, %v755_v48  ;;  %v562_v48 = vrot.slane %v560_v36, 1  ;;  %v396_v14 = vsel %vm2545_vm2, %v314_v54, 0  ;;  %v202_v41 = vld [vmem:[%s2537_s19 + $0xf0] sm:$0xff] }
  0xbd   : > { %v849_v11 = vpop.permute.xlu0 %848  ;;  %v1012_v31 = vsel %vm1006_vm8, %v979_v26, %v753_v53  ;;  %v1047_v32 = vsel %vm1039_vm9, %v1014_v47, %v787_v55  ;;  %v315_v55 = vshll.u32 %v217_v20, 16  ;;  %v572_v20 = vshll.u32 %v396_v14, 16 }
  0xbe   : > { %770 = vrot.lane.b32.xlu1 %v2855_v51, %s2488_s28  ;;  %v1045_v27 = vsel %vm1039_vm9, %v1012_v31, %v785_v62  ;;  %v201_v62 = vld [vmem:[%s2537_s19 + $0xe8] sm:$0xff]  ;;  %v662_v47 = vrot.slane %v396_v14, 1 }
  0xbf   : > { %768 = vrot.lane.b32.xlu0 %v2801_v57, %s2488_s28  ;;  %v1078_v39 = vsel %vm1072_vm10, %v1045_v27, %v817_v6  ;;  %v317_v3 = vor.u32 %v315_v55, %v314_v54  ;;  %v574_v38 = vrot.slane %v572_v20, 1 }
  0xc0   : > { %v883_v28 = vpop.permute.xlu1 %882  ;;  %v1111_v42 = vsel %vm1105_vm11, %v1078_v39, %v849_v11 }
  0xc1   : > { %v881_v33 = vpop.permute.xlu0 %880 }
  0xc2   : > { %802 = vrot.lane.b32.xlu1 %v551_v21, %s2491_s17  ;;  %v1144_v49 = vsel %vm1138_vm12, %v1111_v42, %v881_v33  ;;  %v203_v42 = vld [vmem:[%s2537_s19 + $0xf8] sm:$0xff] }
  0xc3   : > { %800 = vrot.lane.b32.xlu0 %v539_v37, %s2491_s17  ;;  %v1080_v37 = vsel %vm1072_vm10, %v1047_v32, %v819_v4  ;;  %v218_v4 = vpack.c.bf16 %v201_v62, %v200_v60 }
  0xc4   : > { %v2904_v45 = vpop.permute.xlu1 %692  ;;  %v1113_v52 = vsel %vm1105_vm11, %v1080_v37, %v851_v9  ;;  %v2936_v9 = vsel %vm2545_vm2, 0, %v317_v3 }
  0xc5   : > { %v913_v50 = vpop.permute.xlu0 %912  ;;  %v1146_v58 = vsel %vm1138_vm12, %v1113_v52, %v883_v28  ;;  %v319_v11 = vshrl.u32 %v218_v4, 16  ;;  %v567_v16 = vshll.u32 %v2936_v9, 16  ;;  %v322_v24 = vshll.u32 %v218_v4, 16 }
  0xc6   : > { %v1177_v35 = vsel %vm1171_vm13, %v1144_v49, %v913_v50  ;;  %834 = vrot.lane.b32.xlu1 %v2893_v22, %s2490_s11  ;;  %v661_v46 = vrot.slane %v2936_v9, 1 }
  0xc7   : > { %832 = vrot.lane.b32.xlu0 %v654_v30, %s2490_s11  ;;  %2378 = vmatprep.mubr.msk.bf16.mxu0 %vm1247_vm14, %v1177_v35  ;;  %v563_v30 = vsel %vm399_vm4, %v558_v44, %v562_v48  ;;  %v321_v23 = vrot.slane %v319_v11, 7  ;;  %v569_v28 = vrot.slane %v567_v16, 1  ;;  %v219_v44 = vpack.c.bf16 %v203_v42, %v202_v41 }
  0xc8   : > { %2420 = vmatprep.mubr.msk.bf16.mxu1 %vm1247_vm14, %v1177_v35  ;;  %v2917_v53 = vpop.permute.xlu1 %694 }
  0xc9   : > { %v915_v59 = vpop.permute.xlu0 %914  ;;  %v324_v33 = vor.u32 %v322_v24, %v321_v23  ;;  %v397_v37 = vsel %vm2545_vm2, %v321_v23, 0  ;;  %v952_v55 = vsel %vm940_vm6, %v2648_v34, %v2917_v53  ;;  %v326_v4 = vshrl.u32 %v219_v44, 16 }
  0xca   : > { %v1179_v63 = vsel %vm1171_vm13, %v1146_v58, %v915_v59  ;;  %866 = vrot.lane.b32.xlu1 %v2870_v10, %s2489_s6  ;;  %v584_v60 = vshll.u32 %v397_v37, 16  ;;  %v329_v14 = vshll.u32 %v219_v44, 16 }
  0xcb   : > { %864 = vrot.lane.b32.xlu0 %v2855_v51, %s2489_s6  ;;  %2379 = vmatmul.mubr.msk.bf16.gmra.mrb[4].mxu0 %vm1247_vm14, %v1179_v63  ;;  %v2953_v25 = vsel %vm2545_vm2, 0, %v324_v33  ;;  %v328_v16 = vrot.slane %v326_v4, 7  ;;  %v665_v33 = vrot.slane %v397_v37, 1 }
  0xcc   : > { %2421 = vmatmul.mubr.msk.bf16.gmra.mrb[4].mxu1 %vm1247_vm14, %v1179_v63  ;;  %v727_v2 = vpop.permute.xlu1 %726  ;;  %v579_v50 = vshll.u32 %v2953_v25, 16 }
  0xcd   : > { %v725_v5 = vpop.permute.xlu0 %724  ;;  %v985_v62 = vsel %vm973_vm7, %v952_v55, %v727_v2  ;;  %v586_v2 = vrot.slane %v584_v60, 1  ;;  %v398_v41 = vsel %vm2545_vm2, %v328_v16, 0 }
  0xce   : > { %898 = vrot.lane.b32.xlu1 %v563_v30, %s2492_s18  ;;  %v581_v59 = vrot.slane %v579_v50, 1 }
  0xcf   : > { %896 = vrot.lane.b32.xlu0 %v551_v21, %s2492_s18 }
  0xd0   : > { %v759_v6 = vpop.permute.xlu1 %758 }
  0xd1   : > { %v757_v13 = vpop.permute.xlu0 %756 }
  0xd2   : > { %708 = vrot.lane.b32.xlu1 %v551_v21, %s2487_s15  ;;  %v565_v21 = vshrl.u32 %v2936_v9, 16 }
  0xd3   : > { %928 = vrot.lane.b32.xlu0 %v2893_v22, %s2493_s20 }
  0xd4   : > { %v791_v17 = vpop.permute.xlu1 %790  ;;  %v570_v36 = vor.u32 %v569_v28, %v565_v21  ;;  %v331_v21 = vor.u32 %v329_v14, %v328_v16 }
  0xd5   : > { %v789_v26 = vpop.permute.xlu0 %788 }
  0xd6   : > { %710 = vrot.lane.b32.xlu1 %v563_v30, %s2487_s15  ;;  %v575_v49 = vsel %vm399_vm4, %v570_v36, %v574_v38 }
  0xd7   : > { %930 = vrot.lane.b32.xlu0 %v660_v19, %s2493_s20 }
  0xd8   : > { %v823_v31 = vpop.permute.xlu1 %822 }
  0xd9   : > { %v821_v27 = vpop.permute.xlu0 %820 }
  0xda   : > { %742 = vrot.lane.b32.xlu1 %v660_v19, %s2486_s14 }
  0xdb   : > { %740 = vrot.lane.b32.xlu0 %v2893_v22, %s2486_s14  ;;  %v950_v22 = vsel %vm940_vm6, %v2627_v15, %v2904_v45  ;;  %v663_v15 = vsel %vm619_vm3, %v661_v46, %v662_v47  ;;  %v577_v45 = vshrl.u32 %v2953_v25, 16 }
  0xdc   : > { %v855_v39 = vpop.permute.xlu1 %854  ;;  %v983_v32 = vsel %vm973_vm7, %v950_v22, %v725_v5  ;;  %v1018_v5 = vsel %vm1006_vm8, %v985_v62, %v759_v6  ;;  %v675_v22 = vshll.u32 %v398_v41, 16 }
  0xdd   : > { %v853_v40 = vpop.permute.xlu0 %852  ;;  %v1016_v48 = vsel %vm1006_vm8, %v983_v32, %v757_v13  ;;  %v1051_v11 = vsel %vm1039_vm9, %v1018_v5, %v791_v17 }
  0xde   : > { %774 = vrot.lane.b32.xlu1 %v2936_v9, %s2488_s28  ;;  %v1049_v54 = vsel %vm1039_vm9, %v1016_v48, %v789_v26  ;;  %v1084_v53 = vsel %vm1072_vm10, %v1051_v11, %v823_v31  ;;  %v664_v31 = vrot.slane %v2953_v25, 1 }
  0xdf   : > { %772 = vrot.lane.b32.xlu0 %v2870_v10, %s2488_s28  ;;  %v1082_v58 = vsel %vm1072_vm10, %v1049_v54, %v821_v27  ;;  %v1117_v13 = vsel %vm1105_vm11, %v1084_v53, %v855_v39  ;;  %v382_v27 = vsel %vm2545_vm2, 0, %v331_v21  ;;  %v682_v54 = vrot.slane %v398_v41, 1 }
  0xe0   : > { %v887_v35 = vpop.permute.xlu1 %886  ;;  %v1115_v63 = vsel %vm1105_vm11, %v1082_v58, %v853_v40  ;;  %v670_v38 = vshll.u32 %v382_v27, 16  ;;  %v666_v40 = vsel %vm619_vm3, %v664_v31, %v665_v33  ;;  %v668_v46 = vshrl.u32 %v382_v27, 16 }
  0xe1   : > { %v885_v52 = vpop.permute.xlu0 %884  ;;  %v1150_v17 = vsel %vm1138_vm12, %v1117_v13, %v887_v35  ;;  %v677_v35 = vrot.slane %v675_v22, 1 }
  0xe2   : > { %806 = vrot.lane.b32.xlu1 %v575_v49, %s2491_s17  ;;  %v1148_v7 = vsel %vm1138_vm12, %v1115_v63, %v885_v52  ;;  %v672_v47 = vrot.slane %v670_v38, 1  ;;  %v681_v52 = vrot.slane %v382_v27, 1 }
  0xe3   : > { %804 = vrot.lane.b32.xlu0 %v563_v30, %s2491_s17  ;;  %v582_v30 = vor.u32 %v581_v59, %v577_v45 }
  0xe4   : > { %v697_v3 = vpop.permute.xlu1 %696  ;;  %v683_v62 = vsel %vm619_vm3, %v681_v52, %v682_v54 }
  0xe5   : > { %v917_v8 = vpop.permute.xlu0 %916  ;;  %v954_v18 = vsel %vm940_vm6, %v2679_v61, %v697_v3 }
  0xe6   : > { %v1181_v34 = vsel %vm1171_vm13, %v1148_v7, %v917_v8  ;;  %838 = vrot.lane.b32.xlu1 %v663_v15, %s2490_s11 }
  0xe7   : > { %836 = vrot.lane.b32.xlu0 %v660_v19, %s2490_s11  ;;  %2382 = vmatprep.mubr.msk.bf16.mxu0 %vm1247_vm14, %v1181_v34  ;;  %v587_v19 = vsel %vm399_vm4, %v582_v30, %v586_v2 }
  0xe8   : > { %2424 = vmatprep.mubr.msk.bf16.mxu1 %vm1247_vm14, %v1181_v34  ;;  %v699_v6 = vpop.permute.xlu1 %698 }
  0xe9   : > { %v919_v23 = vpop.permute.xlu0 %918  ;;  %v956_v61 = vsel %vm940_vm6, %v2694_v12, %v699_v6 }
  0xea   : > { %v1183_v24 = vsel %vm1171_vm13, %v1150_v17, %v919_v23  ;;  %870 = vrot.lane.b32.xlu1 %v2953_v25, %s2489_s6 }
  0xeb   : > { %868 = vrot.lane.b32.xlu0 %v2936_v9, %s2489_s6  ;;  %2383 = vmatmul.mubr.msk.bf16.gmra.mrb[8].mxu0 %vm1247_vm14, %v1183_v24 }
  0xec   : > { %2425 = vmatmul.mubr.msk.bf16.gmra.mrb[8].mxu1 %vm1247_vm14, %v1183_v24  ;;  %v731_v26 = vpop.permute.xlu1 %730 }
  0xed   : > { %v729_v28 = vpop.permute.xlu0 %728  ;;  %v989_v63 = vsel %vm973_vm7, %v956_v61, %v731_v26 }
  0xee   : > { %902 = vrot.lane.b32.xlu1 %v587_v19, %s2492_s18  ;;  %v987_v45 = vsel %vm973_vm7, %v954_v18, %v729_v28 }
  0xef   : > { %900 = vrot.lane.b32.xlu0 %v575_v49, %s2492_s18 }
  0xf0   : > { %v763_v20 = vpop.permute.xlu1 %762 }
  0xf1   : > { %v761_v36 = vpop.permute.xlu0 %760  ;;  %v1022_v5 = vsel %vm1006_vm8, %v989_v63, %v763_v20 }
  0xf2   : > { %712 = vrot.lane.b32.xlu1 %v575_v49, %s2487_s15  ;;  %v673_v49 = vor.u32 %v672_v47, %v668_v46 }
  0xf3   : > { %932 = vrot.lane.b32.xlu0 %v663_v15, %s2493_s20 }
  0xf4   : > { %v795_v39 = vpop.permute.xlu1 %794  ;;  %v678_v48 = vsel %vm399_vm4, %v673_v49, %v677_v35 }
  0xf5   : > { %v793_v42 = vpop.permute.xlu0 %792  ;;  %v1055_v11 = vsel %vm1039_vm9, %v1022_v5, %v795_v39 }
  0xf6   : > { %714 = vrot.lane.b32.xlu1 %v587_v19, %s2487_s15 }
  0xf7   : > { %934 = vrot.lane.b32.xlu0 %v666_v40, %s2493_s20 }
  0xf8   : > { %v827_v50 = vpop.permute.xlu1 %826 }
  0xf9   : > { %v825_v32 = vpop.permute.xlu0 %824  ;;  %v1088_v34 = vsel %vm1072_vm10, %v1055_v11, %v827_v50 }
  0xfa   : > { %746 = vrot.lane.b32.xlu1 %v666_v40, %s2486_s14 }
  0xfb   : > { %744 = vrot.lane.b32.xlu0 %v663_v15, %s2486_s14  ;;  %v1020_v15 = vsel %vm1006_vm8, %v987_v45, %v761_v36 }
  0xfc   : > { %v859_v37 = vpop.permute.xlu1 %858  ;;  %v1053_v59 = vsel %vm1039_vm9, %v1020_v15, %v793_v42 }
  0xfd   : > { %v857_v44 = vpop.permute.xlu0 %856  ;;  %v1086_v60 = vsel %vm1072_vm10, %v1053_v59, %v825_v32  ;;  %v1121_v53 = vsel %vm1105_vm11, %v1088_v34, %v859_v37 }
  0xfe   : > { %778 = vrot.lane.b32.xlu1 %v382_v27, %s2488_s28  ;;  %v1119_v3 = vsel %vm1105_vm11, %v1086_v60, %v857_v44 }
  0xff   : > { %776 = vrot.lane.b32.xlu0 %v2953_v25, %s2488_s28  ;;  %s3152_s28 = scalar_lea.vmem %s3358_s3, %s2256_s16 }
 0x100   : > { %v891_v55 = vpop.permute.xlu1 %890 }
 0x101   : > { %v889_v58 = vpop.permute.xlu0 %888  ;;  %v1154_v2 = vsel %vm1138_vm12, %v1121_v53, %v891_v55 }
 0x102   : > { %810 = vrot.lane.b32.xlu1 %v678_v48, %s2491_s17  ;;  %v1152_v7 = vsel %vm1138_vm12, %v1119_v3, %v889_v58 }
 0x103   : > { %808 = vrot.lane.b32.xlu0 %v587_v19, %s2491_s17 }
 0x104   : > { %v701_v4 = vpop.permute.xlu1 %700 }
 0x105   : > { %v921_v8 = vpop.permute.xlu0 %920  ;;  %v958_v20 = vsel %vm940_vm6, %v2725_v43, %v701_v4 }
 0x106   : > { %v1185_v12 = vsel %vm1171_vm13, %v1152_v7, %v921_v8  ;;  %842 = vrot.lane.b32.xlu1 %v683_v62, %s2490_s11 }
 0x107   : > { %840 = vrot.lane.b32.xlu0 %v666_v40, %s2490_s11  ;;  %2386 = vmatprep.mubr.msk.bf16.mxu0 %vm1247_vm14, %v1185_v12 }
 0x108   : > { %2428 = vmatprep.mubr.msk.bf16.mxu1 %vm1247_vm14, %v1185_v12  ;;  %v703_v30 = vpop.permute.xlu1 %702 }
 0x109   : > { %v923_v13 = vpop.permute.xlu0 %922 }
 0x10a   : > { %v1187_v6 = vsel %vm1171_vm13, %v1154_v2, %v923_v13  ;;  %874 = vrot.lane.b32.xlu1 %v2485_v0, %s2489_s6 }
 0x10b   : > { %872 = vrot.lane.b32.xlu0 %v382_v27, %s2489_s6  ;;  %2387 = vmatmul.mubr.msk.bf16.gmra.mrb[12].mxu0 %vm1247_vm14, %v1187_v6 }
 0x10c   : > { %2429 = vmatmul.mubr.msk.bf16.gmra.mrb[12].mxu1 %vm1247_vm14, %v1187_v6  ;;  %v735_v16 = vpop.permute.xlu1 %734 }
 0x10d   : > { %v733_v14 = vpop.permute.xlu0 %732 }
 0x10e   : > { %906 = vrot.lane.b32.xlu1 %v2523_v1, %s2492_s18  ;;  %v991_v31 = vsel %vm973_vm7, %v958_v20, %v733_v14 }
 0x10f   : > { %904 = vrot.lane.b32.xlu0 %v678_v48, %s2492_s18 }
 0x110   : > { %v767_v17 = vpop.permute.xlu1 %766 }
 0x111   : > { %v765_v23 = vpop.permute.xlu0 %764 }
 0x112   : > { %938 = vrot.lane.b32.xlu1 %v2523_v1, %s2493_s20  ;;  %v1024_v27 = vsel %vm1006_vm8, %v991_v31, %v765_v23  ;;  %v960_v1 = vsel %vm940_vm6, %v2740_v56, %v703_v30 }
 0x113   : > { %936 = vrot.lane.b32.xlu0 %v683_v62, %s2493_s20  ;;  %v993_v40 = vsel %vm973_vm7, %v960_v1, %v735_v16 }
 0x114   : > { %v799_v0 = vpop.permute.xlu1 %798  ;;  %v1026_v43 = vsel %vm1006_vm8, %v993_v40, %v767_v17 }
 0x115   : > { %v797_v24 = vpop.permute.xlu0 %796  ;;  %v1059_v22 = vsel %vm1039_vm9, %v1026_v43, %v799_v0 }
 0x116   : > { %v1057_v38 = vsel %vm1039_vm9, %v1024_v27, %v797_v24 }
 0x118   : > { %v831_v19 = vpop.permute.xlu1 %830 }
 0x119   : > { %v829_v26 = vpop.permute.xlu0 %828  ;;  %v1092_v32 = vsel %vm1072_vm10, %v1059_v22, %v831_v19 }
 0x11a   : > { %v1090_v39 = vsel %vm1072_vm10, %v1057_v38, %v829_v26 }
 0x11c   : > { %v863_v21 = vpop.permute.xlu1 %862 }
 0x11d   : > { %v861_v28 = vpop.permute.xlu0 %860  ;;  %v1125_v56 = vsel %vm1105_vm11, %v1092_v32, %v863_v21 }
 0x11e   : > { %v1123_v41 = vsel %vm1105_vm11, %v1090_v39, %v861_v28 }
 0x120   : > { %v895_v33 = vpop.permute.xlu1 %894 }
 0x121   : > { %v893_v36 = vpop.permute.xlu0 %892  ;;  %v1158_v35 = vsel %vm1138_vm12, %v1125_v56, %v895_v33 }
 0x122   : > { %v1156_v46 = vsel %vm1138_vm12, %v1123_v41, %v893_v36 }
 0x124   : > { %v705_v42 = vpop.permute.xlu1 %704 }
 0x125   : > { %v925_v47 = vpop.permute.xlu0 %924  ;;  %v962_v60 = vsel %vm940_vm6, %v2776_v29, %v705_v42 }
 0x126   : > { %v1189_v50 = vsel %vm1171_vm13, %v1156_v46, %v925_v47 }
 0x127   : > { %2390 = vmatprep.mubr.msk.bf16.mxu0 %vm1247_vm14, %v1189_v50  ;;  %2432 = vmatprep.mubr.msk.bf16.mxu1 %vm1247_vm14, %v1189_v50 }
 0x128   : > { %v707_v49 = vpop.permute.xlu1 %706 }
 0x129   : > { %v927_v37 = vpop.permute.xlu0 %926  ;;  %v964_v7 = vsel %vm940_vm6, %v2801_v57, %v707_v49 }
 0x12a   : > { %v1191_v44 = vsel %vm1171_vm13, %v1158_v35, %v927_v37 }
 0x12b   : > { %2391 = vmatmul.mubr.msk.bf16.gmra.mrb[16].mxu0 %vm1247_vm14, %v1191_v44  ;;  %2433 = vmatmul.mubr.msk.bf16.gmra.mrb[16].mxu1 %vm1247_vm14, %v1191_v44 }
 0x12c   : > { %v739_v18 = vpop.permute.xlu1 %738 }
 0x12d   : > { %v737_v48 = vpop.permute.xlu0 %736  ;;  %v997_v11 = vsel %vm973_vm7, %v964_v7, %v739_v18 }
 0x12e   : > { %v995_v62 = vsel %vm973_vm7, %v962_v60, %v737_v48 }
 0x130   : > { %v771_v52 = vpop.permute.xlu1 %770 }
 0x131   : > { %v769_v54 = vpop.permute.xlu0 %768  ;;  %v1030_v29 = vsel %vm1006_vm8, %v997_v11, %v771_v52 }
 0x132   : > { %v1028_v3 = vsel %vm1006_vm8, %v995_v62, %v769_v54  ;;  %v3124_v62 = vld [vmem:[%s3357_s2] ss:$0 sm:$0xff] }
 0x134   : > { %v803_v45 = vpop.permute.xlu1 %802 }
 0x135   : > { %v801_v55 = vpop.permute.xlu0 %800  ;;  %v1063_v2 = vsel %vm1039_vm9, %v1030_v29, %v803_v45 }
 0x136   : > { %v1061_v5 = vsel %vm1039_vm9, %v1028_v3, %v801_v55 }
 0x138   : > { %v835_v15 = vpop.permute.xlu1 %834 }
 0x139   : > { %v833_v58 = vpop.permute.xlu0 %832  ;;  %v1096_v6 = vsel %vm1072_vm10, %v1063_v2, %v835_v15 }
 0x13a   : > { %v1094_v8 = vsel %vm1072_vm10, %v1061_v5, %v833_v58  ;;  %v3133_v5 = vld [vmem:[%s3357_s2 + $0x1] ss:$0 sm:$0xff] }
 0x13c   : > { %v867_v59 = vpop.permute.xlu1 %866 }
 0x13d   : > { %v865_v61 = vpop.permute.xlu0 %864  ;;  %v1129_v57 = vsel %vm1105_vm11, %v1096_v6, %v867_v59 }
 0x13e   : > { %v1127_v12 = vsel %vm1105_vm11, %v1094_v8, %v865_v61 }
 0x140   : > { %v899_v63 = vpop.permute.xlu1 %898 }
 0x141   : > { %v897_v4 = vpop.permute.xlu0 %896  ;;  %v1162_v14 = vsel %vm1138_vm12, %v1129_v57, %v899_v63 }
 0x142   : > { %v1160_v53 = vsel %vm1138_vm12, %v1127_v12, %v897_v4 }
 0x144   : > { %v709_v34 = vpop.permute.xlu1 %708 }
 0x145   : > { %v929_v30 = vpop.permute.xlu0 %928  ;;  %v966_v36 = vsel %vm940_vm6, %v2855_v51, %v709_v34 }
 0x146   : > { %v1193_v13 = vsel %vm1171_vm13, %v1160_v53, %v929_v30 }
 0x147   : > { %2394 = vmatprep.mubr.msk.bf16.mxu0 %vm1247_vm14, %v1193_v13  ;;  %2436 = vmatprep.mubr.msk.bf16.mxu1 %vm1247_vm14, %v1193_v13 }
 0x148   : > { %v711_v16 = vpop.permute.xlu1 %710 }
 0x149   : > { %v931_v17 = vpop.permute.xlu0 %930  ;;  %v968_v42 = vsel %vm940_vm6, %v2870_v10, %v711_v16 }
 0x14a   : > { %v1195_v23 = vsel %vm1171_vm13, %v1162_v14, %v931_v17 }
 0x14b   : > { %2395 = vmatmul.mubr.msk.bf16.gmra.mrb[20].mxu0 %vm1247_vm14, %v1195_v23  ;;  %2437 = vmatmul.mubr.msk.bf16.gmra.mrb[20].mxu1 %vm1247_vm14, %v1195_v23 }
 0x14c   : > { %v743_v0 = vpop.permute.xlu1 %742 }
 0x14d   : > { %v741_v24 = vpop.permute.xlu0 %740  ;;  %v1001_v46 = vsel %vm973_vm7, %v968_v42, %v743_v0 }
 0x14e   : > { %v999_v38 = vsel %vm973_vm7, %v966_v36, %v741_v24 }
 0x150   : > { %v775_v19 = vpop.permute.xlu1 %774 }
 0x151   : > { %v773_v26 = vpop.permute.xlu0 %772  ;;  %v1034_v51 = vsel %vm1006_vm8, %v1001_v46, %v775_v19 }
 0x152   : > { %v1032_v39 = vsel %vm1006_vm8, %v999_v38, %v773_v26 }
 0x154   : > { %v807_v21 = vpop.permute.xlu1 %806 }
 0x155   : > { %v805_v28 = vpop.permute.xlu0 %804  ;;  %v1067_v56 = vsel %vm1039_vm9, %v1034_v51, %v807_v21 }
 0x156   : > { %v1065_v41 = vsel %vm1039_vm9, %v1032_v39, %v805_v28 }
 0x158   : > { %v839_v20 = vpop.permute.xlu1 %838 }
 0x159   : > { %v837_v31 = vpop.permute.xlu0 %836  ;;  %v1100_v35 = vsel %vm1072_vm10, %v1067_v56, %v839_v20 }
 0x15a   : > { %v1098_v43 = vsel %vm1072_vm10, %v1065_v41, %v837_v31 }
 0x15c   : > { %v871_v33 = vpop.permute.xlu1 %870 }
 0x15d   : > { %v869_v27 = vpop.permute.xlu0 %868  ;;  %v1133_v10 = vsel %vm1105_vm11, %v1100_v35, %v871_v33 }
 0x15e   : > { %v1131_v47 = vsel %vm1105_vm11, %v1098_v43, %v869_v27 }
 0x160   : > { %v903_v1 = vpop.permute.xlu1 %902 }
 0x161   : > { %v901_v40 = vpop.permute.xlu0 %900  ;;  %v1166_v44 = vsel %vm1138_vm12, %v1133_v10, %v903_v1 }
 0x162   : > { %v1164_v50 = vsel %vm1138_vm12, %v1131_v47, %v901_v40 }
 0x164   : > { %v713_v22 = vpop.permute.xlu1 %712 }
 0x165   : > { %v933_v32 = vpop.permute.xlu0 %932  ;;  %v970_v63 = vsel %vm940_vm6, %v2936_v9, %v713_v22 }
 0x166   : > { %v1197_v49 = vsel %vm1171_vm13, %v1164_v50, %v933_v32 }
 0x167   : > { %2398 = vmatprep.mubr.msk.bf16.mxu0 %vm1247_vm14, %v1197_v49  ;;  %2440 = vmatprep.mubr.msk.bf16.mxu1 %vm1247_vm14, %v1197_v49 }
 0x168   : > { %v715_v37 = vpop.permute.xlu1 %714 }
 0x169   : > { %v935_v18 = vpop.permute.xlu0 %934  ;;  %v972_v3 = vsel %vm940_vm6, %v2953_v25, %v715_v37 }
 0x16a   : > { %v1199_v48 = vsel %vm1171_vm13, %v1166_v44, %v935_v18 }
 0x16b   : > { %2399 = vmatmul.mubr.msk.bf16.gmra.mrb[24].mxu0 %vm1247_vm14, %v1199_v48  ;;  %2441 = vmatmul.mubr.msk.bf16.gmra.mrb[24].mxu1 %vm1247_vm14, %v1199_v48 }
 0x16c   : > { %v747_v52 = vpop.permute.xlu1 %746 }
 0x16d   : > { %v745_v54 = vpop.permute.xlu0 %744  ;;  %v1005_v7 = vsel %vm973_vm7, %v972_v3, %v747_v52 }
 0x16e   : > { %v1003_v8 = vsel %vm973_vm7, %v970_v63, %v745_v54 }
 0x170   : > { %v779_v45 = vpop.permute.xlu1 %778 }
 0x171   : > { %v777_v55 = vpop.permute.xlu0 %776  ;;  %v1038_v12 = vsel %vm1006_vm8, %v1005_v7, %v779_v45 }
 0x172   : > { %v1036_v34 = vsel %vm1006_vm8, %v1003_v8, %v777_v55 }
 0x174   : > { %v811_v15 = vpop.permute.xlu1 %810 }
 0x175   : > { %v809_v58 = vpop.permute.xlu0 %808  ;;  %v1071_v53 = vsel %vm1039_vm9, %v1038_v12, %v811_v15 }
 0x176   : > { %v1069_v30 = vsel %vm1039_vm9, %v1036_v34, %v809_v58 }
 0x178   : > { %v843_v59 = vpop.permute.xlu1 %842 }
 0x179   : > { %v841_v61 = vpop.permute.xlu0 %840  ;;  %v1104_v16 = vsel %vm1072_vm10, %v1071_v53, %v843_v59 }
 0x17a   : > { %v1102_v19 = vsel %vm1072_vm10, %v1069_v30, %v841_v61 }
 0x17c   : > { %v875_v60 = vpop.permute.xlu1 %874 }
 0x17d   : > { %v873_v4 = vpop.permute.xlu0 %872  ;;  %v1137_v43 = vsel %vm1105_vm11, %v1104_v16, %v875_v60 }
 0x17e   : > { %v2376_v11 = vpop.f32.mrb[0].mxu0  ;;  %v1135_v50 = vsel %vm1105_vm11, %v1102_v19, %v873_v4 }
 0x17f   : > { %v1327_v9 = vadd.f32 %v2376_v11, %v3124_v62  ;;  %v2418_v25 = vpop.f32.mrb[0].mxu1  ;;  %v1318_v29 = vpop.f32.mrb[1].mxu0 }
 0x180   : > { %v1729_v2 = vadd.f32 %v2418_v25, %v3133_v5  ;;  %v1319_v13 = vadd.f32 %v3124_v62, %v1318_v29  ;;  %v1720_v6 = vpop.f32.mrb[1].mxu1  ;;  %v2377_v57 = vpop.f32.mrb[2].mxu0 }
 0x181   : > { %v1447_v14 = vmax.f32 %v1327_v9, 0.0  ;;  %v1721_v17 = vadd.f32 %v3133_v5, %v1720_v6  ;;  %v1330_v23 = vadd.f32 %v2377_v57, %v3124_v62  ;;  %v2419_v0 = vpop.f32.mrb[2].mxu1  ;;  %v907_v24 = vpop.permute.xlu1 %906 }
 0x182   : > { %v1849_v26 = vmax.f32 %v1729_v2, 0.0  ;;  %v1445_v21 = vmax.f32 %v1319_v13, 0.0  ;;  %v1732_v28 = vadd.f32 %v2419_v0, %v3133_v5  ;;  %v1321_v20 = vpop.f32.mrb[3].mxu0  ;;  %v1723_v31 = vpop.f32.mrb[3].mxu1  ;;  %v1170_v56 = vsel %vm1138_vm12, %v1137_v43, %v907_v24 }
 0x183   : > { %v2260_v33 = vpack.c.bf16 %v1447_v14, %v1447_v14  ;;  %v1847_v27 = vmax.f32 %v1721_v17, 0.0  ;;  %v1448_v36 = vmax.f32 %v1330_v23, 0.0  ;;  %v1322_v38 = vadd.f32 %v3124_v62, %v1321_v20  ;;  %v905_v1 = vpop.permute.xlu0 %904 }
 0x184   : > { %v2292_v39 = vpack.c.bf16 %v1849_v26, %v1849_v26  ;;  %v2258_v40 = vpack.c.bf16 %v1445_v21, %v1445_v21  ;;  %v1850_v41 = vmax.f32 %v1732_v28, 0.0  ;;  %v1724_v42 = vadd.f32 %v3133_v5, %v1723_v31 }
 0x185   : > { %1608 = vst.msk [vmem:[%s3152_s28 + $0x8] sm:$0xf] %vm1605_vm15, %v2260_v33  ;;  %v2290_v46 = vpack.c.bf16 %v1847_v27, %v1847_v27  ;;  %v2261_v47 = vpack.c.bf16 %v1448_v36, %v1448_v36  ;;  %v1446_v22 = vmax.f32 %v1322_v38, 0.0  ;;  %v939_v51 = vpop.permute.xlu1 %938  ;;  %v1168_v10 = vsel %vm1138_vm12, %v1135_v50, %v905_v1 }
 0x186   : > { %2224 = vst.msk [vmem:[%s3152_s28 + $0x88] sm:$0xf] %vm1605_vm15, %v2292_v39  ;;  %1606 = vst.msk [vmem:[%s3152_s28] sm:$0xf] %vm1605_vm15, %v2258_v40  ;;  %v2293_v32 = vpack.c.bf16 %v1850_v41, %v1850_v41  ;;  %v1848_v49 = vmax.f32 %v1724_v42, 0.0  ;;  %v1203_v37 = vsel %vm1171_vm13, %v1170_v56, %v939_v51 }
 0x187   : > { %2222 = vst.msk [vmem:[%s3152_s28 + $0x80] sm:$0xf] %vm1605_vm15, %v2290_v46  ;;  %1609 = vst.msk [vmem:[%s3152_s28 + $0xc] sm:$0xf] %vm1605_vm15, %v2261_v47  ;;  %v2259_v35 = vpack.c.bf16 %v1446_v22, %v1446_v22  ;;  %v937_v44 = vpop.permute.xlu0 %936 }
 0x188   : > { %2225 = vst.msk [vmem:[%s3152_s28 + $0x8c] sm:$0xf] %vm1605_vm15, %v2293_v32  ;;  %v2291_v18 = vpack.c.bf16 %v1848_v49, %v1848_v49  ;;  %v1201_v48 = vsel %vm1171_vm13, %v1168_v10, %v937_v44 }
 0x189   : > { %1607 = vst.msk [vmem:[%s3152_s28 + $0x4] sm:$0xf] %vm1605_vm15, %v2259_v35  ;;  %2402 = vmatprep.mubr.msk.bf16.mxu0 %vm1247_vm14, %v1201_v48  ;;  %2444 = vmatprep.mubr.msk.bf16.mxu1 %vm1247_vm14, %v1201_v48 }
 0x18a   : > { %2223 = vst.msk [vmem:[%s3152_s28 + $0x84] sm:$0xf] %vm1605_vm15, %v2291_v18  ;;  %2403 = vmatmul.mubr.msk.bf16.gmra.mrb[28].mxu0 %vm1247_vm14, %v1203_v37  ;;  %2445 = vmatmul.mubr.msk.bf16.gmra.mrb[28].mxu1 %vm1247_vm14, %v1203_v37 }
 0x19e   : > { %v2380_v52 = vpop.f32.mrb[4].mxu0 }
 0x19f   : > { %v1343_v54 = vadd.f32 %v2380_v52, %v3124_v62  ;;  %v2422_v45 = vpop.f32.mrb[4].mxu1  ;;  %v1334_v55 = vpop.f32.mrb[5].mxu0 }
 0x1a0   : > { %v1745_v15 = vadd.f32 %v2422_v45, %v3133_v5  ;;  %v1335_v58 = vadd.f32 %v3124_v62, %v1334_v55  ;;  %v1736_v59 = vpop.f32.mrb[5].mxu1  ;;  %v2381_v61 = vpop.f32.mrb[6].mxu0 }
 0x1a1   : > { %v1451_v60 = vmax.f32 %v1343_v54, 0.0  ;;  %v1737_v63 = vadd.f32 %v3133_v5, %v1736_v59  ;;  %v1346_v3 = vadd.f32 %v2381_v61, %v3124_v62  ;;  %v2423_v4 = vpop.f32.mrb[6].mxu1  ;;  %v1337_v7 = vpop.f32.mrb[7].mxu0 }
 0x1a2   : > { %v1853_v8 = vmax.f32 %v1745_v15, 0.0  ;;  %v1449_v11 = vmax.f32 %v1335_v58, 0.0  ;;  %v1748_v12 = vadd.f32 %v2423_v4, %v3133_v5  ;;  %v1338_v34 = vadd.f32 %v3124_v62, %v1337_v7  ;;  %v1739_v9 = vpop.f32.mrb[7].mxu1 }
 0x1a3   : > { %v2264_v25 = vpack.c.bf16 %v1451_v60, %v1451_v60  ;;  %v1851_v29 = vmax.f32 %v1737_v63, 0.0  ;;  %v1452_v53 = vmax.f32 %v1346_v3, 0.0  ;;  %v1740_v30 = vadd.f32 %v3133_v5, %v1739_v9 }
 0x1a4   : > { %v2296_v2 = vpack.c.bf16 %v1853_v8, %v1853_v8  ;;  %v2262_v13 = vpack.c.bf16 %v1449_v11, %v1449_v11  ;;  %v1854_v6 = vmax.f32 %v1748_v12, 0.0  ;;  %v1450_v57 = vmax.f32 %v1338_v34, 0.0 }
 0x1a5   : > { %1612 = vst.msk [vmem:[%s3152_s28 + $0x18] sm:$0xf] %vm1605_vm15, %v2264_v25  ;;  %v2294_v16 = vpack.c.bf16 %v1851_v29, %v1851_v29  ;;  %v2265_v14 = vpack.c.bf16 %v1452_v53, %v1452_v53  ;;  %v1852_v17 = vmax.f32 %v1740_v30, 0.0 }
 0x1a6   : > { %2228 = vst.msk [vmem:[%s3152_s28 + $0x98] sm:$0xf] %vm1605_vm15, %v2296_v2  ;;  %1610 = vst.msk [vmem:[%s3152_s28 + $0x10] sm:$0xf] %vm1605_vm15, %v2262_v13  ;;  %v2297_v23 = vpack.c.bf16 %v1854_v6, %v1854_v6  ;;  %v2263_v0 = vpack.c.bf16 %v1450_v57, %v1450_v57 }
 0x1a7   : > { %2226 = vst.msk [vmem:[%s3152_s28 + $0x90] sm:$0xf] %vm1605_vm15, %v2294_v16  ;;  %1613 = vst.msk [vmem:[%s3152_s28 + $0x1c] sm:$0xf] %vm1605_vm15, %v2265_v14  ;;  %v2295_v24 = vpack.c.bf16 %v1852_v17, %v1852_v17 }
 0x1a8   : > { %2229 = vst.msk [vmem:[%s3152_s28 + $0x9c] sm:$0xf] %vm1605_vm15, %v2297_v23  ;;  %1611 = vst.msk [vmem:[%s3152_s28 + $0x14] sm:$0xf] %vm1605_vm15, %v2263_v0 }
 0x1a9   : > { %2227 = vst.msk [vmem:[%s3152_s28 + $0x94] sm:$0xf] %vm1605_vm15, %v2295_v24 }
 0x1be   : > { %v2384_v19 = vpop.f32.mrb[8].mxu0 }
 0x1bf   : > { %v1359_v26 = vadd.f32 %v2384_v19, %v3124_v62  ;;  %v2426_v21 = vpop.f32.mrb[8].mxu1  ;;  %v1350_v28 = vpop.f32.mrb[9].mxu0 }
 0x1c0   : > { %v1761_v20 = vadd.f32 %v2426_v21, %v3133_v5  ;;  %v1351_v31 = vadd.f32 %v3124_v62, %v1350_v28  ;;  %v1752_v33 = vpop.f32.mrb[9].mxu1  ;;  %v2385_v27 = vpop.f32.mrb[10].mxu0 }
 0x1c1   : > { %v1455_v36 = vmax.f32 %v1359_v26, 0.0  ;;  %v1753_v38 = vadd.f32 %v3133_v5, %v1752_v33  ;;  %v1362_v1 = vadd.f32 %v2385_v27, %v3124_v62  ;;  %v2427_v39 = vpop.f32.mrb[10].mxu1  ;;  %v1353_v40 = vpop.f32.mrb[11].mxu0 }
 0x1c2   : > { %v1857_v41 = vmax.f32 %v1761_v20, 0.0  ;;  %v1453_v42 = vmax.f32 %v1351_v31, 0.0  ;;  %v1764_v43 = vadd.f32 %v2427_v39, %v3133_v5  ;;  %v1354_v46 = vadd.f32 %v3124_v62, %v1353_v40  ;;  %v1755_v47 = vpop.f32.mrb[11].mxu1 }
 0x1c3   : > { %v2268_v22 = vpack.c.bf16 %v1455_v36, %v1455_v36  ;;  %v1855_v51 = vmax.f32 %v1753_v38, 0.0  ;;  %v1456_v50 = vmax.f32 %v1362_v1, 0.0  ;;  %v1756_v32 = vadd.f32 %v3133_v5, %v1755_v47 }
 0x1c4   : > { %v2300_v56 = vpack.c.bf16 %v1857_v41, %v1857_v41  ;;  %v2266_v49 = vpack.c.bf16 %v1453_v42, %v1453_v42  ;;  %v1858_v35 = vmax.f32 %v1764_v43, 0.0  ;;  %v1454_v10 = vmax.f32 %v1354_v46, 0.0 }
 0x1c5   : > { %1616 = vst.msk [vmem:[%s3152_s28 + $0x28] sm:$0xf] %vm1605_vm15, %v2268_v22  ;;  %v2298_v37 = vpack.c.bf16 %v1855_v51, %v1855_v51  ;;  %v2269_v44 = vpack.c.bf16 %v1456_v50, %v1456_v50  ;;  %v1856_v18 = vmax.f32 %v1756_v32, 0.0 }
 0x1c6   : > { %2232 = vst.msk [vmem:[%s3152_s28 + $0xa8] sm:$0xf] %vm1605_vm15, %v2300_v56  ;;  %1614 = vst.msk [vmem:[%s3152_s28 + $0x20] sm:$0xf] %vm1605_vm15, %v2266_v49  ;;  %v2301_v48 = vpack.c.bf16 %v1858_v35, %v1858_v35  ;;  %v2267_v52 = vpack.c.bf16 %v1454_v10, %v1454_v10 }
 0x1c7   : > { %2230 = vst.msk [vmem:[%s3152_s28 + $0xa0] sm:$0xf] %vm1605_vm15, %v2298_v37  ;;  %1617 = vst.msk [vmem:[%s3152_s28 + $0x2c] sm:$0xf] %vm1605_vm15, %v2269_v44  ;;  %v2299_v54 = vpack.c.bf16 %v1856_v18, %v1856_v18 }
 0x1c8   : > { %2233 = vst.msk [vmem:[%s3152_s28 + $0xac] sm:$0xf] %vm1605_vm15, %v2301_v48  ;;  %1615 = vst.msk [vmem:[%s3152_s28 + $0x24] sm:$0xf] %vm1605_vm15, %v2267_v52 }
 0x1c9   : > { %2231 = vst.msk [vmem:[%s3152_s28 + $0xa4] sm:$0xf] %vm1605_vm15, %v2299_v54 }
 0x1de   : > { %v2388_v45 = vpop.f32.mrb[12].mxu0 }
 0x1df   : > { %v1375_v55 = vadd.f32 %v2388_v45, %v3124_v62  ;;  %v2430_v15 = vpop.f32.mrb[12].mxu1  ;;  %v1366_v58 = vpop.f32.mrb[13].mxu0 }
 0x1e0   : > { %v1777_v59 = vadd.f32 %v2430_v15, %v3133_v5  ;;  %v1367_v61 = vadd.f32 %v3124_v62, %v1366_v58  ;;  %v1768_v60 = vpop.f32.mrb[13].mxu1  ;;  %v2389_v63 = vpop.f32.mrb[14].mxu0 }
 0x1e1   : > { %v1459_v3 = vmax.f32 %v1375_v55, 0.0  ;;  %v1769_v4 = vadd.f32 %v3133_v5, %v1768_v60  ;;  %v1378_v7 = vadd.f32 %v2389_v63, %v3124_v62  ;;  %v2431_v8 = vpop.f32.mrb[14].mxu1  ;;  %v1369_v11 = vpop.f32.mrb[15].mxu0 }
 0x1e2   : > { %v1861_v12 = vmax.f32 %v1777_v59, 0.0  ;;  %v1457_v34 = vmax.f32 %v1367_v61, 0.0  ;;  %v1780_v9 = vadd.f32 %v2431_v8, %v3133_v5  ;;  %v1370_v25 = vadd.f32 %v3124_v62, %v1369_v11  ;;  %v1771_v29 = vpop.f32.mrb[15].mxu1 }
 0x1e3   : > { %v2272_v53 = vpack.c.bf16 %v1459_v3, %v1459_v3  ;;  %v1859_v30 = vmax.f32 %v1769_v4, 0.0  ;;  %v1460_v2 = vmax.f32 %v1378_v7, 0.0  ;;  %v1772_v13 = vadd.f32 %v3133_v5, %v1771_v29 }
 0x1e4   : > { %v2304_v6 = vpack.c.bf16 %v1861_v12, %v1861_v12  ;;  %v2270_v57 = vpack.c.bf16 %v1457_v34, %v1457_v34  ;;  %v1862_v16 = vmax.f32 %v1780_v9, 0.0  ;;  %v1458_v14 = vmax.f32 %v1370_v25, 0.0 }
 0x1e5   : > { %1620 = vst.msk [vmem:[%s3152_s28 + $0x38] sm:$0xf] %vm1605_vm15, %v2272_v53  ;;  %v2302_v17 = vpack.c.bf16 %v1859_v30, %v1859_v30  ;;  %v2273_v23 = vpack.c.bf16 %v1460_v2, %v1460_v2  ;;  %v1860_v0 = vmax.f32 %v1772_v13, 0.0 }
 0x1e6   : > { %2236 = vst.msk [vmem:[%s3152_s28 + $0xb8] sm:$0xf] %vm1605_vm15, %v2304_v6  ;;  %1618 = vst.msk [vmem:[%s3152_s28 + $0x30] sm:$0xf] %vm1605_vm15, %v2270_v57  ;;  %v2305_v24 = vpack.c.bf16 %v1862_v16, %v1862_v16  ;;  %v2271_v19 = vpack.c.bf16 %v1458_v14, %v1458_v14 }
 0x1e7   : > { %2234 = vst.msk [vmem:[%s3152_s28 + $0xb0] sm:$0xf] %vm1605_vm15, %v2302_v17  ;;  %1621 = vst.msk [vmem:[%s3152_s28 + $0x3c] sm:$0xf] %vm1605_vm15, %v2273_v23  ;;  %v2303_v26 = vpack.c.bf16 %v1860_v0, %v1860_v0 }
 0x1e8   : > { %2237 = vst.msk [vmem:[%s3152_s28 + $0xbc] sm:$0xf] %vm1605_vm15, %v2305_v24  ;;  %1619 = vst.msk [vmem:[%s3152_s28 + $0x34] sm:$0xf] %vm1605_vm15, %v2271_v19 }
 0x1e9   : > { %2235 = vst.msk [vmem:[%s3152_s28 + $0xb4] sm:$0xf] %vm1605_vm15, %v2303_v26 }
 0x1fe   : > { %v2392_v21 = vpop.f32.mrb[16].mxu0  ;;  %v2434_v28 = vpop.f32.mrb[16].mxu1 }
 0x1ff   : > { %v1391_v20 = vadd.f32 %v2392_v21, %v3124_v62  ;;  %v1793_v31 = vadd.f32 %v2434_v28, %v3133_v5  ;;  %v1382_v33 = vpop.f32.mrb[17].mxu0  ;;  %v1784_v27 = vpop.f32.mrb[17].mxu1 }
 0x200   : > { %v1383_v36 = vadd.f32 %v3124_v62, %v1382_v33  ;;  %v1785_v38 = vadd.f32 %v3133_v5, %v1784_v27  ;;  %v2393_v1 = vpop.f32.mrb[18].mxu0  ;;  %v2435_v39 = vpop.f32.mrb[18].mxu1 }
 0x201   : > { %v1463_v40 = vmax.f32 %v1391_v20, 0.0  ;;  %v1865_v41 = vmax.f32 %v1793_v31, 0.0  ;;  %v1394_v42 = vadd.f32 %v2393_v1, %v3124_v62  ;;  %v1796_v43 = vadd.f32 %v2435_v39, %v3133_v5  ;;  %v1385_v46 = vpop.f32.mrb[19].mxu0  ;;  %v1787_v47 = vpop.f32.mrb[19].mxu1 }
 0x202   : > { %v1461_v22 = vmax.f32 %v1383_v36, 0.0  ;;  %v1863_v51 = vmax.f32 %v1785_v38, 0.0  ;;  %v1386_v50 = vadd.f32 %v3124_v62, %v1385_v46  ;;  %v1788_v32 = vadd.f32 %v3133_v5, %v1787_v47 }
 0x203   : > { %v2276_v56 = vpack.c.bf16 %v1463_v40, %v1463_v40  ;;  %v2308_v49 = vpack.c.bf16 %v1865_v41, %v1865_v41  ;;  %v1464_v35 = vmax.f32 %v1394_v42, 0.0  ;;  %v1866_v10 = vmax.f32 %v1796_v43, 0.0 }
 0x204   : > { %v2274_v37 = vpack.c.bf16 %v1461_v22, %v1461_v22  ;;  %v2306_v44 = vpack.c.bf16 %v1863_v51, %v1863_v51  ;;  %v1462_v18 = vmax.f32 %v1386_v50, 0.0  ;;  %v1864_v48 = vmax.f32 %v1788_v32, 0.0 }
 0x205   : > { %1624 = vst.msk [vmem:[%s3152_s28 + $0x48] sm:$0xf] %vm1605_vm15, %v2276_v56  ;;  %2240 = vst.msk [vmem:[%s3152_s28 + $0xc8] sm:$0xf] %vm1605_vm15, %v2308_v49  ;;  %v2277_v52 = vpack.c.bf16 %v1464_v35, %v1464_v35  ;;  %v2309_v54 = vpack.c.bf16 %v1866_v10, %v1866_v10 }
 0x206   : > { %1622 = vst.msk [vmem:[%s3152_s28 + $0x40] sm:$0xf] %vm1605_vm15, %v2274_v37  ;;  %2238 = vst.msk [vmem:[%s3152_s28 + $0xc0] sm:$0xf] %vm1605_vm15, %v2306_v44  ;;  %v2275_v45 = vpack.c.bf16 %v1462_v18, %v1462_v18  ;;  %v2307_v55 = vpack.c.bf16 %v1864_v48, %v1864_v48 }
 0x207   : > { %1625 = vst.msk [vmem:[%s3152_s28 + $0x4c] sm:$0xf] %vm1605_vm15, %v2277_v52  ;;  %2241 = vst.msk [vmem:[%s3152_s28 + $0xcc] sm:$0xf] %vm1605_vm15, %v2309_v54 }
 0x208   : > { %1623 = vst.msk [vmem:[%s3152_s28 + $0x44] sm:$0xf] %vm1605_vm15, %v2275_v45  ;;  %2239 = vst.msk [vmem:[%s3152_s28 + $0xc4] sm:$0xf] %vm1605_vm15, %v2307_v55 }
 0x21e   : > { %v2396_v15 = vpop.f32.mrb[20].mxu0  ;;  %v2438_v58 = vpop.f32.mrb[20].mxu1 }
 0x21f   : > { %v1407_v59 = vadd.f32 %v2396_v15, %v3124_v62  ;;  %v1809_v61 = vadd.f32 %v2438_v58, %v3133_v5  ;;  %v1398_v60 = vpop.f32.mrb[21].mxu0  ;;  %v1800_v63 = vpop.f32.mrb[21].mxu1 }
 0x220   : > { %v1399_v3 = vadd.f32 %v3124_v62, %v1398_v60  ;;  %v1801_v4 = vadd.f32 %v3133_v5, %v1800_v63  ;;  %v2397_v7 = vpop.f32.mrb[22].mxu0  ;;  %v2439_v8 = vpop.f32.mrb[22].mxu1 }
 0x221   : > { %v1467_v11 = vmax.f32 %v1407_v59, 0.0  ;;  %v1869_v12 = vmax.f32 %v1809_v61, 0.0  ;;  %v1410_v34 = vadd.f32 %v2397_v7, %v3124_v62  ;;  %v1812_v9 = vadd.f32 %v2439_v8, %v3133_v5  ;;  %v1401_v25 = vpop.f32.mrb[23].mxu0  ;;  %v1803_v29 = vpop.f32.mrb[23].mxu1 }
 0x222   : > { %v1465_v53 = vmax.f32 %v1399_v3, 0.0  ;;  %v1867_v30 = vmax.f32 %v1801_v4, 0.0  ;;  %v1402_v2 = vadd.f32 %v3124_v62, %v1401_v25  ;;  %v1804_v13 = vadd.f32 %v3133_v5, %v1803_v29 }
 0x223   : > { %v2280_v6 = vpack.c.bf16 %v1467_v11, %v1467_v11  ;;  %v2312_v57 = vpack.c.bf16 %v1869_v12, %v1869_v12  ;;  %v1468_v16 = vmax.f32 %v1410_v34, 0.0  ;;  %v1870_v14 = vmax.f32 %v1812_v9, 0.0 }
 0x224   : > { %v2278_v17 = vpack.c.bf16 %v1465_v53, %v1465_v53  ;;  %v2310_v23 = vpack.c.bf16 %v1867_v30, %v1867_v30  ;;  %v1466_v0 = vmax.f32 %v1402_v2, 0.0  ;;  %v1868_v24 = vmax.f32 %v1804_v13, 0.0 }
 0x225   : > { %1628 = vst.msk [vmem:[%s3152_s28 + $0x58] sm:$0xf] %vm1605_vm15, %v2280_v6  ;;  %2244 = vst.msk [vmem:[%s3152_s28 + $0xd8] sm:$0xf] %vm1605_vm15, %v2312_v57  ;;  %v2281_v19 = vpack.c.bf16 %v1468_v16, %v1468_v16  ;;  %v2313_v26 = vpack.c.bf16 %v1870_v14, %v1870_v14 }
 0x226   : > { %1626 = vst.msk [vmem:[%s3152_s28 + $0x50] sm:$0xf] %vm1605_vm15, %v2278_v17  ;;  %2242 = vst.msk [vmem:[%s3152_s28 + $0xd0] sm:$0xf] %vm1605_vm15, %v2310_v23  ;;  %v2279_v21 = vpack.c.bf16 %v1466_v0, %v1466_v0  ;;  %v2311_v28 = vpack.c.bf16 %v1868_v24, %v1868_v24 }
 0x227   : > { %1629 = vst.msk [vmem:[%s3152_s28 + $0x5c] sm:$0xf] %vm1605_vm15, %v2281_v19  ;;  %2245 = vst.msk [vmem:[%s3152_s28 + $0xdc] sm:$0xf] %vm1605_vm15, %v2313_v26 }
 0x228   : > { %1627 = vst.msk [vmem:[%s3152_s28 + $0x54] sm:$0xf] %vm1605_vm15, %v2279_v21  ;;  %2243 = vst.msk [vmem:[%s3152_s28 + $0xd4] sm:$0xf] %vm1605_vm15, %v2311_v28 }
 0x23e   : > { %v2400_v20 = vpop.f32.mrb[24].mxu0  ;;  %v2442_v31 = vpop.f32.mrb[24].mxu1 }
 0x23f   : > { %v1423_v33 = vadd.f32 %v2400_v20, %v3124_v62  ;;  %v1825_v27 = vadd.f32 %v2442_v31, %v3133_v5  ;;  %v1414_v36 = vpop.f32.mrb[25].mxu0  ;;  %v1816_v38 = vpop.f32.mrb[25].mxu1 }
 0x240   : > { %v1415_v1 = vadd.f32 %v3124_v62, %v1414_v36  ;;  %v1817_v39 = vadd.f32 %v3133_v5, %v1816_v38  ;;  %v2401_v40 = vpop.f32.mrb[26].mxu0  ;;  %v2443_v41 = vpop.f32.mrb[26].mxu1 }
 0x241   : > { %v1471_v42 = vmax.f32 %v1423_v33, 0.0  ;;  %v1873_v43 = vmax.f32 %v1825_v27, 0.0  ;;  %v1426_v46 = vadd.f32 %v2401_v40, %v3124_v62  ;;  %v1828_v47 = vadd.f32 %v2443_v41, %v3133_v5  ;;  %v1417_v22 = vpop.f32.mrb[27].mxu0  ;;  %v1819_v51 = vpop.f32.mrb[27].mxu1 }
 0x242   : > { %v1469_v50 = vmax.f32 %v1415_v1, 0.0  ;;  %v1871_v32 = vmax.f32 %v1817_v39, 0.0  ;;  %v1418_v56 = vadd.f32 %v3124_v62, %v1417_v22  ;;  %v1820_v49 = vadd.f32 %v3133_v5, %v1819_v51 }
 0x243   : > { %v2284_v35 = vpack.c.bf16 %v1471_v42, %v1471_v42  ;;  %v2316_v10 = vpack.c.bf16 %v1873_v43, %v1873_v43  ;;  %v1472_v37 = vmax.f32 %v1426_v46, 0.0  ;;  %v1874_v44 = vmax.f32 %v1828_v47, 0.0 }
 0x244   : > { %v2282_v18 = vpack.c.bf16 %v1469_v50, %v1469_v50  ;;  %v2314_v48 = vpack.c.bf16 %v1871_v32, %v1871_v32  ;;  %v1470_v52 = vmax.f32 %v1418_v56, 0.0  ;;  %v1872_v54 = vmax.f32 %v1820_v49, 0.0 }
 0x245   : > { %1632 = vst.msk [vmem:[%s3152_s28 + $0x68] sm:$0xf] %vm1605_vm15, %v2284_v35  ;;  %2248 = vst.msk [vmem:[%s3152_s28 + $0xe8] sm:$0xf] %vm1605_vm15, %v2316_v10  ;;  %v2285_v45 = vpack.c.bf16 %v1472_v37, %v1472_v37  ;;  %v2317_v55 = vpack.c.bf16 %v1874_v44, %v1874_v44 }
 0x246   : > { %1630 = vst.msk [vmem:[%s3152_s28 + $0x60] sm:$0xf] %vm1605_vm15, %v2282_v18  ;;  %2246 = vst.msk [vmem:[%s3152_s28 + $0xe0] sm:$0xf] %vm1605_vm15, %v2314_v48  ;;  %v2283_v15 = vpack.c.bf16 %v1470_v52, %v1470_v52  ;;  %v2315_v58 = vpack.c.bf16 %v1872_v54, %v1872_v54 }
 0x247   : > { %1633 = vst.msk [vmem:[%s3152_s28 + $0x6c] sm:$0xf] %vm1605_vm15, %v2285_v45  ;;  %2249 = vst.msk [vmem:[%s3152_s28 + $0xec] sm:$0xf] %vm1605_vm15, %v2317_v55 }
 0x248   : > { %1631 = vst.msk [vmem:[%s3152_s28 + $0x64] sm:$0xf] %vm1605_vm15, %v2283_v15  ;;  %2247 = vst.msk [vmem:[%s3152_s28 + $0xe4] sm:$0xf] %vm1605_vm15, %v2315_v58 }
 0x25d   : > { %v2404_v59 = vpop.f32.mrb[28].mxu0  ;;  %v2446_v61 = vpop.f32.mrb[28].mxu1 }
 0x25e   : > { %v1439_v60 = vadd.f32 %v2404_v59, %v3124_v62  ;;  %v1841_v63 = vadd.f32 %v2446_v61, %v3133_v5  ;;  %v1430_v3 = vpop.f32.mrb[29].mxu0  ;;  %v1832_v4 = vpop.f32.mrb[29].mxu1 }
 0x25f   : > { %v1431_v7 = vadd.f32 %v3124_v62, %v1430_v3  ;;  %v1833_v8 = vadd.f32 %v3133_v5, %v1832_v4  ;;  %v2405_v11 = vpop.f32.mrb[30].mxu0  ;;  %v2447_v12 = vpop.f32.mrb[30].mxu1 }
 0x260   : > { %v1475_v34 = vmax.f32 %v1439_v60, 0.0  ;;  %v1877_v9 = vmax.f32 %v1841_v63, 0.0  ;;  %v1442_v25 = vadd.f32 %v2405_v11, %v3124_v62  ;;  %v1844_v29 = vadd.f32 %v2447_v12, %v3133_v5  ;;  %v1433_v53 = vpop.f32.mrb[31].mxu0  ;;  %v1835_v30 = vpop.f32.mrb[31].mxu1 }
 0x261   : > { %v1473_v2 = vmax.f32 %v1431_v7, 0.0  ;;  %v1875_v13 = vmax.f32 %v1833_v8, 0.0  ;;  %v1434_v6 = vadd.f32 %v3124_v62, %v1433_v53  ;;  %v1836_v57 = vadd.f32 %v3133_v5, %v1835_v30 }
 0x262   : > { %v2288_v16 = vpack.c.bf16 %v1475_v34, %v1475_v34  ;;  %v2320_v14 = vpack.c.bf16 %v1877_v9, %v1877_v9  ;;  %v1476_v17 = vmax.f32 %v1442_v25, 0.0  ;;  %v1878_v23 = vmax.f32 %v1844_v29, 0.0 }
 0x263   : > { %v2286_v0 = vpack.c.bf16 %v1473_v2, %v1473_v2  ;;  %v2318_v24 = vpack.c.bf16 %v1875_v13, %v1875_v13  ;;  %v1474_v19 = vmax.f32 %v1434_v6, 0.0  ;;  %v1876_v26 = vmax.f32 %v1836_v57, 0.0 }
 0x264   : > { %1636 = vst.msk [vmem:[%s3152_s28 + $0x78] sm:$0xf] %vm1605_vm15, %v2288_v16  ;;  %2252 = vst.msk [vmem:[%s3152_s28 + $0xf8] sm:$0xf] %vm1605_vm15, %v2320_v14  ;;  %v2289_v21 = vpack.c.bf16 %v1476_v17, %v1476_v17  ;;  %v2321_v62 = vpack.c.bf16 %v1878_v23, %v1878_v23 }
 0x265   : > { %1634 = vst.msk [vmem:[%s3152_s28 + $0x70] sm:$0xf] %vm1605_vm15, %v2286_v0  ;;  %2250 = vst.msk [vmem:[%s3152_s28 + $0xf0] sm:$0xf] %vm1605_vm15, %v2318_v24  ;;  %v2287_v5 = vpack.c.bf16 %v1474_v19, %v1474_v19  ;;  %v2319_v28 = vpack.c.bf16 %v1876_v26, %v1876_v26 }
 0x266   : > { %1637 = vst.msk [vmem:[%s3152_s28 + $0x7c] sm:$0xf] %vm1605_vm15, %v2289_v21  ;;  %2253 = vst.msk [vmem:[%s3152_s28 + $0xfc] sm:$0xf] %vm1605_vm15, %v2321_v62 }
 0x267   : > { %1635 = vst.msk [vmem:[%s3152_s28 + $0x74] sm:$0xf] %vm1605_vm15, %v2287_v5  ;;  %2251 = vst.msk [vmem:[%s3152_s28 + $0xf4] sm:$0xf] %vm1605_vm15, %v2319_v28 }
 0x268 PF: > { %s13_s12 = sadd.s32 1, %s2483_s12  }
 0x269   : > { %p10_p4 = scmp.ge.s32.totalorder %s13_s12, 4  }
 0x26b   :  { %12 = sbr.rel (!%p10_p4) target bundleno = 1 (0x1), region = 65 }

// kernel: fused_block_forward.7
= control target key start
LH: loop header
LB: loop body
LE: loop exit
PB: predicated region body
PF: predicated region fallthrough
CT: control target
= control target key end

     0   :  { %s4317_s24 = smov 0   ;;  %s6348_s0 = inlined_call_operand.vmem [shape: f32[2,16,16,32], index: 0, kind: input, shape index: {}]   ;;  %s6349_s1 = inlined_call_operand.vmem [shape: bf16[2,2,16,16,32], index: 1, kind: input, shape index: {}]   ;;  %s6350_s2 = inlined_call_operand.vmem [shape: f32[2,32], index: 2, kind: input, shape index: {}]   ;;  %s6351_s3 = inlined_call_operand.vmem [shape: bf16[288,64], index: 3, kind: input, shape index: {}]   ;;  %s6352_s4 = inlined_call_operand.vmem [shape: f32[1,64], index: 4, kind: input, shape index: {}]   ;;  %s6353_s5 = inlined_call_operand.vmem [shape: bf16[288,64], index: 5, kind: input, shape index: {}]   ;;  %s6354_s6 = inlined_call_operand.vmem [shape: f32[1,64], index: 6, kind: input, shape index: {}]   ;;  %s6355_s7 = inlined_call_operand.vmem [shape: f32[2,16,16,64], index: 7, kind: output, shape index: {}]  }
   0x1 LB: > { %s3757_s25 = sadd.s32 4294967295, %s4271_s24   ;;  %p3761_p0 = scmp.ge.s32.totalorder %s4271_s24, 1  ;;  %s4271_s24 = sphi %s4317_s24, %s17_s24  }
   0x2   : > { %p247_p1 = scmp.lt.s32.totalorder %s4271_s24, 3 }
   0x4   : > { %p248_p2 = pnand %p3761_p0, %p247_p1 }
   0x6   : > { %251 = sbr.rel (%p248_p2) target bundleno = 1076 (0x434), region = 48 }
   0xd   : > { %v4273_v0 = vmov 0   ;;  %p284_p3 = scmp.lt.s32.totalorder %s3757_s25, 1  ;;  %vm557_vm0 = vsmask.f32 256  ;;  %v4219_v2 = vld [vmem:[%s6351_s3 + $0x40] sm:$0xff]   ;;  %s4274_s28 = smov 64  }
   0xe   : > { %v4326_v1 = vrot.slane %v4273_v0, 1  ;;  %s4275_s29 = smov 32   ;;  %3861 = vmatprep.subr.bf16.mxu0 %v4219_v2  ;;  %v4220_v3 = vld [vmem:[%s6351_s3] sm:$0xff]   ;;  %v4221_v4 = vld [vmem:[%s6351_s3 + $0x48] sm:$0xff]   ;;  %vm556_vm1 = vcmask 1040384   ;;  %vm811_vm3 = vcmask 1046528  }
   0xf   : > { %s6368_s25 = smov (!%p284_p3, %s3757_s25), 1  ;;  %3862 = vmatpush3.bf16.msra.mxu0 %v4220_v3  ;;  %v4222_v5 = vld [vmem:[%s6351_s3 + $0x8] sm:$0xff]   ;;  %vm4356_vm2 = vmand %vm556_vm1, %vm557_vm0  ;;  %vm1068_vm4 = vcmask 261120   ;;  %vm591_vm5 = vsmask.f32 7424  ;;  %s4276_s17 = smov 96  }
  0x10   : > { %6359 = vst [vmem:[#allocation2_spill] sm:$0xff] %v4326_v1  ;;  %908 = vrot.lane.b32.xlu1 %v4326_v1, %s4274_s28  ;;  %876 = vrot.lane.b32.xlu0 %v4326_v1, %s4275_s29  ;;  %s4338_s9 = sshll.u32 %s6368_s25, 8  ;;  %v4223_v48 = vld [vmem:[%s6351_s3 + $0x50] sm:$0xff]   ;;  %v4226_v56 = vld [vmem:[%s6351_s3 + $0x58] sm:$0xff]   ;;  %vm1101_vm6 = vcmask 523264   ;;  %vm1134_vm7 = vcmask 785408  }
  0x11   : > { %s4347_s14 = scalar_lea.vmem %s6349_s1, %s4338_s9  ;;  %3863 = vmatprep.subr.bf16.mxu0 %v4221_v4  ;;  %v4224_v53 = vld [vmem:[%s6351_s3 + $0x10] sm:$0xff]   ;;  %v4227_v59 = vld [vmem:[%s6351_s3 + $0x18] sm:$0xff]   ;;  %v4228_v3 = vld [vmem:[%s6351_s3 + $0x60] sm:$0xff]   ;;  %s5229_s19 = scalar_lea.vmem %s6348_s0, %s4338_s9 }
  0x12   : > { %v4209_v6 = vld [vmem:[%s4347_s14 + $0x10] sm:$0xff]   ;;  %v4210_v7 = vld [vmem:[%s4347_s14 + $0x8] sm:$0xff]   ;;  %v4211_v12 = vld [vmem:[%s4347_s14] sm:$0xff]   ;;  %s6220_s10 = scalar_lea.vmem %s6355_s7, %s4338_s9 }
  0x13   : > { %v427_v8 = vshrl.u32 %v4209_v6, 16  ;;  %v430_v9 = vshll.u32 %v4209_v6, 16  ;;  %v420_v10 = vshrl.u32 %v4210_v7, 16  ;;  %v423_v11 = vshll.u32 %v4210_v7, 16  ;;  %3864 = vmatpush3.bf16.msra.mxu0 %v4222_v5  ;;  %v4212_v19 = vld [vmem:[%s4347_s14 + $0x18] sm:$0xff]   ;;  %v4213_v55 = vld [vmem:[%s4347_s14 + $0x20] sm:$0xff]  }
  0x14   : > { %v413_v16 = vshrl.u32 %v4211_v12, 16  ;;  %v416_v17 = vshll.u32 %v4211_v12, 16  ;;  %v434_v31 = vshrl.u32 %v4212_v19, 16  ;;  %v437_v41 = vshll.u32 %v4212_v19, 16  ;;  %3865 = vmatprep.subr.bf16.mxu0 %v4223_v48 }
  0x15   : > { %v429_v13 = vrot.slane %v427_v8, 7  ;;  %v422_v15 = vrot.slane %v420_v10, 7  ;;  %v441_v2 = vshrl.u32 %v4213_v55, 16  ;;  %v4229_v10 = vld [vmem:[%s6351_s3 + $0x20] sm:$0xff]   ;;  %v444_v12 = vshll.u32 %v4213_v55, 16 }
  0x16   : > { %v415_v21 = vrot.slane %v413_v16, 7  ;;  %v436_v44 = vrot.slane %v434_v31, 7  ;;  %v4236_v31 = vld [vmem:[%s6351_s3 + $0x80] sm:$0xff]  }
  0x17   : > { %v432_v18 = vor.u32 %v430_v9, %v429_v13  ;;  %v425_v20 = vor.u32 %v423_v11, %v422_v15  ;;  %v576_v22 = vsel %vm4356_vm2, %v422_v15, 0  ;;  %v577_v35 = vsel %vm4356_vm2, %v429_v13, 0  ;;  %3866 = vmatpush3.bf16.msra.mxu0 %v4224_v53  ;;  %v4230_v13 = vld [vmem:[%s6351_s3 + $0x68] sm:$0xff]   ;;  %4121 = vmatprep.subr.bf16.mxu1 %v4236_v31 }
  0x18   : > { %v818_v24 = vrot.slane %v576_v22, 1  ;;  %v418_v26 = vor.u32 %v416_v17, %v415_v21  ;;  %v575_v27 = vsel %vm4356_vm2, %v415_v21, 0  ;;  %v620_v34 = vshll.u32 %v576_v22, 16  ;;  %3867 = vmatprep.subr.bf16.mxu0 %v4226_v56  ;;  %v4231_v15 = vld [vmem:[%s6351_s3 + $0x28] sm:$0xff]   ;;  %v4233_v22 = vld [vmem:[%s6351_s3 + $0x70] sm:$0xff]   ;;  %4122 = vmatpush3.bf16.msra.mxu1 %v4236_v31  ;;  %v4217_v56 = vld [vmem:[%s4347_s14 + $0x40] sm:$0xff]  }
  0x19   : > { %v4365_v23 = vsel %vm4356_vm2, 0, %v432_v18  ;;  %v4371_v25 = vsel %vm4356_vm2, 0, %v425_v20  ;;  %v815_v28 = vrot.slane %v575_v27, 1  ;;  %v632_v43 = vshll.u32 %v577_v35, 16  ;;  %v4214_v21 = vld [vmem:[%s4347_s14 + $0x28] sm:$0xff]  }
  0x1a   : > { %1006 = vrot.lane.b32.xlu0 %v4365_v23, %s4274_s28  ;;  %1004 = vrot.lane.b32.xlu1 %v4371_v25, %s4274_s28  ;;  %v817_v29 = vrot.slane %v4371_v25, 1  ;;  %v615_v30 = vshll.u32 %v4371_v25, 16  ;;  %v4381_v32 = vsel %vm4356_vm2, 0, %v418_v26  ;;  %v613_v33 = vshrl.u32 %v4371_v25, 16 }
  0x1b   : > { %v814_v36 = vrot.slane %v4381_v32, 1  ;;  %v627_v39 = vshll.u32 %v4365_v23, 16  ;;  %v603_v40 = vshll.u32 %v4381_v32, 16  ;;  %v601_v45 = vshrl.u32 %v4381_v32, 16  ;;  %3868 = vmatpush3.bf16.msra.mxu0 %v4227_v59 }
  0x1c   : > { %v4388_v37 = vsel %vm811_vm3, %v817_v29, %v818_v24  ;;  %v617_v38 = vrot.slane %v615_v30, 1  ;;  %v608_v47 = vshll.u32 %v575_v27, 16  ;;  %v622_v50 = vrot.slane %v620_v34, 1  ;;  %3869 = vmatprep.subr.bf16.mxu0 %v4228_v3  ;;  %v4234_v24 = vld [vmem:[%s6351_s3 + $0x30] sm:$0xff]   ;;  %v4235_v30 = vld [vmem:[%s6351_s3 + $0x78] sm:$0xff]  }
  0x1d   : > { %4125 = vmatprep.mubr.msk.bf16.mxu1 %vm1068_vm4, %v4388_v37  ;;  %v816_v42 = vsel %vm811_vm3, %v814_v36, %v815_v28  ;;  %v605_v46 = vrot.slane %v603_v40, 1  ;;  %v625_v51 = vshrl.u32 %v4365_v23, 16  ;;  %v629_v52 = vrot.slane %v627_v39, 1  ;;  %v4215_v34 = vld [vmem:[%s4347_s14 + $0x30] sm:$0xff]   ;;  %v4237_v39 = vld [vmem:[%s6351_s3 + $0x38] sm:$0xff]  }
  0x1e   : > { %940 = vrot.lane.b32.xlu1 %v4381_v32, %s4276_s17  ;;  %972 = vrot.lane.b32.xlu0 %v816_v42, %s4275_s29  ;;  %v618_v49 = vor.u32 %v617_v38, %v613_v33  ;;  %v439_v54 = vor.u32 %v437_v41, %v436_v44  ;;  %v610_v58 = vrot.slane %v608_v47, 1  ;;  %v634_v62 = vrot.slane %v632_v43, 1  ;;  %v4216_v43 = vld [vmem:[%s4347_s14 + $0x38] sm:$0xff]  }
  0x1f   : > { %v606_v57 = vor.u32 %v605_v46, %v601_v45  ;;  %v630_v61 = vor.u32 %v629_v52, %v625_v51  ;;  %v821_v5 = vrot.slane %v577_v35, 1  ;;  %v820_v7 = vrot.slane %v4365_v23, 1  ;;  %3870 = vmatpush3.bf16.msra.mxu0 %v4229_v10 }
  0x20   : > { %v4418_v60 = vsel %vm591_vm5, %v618_v49, %v622_v50  ;;  %v4422_v63 = vsel %vm4356_vm2, 0, %v439_v54  ;;  %v578_v8 = vsel %vm4356_vm2, %v436_v44, 0  ;;  %v443_v11 = vrot.slane %v441_v2, 7  ;;  %3871 = vmatprep.subr.bf16.mxu0 %v4230_v13 }
  0x21   : > { %v4431_v4 = vsel %vm591_vm5, %v606_v57, %v610_v58  ;;  %v4434_v6 = vsel %vm591_vm5, %v630_v61, %v634_v62  ;;  %v639_v9 = vshll.u32 %v4422_v63, 16  ;;  %v644_v16 = vshll.u32 %v578_v8, 16  ;;  %v4218_v57 = vld [vmem:[%s4347_s14 + $0x48] sm:$0xff]  }
  0x22   : > { %942 = vrot.lane.b32.xlu1 %v4371_v25, %s4276_s17  ;;  %974 = vrot.lane.b32.xlu0 %v4388_v37, %s4275_s29  ;;  %v822_v17 = vsel %vm811_vm3, %v820_v7, %v821_v5  ;;  %v637_v18 = vshrl.u32 %v4422_v63, 16  ;;  %v446_v20 = vor.u32 %v444_v12, %v443_v11  ;;  %v448_v29 = vshrl.u32 %v4214_v21, 16  ;;  %v4225_v12 = vld [vmem:[%s4347_s14 + $0x50] sm:$0xff]  }
  0x23   : > { %v641_v19 = vrot.slane %v639_v9, 1  ;;  %3872 = vmatpush3.bf16.msra.mxu0 %v4231_v15  ;;  %v646_v27 = vrot.slane %v644_v16, 1  ;;  %v824_v33 = vrot.slane %v578_v8, 1  ;;  %v823_v36 = vrot.slane %v4422_v63, 1 }
  0x24   : > { %3873 = vmatprep.subr.bf16.mxu0 %v4233_v22  ;;  %v4467_v28 = vsel %vm4356_vm2, 0, %v446_v20  ;;  %v450_v40 = vrot.slane %v448_v29, 7  ;;  %v451_v41 = vshll.u32 %v4214_v21, 16  ;;  %v455_v48 = vshrl.u32 %v4215_v34, 16 }
  0x25   : > { %v642_v26 = vor.u32 %v641_v19, %v637_v18  ;;  %v651_v38 = vshll.u32 %v4467_v28, 16  ;;  %v825_v45 = vsel %vm811_vm3, %v823_v36, %v824_v33  ;;  %v649_v46 = vshrl.u32 %v4467_v28, 16 }
  0x26   : > { %910 = vrot.lane.b32.xlu1 %v816_v42, %s4274_s28  ;;  %1036 = vrot.lane.b32.xlu0 %v4418_v60, %s4276_s17  ;;  %v4238_v42 = vld [vmem:[%s6351_s3 + $0x88] sm:$0xff]   ;;  %v453_v49 = vor.u32 %v451_v41, %v450_v40  ;;  %v462_v50 = vshrl.u32 %v4216_v43, 16  ;;  %v457_v53 = vrot.slane %v455_v48, 7  ;;  %v458_v54 = vshll.u32 %v4215_v34, 16 }
  0x27   : > { %3874 = vmatpush3.bf16.msra.mxu0 %v4234_v24  ;;  %v4481_v35 = vsel %vm591_vm5, %v642_v26, %v646_v27  ;;  %4123 = vmatprep.subr.bf16.mxu1 %v4238_v42  ;;  %v653_v47 = vrot.slane %v651_v38, 1  ;;  %v580_v59 = vsel %vm4356_vm2, %v450_v40, 0  ;;  %v465_v62 = vshll.u32 %v4216_v43, 16  ;;  %v4232_v26 = vld [vmem:[%s4347_s14 + $0x58] sm:$0xff]  }
  0x28   : > { %3875 = vmatprep.subr.bf16.mxu0 %v4235_v30  ;;  %4124 = vmatpush3.bf16.msra.mxu1 %v4238_v42  ;;  %v4506_v55 = vsel %vm4356_vm2, 0, %v453_v49  ;;  %v464_v61 = vrot.slane %v462_v50, 7  ;;  %v826_v2 = vrot.slane %v4467_v28, 1  ;;  %v830_v3 = vrot.slane %v580_v59, 1 }
  0x29   : > { %v654_v51 = vor.u32 %v653_v47, %v649_v46  ;;  %v663_v7 = vshll.u32 %v4506_v55, 16  ;;  %v829_v8 = vrot.slane %v4506_v55, 1  ;;  %v460_v9 = vor.u32 %v458_v54, %v457_v53 }
  0x2a   : > { %878 = vrot.lane.b32.xlu1 %v4431_v4, %s4275_s29  ;;  %1038 = vrot.lane.b32.xlu0 %v4434_v6, %s4276_s17  ;;  %v467_v10 = vor.u32 %v465_v62, %v464_v61  ;;  %v661_v15 = vshrl.u32 %v4506_v55, 16  ;;  %v668_v16 = vshll.u32 %v580_v59, 16  ;;  %v581_v21 = vsel %vm4356_vm2, %v457_v53, 0 }
  0x2b   : > { %3876 = vmatpush3.bf16.msra.mxu0 %v4237_v39  ;;  %4126 = vmatmul.mubr.msk.bf16.vlgmr.msra.gmra.mrb[0].mxu1 %vm1068_vm4, %v822_v17  ;;  %v665_v18 = vrot.slane %v663_v7, 1  ;;  %v4532_v19 = vsel %vm811_vm3, %v829_v8, %v830_v3  ;;  %v4536_v20 = vsel %vm4356_vm2, 0, %v460_v9  ;;  %v833_v22 = vrot.slane %v581_v21, 1  ;;  %v4240_v7 = vld [vmem:[%s4347_s14 + $0x68] sm:$0xff]  }
  0x2c   : > { %4129 = vmatprep.mubr.msk.bf16.mxu1 %vm1068_vm4, %v825_v45  ;;  %v4544_v24 = vsel %vm4356_vm2, %v464_v61, 0  ;;  %v4553_v27 = vsel %vm4356_vm2, 0, %v467_v10  ;;  %v472_v30 = vshll.u32 %v4217_v56, 16  ;;  %v483_v31 = vshrl.u32 %v4225_v12, 16 }
  0x2d   : > { %v675_v33 = vshll.u32 %v4536_v20, 16  ;;  %v832_v34 = vrot.slane %v4536_v20, 1  ;;  %v666_v38 = vor.u32 %v665_v18, %v661_v15  ;;  %v670_v39 = vrot.slane %v668_v16, 1 }
  0x2e   : > { %880 = vrot.lane.b32.xlu1 %v4418_v60, %s4275_s29  ;;  %976 = vrot.lane.b32.xlu0 %v822_v17, %s4275_s29  ;;  %v835_v40 = vrot.slane %v4553_v27, 1  ;;  %v836_v41 = vrot.slane %v4544_v24, 1  ;;  %v490_v42 = vshrl.u32 %v4232_v26, 16  ;;  %v680_v43 = vshll.u32 %v581_v21, 16 }
  0x2f   : > { %v485_v46 = vrot.slane %v483_v31, 7  ;;  %v486_v47 = vshll.u32 %v4225_v12, 16  ;;  %v673_v48 = vshrl.u32 %v4536_v20, 16  ;;  %v677_v49 = vrot.slane %v675_v33, 1  ;;  %v4241_v33 = vld [vmem:[%s4347_s14 + $0x70] sm:$0xff]  }
  0x30   : > { %v4566_v50 = vsel %vm811_vm3, %v832_v34, %v833_v22  ;;  %v493_v54 = vshll.u32 %v4232_v26, 16  ;;  %v682_v10 = vrot.slane %v680_v43, 1  ;;  %v504_v22 = vshrl.u32 %v4240_v7, 16 }
  0x31   : > { %v488_v61 = vor.u32 %v486_v47, %v485_v46  ;;  %v4612_v16 = vsel %vm4356_vm2, %v485_v46, 0  ;;  %v678_v26 = vor.u32 %v677_v49, %v673_v48  ;;  %v511_v46 = vshrl.u32 %v4241_v33, 16 }
  0x32   : > { %912 = vrot.lane.b32.xlu1 %v4388_v37, %s4274_s28  ;;  %1008 = vrot.lane.b32.xlu0 %v4422_v63, %s4274_s28  ;;  %v579_v37 = vsel %vm4356_vm2, %v443_v11, 0  ;;  %v469_v11 = vshrl.u32 %v4217_v56, 16  ;;  %v492_v56 = vrot.slane %v490_v42, 7  ;;  %v845_v21 = vrot.slane %v4612_v16, 1 }
  0x33   : > { %v656_v44 = vshll.u32 %v579_v37, 16  ;;  %v827_v58 = vrot.slane %v579_v37, 1  ;;  %v479_v37 = vshll.u32 %v4218_v57, 16  ;;  %v4608_v15 = vsel %vm4356_vm2, 0, %v488_v61 }
  0x34   : > { %v471_v29 = vrot.slane %v469_v11, 7  ;;  %v495_v11 = vor.u32 %v493_v54, %v492_v56  ;;  %v844_v18 = vrot.slane %v4608_v15, 1 }
  0x35   : > { %v658_v52 = vrot.slane %v656_v44, 1  ;;  %v4528_v13 = vsel %vm811_vm3, %v826_v2, %v827_v58 }
  0x36   : > { %944 = vrot.lane.b32.xlu1 %v4365_v23, %s4276_s17  ;;  %1040 = vrot.lane.b32.xlu0 %v4481_v35, %s4276_s17  ;;  %v474_v44 = vor.u32 %v472_v30, %v471_v29  ;;  %v4576_v53 = vsel %vm4356_vm2, %v471_v29, 0  ;;  %v4626_v30 = vsel %vm4356_vm2, %v492_v56, 0  ;;  %v4633_v34 = vsel %vm4356_vm2, 0, %v495_v11 }
  0x37   : > { %v4518_v5 = vsel %vm591_vm5, %v654_v51, %v658_v52  ;;  %4130 = vmatmul.mubr.msk.bf16.gmra.mrb[4].mxu1 %vm1068_vm4, %v4528_v13  ;;  %v4569_v52 = vsel %vm591_vm5, %v666_v38, %v670_v39  ;;  %v839_v59 = vrot.slane %v4576_v53, 1  ;;  %v506_v38 = vrot.slane %v504_v22, 7 }
  0x38   : > { %4133 = vmatprep.mubr.msk.bf16.mxu1 %vm1068_vm4, %v4532_v19  ;;  %v4587_v58 = vsel %vm4356_vm2, 0, %v474_v44  ;;  %v507_v39 = vshll.u32 %v4240_v7, 16  ;;  %v847_v42 = vrot.slane %v4633_v34, 1  ;;  %v848_v43 = vrot.slane %v4626_v30, 1 }
  0x39   : > { %v838_v62 = vrot.slane %v4587_v58, 1  ;;  %v4654_v47 = vsel %vm811_vm3, %v844_v18, %v845_v21  ;;  %v4677_v61 = vsel %vm4356_vm2, %v506_v38, 0  ;;  %v514_v7 = vshll.u32 %v4241_v33, 16 }
  0x3a   : > { %882 = vrot.lane.b32.xlu1 %v4434_v6, %s4275_s29  ;;  %978 = vrot.lane.b32.xlu0 %v825_v45, %s4275_s29  ;;  %v509_v48 = vor.u32 %v507_v39, %v506_v38  ;;  %v4658_v56 = vsel %vm811_vm3, %v847_v42, %v848_v43  ;;  %v854_v22 = vrot.slane %v4677_v61, 1 }
  0x3e   : > { %914 = vrot.lane.b32.xlu1 %v822_v17, %s4274_s28  ;;  %1010 = vrot.lane.b32.xlu0 %v4467_v28, %s4274_s28  ;;  %v476_v17 = vshrl.u32 %v4218_v57, 16  ;;  %v4239_v57 = vld [vmem:[%s4347_s14 + $0x60] sm:$0xff]  }
  0x3f   : > { %4134 = vmatmul.mubr.msk.bf16.gmra.mrb[8].mxu1 %vm1068_vm4, %v4566_v50  ;;  %v497_v12 = vshrl.u32 %v4239_v57, 16  ;;  %v500_v31 = vshll.u32 %v4239_v57, 16 }
  0x40   : > { %v478_v36 = vrot.slane %v476_v17, 7  ;;  %v4617_v17 = vsel %vm811_vm3, %v838_v62, %v839_v59  ;;  %v513_v62 = vrot.slane %v511_v46, 7  ;;  %v697_v46 = vshrl.u32 %v4587_v58, 16 }
  0x42   : > { %946 = vrot.lane.b32.xlu1 %v4422_v63, %s4276_s17  ;;  %1042 = vrot.lane.b32.xlu0 %v4518_v5, %s4276_s17  ;;  %v481_v51 = vor.u32 %v479_v37, %v478_v36  ;;  %v4599_v3 = vsel %vm4356_vm2, %v478_v36, 0  ;;  %v499_v36 = vrot.slane %v497_v12, 7  ;;  %v4242_v37 = vld [vmem:[%s4347_s14 + $0x78] sm:$0xff]  }
  0x43   : > { %v842_v9 = vrot.slane %v4599_v3, 1  ;;  %v518_v49 = vshrl.u32 %v4242_v37, 16  ;;  %v521_v11 = vshll.u32 %v4242_v37, 16  ;;  %v699_v37 = vshll.u32 %v4587_v58, 16 }
  0x44   : > { %v4595_v2 = vsel %vm4356_vm2, 0, %v481_v51  ;;  %v502_v44 = vor.u32 %v500_v31, %v499_v36  ;;  %v685_v51 = vshrl.u32 %v4553_v27, 16  ;;  %v4662_v57 = vsel %vm4356_vm2, %v499_v36, 0 }
  0x45   : > { %v841_v8 = vrot.slane %v4595_v2, 1 }
  0x46   : > { %884 = vrot.lane.b32.xlu1 %v4481_v35, %s4275_s29  ;;  %980 = vrot.lane.b32.xlu0 %v4528_v13, %s4275_s29  ;;  %v4673_v59 = vsel %vm4356_vm2, 0, %v502_v44 }
  0x47   : > { %v4622_v29 = vsel %vm811_vm3, %v841_v8, %v842_v9  ;;  %v850_v8 = vrot.slane %v4673_v59, 1  ;;  %v4684_v9 = vsel %vm4356_vm2, 0, %v509_v48 }
  0x48   : > { %v853_v21 = vrot.slane %v4684_v9, 1 }
  0x4a   : > { %916 = vrot.lane.b32.xlu1 %v825_v45, %s4274_s28  ;;  %1012 = vrot.lane.b32.xlu0 %v4506_v55, %s4274_s28  ;;  %v4572_v45 = vsel %vm811_vm3, %v835_v40, %v836_v41  ;;  %v4643_v40 = vsel %vm591_vm5, %v678_v26, %v682_v10  ;;  %v687_v41 = vshll.u32 %v4553_v27, 16  ;;  %v520_v10 = vrot.slane %v518_v49, 7 }
  0x4b   : > { %4137 = vmatprep.mubr.msk.bf16.mxu1 %vm1068_vm4, %v4572_v45  ;;  %v516_v26 = vor.u32 %v514_v7, %v513_v62  ;;  %v4700_v38 = vsel %vm811_vm3, %v853_v21, %v854_v22  ;;  %v721_v22 = vshrl.u32 %v4608_v15, 16 }
  0x4c   : > { %4138 = vmatmul.mubr.msk.bf16.gmra.mrb[12].mxu1 %vm1068_vm4, %v4617_v17  ;;  %v689_v54 = vrot.slane %v687_v41, 1  ;;  %v523_v33 = vor.u32 %v521_v11, %v520_v10  ;;  %v4715_v41 = vsel %vm4356_vm2, %v513_v62, 0 }
  0x4d   : > { %4141 = vmatprep.mubr.msk.bf16.mxu1 %vm1068_vm4, %v4622_v29  ;;  %v4711_v39 = vsel %vm4356_vm2, 0, %v516_v26  ;;  %v857_v43 = vrot.slane %v4715_v41, 1 }
  0x4e   : > { %948 = vrot.lane.b32.xlu1 %v4467_v28, %s4276_s17  ;;  %1044 = vrot.lane.b32.xlu0 %v4569_v52, %s4276_s17  ;;  %v690_v12 = vor.u32 %v689_v54, %v685_v51  ;;  %v856_v42 = vrot.slane %v4711_v39, 1  ;;  %v4723_v44 = vsel %vm4356_vm2, 0, %v523_v33  ;;  %v728_v33 = vshll.u32 %v4612_v16, 16 }
  0x4f   : > { %v873_v48 = vrot.slane %v4723_v44, 1  ;;  %v735_v16 = vshll.u32 %v4633_v34, 16 }
  0x50   : > { %v4737_v51 = vsel %vm811_vm3, %v856_v42, %v857_v43 }
  0x52   : > { %886 = vrot.lane.b32.xlu1 %v4518_v5, %s4275_s29  ;;  %982 = vrot.lane.b32.xlu0 %v4532_v19, %s4275_s29 }
  0x54   : > { %4142 = vmatmul.mubr.msk.bf16.gmra.mrb[16].mxu1 %vm1068_vm4, %v4654_v47 }
  0x55   : > { %4145 = vmatprep.mubr.msk.bf16.mxu1 %vm1068_vm4, %v4658_v56 }
  0x56   : > { %918 = vrot.lane.b32.xlu1 %v4528_v13, %s4274_s28  ;;  %1014 = vrot.lane.b32.xlu0 %v4536_v20, %s4274_s28  ;;  %v692_v13 = vshll.u32 %v4544_v24, 16  ;;  %v851_v24 = vrot.slane %v4662_v57, 1 }
  0x58   : > { %v694_v18 = vrot.slane %v692_v13, 1  ;;  %v4693_v31 = vsel %vm811_vm3, %v850_v8, %v851_v24  ;;  %v701_v13 = vrot.slane %v699_v37, 1  ;;  %v711_v8 = vshll.u32 %v4595_v2, 16 }
  0x59   : > { %v730_v37 = vrot.slane %v728_v33, 1  ;;  %v752_v33 = vshll.u32 %v4662_v57, 16 }
  0x5a   : > { %950 = vrot.lane.b32.xlu1 %v4506_v55, %s4276_s17  ;;  %1046 = vrot.lane.b32.xlu0 %v4643_v40, %s4276_s17  ;;  %v4696_v36 = vsel %vm591_vm5, %v690_v12, %v694_v18  ;;  %v702_v54 = vor.u32 %v701_v13, %v697_v46  ;;  %v713_v11 = vrot.slane %v711_v8, 1  ;;  %v716_v12 = vshll.u32 %v4599_v3, 16 }
  0x5b   : > { %v723_v3 = vshll.u32 %v4608_v15, 16 }
  0x5c   : > { %4146 = vmatmul.mubr.msk.bf16.gmra.mrb[20].mxu1 %vm1068_vm4, %v4693_v31  ;;  %v718_v18 = vrot.slane %v716_v12, 1 }
  0x5d   : > { %4149 = vmatprep.mubr.msk.bf16.mxu1 %vm1068_vm4, %v4700_v38  ;;  %v725_v26 = vrot.slane %v723_v3, 1 }
  0x5e   : > { %888 = vrot.lane.b32.xlu1 %v4569_v52, %s4275_s29  ;;  %984 = vrot.lane.b32.xlu0 %v4566_v50, %s4275_s29 }
  0x62   : > { %920 = vrot.lane.b32.xlu1 %v4532_v19, %s4274_s28  ;;  %1016 = vrot.lane.b32.xlu0 %v4553_v27, %s4274_s28  ;;  %v704_v19 = vshll.u32 %v4576_v53, 16  ;;  %v4727_v53 = vsel %vm4356_vm2, %v520_v10, 0  ;;  %v709_v10 = vshrl.u32 %v4595_v2, 16 }
  0x63   : > { %v874_v49 = vrot.slane %v4727_v53, 1 }
  0x64   : > { %v706_v24 = vrot.slane %v704_v19, 1  ;;  %4150 = vmatmul.mubr.msk.bf16.gmra.mrb[24].mxu1 %vm1068_vm4, %v4737_v51 }
  0x65   : > { %v4740_v62 = vsel %vm811_vm3, %v873_v48, %v874_v49  ;;  %v733_v48 = vshrl.u32 %v4633_v34, 16  ;;  %v740_v49 = vshll.u32 %v4626_v30, 16  ;;  %v747_v30 = vshll.u32 %v4673_v59, 16 }
  0x66   : > { %952 = vrot.lane.b32.xlu1 %v4536_v20, %s4276_s17  ;;  %1048 = vrot.lane.b32.xlu0 %v4696_v36, %s4276_s17  ;;  %v4751_v7 = vsel %vm591_vm5, %v702_v54, %v706_v24 }
  0x67   : > { %4153 = vmatprep.mubr.msk.bf16.mxu1 %vm1068_vm4, %v4740_v62  ;;  %v742_v8 = vrot.slane %v740_v49, 1 }
  0x6a   : > { %890 = vrot.lane.b32.xlu1 %v4643_v40, %s4275_s29  ;;  %986 = vrot.lane.b32.xlu0 %v4572_v45, %s4275_s29 }
  0x6c   : > { %4154 = vmatmul.mubr.msk.bf16.gmra.mrb[28].mxu1 %vm1068_vm4, %v4326_v1 }
  0x6e   : > { %922 = vrot.lane.b32.xlu1 %v4566_v50, %s4274_s28  ;;  %1018 = vrot.lane.b32.xlu0 %v4587_v58, %s4274_s28  ;;  %v714_v50 = vor.u32 %v713_v11, %v709_v10 }
  0x70   : > { %v4771_v21 = vsel %vm591_vm5, %v714_v50, %v718_v18 }
  0x72   : > { %954 = vrot.lane.b32.xlu1 %v4553_v27, %s4276_s17  ;;  %1050 = vrot.lane.b32.xlu0 %v4751_v7, %s4276_s17 }
  0x76   : > { %892 = vrot.lane.b32.xlu1 %v4696_v36, %s4275_s29  ;;  %988 = vrot.lane.b32.xlu0 %v4617_v17, %s4275_s29 }
  0x7a   : > { %924 = vrot.lane.b32.xlu1 %v4572_v45, %s4274_s28  ;;  %1020 = vrot.lane.b32.xlu0 %v4595_v2, %s4274_s28  ;;  %v726_v45 = vor.u32 %v725_v26, %v721_v22  ;;  %v745_v22 = vshrl.u32 %v4673_v59, 16  ;;  %v749_v26 = vrot.slane %v747_v30, 1  ;;  %v759_v30 = vshll.u32 %v4684_v9, 16 }
  0x7c   : > { %v4789_v43 = vsel %vm591_vm5, %v726_v45, %v730_v37 }
  0x7e   : > { %956 = vrot.lane.b32.xlu1 %v4587_v58, %s4276_s17  ;;  %1052 = vrot.lane.b32.xlu0 %v4771_v21, %s4276_s17 }
  0x82   : > { %894 = vrot.lane.b32.xlu1 %v4751_v7, %s4275_s29  ;;  %990 = vrot.lane.b32.xlu0 %v4622_v29, %s4275_s29  ;;  %v877_v19 = vpop.permute.xlu0 %876  ;;  %v909_v42 = vpop.permute.xlu1 %908 }
  0x83   : > { %v1070_v3 = vsel %vm1068_vm4, 0, %v877_v19 }
  0x86   : > { %926 = vrot.lane.b32.xlu1 %v4617_v17, %s4274_s28  ;;  %1022 = vrot.lane.b32.xlu0 %v4608_v15, %s4274_s28  ;;  %v737_v17 = vrot.slane %v735_v16, 1  ;;  %v4826_v16 = vsel %vm1101_vm6, %v1070_v3, %v909_v42  ;;  %v764_v3 = vshll.u32 %v4677_v61, 16 }
  0x88   : > { %v738_v24 = vor.u32 %v737_v17, %v733_v48  ;;  %v750_v48 = vor.u32 %v749_v26, %v745_v22  ;;  %v754_v17 = vrot.slane %v752_v33, 1 }
  0x8a   : > { %958 = vrot.lane.b32.xlu1 %v4595_v2, %s4276_s17  ;;  %1054 = vrot.lane.b32.xlu0 %v4789_v43, %s4276_s17  ;;  %v4807_v12 = vsel %vm591_vm5, %v738_v24, %v742_v8  ;;  %v4841_v8 = vsel %vm591_vm5, %v750_v48, %v754_v17  ;;  %v769_v17 = vshrl.u32 %v4711_v39, 16 }
  0x8c   : > { %v1007_v46 = vpop.permute.xlu0 %1006  ;;  %v1005_v13 = vpop.permute.xlu1 %1004 }
  0x8e   : > { %896 = vrot.lane.b32.xlu1 %v4771_v21, %s4275_s29  ;;  %992 = vrot.lane.b32.xlu0 %v4654_v47, %s4275_s29 }
  0x90   : > { %v941_v54 = vpop.permute.xlu1 %940  ;;  %v973_v10 = vpop.permute.xlu0 %972 }
  0x91   : > { %v1185_v18 = vsel %vm1068_vm4, %v4431_v4, %v973_v10  ;;  %v1136_v57 = vsel %vm1134_vm7, %v4826_v16, %v941_v54 }
  0x92   : > { %928 = vrot.lane.b32.xlu1 %v4622_v29, %s4274_s28  ;;  %1024 = vrot.lane.b32.xlu0 %v4633_v34, %s4274_s28  ;;  %v1232_v37 = vsel %vm1101_vm6, %v1185_v18, %v1005_v13  ;;  %v761_v18 = vrot.slane %v759_v30, 1 }
  0x94   : > { %v943_v11 = vpop.permute.xlu1 %942  ;;  %v975_v50 = vpop.permute.xlu0 %974 }
  0x95   : > { %v1188_v4 = vsel %vm1068_vm4, %v4418_v60, %v975_v50  ;;  %v757_v50 = vshrl.u32 %v4684_v9, 16 }
  0x96   : > { %960 = vrot.lane.b32.xlu1 %v4608_v15, %s4276_s17  ;;  %1056 = vrot.lane.b32.xlu0 %v4807_v12, %s4276_s17  ;;  %v1234_v24 = vsel %vm1101_vm6, %v1188_v4, %v1007_v46 }
  0x98   : > { %v911_v29 = vpop.permute.xlu1 %910  ;;  %v1037_v45 = vpop.permute.xlu0 %1036 }
  0x99   : > { %v1264_v19 = vsel %vm1134_vm7, %v1232_v37, %v1037_v45  ;;  %v762_v45 = vor.u32 %v761_v18, %v757_v50  ;;  %v766_v37 = vrot.slane %v764_v3, 1  ;;  %v862_v3 = vshll.u32 %v4723_v44, 16 }
  0x9a   : > { %898 = vrot.lane.b32.xlu1 %v4789_v43, %s4275_s29  ;;  %994 = vrot.lane.b32.xlu0 %v4658_v56, %s4275_s29 }
  0x9b   : > { %1542 = vmatprep.mubr.bf16.mxu0 %v1264_v19 }
  0x9c   : > { %1543 = vmatmul.mubr.bf16.vlgmr.msra.gmra.mrb[0].mxu0 %v1136_v57  ;;  %v879_v13 = vpop.permute.xlu1 %878  ;;  %v1039_v60 = vpop.permute.xlu0 %1038  ;;  %v4869_v57 = vsel %vm591_vm5, %v762_v45, %v766_v37 }
  0x9d   : > { %v1072_v49 = vsel %vm1068_vm4, %v4381_v32, %v879_v13  ;;  %v1267_v42 = vsel %vm1134_vm7, %v1234_v24, %v1039_v60  ;;  %v771_v13 = vshll.u32 %v4711_v39, 16 }
  0x9e   : > { %930 = vrot.lane.b32.xlu1 %v4654_v47, %s4274_s28  ;;  %1026 = vrot.lane.b32.xlu0 %v4673_v59, %s4274_s28  ;;  %v1105_v10 = vsel %vm1101_vm6, %v1072_v49, %v911_v29  ;;  %v776_v49 = vshll.u32 %v4715_v41, 16 }
  0x9f   : > { %1550 = vmatprep.mubr.bf16.mxu0 %v1267_v42  ;;  %v1139_v47 = vsel %vm1134_vm7, %v1105_v10, %v943_v11  ;;  %v773_v60 = vrot.slane %v771_v13, 1 }
  0xa0   : > { %v881_v54 = vpop.permute.xlu1 %880  ;;  %v977_v32 = vpop.permute.xlu0 %976 }
  0xa1   : > { %v1074_v29 = vsel %vm1068_vm4, %v4371_v25, %v881_v54  ;;  %v1191_v11 = vsel %vm1068_vm4, %v4434_v6, %v977_v32  ;;  %v774_v32 = vor.u32 %v773_v60, %v769_v17 }
  0xa2   : > { %962 = vrot.lane.b32.xlu1 %v4633_v34, %s4276_s17  ;;  %1058 = vrot.lane.b32.xlu0 %v4841_v8, %s4276_s17 }
  0xa4   : > { %1551 = vmatmul.mubr.bf16.gmra.mrb[4].mxu0 %v1139_v47  ;;  %v913_v46 = vpop.permute.xlu1 %912  ;;  %v1009_v22 = vpop.permute.xlu0 %1008  ;;  %v778_v47 = vrot.slane %v776_v49, 1 }
  0xa5   : > { %v1107_v26 = vsel %vm1101_vm6, %v1074_v29, %v913_v46  ;;  %v1236_v61 = vsel %vm1101_vm6, %v1191_v11, %v1009_v22  ;;  %v860_v29 = vshrl.u32 %v4723_v44, 16  ;;  %v864_v11 = vrot.slane %v862_v3, 1 }
  0xa6   : > { %900 = vrot.lane.b32.xlu1 %v4807_v12, %s4275_s29  ;;  %996 = vrot.lane.b32.xlu0 %v4693_v31, %s4275_s29  ;;  %v4895_v18 = vsel %vm591_vm5, %v774_v32, %v778_v47 }
  0xa8   : > { %v945_v33 = vpop.permute.xlu1 %944  ;;  %v1041_v4 = vpop.permute.xlu0 %1040 }
  0xa9   : > { %v1142_v19 = vsel %vm1134_vm7, %v1107_v26, %v945_v33  ;;  %v1270_v25 = vsel %vm1134_vm7, %v1236_v61, %v1041_v4  ;;  %v867_v26 = vshll.u32 %v4727_v53, 16 }
  0xaa   : > { %932 = vrot.lane.b32.xlu1 %v4658_v56, %s4274_s28  ;;  %1028 = vrot.lane.b32.xlu0 %v4684_v9, %s4274_s28 }
  0xab   : > { %1558 = vmatprep.mubr.bf16.mxu0 %v1270_v25  ;;  %v869_v25 = vrot.slane %v867_v26, 1 }
  0xac   : > { %1559 = vmatmul.mubr.bf16.gmra.mrb[8].mxu0 %v1142_v19  ;;  %v883_v6 = vpop.permute.xlu1 %882  ;;  %v979_v48 = vpop.permute.xlu0 %978  ;;  %v865_v19 = vor.u32 %v864_v11, %v860_v29 }
  0xad   : > { %v1076_v42 = vsel %vm1068_vm4, %v4365_v23, %v883_v6  ;;  %v1194_v54 = vsel %vm1068_vm4, %v4481_v35, %v979_v48 }
  0xae   : > { %964 = vrot.lane.b32.xlu1 %v4673_v59, %s4276_s17  ;;  %1060 = vrot.lane.b32.xlu0 %v4869_v57, %s4276_s17  ;;  %v4921_v48 = vsel %vm591_vm5, %v865_v19, %v869_v25 }
  0xb0   : > { %v915_v56 = vpop.permute.xlu1 %914  ;;  %v1011_v24 = vpop.permute.xlu0 %1010 }
  0xb1   : > { %v1109_v10 = vsel %vm1101_vm6, %v1076_v42, %v915_v56  ;;  %v1238_v41 = vsel %vm1101_vm6, %v1194_v54, %v1011_v24 }
  0xb2   : > { %902 = vrot.lane.b32.xlu1 %v4841_v8, %s4275_s29  ;;  %998 = vrot.lane.b32.xlu0 %v4700_v38, %s4275_s29 }
  0xb4   : > { %v947_v30 = vpop.permute.xlu1 %946  ;;  %v1043_v46 = vpop.permute.xlu0 %1042 }
  0xb5   : > { %v1145_v50 = vsel %vm1134_vm7, %v1109_v10, %v947_v30  ;;  %v1273_v23 = vsel %vm1134_vm7, %v1238_v41, %v1043_v46 }
  0xb6   : > { %934 = vrot.lane.b32.xlu1 %v4693_v31, %s4274_s28  ;;  %1030 = vrot.lane.b32.xlu0 %v4711_v39, %s4274_s28 }
  0xb7   : > { %1566 = vmatprep.mubr.bf16.mxu0 %v1273_v23 }
  0xb8   : > { %1567 = vmatmul.mubr.bf16.gmra.mrb[12].mxu0 %v1145_v50  ;;  %v885_v35 = vpop.permute.xlu1 %884  ;;  %v981_v22 = vpop.permute.xlu0 %980 }
  0xb9   : > { %v1078_v45 = vsel %vm1068_vm4, %v4422_v63, %v885_v35  ;;  %v1197_v37 = vsel %vm1068_vm4, %v4518_v5, %v981_v22 }
  0xba   : > { %966 = vrot.lane.b32.xlu1 %v4684_v9, %s4276_s17  ;;  %1062 = vrot.lane.b32.xlu0 %v4895_v18, %s4276_s17 }
  0xbc   : > { %v917_v31 = vpop.permute.xlu1 %916  ;;  %v1013_v33 = vpop.permute.xlu0 %1012 }
  0xbd   : > { %v1111_v61 = vsel %vm1101_vm6, %v1078_v45, %v917_v31  ;;  %v1240_v53 = vsel %vm1101_vm6, %v1197_v37, %v1013_v33 }
  0xbe   : > { %904 = vrot.lane.b32.xlu1 %v4869_v57, %s4275_s29  ;;  %1000 = vrot.lane.b32.xlu0 %v4737_v51, %s4275_s29 }
  0xc0   : > { %v949_v4 = vpop.permute.xlu1 %948  ;;  %v1045_v6 = vpop.permute.xlu0 %1044 }
  0xc1   : > { %v1148_v13 = vsel %vm1134_vm7, %v1111_v61, %v949_v4  ;;  %v1276_v63 = vsel %vm1134_vm7, %v1240_v53, %v1045_v6 }
  0xc2   : > { %936 = vrot.lane.b32.xlu1 %v4700_v38, %s4274_s28  ;;  %1032 = vrot.lane.b32.xlu0 %v4723_v44, %s4274_s28 }
  0xc3   : > { %1574 = vmatprep.mubr.bf16.mxu0 %v1276_v63 }
  0xc4   : > { %1575 = vmatmul.mubr.bf16.gmra.mrb[16].mxu0 %v1148_v13  ;;  %v887_v5 = vpop.permute.xlu1 %886  ;;  %v983_v56 = vpop.permute.xlu0 %982 }
  0xc5   : > { %v1080_v60 = vsel %vm1068_vm4, %v4467_v28, %v887_v5  ;;  %v1200_v49 = vsel %vm1068_vm4, %v4569_v52, %v983_v56 }
  0xc6   : > { %968 = vrot.lane.b32.xlu1 %v4711_v39, %s4276_s17  ;;  %1064 = vrot.lane.b32.xlu0 %v4921_v48, %s4276_s17 }
  0xc8   : > { %v919_v17 = vpop.permute.xlu1 %918  ;;  %v1015_v38 = vpop.permute.xlu0 %1014 }
  0xc9   : > { %v1113_v24 = vsel %vm1101_vm6, %v1080_v60, %v919_v17  ;;  %v1242_v54 = vsel %vm1101_vm6, %v1200_v49, %v1015_v38 }
  0xca   : > { %906 = vrot.lane.b32.xlu1 %v4895_v18, %s4275_s29  ;;  %1002 = vrot.lane.b32.xlu0 %v4740_v62, %s4275_s29 }
  0xcc   : > { %v951_v42 = vpop.permute.xlu1 %950  ;;  %v1047_v10 = vpop.permute.xlu0 %1046 }
  0xcd   : > { %v1151_v30 = vsel %vm1134_vm7, %v1113_v24, %v951_v42  ;;  %v1279_v32 = vsel %vm1134_vm7, %v1242_v54, %v1047_v10 }
  0xce   : > { %938 = vrot.lane.b32.xlu1 %v4737_v51, %s4274_s28  ;;  %1034 = vrot.lane.b32.xlu0 %v4273_v0, %s4274_s28 }
  0xcf   : > { %1582 = vmatprep.mubr.bf16.mxu0 %v1279_v32 }
  0xd0   : > { %1583 = vmatmul.mubr.bf16.gmra.mrb[20].mxu0 %v1151_v30  ;;  %v889_v28 = vpop.permute.xlu1 %888  ;;  %v985_v52 = vpop.permute.xlu0 %984 }
  0xd1   : > { %v1082_v51 = vsel %vm1068_vm4, %v4506_v55, %v889_v28  ;;  %v1203_v41 = vsel %vm1068_vm4, %v4643_v40, %v985_v52 }
  0xd2   : > { %970 = vrot.lane.b32.xlu1 %v4723_v44, %s4276_s17  ;;  %1066 = vrot.lane.b32.xlu0 %v4326_v1, %s4276_s17 }
  0xd4   : > { %v921_v62 = vpop.permute.xlu1 %920  ;;  %v1017_v47 = vpop.permute.xlu0 %1016 }
  0xd5   : > { %v1115_v0 = vsel %vm1101_vm6, %v1082_v51, %v921_v62  ;;  %v1244_v50 = vsel %vm1101_vm6, %v1203_v41, %v1017_v47 }
  0xd8   : > { %v953_v46 = vpop.permute.xlu1 %952  ;;  %v1049_v23 = vpop.permute.xlu0 %1048 }
  0xd9   : > { %v1154_v35 = vsel %vm1134_vm7, %v1115_v0, %v953_v46  ;;  %v1282_v44 = vsel %vm1134_vm7, %v1244_v50, %v1049_v23 }
  0xda   : > { %1590 = vmatprep.mubr.bf16.mxu0 %v1282_v44 }
  0xdb   : > { %1591 = vmatmul.mubr.bf16.gmra.mrb[24].mxu0 %v1154_v35 }
  0xdc   : > { %v891_v3 = vpop.permute.xlu1 %890  ;;  %v987_v22 = vpop.permute.xlu0 %986 }
  0xdd   : > { %v1084_v55 = vsel %vm1068_vm4, %v4536_v20, %v891_v3  ;;  %v1206_v40 = vsel %vm1068_vm4, %v4696_v36, %v987_v22 }
  0xe0   : > { %v923_v31 = vpop.permute.xlu1 %922  ;;  %v1019_v29 = vpop.permute.xlu0 %1018 }
  0xe1   : > { %v1117_v11 = vsel %vm1101_vm6, %v1084_v55, %v923_v31  ;;  %v1246_v33 = vsel %vm1101_vm6, %v1206_v40, %v1019_v29 }
  0xe4   : > { %v955_v26 = vpop.permute.xlu1 %954  ;;  %v1051_v45 = vpop.permute.xlu0 %1050 }
  0xe5   : > { %v1157_v37 = vsel %vm1134_vm7, %v1117_v11, %v955_v26  ;;  %v1285_v61 = vsel %vm1134_vm7, %v1246_v33, %v1051_v45 }
  0xe6   : > { %1598 = vmatprep.mubr.bf16.mxu0 %v1285_v61 }
  0xe7   : > { %1599 = vmatmul.mubr.bf16.gmra.mrb[28].mxu0 %v1157_v37 }
  0xe8   : > { %v893_v4 = vpop.permute.xlu1 %892  ;;  %v989_v19 = vpop.permute.xlu0 %988 }
  0xe9   : > { %v1086_v20 = vsel %vm1068_vm4, %v4553_v27, %v893_v4  ;;  %v1209_v36 = vsel %vm1068_vm4, %v4751_v7, %v989_v19 }
  0xec   : > { %v925_v25 = vpop.permute.xlu1 %924  ;;  %v1021_v53 = vpop.permute.xlu0 %1020 }
  0xed   : > { %v1119_v6 = vsel %vm1101_vm6, %v1086_v20, %v925_v25  ;;  %v1248_v63 = vsel %vm1101_vm6, %v1209_v36, %v1021_v53 }
  0xf0   : > { %v957_v13 = vpop.permute.xlu1 %956  ;;  %v1053_v5 = vpop.permute.xlu0 %1052 }
  0xf1   : > { %v1160_v56 = vsel %vm1134_vm7, %v1119_v6, %v957_v13  ;;  %v1288_v17 = vsel %vm1134_vm7, %v1248_v63, %v1053_v5 }
  0xf2   : > { %1606 = vmatprep.mubr.bf16.mxu0 %v1288_v17 }
  0xf3   : > { %1607 = vmatmul.mubr.bf16.gmra.mrb[32].mxu0 %v1160_v56 }
  0xf4   : > { %v895_v38 = vpop.permute.xlu1 %894  ;;  %v991_v60 = vpop.permute.xlu0 %990 }
  0xf5   : > { %v1088_v27 = vsel %vm1068_vm4, %v4587_v58, %v895_v38  ;;  %v1212_v7 = vsel %vm1068_vm4, %v4771_v21, %v991_v60 }
  0xf8   : > { %v927_v49 = vpop.permute.xlu1 %926  ;;  %v1023_v24 = vpop.permute.xlu0 %1022 }
  0xf9   : > { %v1121_v42 = vsel %vm1101_vm6, %v1088_v27, %v927_v49  ;;  %v1250_v10 = vsel %vm1101_vm6, %v1212_v7, %v1023_v24 }
  0xfc   : > { %v959_v54 = vpop.permute.xlu1 %958  ;;  %v1055_v30 = vpop.permute.xlu0 %1054 }
  0xfd   : > { %v1163_v32 = vsel %vm1134_vm7, %v1121_v42, %v959_v54  ;;  %v1291_v28 = vsel %vm1134_vm7, %v1250_v10, %v1055_v30 }
  0xfe   : > { %1614 = vmatprep.mubr.bf16.mxu0 %v1291_v28  ;;  %v4987_v22 = vpop.f32.mrb[0].mxu1 }
  0xff   : > { %1615 = vmatmul.mubr.bf16.gmra.mrb[36].mxu0 %v1163_v32  ;;  %v4989_v31 = vpop.f32.mrb[1].mxu1 }
 0x100   : > { %v897_v52 = vpop.permute.xlu1 %896  ;;  %v993_v62 = vpop.permute.xlu0 %992 }
 0x101   : > { %v1090_v58 = vsel %vm1068_vm4, %v4595_v2, %v897_v52  ;;  %v1215_v21 = vsel %vm1068_vm4, %v4789_v43, %v993_v62  ;;  %v4991_v29 = vpop.f32.mrb[2].mxu1 }
 0x102   : > { %v4993_v55 = vpop.f32.mrb[3].mxu1 }
 0x104   : > { %v929_v47 = vpop.permute.xlu1 %928  ;;  %v1025_v51 = vpop.permute.xlu0 %1024 }
 0x105   : > { %v1123_v41 = vsel %vm1101_vm6, %v1090_v58, %v929_v47  ;;  %v1252_v46 = vsel %vm1101_vm6, %v1215_v21, %v1025_v51 }
 0x108   : > { %v961_v0 = vpop.permute.xlu1 %960  ;;  %v1057_v50 = vpop.permute.xlu0 %1056 }
 0x109   : > { %v1166_v23 = vsel %vm1134_vm7, %v1123_v41, %v961_v0  ;;  %v1294_v35 = vsel %vm1134_vm7, %v1252_v46, %v1057_v50 }
 0x10a   : > { %1622 = vmatprep.mubr.bf16.mxu0 %v1294_v35  ;;  %v5003_v19 = vpop.f32.mrb[4].mxu1 }
 0x10b   : > { %1623 = vmatmul.mubr.bf16.gmra.mrb[40].mxu0 %v1166_v23  ;;  %v5005_v53 = vpop.f32.mrb[5].mxu1 }
 0x10c   : > { %v899_v44 = vpop.permute.xlu1 %898  ;;  %v995_v3 = vpop.permute.xlu0 %994 }
 0x10d   : > { %v1092_v40 = vsel %vm1068_vm4, %v4608_v15, %v899_v44  ;;  %v1218_v11 = vsel %vm1068_vm4, %v4807_v12, %v995_v3  ;;  %v5007_v20 = vpop.f32.mrb[6].mxu1 }
 0x10e   : > { %v5009_v12 = vpop.f32.mrb[7].mxu1 }
 0x110   : > { %v931_v2 = vpop.permute.xlu1 %930  ;;  %v1027_v43 = vpop.permute.xlu0 %1026 }
 0x111   : > { %v1125_v26 = vsel %vm1101_vm6, %v1092_v40, %v931_v2  ;;  %v1254_v45 = vsel %vm1101_vm6, %v1218_v11, %v1027_v43 }
 0x112   : > { %v5013_v63 = vpop.f32.mrb[8].mxu1 }
 0x113   : > { %v5018_v38 = vpop.f32.mrb[9].mxu1 }
 0x114   : > { %v963_v33 = vpop.permute.xlu1 %962  ;;  %v1059_v37 = vpop.permute.xlu0 %1058 }
 0x115   : > { %v1169_v61 = vsel %vm1134_vm7, %v1125_v26, %v963_v33  ;;  %v1297_v4 = vsel %vm1134_vm7, %v1254_v45, %v1059_v37  ;;  %v5022_v27 = vpop.f32.mrb[10].mxu1 }
 0x116   : > { %1630 = vmatprep.mubr.bf16.mxu0 %v1297_v4 }
 0x117   : > { %1631 = vmatmul.mubr.bf16.gmra.mrb[44].mxu0 %v1169_v61 }
 0x118   : > { %v901_v25 = vpop.permute.xlu1 %900  ;;  %v997_v15 = vpop.permute.xlu0 %996 }
 0x119   : > { %v1094_v13 = vsel %vm1068_vm4, %v4633_v34, %v901_v25  ;;  %v1221_v5 = vsel %vm1068_vm4, %v4841_v8, %v997_v15  ;;  %v5025_v34 = vpop.f32.mrb[11].mxu1 }
 0x11c   : > { %v933_v36 = vpop.permute.xlu1 %932  ;;  %v1029_v6 = vpop.permute.xlu0 %1028 }
 0x11d   : > { %v1127_v56 = vsel %vm1101_vm6, %v1094_v13, %v933_v36  ;;  %v1256_v60 = vsel %vm1101_vm6, %v1221_v5, %v1029_v6 }
 0x11f   : > { %v5035_v0 = vpop.f32.mrb[12].mxu1 }
 0x120   : > { %v965_v17 = vpop.permute.xlu1 %964  ;;  %v1061_v49 = vpop.permute.xlu0 %1060 }
 0x121   : > { %v1172_v24 = vsel %vm1134_vm7, %v1127_v56, %v965_v17  ;;  %v1300_v7 = vsel %vm1134_vm7, %v1256_v60, %v1061_v49  ;;  %v5037_v46 = vpop.f32.mrb[13].mxu1 }
 0x122   : > { %1638 = vmatprep.mubr.bf16.mxu0 %v1300_v7  ;;  %v5039_v50 = vpop.f32.mrb[14].mxu1 }
 0x123   : > { %1639 = vmatmul.mubr.bf16.gmra.mrb[48].mxu0 %v1172_v24  ;;  %v5041_v23 = vpop.f32.mrb[15].mxu1 }
 0x124   : > { %v903_v42 = vpop.permute.xlu1 %902  ;;  %v999_v8 = vpop.permute.xlu0 %998 }
 0x125   : > { %v1096_v30 = vsel %vm1068_vm4, %v4673_v59, %v903_v42  ;;  %v1224_v32 = vsel %vm1068_vm4, %v4869_v57, %v999_v8  ;;  %v5084_v8 = vld [vmem:[%s6352_s4] ss:$0 sm:$0xff] }
 0x127   : > { %v5065_v5 = vpop.f32.mrb[16].mxu1 }
 0x128   : > { %v935_v54 = vpop.permute.xlu1 %934  ;;  %v1031_v10 = vpop.permute.xlu0 %1030 }
 0x129   : > { %v1129_v28 = vsel %vm1101_vm6, %v1096_v30, %v935_v54  ;;  %v1258_v62 = vsel %vm1101_vm6, %v1224_v32, %v1031_v10 }
 0x12c   : > { %v967_v52 = vpop.permute.xlu1 %966  ;;  %v1063_v47 = vpop.permute.xlu0 %1062 }
 0x12d   : > { %v1175_v51 = vsel %vm1134_vm7, %v1129_v28, %v967_v52  ;;  %v1303_v58 = vsel %vm1134_vm7, %v1258_v62, %v1063_v47 }
 0x12e   : > { %1646 = vmatprep.mubr.bf16.mxu0 %v1303_v58 }
 0x12f   : > { %1647 = vmatmul.mubr.bf16.gmra.mrb[52].mxu0 %v1175_v51 }
 0x130   : > { %v905_v21 = vpop.permute.xlu1 %904  ;;  %v1001_v41 = vpop.permute.xlu0 %1000 }
 0x131   : > { %v1098_v35 = vsel %vm1068_vm4, %v4684_v9, %v905_v21  ;;  %v1227_v44 = vsel %vm1068_vm4, %v4895_v18, %v1001_v41 }
 0x134   : > { %v937_v59 = vpop.permute.xlu1 %936  ;;  %v1033_v57 = vpop.permute.xlu0 %1032 }
 0x135   : > { %v1131_v3 = vsel %vm1101_vm6, %v1098_v35, %v937_v59  ;;  %v1260_v43 = vsel %vm1101_vm6, %v1227_v44, %v1033_v57 }
 0x138   : > { %v969_v2 = vpop.permute.xlu1 %968  ;;  %v1065_v40 = vpop.permute.xlu0 %1064 }
 0x139   : > { %v1178_v11 = vsel %vm1134_vm7, %v1131_v3, %v969_v2  ;;  %v1306_v26 = vsel %vm1134_vm7, %v1260_v43, %v1065_v40 }
 0x13a   : > { %1654 = vmatprep.mubr.bf16.mxu0 %v1306_v26 }
 0x13b   : > { %1655 = vmatmul.mubr.bf16.gmra.mrb[56].mxu0 %v1178_v11 }
 0x13c   : > { %v907_v33 = vpop.permute.xlu1 %906  ;;  %v1003_v45 = vpop.permute.xlu0 %1002 }
 0x13d   : > { %v1100_v9 = vsel %vm1068_vm4, %v4711_v39, %v907_v33  ;;  %v1230_v18 = vsel %vm1068_vm4, %v4921_v48, %v1003_v45  ;;  %v5067_v39 = vpop.f32.mrb[17].mxu1 }
 0x13e   : > { %v5069_v48 = vpop.f32.mrb[18].mxu1 }
 0x13f   : > { %v5071_v56 = vpop.f32.mrb[19].mxu1 }
 0x140   : > { %v939_v37 = vpop.permute.xlu1 %938  ;;  %v5051_v61 = vpop.permute.xlu0 %1034 }
 0x141   : > { %6362 = vst [vmem:[#allocation3_spill] sm:$0xff] %v5051_v61  ;;  %v1133_v4 = vsel %vm1101_vm6, %v1100_v9, %v939_v37  ;;  %v1262_v15 = vsel %vm1101_vm6, %v1230_v18, %v5051_v61  ;;  %v5073_v17 = vpop.f32.mrb[20].mxu1  ;;  %v5122_v18 = vld [vmem:[%s6353_s5 + $0x80] sm:$0xff]  }
 0x142   : > { %v5075_v60 = vpop.f32.mrb[21].mxu1  ;;  %4157 = vmatprep.subr.bf16.mxu0 %v5122_v18 }
 0x143   : > { %v5077_v49 = vpop.f32.mrb[22].mxu1  ;;  %4158 = vmatpush3.bf16.msra.mxu0 %v5122_v18 }
 0x144   : > { %v971_v25 = vpop.permute.xlu1 %970  ;;  %v5060_v36 = vpop.permute.xlu0 %1066 }
 0x145   : > { %6363 = vst [vmem:[#allocation4_spill] sm:$0xff] %v5060_v36  ;;  %v1181_v6 = vsel %vm1134_vm7, %v1133_v4, %v971_v25  ;;  %v1309_v13 = vsel %vm1134_vm7, %v1262_v15, %v5060_v36  ;;  %v5079_v24 = vpop.f32.mrb[23].mxu1  ;;  %v4244_v15 = vld [vmem:[%s6353_s5 + $0x88] sm:$0xff]  }
 0x146   : > { %1662 = vmatprep.mubr.bf16.mxu0 %v1309_v13  ;;  %v5099_v35 = vpop.f32.mrb[24].mxu1  ;;  %4159 = vmatprep.subr.bf16.mxu0 %v4244_v15 }
 0x147   : > { %1663 = vmatmul.mubr.bf16.gmra.mrb[60].mxu0 %v1181_v6  ;;  %v5101_v44 = vpop.f32.mrb[25].mxu1 }
 0x148   : > { %v5107_v2 = vpop.f32.mrb[26].mxu1  ;;  %4160 = vmatpush3.bf16.msra.mxu0 %v4244_v15 }
 0x149   : > { %v5109_v43 = vpop.f32.mrb[27].mxu1 }
 0x16f   : > { %v3877_v7 = vpop.f32.mrb[0].mxu0 }
 0x170   : > { %v3878_v42 = vpop.f32.mrb[1].mxu0 }
 0x171   : > { %v3879_v54 = vadd.f32 %v3878_v42, %v3877_v7  ;;  %v3880_v10 = vpop.f32.mrb[2].mxu0 }
 0x172   : > { %v3881_v30 = vpop.f32.mrb[3].mxu0 }
 0x173   : > { %v3882_v32 = vadd.f32 %v3881_v30, %v3880_v10  ;;  %v1545_v28 = vadd.f32 %v3879_v54, %v5084_v8 }
 0x175   : > { %v5088_v52 = vadd.f32 %v4989_v31, %v1545_v28  ;;  %v1548_v62 = vadd.f32 %v3882_v32, %v5084_v8  ;;  %v5150_v28 = vpop.f32.mrb[28].mxu1 }
 0x177   : > { %v5092_v47 = vadd.f32 %v4993_v55, %v1548_v62  ;;  %v3883_v51 = vpop.f32.mrb[4].mxu0  ;;  %2034 = vrot.lane.b32.xlu0 %v5088_v52, %s4276_s17  ;;  %v5152_v62 = vpop.f32.mrb[29].mxu1 }
 0x178   : > { %v3884_v58 = vpop.f32.mrb[5].mxu0 }
 0x179   : > { %v3885_v21 = vadd.f32 %v3884_v58, %v3883_v51  ;;  %v3886_v41 = vpop.f32.mrb[6].mxu0  ;;  %2036 = vrot.lane.b32.xlu1 %v5092_v47, %s4276_s17  ;;  %v5156_v51 = vpop.f32.mrb[30].mxu1 }
 0x17a   : > { %v3887_v59 = vpop.f32.mrb[7].mxu0  ;;  %v5158_v58 = vpop.f32.mrb[31].mxu1 }
 0x17b   : > { %v1553_v57 = vadd.f32 %v3885_v21, %v5084_v8  ;;  %v3888_v31 = vadd.f32 %v3887_v59, %v3886_v41 }
 0x17d   : > { %v5104_v55 = vadd.f32 %v4987_v22, %v1553_v57  ;;  %v1556_v3 = vadd.f32 %v3888_v31, %v5084_v8 }
 0x17f   : > { %v5112_v40 = vadd.f32 %v4991_v29, %v1556_v3  ;;  %v3889_v11 = vpop.f32.mrb[8].mxu0  ;;  %2038 = vrot.lane.b32.xlu0 %v5104_v55, %s4276_s17 }
 0x180   : > { %v3890_v26 = vpop.f32.mrb[9].mxu0 }
 0x181   : > { %v3891_v33 = vadd.f32 %v3890_v26, %v3889_v11  ;;  %v3892_v45 = vpop.f32.mrb[10].mxu0  ;;  %2040 = vrot.lane.b32.xlu1 %v5112_v40, %s4276_s17 }
 0x182   : > { %v3893_v22 = vpop.f32.mrb[11].mxu0 }
 0x183   : > { %v3894_v37 = vadd.f32 %v3893_v22, %v3892_v45  ;;  %v1561_v9 = vadd.f32 %v3891_v33, %v5084_v8 }
 0x185   : > { %v5125_v29 = vadd.f32 %v5005_v53, %v1561_v9  ;;  %v1564_v4 = vadd.f32 %v3894_v37, %v5084_v8 }
 0x187   : > { %v5131_v25 = vadd.f32 %v5009_v12, %v1564_v4  ;;  %2042 = vrot.lane.b32.xlu0 %v5125_v29, %s4276_s17 }
 0x189   : > { %2044 = vrot.lane.b32.xlu1 %v5131_v25, %s4276_s17 }
 0x18b   : > { %v3895_v53 = vpop.f32.mrb[12].mxu0 }
 0x18c   : > { %v3896_v6 = vpop.f32.mrb[13].mxu0 }
 0x18d   : > { %v3897_v13 = vadd.f32 %v3896_v6, %v3895_v53  ;;  %v3898_v7 = vpop.f32.mrb[14].mxu0 }
 0x18e   : > { %v3899_v42 = vpop.f32.mrb[15].mxu0 }
 0x18f   : > { %v1569_v12 = vadd.f32 %v3897_v13, %v5084_v8  ;;  %v3900_v54 = vadd.f32 %v3899_v42, %v3898_v7 }
 0x191   : > { %v5142_v10 = vadd.f32 %v5003_v19, %v1569_v12  ;;  %v1572_v30 = vadd.f32 %v3900_v54, %v5084_v8 }
 0x193   : > { %v5146_v32 = vadd.f32 %v5007_v20, %v1572_v30  ;;  %2046 = vrot.lane.b32.xlu0 %v5142_v10, %s4276_s17 }
 0x195   : > { %2048 = vrot.lane.b32.xlu1 %v5146_v32, %s4276_s17 }
 0x197   : > { %v3901_v19 = vpop.f32.mrb[16].mxu0 }
 0x198   : > { %v3902_v21 = vpop.f32.mrb[17].mxu0 }
 0x199   : > { %v3903_v41 = vadd.f32 %v3902_v21, %v3901_v19  ;;  %v3904_v59 = vpop.f32.mrb[18].mxu0 }
 0x19a   : > { %v3905_v20 = vpop.f32.mrb[19].mxu0 }
 0x19b   : > { %v3906_v57 = vadd.f32 %v3905_v20, %v3904_v59  ;;  %v1577_v31 = vadd.f32 %v3903_v41, %v5084_v8 }
 0x19d   : > { %v5162_v3 = vadd.f32 %v5018_v38, %v1577_v31  ;;  %v1580_v11 = vadd.f32 %v3906_v57, %v5084_v8 }
 0x19f   : > { %v5166_v26 = vadd.f32 %v5025_v34, %v1580_v11  ;;  %2050 = vrot.lane.b32.xlu0 %v5162_v3, %s4276_s17 }
 0x1a1   : > { %2052 = vrot.lane.b32.xlu1 %v5166_v26, %s4276_s17 }
 0x1a3   : > { %v3907_v33 = vpop.f32.mrb[20].mxu0 }
 0x1a4   : > { %v3908_v45 = vpop.f32.mrb[21].mxu0 }
 0x1a5   : > { %v3909_v22 = vadd.f32 %v3908_v45, %v3907_v33  ;;  %v3910_v37 = vpop.f32.mrb[22].mxu0 }
 0x1a6   : > { %v3911_v9 = vpop.f32.mrb[23].mxu0 }
 0x1a7   : > { %v1585_v4 = vadd.f32 %v3909_v22, %v5084_v8  ;;  %v3912_v38 = vadd.f32 %v3911_v9, %v3910_v37 }
 0x1a9   : > { %v5174_v15 = vadd.f32 %v5013_v63, %v1585_v4  ;;  %v1588_v34 = vadd.f32 %v3912_v38, %v5084_v8 }
 0x1ab   : > { %v5178_v53 = vadd.f32 %v5022_v27, %v1588_v34  ;;  %2054 = vrot.lane.b32.xlu0 %v5174_v15, %s4276_s17 }
 0x1ad   : > { %2056 = vrot.lane.b32.xlu1 %v5178_v53, %s4276_s17 }
 0x1ae   : > { %v3913_v6 = vpop.f32.mrb[24].mxu0 }
 0x1af   : > { %v3914_v13 = vpop.f32.mrb[25].mxu0 }
 0x1b0   : > { %v3915_v7 = vadd.f32 %v3914_v13, %v3913_v6  ;;  %v3916_v42 = vpop.f32.mrb[26].mxu0 }
 0x1b1   : > { %v3917_v12 = vpop.f32.mrb[27].mxu0 }
 0x1b2   : > { %v3918_v54 = vadd.f32 %v3917_v12, %v3916_v42  ;;  %v1593_v63 = vadd.f32 %v3915_v7, %v5084_v8 }
 0x1b4   : > { %v5186_v30 = vadd.f32 %v5037_v46, %v1593_v63  ;;  %v1596_v27 = vadd.f32 %v3918_v54, %v5084_v8 }
 0x1b6   : > { %v5190_v19 = vadd.f32 %v5041_v23, %v1596_v27  ;;  %2058 = vrot.lane.b32.xlu0 %v5186_v30, %s4276_s17 }
 0x1b8   : > { %2060 = vrot.lane.b32.xlu1 %v5190_v19, %s4276_s17 }
 0x1ba   : > { %v3919_v21 = vpop.f32.mrb[28].mxu0 }
 0x1bb   : > { %v3920_v41 = vpop.f32.mrb[29].mxu0 }
 0x1bc   : > { %v3921_v59 = vadd.f32 %v3920_v41, %v3919_v21  ;;  %v3922_v20 = vpop.f32.mrb[30].mxu0  ;;  %v1834_v41 = vld [vmem:[%s5229_s19] sm:$0xff] }
 0x1bd   : > { %v3923_v57 = vpop.f32.mrb[31].mxu0 }
 0x1be   : > { %v1601_v31 = vadd.f32 %v3921_v59, %v5084_v8  ;;  %v3924_v46 = vadd.f32 %v3923_v57, %v3922_v20  ;;  %v1835_v20 = vld [vmem:[%s5229_s19 + $0x8] sm:$0xff] }
 0x1c0   : > { %v5198_v11 = vadd.f32 %v5035_v0, %v1601_v31  ;;  %v1604_v23 = vadd.f32 %v3924_v46, %v5084_v8 }
 0x1c2   : > { %v5202_v33 = vadd.f32 %v5039_v50, %v1604_v23  ;;  %2062 = vrot.lane.b32.xlu0 %v5198_v11, %s4276_s17  ;;  %v5249_v23 = vld [vmem:[%s6350_s2 + $0x1] ss:$0 sm:$0xff] }
 0x1c4   : > { %2064 = vrot.lane.b32.xlu1 %v5202_v33, %s4276_s17 }
 0x1c6   : > { %v3925_v45 = vpop.f32.mrb[32].mxu0 }
 0x1c7   : > { %v3926_v22 = vpop.f32.mrb[33].mxu0 }
 0x1c8   : > { %v3927_v37 = vadd.f32 %v3926_v22, %v3925_v45  ;;  %v3928_v9 = vpop.f32.mrb[34].mxu0 }
 0x1c9   : > { %v3929_v4 = vpop.f32.mrb[35].mxu0 }
 0x1ca   : > { %v3930_v38 = vadd.f32 %v3929_v4, %v3928_v9  ;;  %v1609_v0 = vadd.f32 %v3927_v37, %v5084_v8  ;;  %v1938_v4 = vadd.f32 1.0, %v5088_v52 }
 0x1cc   : > { %v5210_v34 = vadd.f32 %v5067_v39, %v1609_v0  ;;  %v1612_v50 = vadd.f32 %v3930_v38, %v5084_v8 }
 0x1ce   : > { %v5214_v6 = vadd.f32 %v5071_v56, %v1612_v50  ;;  %2066 = vrot.lane.b32.xlu0 %v5210_v34, %s4276_s17 }
 0x1d0   : > { %2068 = vrot.lane.b32.xlu1 %v5214_v6, %s4276_s17 }
 0x1d2   : > { %v3931_v13 = vpop.f32.mrb[36].mxu0 }
 0x1d3   : > { %v3932_v7 = vpop.f32.mrb[37].mxu0 }
 0x1d4   : > { %v3933_v42 = vadd.f32 %v3932_v7, %v3931_v13  ;;  %v3934_v12 = vpop.f32.mrb[38].mxu0  ;;  %v1836_v13 = vld [vmem:[%s5229_s19 + $0x10] sm:$0xff]  ;;  %v1939_v7 = vadd.f32 1.0, %v5092_v47 }
 0x1d5   : > { %v3935_v54 = vpop.f32.mrb[39].mxu0 }
 0x1d6   : > { %v1617_v63 = vadd.f32 %v3933_v42, %v5084_v8  ;;  %v3936_v39 = vadd.f32 %v3935_v54, %v3934_v12  ;;  %v1837_v54 = vld [vmem:[%s5229_s19 + $0x18] sm:$0xff] }
 0x1d8   : > { %v5222_v27 = vadd.f32 %v5065_v5, %v1617_v63  ;;  %v1620_v56 = vadd.f32 %v3936_v39, %v5084_v8  ;;  %v5241_v5 = vld [vmem:[%s6350_s2] ss:$0 sm:$0xff] }
 0x1d9   : > { %v1870_v31 = vsub.f32 %v1834_v41, %v5241_v5  ;;  %v1871_v22 = vsub.f32 %v1835_v20, %v5241_v5  ;;  %v1872_v63 = vsub.f32 %v1836_v13, %v5241_v5  ;;  %v1873_v47 = vsub.f32 %v1837_v54, %v5241_v5 }
 0x1da   : > { %v5232_v21 = vadd.f32 %v5069_v48, %v1620_v56  ;;  %2070 = vrot.lane.b32.xlu0 %v5222_v27, %s4276_s17 }
 0x1db   : > { %v1906_v38 = vmul.f32 %v5249_v23, %v1870_v31  ;;  %v1907_v42 = vmul.f32 %v5249_v23, %v1871_v22  ;;  %v1940_v31 = vadd.f32 1.0, %v5104_v55  ;;  %v1838_v22 = vld [vmem:[%s5229_s19 + $0x20] sm:$0xff] }
 0x1dc   : > { %2072 = vrot.lane.b32.xlu1 %v5232_v21, %s4276_s17 }
 0x1dd   : > { %v1970_v52 = vmul.f32 %v1938_v4, %v1906_v38  ;;  %v1971_v56 = vmul.f32 %v1939_v7, %v1907_v42  ;;  %v1941_v4 = vadd.f32 1.0, %v5112_v40  ;;  %v1909_v38 = vmul.f32 %v5249_v23, %v1873_v47  ;;  %v1839_v7 = vld [vmem:[%s5229_s19 + $0x28] sm:$0xff] }
 0x1de   : > { %v3937_v59 = vpop.f32.mrb[40].mxu0  ;;  %v1875_v47 = vsub.f32 %v1839_v7, %v5241_v5  ;;  %v1840_v7 = vld [vmem:[%s5229_s19 + $0x30] sm:$0xff] }
 0x1df   : > { %v3938_v57 = vpop.f32.mrb[41].mxu0 }
 0x1e0   : > { %v3939_v48 = vadd.f32 %v3938_v57, %v3937_v59  ;;  %v3940_v46 = vpop.f32.mrb[42].mxu0 }
 0x1e1   : > { %v3941_v45 = vpop.f32.mrb[43].mxu0 }
 0x1e2   : > { %v3942_v37 = vadd.f32 %v3941_v45, %v3940_v46  ;;  %v1625_v9 = vadd.f32 %v3939_v48, %v5084_v8  ;;  %v1908_v48 = vmul.f32 %v5249_v23, %v1872_v63 }
 0x1e4   : > { %v5256_v0 = vadd.f32 %v5075_v60, %v1625_v9  ;;  %v1628_v50 = vadd.f32 %v3942_v37, %v5084_v8  ;;  %v1972_v55 = vmul.f32 %v1940_v31, %v1908_v48  ;;  %v1943_v48 = vadd.f32 1.0, %v5131_v25 }
 0x1e6   : > { %v5263_v12 = vadd.f32 %v5079_v24, %v1628_v50  ;;  %2074 = vrot.lane.b32.xlu0 %v5256_v0, %s4276_s17 }
 0x1e8   : > { %2076 = vrot.lane.b32.xlu1 %v5263_v12, %s4276_s17 }
 0x1e9   : > { %v2035_v60 = vpop.permute.xlu0 %2034 }
 0x1ea   : > { %v2130_v39 = vadd.f32 %v2035_v60, %v1970_v52  ;;  %v3943_v41 = vpop.f32.mrb[44].mxu0  ;;  %v1874_v52 = vsub.f32 %v1838_v22, %v5241_v5 }
 0x1eb   : > { %v2037_v59 = vpop.permute.xlu1 %2036  ;;  %v3944_v57 = vpop.f32.mrb[45].mxu0 }
 0x1ec   : > { %v2194_v24 = vmul.f32 0.2, %v2130_v39  ;;  %v2131_v20 = vadd.f32 %v2037_v59, %v1971_v56  ;;  %vm2162_vm8 = vcmp.ge.f32.partialorder %v2130_v39, 0.0  ;;  %v3945_v46 = vadd.f32 %v3944_v57, %v3943_v41  ;;  %v3946_v45 = vpop.f32.mrb[46].mxu0 }
 0x1ed   : > { %v3947_v9 = vpop.f32.mrb[47].mxu0  ;;  %v1973_v59 = vmul.f32 %v1941_v4, %v1909_v38 }
 0x1ee   : > { %vm2163_vm9 = vcmp.ge.f32.partialorder %v2131_v20, 0.0  ;;  %v2195_v37 = vmul.f32 0.2, %v2131_v20  ;;  %v1633_v50 = vadd.f32 %v3945_v46, %v5084_v8  ;;  %v3948_v13 = vadd.f32 %v3947_v9, %v3946_v45 }
 0x1ef   : > { %v2226_v42 = vsel %vm2162_vm8, %v2130_v39, %v2194_v24  ;;  %v1942_v24 = vadd.f32 1.0, %v5125_v29  ;;  %v1911_v46 = vmul.f32 %v5249_v23, %v1875_v47 }
 0x1f0   : > { %v2227_v54 = vsel %vm2163_vm9, %v2131_v20, %v2195_v37  ;;  %v5283_v60 = vadd.f32 %v5073_v17, %v1633_v50  ;;  %v1636_v56 = vadd.f32 %v3948_v13, %v5084_v8  ;;  %v1910_v17 = vmul.f32 %v5249_v23, %v1874_v52 }
 0x1f1   : > { %v5280_v63 = vpack.c.bf16 %v2227_v54, %v2226_v42  ;;  %v2039_v41 = vpop.permute.xlu0 %2038 }
 0x1f2   : > { %v2132_v40 = vadd.f32 %v2039_v41, %v1972_v55  ;;  %v5288_v57 = vadd.f32 %v5077_v49, %v1636_v56  ;;  %2078 = vrot.lane.b32.xlu1 %v5283_v60, %s4276_s17  ;;  %v1974_v9 = vmul.f32 %v1942_v24, %v1910_v17  ;;  %v1975_v55 = vmul.f32 %v1943_v48, %v1911_v46 }
 0x1f3   : > { %v2041_v39 = vpop.permute.xlu1 %2040 }
 0x1f4   : > { %v2196_v20 = vmul.f32 0.2, %v2132_v40  ;;  %v2133_v31 = vadd.f32 %v2041_v39, %v1973_v59  ;;  %vm2164_vm10 = vcmp.ge.f32.partialorder %v2132_v40, 0.0  ;;  %2080 = vrot.lane.b32.xlu0 %v5288_v57, %s4276_s17  ;;  %v1841_v59 = vld [vmem:[%s5229_s19 + $0x38] sm:$0xff] }
 0x1f6   : > { %vm2165_vm11 = vcmp.ge.f32.partialorder %v2133_v31, 0.0  ;;  %v2197_v49 = vmul.f32 0.2, %v2133_v31  ;;  %v3949_v45 = vpop.f32.mrb[48].mxu0  ;;  %v2228_v22 = vsel %vm2164_vm10, %v2132_v40, %v2196_v20  ;;  %v1876_v20 = vsub.f32 %v1840_v7, %v5241_v5 }
 0x1f7   : > { %v3950_v29 = vpop.f32.mrb[49].mxu0 }
 0x1f8   : > { %v2229_v37 = vsel %vm2165_vm11, %v2133_v31, %v2197_v49  ;;  %v3951_v38 = vadd.f32 %v3950_v29, %v3949_v45  ;;  %v3952_v50 = vpop.f32.mrb[50].mxu0  ;;  %v1877_v49 = vsub.f32 %v1841_v59, %v5241_v5  ;;  %v1944_v29 = vadd.f32 1.0, %v5142_v10 }
 0x1f9   : > { %v2259_v4 = vpack.c.bf16 %v2229_v37, %v2228_v22  ;;  %v2043_v13 = vpop.permute.xlu0 %2042  ;;  %v3953_v54 = vpop.f32.mrb[51].mxu0 }
 0x1fa   : > { %v2134_v42 = vadd.f32 %v2043_v13, %v1974_v9  ;;  %v3954_v25 = vadd.f32 %v3953_v54, %v3952_v50  ;;  %v1641_v41 = vadd.f32 %v3951_v38, %v5084_v8  ;;  %v1912_v9 = vmul.f32 %v5249_v23, %v1876_v20  ;;  %v1842_v54 = vld [vmem:[%s5229_s19 + $0x40] sm:$0xff] }
 0x1fb   : > { %v2282_v52 = vshrl.u32 %v2259_v4, 16  ;;  %v2045_v56 = vpop.permute.xlu1 %2044  ;;  %v2285_v47 = vshll.u32 %v2259_v4, 16  ;;  %v1945_v13 = vadd.f32 1.0, %v5146_v32  ;;  %v1913_v7 = vmul.f32 %v5249_v23, %v1877_v49 }
 0x1fc   : > { %v2198_v40 = vmul.f32 0.2, %v2134_v42  ;;  %v2135_v39 = vadd.f32 %v2045_v56, %v1975_v55  ;;  %vm2166_vm12 = vcmp.ge.f32.partialorder %v2134_v42, 0.0  ;;  %v5303_v31 = vadd.f32 %v5101_v44, %v1641_v41 }
 0x1fd   : > { %v2284_v24 = vrot.slane %v2282_v52, 7  ;;  %v1644_v17 = vadd.f32 %v3954_v25, %v5084_v8  ;;  %v1976_v52 = vmul.f32 %v1944_v29, %v1912_v9 }
 0x1fe   : > { %vm2167_vm13 = vcmp.ge.f32.partialorder %v2135_v39, 0.0  ;;  %v2199_v48 = vmul.f32 0.2, %v2135_v39  ;;  %2082 = vrot.lane.b32.xlu1 %v5303_v31, %s4276_s17  ;;  %v2230_v44 = vsel %vm2166_vm12, %v2134_v42, %v2198_v40 }
 0x1ff   : > { %v2287_v46 = vor.u32 %v2285_v47, %v2284_v24  ;;  %v5308_v45 = vadd.f32 %v5109_v43, %v1644_v17  ;;  %v5314_v22 = vsel %vm4356_vm2, %v2284_v24, 0  ;;  %v1977_v24 = vmul.f32 %v1945_v13, %v1913_v7 }
 0x200   : > { %v2231_v37 = vsel %vm2167_vm13, %v2135_v39, %v2199_v48  ;;  %v2664_v50 = vrot.slane %v5314_v22, 1  ;;  %v1843_v39 = vld [vmem:[%s5229_s19 + $0x48] sm:$0xff]  ;;  %v1878_v17 = vsub.f32 %v1842_v54, %v5241_v5 }
 0x201   : > { %v5320_v4 = vsel %vm4356_vm2, 0, %v2287_v46  ;;  %v2260_v43 = vpack.c.bf16 %v2231_v37, %v2230_v44  ;;  %2084 = vrot.lane.b32.xlu0 %v5308_v45, %s4276_s17 }
 0x202   : > { %v2663_v38 = vrot.slane %v5320_v4, 1  ;;  %v3955_v42 = vpop.f32.mrb[52].mxu0 }
 0x203   : > { %v2289_v10 = vshrl.u32 %v2260_v43, 16  ;;  %v3956_v55 = vpop.f32.mrb[53].mxu0  ;;  %v2292_v41 = vshll.u32 %v2260_v43, 16  ;;  %v1879_v43 = vsub.f32 %v1843_v39, %v5241_v5 }
 0x204   : > { %v5330_v25 = vsel %vm811_vm3, %v2663_v38, %v2664_v50  ;;  %v3957_v59 = vadd.f32 %v3956_v55, %v3955_v42  ;;  %v3958_v47 = vpop.f32.mrb[54].mxu0  ;;  %v1914_v55 = vmul.f32 %v5249_v23, %v1878_v17  ;;  %v2275_v17 = vshrl.u32 %v5280_v63, 16 }
 0x205   : > { %v2291_v56 = vrot.slane %v2289_v10, 7  ;;  %v2047_v40 = vpop.permute.xlu0 %2046  ;;  %4161 = vmatprep.mubr.msk.bf16.mxu0 %vm1068_vm4, %v5330_v25  ;;  %v3959_v20 = vpop.f32.mrb[55].mxu0 }
 0x206   : > { %v2136_v32 = vadd.f32 %v2047_v40, %v1976_v52  ;;  %v1649_v46 = vadd.f32 %v3957_v59, %v5084_v8  ;;  %v3960_v44 = vadd.f32 %v3959_v20, %v3958_v47  ;;  %v1946_v52 = vadd.f32 1.0, %v5162_v3  ;;  %v1844_v20 = vld [vmem:[%s5229_s19 + $0x50] sm:$0xff] }
 0x207   : > { %v2294_v48 = vor.u32 %v2292_v41, %v2291_v56  ;;  %v5338_v49 = vsel %vm4356_vm2, %v2291_v56, 0  ;;  %v2049_v37 = vpop.permute.xlu1 %2048  ;;  %v1947_v40 = vadd.f32 1.0, %v5166_v26  ;;  %v1915_v3 = vmul.f32 %v5249_v23, %v1879_v43  ;;  %v4248_v26 = vld [vmem:[%s6353_s5 + $0x8] sm:$0xff]  }
 0x208   : > { %v2200_v29 = vmul.f32 0.2, %v2136_v32  ;;  %v2137_v9 = vadd.f32 %v2049_v37, %v1977_v24  ;;  %v5347_v50 = vadd.f32 %v5099_v35, %v1649_v46  ;;  %vm2168_vm14 = vcmp.ge.f32.partialorder %v2136_v32, 0.0  ;;  %v4245_v35 = vld [vmem:[%s6353_s5 + $0x40] sm:$0xff]   ;;  %v4247_v24 = vld [vmem:[%s6353_s5 + $0x48] sm:$0xff]  }
 0x209   : > { %v5344_v38 = vsel %vm4356_vm2, 0, %v2294_v48  ;;  %v1652_v13 = vadd.f32 %v3960_v44, %v5084_v8  ;;  %v2667_v7 = vrot.slane %v5338_v49, 1  ;;  %3991 = vmatprep.subr.bf16.mxu1 %v4245_v35  ;;  %v1978_v46 = vmul.f32 %v1946_v52, %v1914_v55 }
 0x20a   : > { %vm2169_vm15 = vcmp.ge.f32.partialorder %v2137_v9, 0.0  ;;  %v2201_v10 = vmul.f32 0.2, %v2137_v9  ;;  %v2666_v42 = vrot.slane %v5344_v38, 1  ;;  %2086 = vrot.lane.b32.xlu1 %v5347_v50, %s4276_s17  ;;  %v2232_v56 = vsel %vm2168_vm14, %v2136_v32, %v2200_v29 }
 0x20b   : > { %v5353_v54 = vadd.f32 %v5107_v2, %v1652_v13  ;;  %v4246_v2 = vld [vmem:[%s6353_s5] sm:$0xff]   ;;  %v1845_v13 = vld [vmem:[%s5229_s19 + $0x58] sm:$0xff]  ;;  %v1880_v35 = vsub.f32 %v1844_v20, %v5241_v5  ;;  %v4250_v20 = vld [vmem:[%s6353_s5 + $0x10] sm:$0xff]  }
 0x20c   : > { %v2233_v41 = vsel %vm2169_vm15, %v2137_v9, %v2201_v10  ;;  %v5363_v59 = vsel %vm811_vm3, %v2666_v42, %v2667_v7  ;;  %3992 = vmatpush3.bf16.msra.mxu1 %v4246_v2  ;;  %v1979_v42 = vmul.f32 %v1947_v40, %v1915_v3  ;;  %v1881_v40 = vsub.f32 %v1845_v13, %v5241_v5 }
 0x20d   : > { %v2261_v47 = vpack.c.bf16 %v2233_v41, %v2232_v56  ;;  %2088 = vrot.lane.b32.xlu0 %v5353_v54, %s4276_s17  ;;  %4162 = vmatmul.mubr.msk.bf16.vlgmr.msra.gmra.mrb[64].mxu0 %vm1068_vm4, %v5363_v59  ;;  %v5393_v3 = vrot.slane %v2275_v17, 7 }
 0x20e   : > { %v3961_v32 = vpop.f32.mrb[56].mxu0  ;;  %3993 = vmatprep.subr.bf16.mxu1 %v4247_v24 }
 0x20f   : > { %v2296_v39 = vshrl.u32 %v2261_v47, 16  ;;  %v3962_v48 = vpop.f32.mrb[57].mxu0  ;;  %v2299_v37 = vshll.u32 %v2261_v47, 16  ;;  %v4249_v47 = vld [vmem:[%s6353_s5 + $0x50] sm:$0xff]  }
 0x210   : > { %v3963_v29 = vadd.f32 %v3962_v48, %v3961_v32  ;;  %v3964_v9 = vpop.f32.mrb[58].mxu0  ;;  %3994 = vmatpush3.bf16.msra.mxu1 %v4248_v26 }
 0x211   : > { %v2298_v44 = vrot.slane %v2296_v39, 7  ;;  %v2051_v43 = vpop.permute.xlu0 %2050  ;;  %v3965_v10 = vpop.f32.mrb[59].mxu0  ;;  %3995 = vmatprep.subr.bf16.mxu1 %v4249_v47  ;;  %v1847_v47 = vld [vmem:[%s5229_s19 + $0x68] sm:$0xff] }
 0x212   : > { %v2138_v7 = vadd.f32 %v2051_v43, %v1978_v46  ;;  %v3966_v41 = vadd.f32 %v3965_v10, %v3964_v9  ;;  %v1657_v55 = vadd.f32 %v3963_v29, %v5084_v8  ;;  %v1846_v9 = vld [vmem:[%s5229_s19 + $0x60] sm:$0xff]  ;;  %v4251_v43 = vld [vmem:[%s6353_s5 + $0x58] sm:$0xff]  }
 0x213   : > { %v2301_v56 = vor.u32 %v2299_v37, %v2298_v44  ;;  %v2053_v2 = vpop.permute.xlu1 %2052  ;;  %v5387_v52 = vsel %vm4356_vm2, %v2298_v44, 0  ;;  %v2278_v37 = vshll.u32 %v5280_v63, 16  ;;  %v4252_v63 = vld [vmem:[%s6353_s5 + $0x18] sm:$0xff]  }
 0x214   : > { %v2202_v39 = vmul.f32 0.2, %v2138_v7  ;;  %v2139_v32 = vadd.f32 %v2053_v2, %v1979_v42  ;;  %vm2170_vm0 = vcmp.ge.f32.partialorder %v2138_v7, 0.0  ;;  %v5403_v48 = vadd.f32 %v5152_v62, %v1657_v55  ;;  %3996 = vmatpush3.bf16.msra.mxu1 %v4250_v20 }
 0x215   : > { %v5400_v24 = vsel %vm4356_vm2, 0, %v2301_v56  ;;  %v1660_v46 = vadd.f32 %v3966_v41, %v5084_v8  ;;  %v2670_v44 = vrot.slane %v5387_v52, 1  ;;  %v1916_v62 = vmul.f32 %v5249_v23, %v1880_v35  ;;  %3997 = vmatprep.subr.bf16.mxu1 %v4251_v43 }
 0x216   : > { %vm2171_vm1 = vcmp.ge.f32.partialorder %v2139_v32, 0.0  ;;  %v2203_v26 = vmul.f32 0.2, %v2139_v32  ;;  %v2669_v17 = vrot.slane %v5400_v24, 1  ;;  %2090 = vrot.lane.b32.xlu1 %v5403_v48, %s4276_s17  ;;  %v2234_v13 = vsel %vm2170_vm0, %v2138_v7, %v2202_v39  ;;  %v4253_v39 = vld [vmem:[%s6353_s5 + $0x60] sm:$0xff]  }
 0x217   : > { %v5410_v29 = vadd.f32 %v5158_v58, %v1660_v46  ;;  %v1948_v58 = vadd.f32 1.0, %v5174_v15  ;;  %v2280_v35 = vor.u32 %v2278_v37, %v5393_v3  ;;  %v1949_v7 = vadd.f32 1.0, %v5178_v53  ;;  %v4254_v46 = vld [vmem:[%s6353_s5 + $0x20] sm:$0xff]  }
 0x218   : > { %v2235_v10 = vsel %vm2171_vm1, %v2139_v32, %v2203_v26  ;;  %v5420_v42 = vsel %vm811_vm3, %v2669_v17, %v2670_v44  ;;  %v1917_v41 = vmul.f32 %v5249_v23, %v1881_v40  ;;  %v1882_v2 = vsub.f32 %v1846_v9, %v5241_v5  ;;  %3998 = vmatpush3.bf16.msra.mxu1 %v4252_v63 }
 0x219   : > { %v2262_v56 = vpack.c.bf16 %v2235_v10, %v2234_v13  ;;  %2092 = vrot.lane.b32.xlu0 %v5410_v29, %s4276_s17  ;;  %4165 = vmatprep.mubr.msk.bf16.mxu0 %vm1068_vm4, %v5420_v42  ;;  %v1980_v20 = vmul.f32 %v1948_v58, %v1916_v62  ;;  %v5443_v37 = vsel %vm4356_vm2, 0, %v2280_v35  ;;  %v1883_v62 = vsub.f32 %v1847_v47, %v5241_v5  ;;  %v4255_v35 = vld [vmem:[%s6353_s5 + $0x68] sm:$0xff]  }
 0x21a   : > { %v3967_v55 = vpop.f32.mrb[60].mxu0  ;;  %3999 = vmatprep.subr.bf16.mxu1 %v4253_v39  ;;  %v1981_v13 = vmul.f32 %v1949_v7, %v1917_v41  ;;  %v1918_v10 = vmul.f32 %v5249_v23, %v1882_v2  ;;  %v1950_v7 = vadd.f32 1.0, %v5186_v30  ;;  %v2453_v47 = vshll.u32 %v5443_v37, 16  ;;  %v4256_v39 = vld [vmem:[%s6353_s5 + $0x28] sm:$0xff]   ;;  %v4257_v30 = vld [vmem:[%s6353_s5 + $0x70] sm:$0xff]  }
 0x21b   : > { %v2303_v15 = vshrl.u32 %v2262_v56, 16  ;;  %v3968_v32 = vpop.f32.mrb[61].mxu0  ;;  %v2306_v26 = vshll.u32 %v2262_v56, 16 }
 0x21c   : > { %v3969_v40 = vadd.f32 %v3968_v32, %v3967_v55  ;;  %v3970_v17 = vpop.f32.mrb[62].mxu0  ;;  %4000 = vmatpush3.bf16.msra.mxu1 %v4254_v46 }
 0x21d   : > { %v2305_v53 = vrot.slane %v2303_v15, 7  ;;  %v2055_v44 = vpop.permute.xlu0 %2054  ;;  %v3971_v43 = vpop.f32.mrb[63].mxu0  ;;  %4001 = vmatprep.subr.bf16.mxu1 %v4255_v35  ;;  %v1919_v35 = vmul.f32 %v5249_v23, %v1883_v62 }
 0x21e   : > { %v2140_v9 = vadd.f32 %v2055_v44, %v1980_v20  ;;  %v1665_v63 = vadd.f32 %v3969_v40, %v5084_v8  ;;  %v3972_v15 = vadd.f32 %v3971_v43, %v3970_v17  ;;  %v2465_v44 = vshll.u32 %v5320_v4, 16  ;;  %v4258_v43 = vld [vmem:[%s6353_s5 + $0x30] sm:$0xff]  }
 0x21f   : > { %v2308_v58 = vor.u32 %v2306_v26, %v2305_v53  ;;  %v2057_v56 = vpop.permute.xlu1 %2056  ;;  %v5450_v55 = vsel %vm4356_vm2, %v2305_v53, 0 }
 0x220   : > { %v2204_v41 = vmul.f32 0.2, %v2140_v9  ;;  %v2141_v2 = vadd.f32 %v2057_v56, %v1981_v13  ;;  %v5465_v20 = vadd.f32 %v5150_v28, %v1665_v63  ;;  %vm2172_vm8 = vcmp.ge.f32.partialorder %v2140_v9, 0.0  ;;  %4002 = vmatpush3.bf16.msra.mxu1 %v4256_v39 }
 0x221   : > { %v5462_v32 = vsel %vm4356_vm2, 0, %v2308_v58  ;;  %v1668_v46 = vadd.f32 %v3972_v15, %v5084_v8  ;;  %v2673_v40 = vrot.slane %v5450_v55, 1  ;;  %v2434_v8 = vsel %vm4356_vm2, %v5393_v3, 0  ;;  %4003 = vmatprep.subr.bf16.mxu1 %v4257_v30  ;;  %v4259_v3 = vld [vmem:[%s6353_s5 + $0x78] sm:$0xff]  }
 0x222   : > { %vm2173_vm9 = vcmp.ge.f32.partialorder %v2141_v2, 0.0  ;;  %v2205_v53 = vmul.f32 0.2, %v2141_v2  ;;  %v2672_v26 = vrot.slane %v5462_v32, 1  ;;  %2094 = vrot.lane.b32.xlu1 %v5465_v20, %s4276_s17  ;;  %v2660_v28 = vrot.slane %v5443_v37, 1  ;;  %v4260_v30 = vld [vmem:[%s6353_s5 + $0x38] sm:$0xff]  }
 0x223   : > { %v5474_v17 = vadd.f32 %v5156_v51, %v1668_v46  ;;  %v2236_v13 = vsel %vm2172_vm8, %v2140_v9, %v2204_v41  ;;  %v2455_v63 = vrot.slane %v2453_v47, 1  ;;  %v1951_v9 = vadd.f32 1.0, %v5190_v19  ;;  %v1848_v46 = vld [vmem:[%s5229_s19 + $0x70] sm:$0xff] }
 0x224   : > { %v2237_v58 = vsel %vm2173_vm9, %v2141_v2, %v2205_v53  ;;  %v5487_v51 = vsel %vm811_vm3, %v2672_v26, %v2673_v40  ;;  %v2661_v56 = vrot.slane %v2434_v8, 1  ;;  %v2451_v41 = vshrl.u32 %v5443_v37, 16  ;;  %4004 = vmatpush3.bf16.msra.mxu1 %v4258_v43 }
 0x225   : > { %v2263_v15 = vpack.c.bf16 %v2237_v58, %v2236_v13  ;;  %2096 = vrot.lane.b32.xlu0 %v5474_v17, %s4276_s17  ;;  %4166 = vmatmul.mubr.msk.bf16.gmra.mrb[68].mxu0 %vm1068_vm4, %v5487_v51  ;;  %v2458_v47 = vshll.u32 %v2434_v8, 16  ;;  %v2467_v39 = vrot.slane %v2465_v44, 1  ;;  %v1982_v53 = vmul.f32 %v1950_v7, %v1918_v10  ;;  %v1849_v44 = vld [vmem:[%s5229_s19 + $0x78] sm:$0xff] }
 0x226   : > { %2782 = vrot.lane.b32.xlu1 %v5443_v37, %s4276_s17  ;;  %v2662_v19 = vsel %vm811_vm3, %v2660_v28, %v2661_v56  ;;  %v2456_v26 = vor.u32 %v2455_v63, %v2451_v41  ;;  %4005 = vmatprep.subr.bf16.mxu1 %v4259_v3  ;;  %v2463_v58 = vshrl.u32 %v5320_v4, 16  ;;  %v2470_v8 = vshll.u32 %v5314_v22, 16 }
 0x227   : > { %v2310_v2 = vshrl.u32 %v2263_v15, 16  ;;  %v2313_v40 = vshll.u32 %v2263_v15, 16  ;;  %v1983_v1 = vmul.f32 %v1951_v9, %v1919_v35  ;;  %v1884_v36 = vsub.f32 %v1848_v46, %v5241_v5 }
 0x228   : > { %v2059_v13 = vpop.permute.xlu0 %2058  ;;  %v2460_v7 = vrot.slane %v2458_v47, 1  ;;  %v2468_v63 = vor.u32 %v2467_v39, %v2463_v58  ;;  %4006 = vmatpush3.bf16.msra.mxu1 %v4260_v30  ;;  %v1885_v22 = vsub.f32 %v1849_v44, %v5241_v5  ;;  %v2472_v35 = vrot.slane %v2470_v8, 1 }
 0x229   : > { %v2312_v62 = vrot.slane %v2310_v2, 7  ;;  %2814 = vrot.lane.b32.xlu0 %v2662_v19, %s4275_s29  ;;  %v2142_v43 = vadd.f32 %v2059_v13, %v1982_v53  ;;  %4193 = vmatprep.subr.bf16.mxu1 %v5122_v18  ;;  %v1952_v18 = vadd.f32 1.0, %v5198_v11  ;;  %v1920_v47 = vmul.f32 %v5249_v23, %v1884_v36  ;;  %v1850_v13 = vld [vmem:[%s5229_s19 + $0x80] sm:$0xff] }
 0x22a   : > { %v2061_v10 = vpop.permute.xlu1 %2060  ;;  %2752 = vrot.lane.b32.xlu1 %v2662_v19, %s4274_s28  ;;  %v5525_v56 = vsel %vm591_vm5, %v2456_v26, %v2460_v7  ;;  %v2477_v53 = vshll.u32 %v5344_v38, 16  ;;  %v1953_v26 = vadd.f32 1.0, %v5202_v33  ;;  %v1921_v11 = vmul.f32 %v5249_v23, %v1885_v22 }
 0x22b   : > { %v2315_v61 = vor.u32 %v2313_v40, %v2312_v62  ;;  %v5514_v28 = vsel %vm4356_vm2, %v2312_v62, 0  ;;  %v2206_v3 = vmul.f32 0.2, %v2142_v43  ;;  %v2143_v15 = vadd.f32 %v2061_v10, %v1983_v1 }
 0x22c   : > { %vm2174_vm10 = vcmp.ge.f32.partialorder %v2142_v43, 0.0  ;;  %v2676_v2 = vrot.slane %v5514_v28, 1  ;;  %v1984_v62 = vmul.f32 %v1952_v18, %v1920_v47  ;;  %v2479_v40 = vrot.slane %v2477_v53, 1 }
 0x22d   : > { %v5520_v9 = vsel %vm4356_vm2, 0, %v2315_v61  ;;  %2816 = vrot.lane.b32.xlu0 %v5330_v25, %s4275_s29  ;;  %vm2175_vm11 = vcmp.ge.f32.partialorder %v2143_v15, 0.0  ;;  %v2207_v41 = vmul.f32 0.2, %v2143_v15  ;;  %v5532_v61 = vsel %vm591_vm5, %v2468_v63, %v2472_v35  ;;  %v1851_v63 = vld [vmem:[%s5229_s19 + $0x88] sm:$0xff] }
 0x22e   : > { %v2675_v1 = vrot.slane %v5520_v9, 1  ;;  %2722 = vrot.lane.b32.xlu1 %v5525_v56, %s4275_s29  ;;  %v2238_v39 = vsel %vm2174_vm10, %v2142_v43, %v2206_v3  ;;  %v2482_v43 = vshll.u32 %v5338_v49, 16  ;;  %v1985_v7 = vmul.f32 %v1953_v26, %v1921_v11 }
 0x22f   : > { %v2239_v46 = vsel %vm2175_vm11, %v2143_v15, %v2207_v41  ;;  %v2475_v33 = vshrl.u32 %v5344_v38, 16  ;;  %v1886_v35 = vsub.f32 %v1850_v13, %v5241_v5  ;;  %v1887_v47 = vsub.f32 %v1851_v63, %v5241_v5 }
 0x230   : > { %v5537_v30 = vsel %vm811_vm3, %v2675_v1, %v2676_v2  ;;  %v2264_v19 = vpack.c.bf16 %v2239_v46, %v2238_v39  ;;  %v2484_v18 = vrot.slane %v2482_v43, 1  ;;  %v2489_v11 = vshll.u32 %v5400_v24, 16 }
 0x231   : > { %4169 = vmatprep.mubr.msk.bf16.mxu0 %vm1068_vm4, %v5537_v30  ;;  %2876 = vrot.lane.b32.xlu0 %v5532_v61, %s4276_s17  ;;  %v2480_v2 = vor.u32 %v2479_v40, %v2475_v33  ;;  %v1922_v26 = vmul.f32 %v5249_v23, %v1886_v35 }
 0x232   : > { %v2317_v36 = vshrl.u32 %v2264_v19, 16  ;;  %2846 = vrot.lane.b32.xlu1 %v5320_v4, %s4274_s28  ;;  %v2320_v8 = vshll.u32 %v2264_v19, 16  ;;  %v1954_v19 = vadd.f32 1.0, %v5210_v34  ;;  %v1955_v34 = vadd.f32 1.0, %v5214_v6 }
 0x233   : > { %v5579_v13 = vsel %vm591_vm5, %v2480_v2, %v2484_v18 }
 0x234   : > { %v2319_v58 = vrot.slane %v2317_v36, 7  ;;  %v2063_v44 = vpop.permute.xlu0 %2062  ;;  %v1986_v43 = vmul.f32 %v1954_v19, %v1922_v26 }
 0x235   : > { %2848 = vrot.lane.b32.xlu0 %v5344_v38, %s4274_s28  ;;  %v2144_v10 = vadd.f32 %v2063_v44, %v1984_v62  ;;  %v2491_v44 = vrot.slane %v2489_v11, 1 }
 0x236   : > { %v2322_v3 = vor.u32 %v2320_v8, %v2319_v58  ;;  %v2065_v15 = vpop.permute.xlu1 %2064  ;;  %2784 = vrot.lane.b32.xlu1 %v5320_v4, %s4276_s17  ;;  %v5558_v22 = vsel %vm4356_vm2, %v2319_v58, 0 }
 0x237   : > { %v2208_v41 = vmul.f32 0.2, %v2144_v10  ;;  %v2145_v1 = vadd.f32 %v2065_v15, %v1985_v7  ;;  %vm2176_vm12 = vcmp.ge.f32.partialorder %v2144_v10, 0.0  ;;  %v2679_v53 = vrot.slane %v5558_v22, 1 }
 0x238   : > { %v5563_v49 = vsel %vm4356_vm2, 0, %v2322_v3  ;;  %v2487_v3 = vshrl.u32 %v5400_v24, 16  ;;  %v2494_v15 = vshll.u32 %v5387_v52, 16 }
 0x239   : > { %2818 = vrot.lane.b32.xlu0 %v5363_v59, %s4275_s29  ;;  %vm2177_vm13 = vcmp.ge.f32.partialorder %v2145_v1, 0.0  ;;  %v2209_v39 = vmul.f32 0.2, %v2145_v1  ;;  %v2678_v46 = vrot.slane %v5563_v49, 1  ;;  %v2240_v36 = vsel %vm2176_vm12, %v2144_v10, %v2208_v41  ;;  %v1852_v10 = vld [vmem:[%s5229_s19 + $0x90] sm:$0xff]  ;;  %v1853_v41 = vld [vmem:[%s5229_s19 + $0x98] sm:$0xff] }
 0x23a   : > { %2754 = vrot.lane.b32.xlu1 %v5330_v25, %s4274_s28  ;;  %v1923_v25 = vmul.f32 %v5249_v23, %v1887_v47  ;;  %v2492_v47 = vor.u32 %v2491_v44, %v2487_v3  ;;  %v2496_v19 = vrot.slane %v2494_v15, 1  ;;  %v1889_v26 = vsub.f32 %v1853_v41, %v5241_v5  ;;  %v1854_v15 = vld [vmem:[%s5229_s19 + $0xa0] sm:$0xff] }
 0x23b   : > { %v2241_v62 = vsel %vm2177_vm13, %v2145_v1, %v2209_v39  ;;  %v5576_v40 = vsel %vm811_vm3, %v2678_v46, %v2679_v53  ;;  %v1888_v39 = vsub.f32 %v1852_v10, %v5241_v5  ;;  %v2501_v10 = vshll.u32 %v5462_v32, 16 }
 0x23c   : > { %v2265_v58 = vpack.c.bf16 %v2241_v62, %v2240_v36  ;;  %4170 = vmatmul.mubr.msk.bf16.gmra.mrb[72].mxu0 %vm1068_vm4, %v5576_v40  ;;  %v1987_v35 = vmul.f32 %v1955_v34, %v1923_v25  ;;  %v1956_v34 = vadd.f32 1.0, %v5222_v27  ;;  %v1925_v27 = vmul.f32 %v5249_v23, %v1889_v26 }
 0x23d   : > { %2878 = vrot.lane.b32.xlu0 %v5579_v13, %s4276_s17  ;;  %v1924_v25 = vmul.f32 %v5249_v23, %v1888_v39  ;;  %v2503_v3 = vrot.slane %v2501_v10, 1  ;;  %v1855_v39 = vld [vmem:[%s5229_s19 + $0xa8] sm:$0xff]  ;;  %v1890_v26 = vsub.f32 %v1854_v15, %v5241_v5 }
 0x23e   : > { %v2324_v8 = vshrl.u32 %v2265_v58, 16  ;;  %2724 = vrot.lane.b32.xlu1 %v5532_v61, %s4275_s29  ;;  %v2327_v33 = vshll.u32 %v2265_v58, 16  ;;  %v5614_v58 = vsel %vm591_vm5, %v2492_v47, %v2496_v19 }
 0x240   : > { %v2326_v7 = vrot.slane %v2324_v8, 7  ;;  %v2067_v63 = vpop.permute.xlu0 %2066 }
 0x241   : > { %2850 = vrot.lane.b32.xlu0 %v5400_v24, %s4274_s28  ;;  %v2146_v6 = vadd.f32 %v2067_v63, %v1986_v43  ;;  %v1988_v63 = vmul.f32 %v1956_v34, %v1924_v25  ;;  %v1891_v25 = vsub.f32 %v1855_v39, %v5241_v5 }
 0x242   : > { %v2329_v1 = vor.u32 %v2327_v33, %v2326_v7  ;;  %v2069_v2 = vpop.permute.xlu1 %2068  ;;  %2786 = vrot.lane.b32.xlu1 %v5344_v38, %s4276_s17  ;;  %v5599_v18 = vsel %vm4356_vm2, %v2326_v7, 0 }
 0x243   : > { %v2210_v46 = vmul.f32 0.2, %v2146_v6  ;;  %v2147_v53 = vadd.f32 %v2069_v2, %v1987_v35  ;;  %vm2178_vm14 = vcmp.ge.f32.partialorder %v2146_v6, 0.0  ;;  %v2682_v62 = vrot.slane %v5599_v18, 1 }
 0x244   : > { %v5604_v52 = vsel %vm4356_vm2, 0, %v2329_v1  ;;  %v2506_v1 = vshll.u32 %v5450_v55, 16 }
 0x245   : > { %2820 = vrot.lane.b32.xlu0 %v5420_v42, %s4275_s29  ;;  %vm2179_vm15 = vcmp.ge.f32.partialorder %v2147_v53, 0.0  ;;  %v2211_v11 = vmul.f32 0.2, %v2147_v53  ;;  %v2681_v36 = vrot.slane %v5604_v52, 1  ;;  %v2242_v8 = vsel %vm2178_vm14, %v2146_v6, %v2210_v46 }
 0x246   : > { %2756 = vrot.lane.b32.xlu1 %v5363_v59, %s4274_s28  ;;  %v1957_v59 = vadd.f32 1.0, %v5232_v21  ;;  %v2499_v21 = vshrl.u32 %v5462_v32, 16  ;;  %v2508_v34 = vrot.slane %v2506_v1, 1 }
 0x247   : > { %v2243_v44 = vsel %vm2179_vm15, %v2147_v53, %v2211_v11  ;;  %v5619_v43 = vsel %vm811_vm3, %v2681_v36, %v2682_v62 }
 0x248   : > { %v2266_v7 = vpack.c.bf16 %v2243_v44, %v2242_v8  ;;  %4173 = vmatprep.mubr.msk.bf16.mxu0 %vm1068_vm4, %v5619_v43  ;;  %v1989_v47 = vmul.f32 %v1957_v59, %v1925_v27  ;;  %v2504_v62 = vor.u32 %v2503_v3, %v2499_v21  ;;  %v1926_v59 = vmul.f32 %v5249_v23, %v1890_v26 }
 0x249   : > { %2880 = vrot.lane.b32.xlu0 %v5614_v58, %s4276_s17  ;;  %v2513_v27 = vshll.u32 %v5520_v9, 16 }
 0x24a   : > { %v2331_v33 = vshrl.u32 %v2266_v7, 16  ;;  %2726 = vrot.lane.b32.xlu1 %v5579_v13, %s4275_s29  ;;  %v2334_v35 = vshll.u32 %v2266_v7, 16  ;;  %v1958_v7 = vadd.f32 1.0, %v5256_v0  ;;  %v5661_v15 = vsel %vm591_vm5, %v2504_v62, %v2508_v34 }
 0x24b   : > { %v1959_v0 = vadd.f32 1.0, %v5263_v12 }
 0x24c   : > { %v2333_v6 = vrot.slane %v2331_v33, 7  ;;  %v2071_v41 = vpop.permute.xlu0 %2070  ;;  %v1990_v1 = vmul.f32 %v1958_v7, %v1926_v59 }
 0x24d   : > { %2852 = vrot.lane.b32.xlu0 %v5462_v32, %s4274_s28  ;;  %v2148_v2 = vadd.f32 %v2071_v41, %v1988_v63  ;;  %v2515_v41 = vrot.slane %v2513_v27, 1 }
 0x24e   : > { %v2336_v46 = vor.u32 %v2334_v35, %v2333_v6  ;;  %v2073_v53 = vpop.permute.xlu1 %2072  ;;  %2788 = vrot.lane.b32.xlu1 %v5400_v24, %s4276_s17  ;;  %v5640_v19 = vsel %vm4356_vm2, %v2333_v6, 0 }
 0x24f   : > { %v2212_v11 = vmul.f32 0.2, %v2148_v2  ;;  %v2149_v36 = vadd.f32 %v2073_v53, %v1989_v47  ;;  %vm2180_vm0 = vcmp.ge.f32.partialorder %v2148_v2, 0.0  ;;  %v2685_v10 = vrot.slane %v5640_v19, 1 }
 0x250   : > { %v5645_v55 = vsel %vm4356_vm2, 0, %v2336_v46  ;;  %v2511_v46 = vshrl.u32 %v5520_v9, 16  ;;  %v2518_v53 = vshll.u32 %v5514_v28, 16 }
 0x251   : > { %2822 = vrot.lane.b32.xlu0 %v5487_v51, %s4275_s29  ;;  %vm2181_vm1 = vcmp.ge.f32.partialorder %v2149_v36, 0.0  ;;  %v2213_v8 = vmul.f32 0.2, %v2149_v36  ;;  %v2684_v44 = vrot.slane %v5645_v55, 1  ;;  %v2244_v33 = vsel %vm2180_vm0, %v2148_v2, %v2212_v11  ;;  %v1856_v2 = vld [vmem:[%s5229_s19 + $0xb0] sm:$0xff]  ;;  %v1857_v11 = vld [vmem:[%s5229_s19 + $0xb8] sm:$0xff] }
 0x252   : > { %2758 = vrot.lane.b32.xlu1 %v5420_v42, %s4274_s28  ;;  %v1927_v42 = vmul.f32 %v5249_v23, %v1891_v25  ;;  %v2516_v25 = vor.u32 %v2515_v41, %v2511_v46  ;;  %v2520_v7 = vrot.slane %v2518_v53, 1  ;;  %v1893_v59 = vsub.f32 %v1857_v11, %v5241_v5  ;;  %v1858_v46 = vld [vmem:[%s5229_s19 + $0xc0] sm:$0xff] }
 0x253   : > { %v2245_v63 = vsel %vm2181_vm1, %v2149_v36, %v2213_v8  ;;  %v5658_v3 = vsel %vm811_vm3, %v2684_v44, %v2685_v10  ;;  %v1892_v8 = vsub.f32 %v1856_v2, %v5241_v5  ;;  %v2530_v11 = vshll.u32 %v5558_v22, 16 }
 0x254   : > { %v2267_v6 = vpack.c.bf16 %v2245_v63, %v2244_v33  ;;  %4174 = vmatmul.mubr.msk.bf16.gmra.mrb[76].mxu0 %vm1068_vm4, %v5658_v3  ;;  %v1991_v26 = vmul.f32 %v1959_v0, %v1927_v42  ;;  %v1960_v0 = vadd.f32 1.0, %v5283_v60  ;;  %v1929_v60 = vmul.f32 %v5249_v23, %v1893_v59 }
 0x255   : > { %2882 = vrot.lane.b32.xlu0 %v5661_v15, %s4276_s17  ;;  %v1928_v42 = vmul.f32 %v5249_v23, %v1892_v8  ;;  %v1859_v23 = vld [vmem:[%s5229_s19 + $0xc8] sm:$0xff] }
 0x256   : > { %v2338_v35 = vshrl.u32 %v2267_v6, 16  ;;  %2728 = vrot.lane.b32.xlu1 %v5614_v58, %s4275_s29  ;;  %v2341_v21 = vshll.u32 %v2267_v6, 16  ;;  %v5696_v6 = vsel %vm591_vm5, %v2516_v25, %v2520_v7 }
 0x258   : > { %v2340_v47 = vrot.slane %v2338_v35, 7  ;;  %v2075_v39 = vpop.permute.xlu0 %2074 }
 0x259   : > { %2854 = vrot.lane.b32.xlu0 %v5520_v9, %s4274_s28  ;;  %v2150_v12 = vadd.f32 %v2075_v39, %v1990_v1  ;;  %v2525_v1 = vshll.u32 %v5563_v49, 16 }
 0x25a   : > { %v2343_v36 = vor.u32 %v2341_v21, %v2340_v47  ;;  %v2077_v62 = vpop.permute.xlu1 %2076  ;;  %2790 = vrot.lane.b32.xlu1 %v5462_v32, %s4276_s17  ;;  %v5681_v34 = vsel %vm4356_vm2, %v2340_v47, 0  ;;  %v1992_v21 = vmul.f32 %v1960_v0, %v1928_v42 }
 0x25b   : > { %v2214_v44 = vmul.f32 0.2, %v2150_v12  ;;  %v2151_v10 = vadd.f32 %v2077_v62, %v1991_v26  ;;  %vm2182_vm8 = vcmp.ge.f32.partialorder %v2150_v12, 0.0  ;;  %v2688_v63 = vrot.slane %v5681_v34, 1 }
 0x25c   : > { %v5686_v28 = vsel %vm4356_vm2, 0, %v2343_v36  ;;  %v2527_v39 = vrot.slane %v2525_v1, 1  ;;  %v1962_v1 = vadd.f32 1.0, %v5303_v31 }
 0x25d   : > { %2824 = vrot.lane.b32.xlu0 %v5537_v30, %s4275_s29  ;;  %vm2183_vm9 = vcmp.ge.f32.partialorder %v2151_v10, 0.0  ;;  %v2215_v27 = vmul.f32 0.2, %v2151_v10  ;;  %v2687_v33 = vrot.slane %v5686_v28, 1  ;;  %v2246_v35 = vsel %vm2182_vm8, %v2150_v12, %v2214_v44 }
 0x25e   : > { %2760 = vrot.lane.b32.xlu1 %v5487_v51, %s4274_s28  ;;  %v1961_v51 = vadd.f32 1.0, %v5288_v57  ;;  %v2523_v57 = vshrl.u32 %v5563_v49, 16 }
 0x25f   : > { %v2247_v41 = vsel %vm2183_vm9, %v2151_v10, %v2215_v27  ;;  %v5701_v5 = vsel %vm811_vm3, %v2687_v33, %v2688_v63  ;;  %v5727_v10 = vld [vmem:[%s6350_s2] ss:$0 sm:$0xff]  ;;  %v2532_v63 = vrot.slane %v2530_v11, 1 }
 0x260   : > { %v2268_v2 = vpack.c.bf16 %v2247_v41, %v2246_v35  ;;  %4177 = vmatprep.mubr.msk.bf16.mxu0 %vm1068_vm4, %v5701_v5  ;;  %v1993_v62 = vmul.f32 %v1961_v51, %v1929_v60  ;;  %v1894_v22 = vsub.f32 %v1858_v46, %v5727_v10  ;;  %v2528_v27 = vor.u32 %v2527_v39, %v2523_v57 }
 0x261   : > { %2884 = vrot.lane.b32.xlu0 %v5696_v6, %s4276_s17  ;;  %v1895_v0 = vsub.f32 %v1859_v23, %v5727_v10  ;;  %v2537_v60 = vshll.u32 %v5604_v52, 16 }
 0x262   : > { %v2345_v47 = vshrl.u32 %v2268_v2, 16  ;;  %2730 = vrot.lane.b32.xlu1 %v5661_v15, %s4275_s29  ;;  %v2348_v12 = vshll.u32 %v2268_v2, 16  ;;  %v5745_v2 = vld [vmem:[%s6350_s2 + $0x1] ss:$0 sm:$0xff]  ;;  %v5753_v31 = vsel %vm591_vm5, %v2528_v27, %v2532_v63 }
 0x263   : > { %v1930_v51 = vmul.f32 %v5745_v2, %v1894_v22 }
 0x264   : > { %v2347_v53 = vrot.slane %v2345_v47, 7  ;;  %v2079_v26 = vpop.permute.xlu1 %2078 }
 0x265   : > { %2856 = vrot.lane.b32.xlu0 %v5563_v49, %s4274_s28  ;;  %v2152_v36 = vadd.f32 %v2079_v26, %v1992_v21  ;;  %v2539_v26 = vrot.slane %v2537_v60, 1  ;;  %v1994_v11 = vmul.f32 %v1962_v1, %v1930_v51 }
 0x266   : > { %v2350_v25 = vor.u32 %v2348_v12, %v2347_v53  ;;  %v2081_v8 = vpop.permute.xlu0 %2080  ;;  %2792 = vrot.lane.b32.xlu1 %v5520_v9, %s4276_s17  ;;  %v5722_v44 = vsel %vm4356_vm2, %v2347_v53, 0  ;;  %v1931_v53 = vmul.f32 %v5745_v2, %v1895_v0 }
 0x267   : > { %v2216_v7 = vmul.f32 0.2, %v2152_v36  ;;  %v2153_v59 = vadd.f32 %v2081_v8, %v1993_v62  ;;  %vm2184_vm10 = vcmp.ge.f32.partialorder %v2152_v36, 0.0  ;;  %v2691_v41 = vrot.slane %v5722_v44, 1 }
 0x268   : > { %v5732_v33 = vsel %vm4356_vm2, 0, %v2350_v25  ;;  %v2535_v25 = vshrl.u32 %v5604_v52, 16  ;;  %v2542_v8 = vshll.u32 %v5599_v18, 16 }
 0x269   : > { %2826 = vrot.lane.b32.xlu0 %v5576_v40, %s4275_s29  ;;  %vm2185_vm11 = vcmp.ge.f32.partialorder %v2153_v59, 0.0  ;;  %v2217_v42 = vmul.f32 0.2, %v2153_v59  ;;  %v2690_v35 = vrot.slane %v5732_v33, 1  ;;  %v2248_v47 = vsel %vm2184_vm10, %v2152_v36, %v2216_v7  ;;  %v1860_v36 = vld [vmem:[%s5229_s19 + $0xd0] sm:$0xff]  ;;  %v1861_v7 = vld [vmem:[%s5229_s19 + $0xd8] sm:$0xff] }
 0x26a   : > { %2762 = vrot.lane.b32.xlu1 %v5537_v30, %s4274_s28  ;;  %v1963_v30 = vadd.f32 1.0, %v5308_v45  ;;  %v2540_v0 = vor.u32 %v2539_v26, %v2535_v25  ;;  %v2544_v1 = vrot.slane %v2542_v8, 1  ;;  %v1897_v51 = vsub.f32 %v1861_v7, %v5727_v10  ;;  %v1862_v8 = vld [vmem:[%s5229_s19 + $0xe0] sm:$0xff] }
 0x26b   : > { %v2249_v21 = vsel %vm2185_vm11, %v2153_v59, %v2217_v42  ;;  %v5750_v39 = vsel %vm811_vm3, %v2690_v35, %v2691_v41  ;;  %v1896_v42 = vsub.f32 %v1860_v36, %v5727_v10  ;;  %v2549_v36 = vshll.u32 %v5645_v55, 16 }
 0x26c   : > { %v2269_v46 = vpack.c.bf16 %v2249_v21, %v2248_v47  ;;  %4178 = vmatmul.mubr.msk.bf16.gmra.mrb[80].mxu0 %vm1068_vm4, %v5750_v39  ;;  %v1995_v22 = vmul.f32 %v1963_v30, %v1931_v53  ;;  %v1964_v30 = vadd.f32 1.0, %v5347_v50  ;;  %v1933_v50 = vmul.f32 %v5745_v2, %v1897_v51 }
 0x26d   : > { %2886 = vrot.lane.b32.xlu0 %v5753_v31, %s4276_s17  ;;  %v1932_v53 = vmul.f32 %v5745_v2, %v1896_v42  ;;  %v2551_v25 = vrot.slane %v2549_v36, 1  ;;  %v1863_v42 = vld [vmem:[%s5229_s19 + $0xe8] sm:$0xff]  ;;  %v1898_v51 = vsub.f32 %v1862_v8, %v5727_v10 }
 0x26e   : > { %v2352_v12 = vshrl.u32 %v2269_v46, 16  ;;  %2732 = vrot.lane.b32.xlu1 %v5696_v6, %s4275_s29  ;;  %v2355_v57 = vshll.u32 %v2269_v46, 16  ;;  %v5788_v46 = vsel %vm591_vm5, %v2540_v0, %v2544_v1 }
 0x270   : > { %v2354_v62 = vrot.slane %v2352_v12, 7  ;;  %v2083_v23 = vpop.permute.xlu1 %2082 }
 0x271   : > { %2858 = vrot.lane.b32.xlu0 %v5604_v52, %s4274_s28  ;;  %v2154_v45 = vadd.f32 %v2083_v23, %v1994_v11  ;;  %v1996_v23 = vmul.f32 %v1964_v30, %v1932_v53  ;;  %v1899_v53 = vsub.f32 %v1863_v42, %v5727_v10 }
 0x272   : > { %v2357_v59 = vor.u32 %v2355_v57, %v2354_v62  ;;  %2794 = vrot.lane.b32.xlu1 %v5563_v49, %s4276_s17  ;;  %v5773_v63 = vsel %vm4356_vm2, %v2354_v62, 0 }
 0x273   : > { %v2085_v27 = vpop.permute.xlu0 %2084  ;;  %v2218_v35 = vmul.f32 0.2, %v2154_v45  ;;  %vm2186_vm12 = vcmp.ge.f32.partialorder %v2154_v45, 0.0  ;;  %v2694_v21 = vrot.slane %v5773_v63, 1 }
 0x274   : > { %v2155_v41 = vadd.f32 %v2085_v27, %v1995_v22  ;;  %v5778_v18 = vsel %vm4356_vm2, 0, %v2357_v59  ;;  %v2554_v59 = vshll.u32 %v5640_v19, 16 }
 0x275   : > { %2828 = vrot.lane.b32.xlu0 %v5619_v43, %s4275_s29  ;;  %v2693_v47 = vrot.slane %v5778_v18, 1  ;;  %v2250_v12 = vsel %vm2186_vm12, %v2154_v45, %v2218_v35 }
 0x276   : > { %vm2187_vm13 = vcmp.ge.f32.partialorder %v2155_v41, 0.0  ;;  %v2219_v60 = vmul.f32 0.2, %v2155_v41  ;;  %2764 = vrot.lane.b32.xlu1 %v5576_v40, %s4274_s28  ;;  %v1965_v40 = vadd.f32 1.0, %v5353_v54  ;;  %v2547_v54 = vshrl.u32 %v5645_v55, 16 }
 0x277   : > { %v5793_v11 = vsel %vm811_vm3, %v2693_v47, %v2694_v21  ;;  %v2556_v30 = vrot.slane %v2554_v59, 1 }
 0x278   : > { %v2251_v26 = vsel %vm2187_vm13, %v2155_v41, %v2219_v60  ;;  %4181 = vmatprep.mubr.msk.bf16.mxu0 %vm1068_vm4, %v5793_v11  ;;  %v1997_v0 = vmul.f32 %v1965_v40, %v1933_v50  ;;  %v2552_v21 = vor.u32 %v2551_v25, %v2547_v54  ;;  %v1934_v40 = vmul.f32 %v5745_v2, %v1898_v51 }
 0x279   : > { %v2270_v62 = vpack.c.bf16 %v2251_v26, %v2250_v12  ;;  %2888 = vrot.lane.b32.xlu0 %v5788_v46, %s4276_s17  ;;  %v2561_v50 = vshll.u32 %v5686_v28, 16 }
 0x27a   : > { %2734 = vrot.lane.b32.xlu1 %v5753_v31, %s4275_s29  ;;  %v5835_v8 = vsel %vm591_vm5, %v2552_v21, %v2556_v30 }
 0x27b   : > { %v2359_v57 = vshrl.u32 %v2270_v62, 16  ;;  %v2362_v22 = vshll.u32 %v2270_v62, 16  ;;  %v1966_v62 = vadd.f32 1.0, %v5403_v48  ;;  %v1967_v48 = vadd.f32 1.0, %v5410_v29 }
 0x27c   : > { %v2087_v7 = vpop.permute.xlu1 %2086 }
 0x27d   : > { %v2361_v45 = vrot.slane %v2359_v57, 7  ;;  %2860 = vrot.lane.b32.xlu0 %v5645_v55, %s4274_s28  ;;  %v2156_v27 = vadd.f32 %v2087_v7, %v1996_v23  ;;  %v2563_v7 = vrot.slane %v2561_v50, 1  ;;  %v1998_v59 = vmul.f32 %v1966_v62, %v1934_v40 }
 0x27e   : > { %2796 = vrot.lane.b32.xlu1 %v5604_v52, %s4276_s17 }
 0x27f   : > { %v2364_v35 = vor.u32 %v2362_v22, %v2361_v45  ;;  %v2089_v41 = vpop.permute.xlu0 %2088  ;;  %v5814_v1 = vsel %vm4356_vm2, %v2361_v45, 0  ;;  %v2220_v60 = vmul.f32 0.2, %v2156_v27  ;;  %vm2188_vm14 = vcmp.ge.f32.partialorder %v2156_v27, 0.0 }
 0x280   : > { %v2157_v47 = vadd.f32 %v2089_v41, %v1997_v0  ;;  %v2697_v36 = vrot.slane %v5814_v1, 1  ;;  %v2566_v41 = vshll.u32 %v5681_v34, 16 }
 0x281   : > { %v5819_v19 = vsel %vm4356_vm2, 0, %v2364_v35  ;;  %2830 = vrot.lane.b32.xlu0 %v5658_v3, %s4275_s29  ;;  %v2252_v57 = vsel %vm2188_vm14, %v2156_v27, %v2220_v60  ;;  %v1864_v27 = vld [vmem:[%s5229_s19 + $0xf0] sm:$0xff]  ;;  %v2559_v35 = vshrl.u32 %v5686_v28, 16  ;;  %v1865_v60 = vld [vmem:[%s5229_s19 + $0xf8] sm:$0xff] }
 0x282   : > { %vm2189_vm15 = vcmp.ge.f32.partialorder %v2157_v47, 0.0  ;;  %v2221_v12 = vmul.f32 0.2, %v2157_v47  ;;  %v2696_v26 = vrot.slane %v5819_v19, 1  ;;  %2766 = vrot.lane.b32.xlu1 %v5619_v43, %s4274_s28  ;;  %v1935_v43 = vmul.f32 %v5745_v2, %v1899_v53 }
 0x283   : > { %v2564_v53 = vor.u32 %v2563_v7, %v2559_v35  ;;  %v2568_v62 = vrot.slane %v2566_v41, 1  ;;  %v1901_v40 = vsub.f32 %v1865_v60, %v5727_v10 }
 0x284   : > { %v2253_v23 = vsel %vm2189_vm15, %v2157_v47, %v2221_v12  ;;  %v5832_v25 = vsel %vm811_vm3, %v2696_v26, %v2697_v36  ;;  %v1999_v51 = vmul.f32 %v1967_v48, %v1935_v43  ;;  %v1900_v12 = vsub.f32 %v1864_v27, %v5727_v10 }
 0x285   : > { %v2271_v45 = vpack.c.bf16 %v2253_v23, %v2252_v57  ;;  %4182 = vmatmul.mubr.msk.bf16.gmra.mrb[84].mxu0 %vm1068_vm4, %v5832_v25  ;;  %2890 = vrot.lane.b32.xlu0 %v5835_v8, %s4276_s17  ;;  %v1968_v48 = vadd.f32 1.0, %v5465_v20  ;;  %v1937_v20 = vmul.f32 %v5745_v2, %v1901_v40 }
 0x286   : > { %2736 = vrot.lane.b32.xlu1 %v5788_v46, %s4275_s29  ;;  %v1936_v43 = vmul.f32 %v5745_v2, %v1900_v12 }
 0x287   : > { %v2366_v22 = vshrl.u32 %v2271_v45, 16  ;;  %v2369_v54 = vshll.u32 %v2271_v45, 16  ;;  %v5870_v45 = vsel %vm591_vm5, %v2564_v53, %v2568_v62 }
 0x288   : > { %v2091_v42 = vpop.permute.xlu1 %2090 }
 0x289   : > { %v2368_v0 = vrot.slane %v2366_v22, 7  ;;  %2862 = vrot.lane.b32.xlu0 %v5686_v28, %s4274_s28  ;;  %v2158_v29 = vadd.f32 %v2091_v42, %v1998_v59  ;;  %v2573_v59 = vshll.u32 %v5732_v33, 16 }
 0x28a   : > { %2798 = vrot.lane.b32.xlu1 %v5645_v55, %s4276_s17 }
 0x28b   : > { %v2371_v47 = vor.u32 %v2369_v54, %v2368_v0  ;;  %v2093_v21 = vpop.permute.xlu0 %2092  ;;  %v5855_v30 = vsel %vm4356_vm2, %v2368_v0, 0  ;;  %v2222_v26 = vmul.f32 0.2, %v2158_v29  ;;  %vm2190_vm0 = vcmp.ge.f32.partialorder %v2158_v29, 0.0 }
 0x28c   : > { %v2159_v36 = vadd.f32 %v2093_v21, %v1999_v51  ;;  %v2700_v23 = vrot.slane %v5855_v30, 1  ;;  %v2000_v54 = vmul.f32 %v1968_v48, %v1936_v43  ;;  %v2575_v42 = vrot.slane %v2573_v59, 1 }
 0x28d   : > { %v5860_v34 = vsel %vm4356_vm2, 0, %v2371_v47  ;;  %2832 = vrot.lane.b32.xlu0 %v5701_v5, %s4275_s29  ;;  %v2254_v22 = vsel %vm2190_vm0, %v2158_v29, %v2222_v26  ;;  %v2571_v47 = vshrl.u32 %v5732_v33, 16  ;;  %v2585_v59 = vshll.u32 %v5778_v18, 16 }
 0x28e   : > { %vm2191_vm1 = vcmp.ge.f32.partialorder %v2159_v36, 0.0  ;;  %v2223_v50 = vmul.f32 0.2, %v2159_v36  ;;  %v2699_v57 = vrot.slane %v5860_v34, 1  ;;  %2768 = vrot.lane.b32.xlu1 %v5658_v3, %s4274_s28  ;;  %v1969_v3 = vadd.f32 1.0, %v5474_v17 }
 0x28f   : > { %v2578_v17 = vshll.u32 %v5722_v44, 16 }
 0x290   : > { %v2255_v7 = vsel %vm2191_vm1, %v2159_v36, %v2223_v50  ;;  %v5875_v10 = vsel %vm811_vm3, %v2699_v57, %v2700_v23  ;;  %v2001_v60 = vmul.f32 %v1969_v3, %v1937_v20  ;;  %v2576_v36 = vor.u32 %v2575_v42, %v2571_v47 }
 0x291   : > { %v2272_v27 = vpack.c.bf16 %v2255_v7, %v2254_v22  ;;  %4185 = vmatprep.mubr.msk.bf16.mxu0 %vm1068_vm4, %v5875_v10  ;;  %2892 = vrot.lane.b32.xlu0 %v5870_v45, %s4276_s17  ;;  %v2580_v50 = vrot.slane %v2578_v17, 1  ;;  %v2583_v42 = vshrl.u32 %v5778_v18, 16 }
 0x292   : > { %2738 = vrot.lane.b32.xlu1 %v5835_v8, %s4275_s29 }
 0x293   : > { %v2373_v0 = vshrl.u32 %v2272_v27, 16  ;;  %v2376_v41 = vshll.u32 %v2272_v27, 16  ;;  %v5907_v7 = vsel %vm591_vm5, %v2576_v36, %v2580_v50 }
 0x294   : > { %v2095_v29 = vpop.permute.xlu1 %2094 }
 0x295   : > { %v2375_v35 = vrot.slane %v2373_v0, 7  ;;  %2864 = vrot.lane.b32.xlu0 %v5732_v33, %s4274_s28  ;;  %v2160_v51 = vadd.f32 %v2095_v29, %v2000_v54  ;;  %v2587_v0 = vrot.slane %v2585_v59, 1 }
 0x296   : > { %2800 = vrot.lane.b32.xlu1 %v5686_v28, %s4276_s17 }
 0x297   : > { %v2378_v21 = vor.u32 %v2376_v41, %v2375_v35  ;;  %v2097_v2 = vpop.permute.xlu0 %2096  ;;  %v2224_v53 = vmul.f32 0.2, %v2160_v51  ;;  %v5894_v26 = vsel %vm4356_vm2, %v2375_v35, 0  ;;  %vm2192_vm8 = vcmp.ge.f32.partialorder %v2160_v51, 0.0 }
 0x298   : > { %v2161_v12 = vadd.f32 %v2097_v2, %v2001_v60  ;;  %v2783_v40 = vpop.permute.xlu1 %2782  ;;  %v2703_v48 = vrot.slane %v5894_v26, 1  ;;  %v2590_v35 = vshll.u32 %v5773_v63, 16  ;;  %v2588_v29 = vor.u32 %v2587_v0, %v2583_v42 }
 0x299   : > { %v5898_v62 = vsel %vm4356_vm2, 0, %v2378_v21  ;;  %2834 = vrot.lane.b32.xlu0 %v5750_v39, %s4275_s29  ;;  %v2256_v43 = vsel %vm2192_vm8, %v2160_v51, %v2224_v53  ;;  %v2967_v2 = vsel %vm1134_vm7, %v4826_v16, %v2783_v40  ;;  %v4264_v16 = vld [vmem:[%s6353_s5 + $0x88] sm:$0xff]  }
 0x29a   : > { %vm2193_vm9 = vcmp.ge.f32.partialorder %v2161_v12, 0.0  ;;  %v2225_v44 = vmul.f32 0.2, %v2161_v12  ;;  %2770 = vrot.lane.b32.xlu1 %v5701_v5, %s4274_s28  ;;  %v2702_v23 = vrot.slane %v5898_v62, 1  ;;  %v2592_v17 = vrot.slane %v2590_v35, 1 }
 0x29b   : > { %v2815_v57 = vpop.permute.xlu0 %2814  ;;  %v2609_v35 = vshll.u32 %v5860_v34, 16 }
 0x29c   : > { %v2257_v22 = vsel %vm2193_vm9, %v2161_v12, %v2225_v44  ;;  %v5913_v3 = vsel %vm811_vm3, %v2702_v23, %v2703_v48  ;;  %v2753_v20 = vpop.permute.xlu1 %2752  ;;  %v3016_v51 = vsel %vm1068_vm4, %v5525_v56, %v2815_v57  ;;  %v5938_v53 = vsel %vm591_vm5, %v2588_v29, %v2592_v17 }
 0x29d   : > { %v5910_v27 = vpack.c.bf16 %v2257_v22, %v2256_v43  ;;  %2894 = vrot.lane.b32.xlu0 %v5907_v7, %s4276_s17  ;;  %4186 = vmatmul.mubr.msk.bf16.gmra.mrb[88].mxu0 %vm1068_vm4, %v5913_v3  ;;  %v2597_v56 = vshll.u32 %v5819_v19, 16  ;;  %v2595_v23 = vshrl.u32 %v5819_v19, 16  ;;  %v2602_v48 = vshll.u32 %v5814_v1, 16 }
 0x29e   : > { %2740 = vrot.lane.b32.xlu1 %v5870_v45, %s4275_s29  ;;  %v2611_v29 = vrot.slane %v2609_v35, 1  ;;  %v2607_v17 = vshrl.u32 %v5860_v34, 16 }
 0x29f   : > { %v2817_v5 = vpop.permute.xlu0 %2816  ;;  %v2599_v40 = vrot.slane %v2597_v56, 1  ;;  %v2604_v1 = vrot.slane %v2602_v48, 1 }
 0x2a0   : > { %v2723_v54 = vpop.permute.xlu1 %2722  ;;  %v3019_v57 = vsel %vm1068_vm4, %v5532_v61, %v2817_v5 }
 0x2a1   : > { %2866 = vrot.lane.b32.xlu0 %v5778_v18, %s4274_s28  ;;  %v2907_v44 = vsel %vm1068_vm4, %v5443_v37, %v2723_v54  ;;  %v2600_v0 = vor.u32 %v2599_v40, %v2595_v23 }
 0x2a2   : > { %2802 = vrot.lane.b32.xlu1 %v5732_v33, %s4276_s17  ;;  %v2937_v59 = vsel %vm1101_vm6, %v2907_v44, %v2753_v20 }
 0x2a3   : > { %v2877_v41 = vpop.permute.xlu0 %2876  ;;  %v5970_v42 = vsel %vm591_vm5, %v2600_v0, %v2604_v1  ;;  %v2626_v0 = vshll.u32 %v5894_v26, 16 }
 0x2a4   : > { %v2847_v60 = vpop.permute.xlu1 %2846 }
 0x2a5   : > { %2836 = vrot.lane.b32.xlu0 %v5793_v11, %s4275_s29  ;;  %v3063_v47 = vsel %vm1101_vm6, %v3016_v51, %v2847_v60  ;;  %v2380_v51 = vshrl.u32 %v5910_v27, 16  ;;  %v2628_v26 = vrot.slane %v2626_v0, 1 }
 0x2a6   : > { %2772 = vrot.lane.b32.xlu1 %v5750_v39, %s4274_s28  ;;  %v3094_v63 = vsel %vm1134_vm7, %v3063_v47, %v2877_v41  ;;  %v4263_v39 = vld [vmem:[%s6353_s5 + $0x80] sm:$0xff]  }
 0x2a7   : > { %v2849_v21 = vpop.permute.xlu0 %2848  ;;  %3368 = vmatprep.mubr.bf16.mxu1 %v3094_v63 }
 0x2a8   : > { %v2785_v12 = vpop.permute.xlu1 %2784  ;;  %3369 = vmatmul.mubr.bf16.vlgmr.msra.gmra.mrb[32].mxu1 %v2967_v2  ;;  %v3065_v43 = vsel %vm1101_vm6, %v3019_v57, %v2849_v21  ;;  %v2614_v21 = vshll.u32 %v5855_v30, 16 }
 0x2a9   : > { %2896 = vrot.lane.b32.xlu0 %v5938_v53, %s4276_s17  ;;  %4195 = vmatpush3.bf16.msra.mxu1 %v4263_v39  ;;  %v2970_v5 = vsel %vm1134_vm7, %v2937_v59, %v2785_v12  ;;  %v2612_v12 = vor.u32 %v2611_v29, %v2607_v17  ;;  %v2382_v39 = vrot.slane %v2380_v51, 7  ;;  %v2619_v59 = vshrl.u32 %v5898_v62, 16 }
 0x2aa   : > { %2742 = vrot.lane.b32.xlu1 %v5907_v7, %s4275_s29  ;;  %4194 = vmatprep.subr.bf16.mxu1 %v4264_v16  ;;  %v2616_v30 = vrot.slane %v2614_v21, 1 }
 0x2ab   : > { %v2819_v36 = vpop.permute.xlu0 %2818  ;;  %v2449_v29 = vsel %vm4356_vm2, %v2382_v39, 0 }
 0x2ac   : > { %v2755_v50 = vpop.permute.xlu1 %2754  ;;  %v3022_v47 = vsel %vm1068_vm4, %v5579_v13, %v2819_v36  ;;  %v5998_v44 = vsel %vm591_vm5, %v2612_v12, %v2616_v30  ;;  %v2713_v17 = vshll.u32 %v2449_v29, 16 }
 0x2ad   : > { %2868 = vrot.lane.b32.xlu0 %v5819_v19, %s4274_s28  ;;  %4196 = vmatpush3.bf16.msra.mxu1 %v4264_v16  ;;  %v2383_v16 = vshll.u32 %v5910_v27, 16 }
 0x2ae   : > { %2804 = vrot.lane.b32.xlu1 %v5778_v18, %s4276_s17 }
 0x2af   : > { %v2879_v22 = vpop.permute.xlu0 %2878  ;;  %v2385_v23 = vor.u32 %v2383_v16, %v2382_v39  ;;  %v2720_v16 = vrot.slane %v2449_v29, 1 }
 0x2b0   : > { %v3097_v37 = vsel %vm1134_vm7, %v3065_v43, %v2879_v22  ;;  %v2725_v61 = vpop.permute.xlu1 %2724 }
 0x2b1   : > { %2838 = vrot.lane.b32.xlu0 %v5832_v25, %s4275_s29  ;;  %3376 = vmatprep.mubr.bf16.mxu1 %v3097_v37  ;;  %v2909_v60 = vsel %vm1068_vm4, %v5320_v4, %v2725_v61  ;;  %v2433_v22 = vsel %vm4356_vm2, 0, %v2385_v23 }
 0x2b2   : > { %3377 = vmatmul.mubr.bf16.gmra.mrb[36].mxu1 %v2970_v5  ;;  %2774 = vrot.lane.b32.xlu1 %v5793_v11, %s4274_s28  ;;  %v2939_v4 = vsel %vm1101_vm6, %v2909_v60, %v2755_v50  ;;  %v2621_v50 = vshll.u32 %v5898_v62, 16  ;;  %v2708_v35 = vshll.u32 %v2433_v22, 16 }
 0x2b3   : > { %v2851_v54 = vpop.permute.xlu0 %2850 }
 0x2b4   : > { %v2787_v20 = vpop.permute.xlu1 %2786  ;;  %v3067_v63 = vsel %vm1101_vm6, %v3022_v47, %v2851_v54  ;;  %v2623_v43 = vrot.slane %v2621_v50, 1  ;;  %v2710_v60 = vrot.slane %v2708_v35, 1  ;;  %v2706_v47 = vshrl.u32 %v2433_v22, 16 }
 0x2b5   : > { %2898 = vrot.lane.b32.xlu0 %v5970_v42, %s4276_s17  ;;  %v2973_v36 = vsel %vm1134_vm7, %v2939_v4, %v2787_v20 }
 0x2b6   : > { %2744 = vrot.lane.b32.xlu1 %v5938_v53, %s4275_s29  ;;  %v2624_v54 = vor.u32 %v2623_v43, %v2619_v59 }
 0x2b7   : > { %v2821_v41 = vpop.permute.xlu0 %2820 }
 0x2b8   : > { %v2757_v11 = vpop.permute.xlu1 %2756  ;;  %v3025_v37 = vsel %vm1068_vm4, %v5614_v58, %v2821_v41  ;;  %v6028_v51 = vsel %vm591_vm5, %v2624_v54, %v2628_v26 }
 0x2b9   : > { %2870 = vrot.lane.b32.xlu0 %v5860_v34, %s4274_s28 }
 0x2ba   : > { %2806 = vrot.lane.b32.xlu1 %v5819_v19, %s4276_s17 }
 0x2bb   : > { %v2881_v2 = vpop.permute.xlu0 %2880 }
 0x2bc   : > { %v3100_v56 = vsel %vm1134_vm7, %v3067_v63, %v2881_v2  ;;  %v2727_v13 = vpop.permute.xlu1 %2726  ;;  %v2711_v63 = vor.u32 %v2710_v60, %v2706_v47 }
 0x2bd   : > { %2840 = vrot.lane.b32.xlu0 %v5875_v10, %s4275_s29  ;;  %3384 = vmatprep.mubr.bf16.mxu1 %v3100_v56  ;;  %v2911_v27 = vsel %vm1068_vm4, %v5344_v38, %v2727_v13  ;;  %v2715_v56 = vrot.slane %v2713_v17, 1 }
 0x2be   : > { %3385 = vmatmul.mubr.bf16.gmra.mrb[40].mxu1 %v2973_v36  ;;  %2776 = vrot.lane.b32.xlu1 %v5832_v25, %s4274_s28  ;;  %v2941_v1 = vsel %vm1101_vm6, %v2911_v27, %v2757_v11  ;;  %v2719_v36 = vrot.slane %v2433_v22, 1 }
 0x2bf   : > { %v2853_v40 = vpop.permute.xlu0 %2852  ;;  %v6043_v39 = vsel %vm591_vm5, %v2711_v63, %v2715_v56 }
 0x2c0   : > { %v2789_v57 = vpop.permute.xlu1 %2788  ;;  %v3069_v61 = vsel %vm1101_vm6, %v3025_v37, %v2853_v40  ;;  %v6053_v50 = vsel %vm811_vm3, %v2719_v36, %v2720_v16 }
 0x2c1   : > { %2900 = vrot.lane.b32.xlu0 %v5998_v44, %s4276_s17  ;;  %v2976_v20 = vsel %vm1134_vm7, %v2941_v1, %v2789_v57 }
 0x2c2   : > { %2746 = vrot.lane.b32.xlu1 %v5970_v42, %s4275_s29 }
 0x2c3   : > { %v2823_v48 = vpop.permute.xlu0 %2822 }
 0x2c4   : > { %v2759_v25 = vpop.permute.xlu1 %2758  ;;  %v3028_v2 = vsel %vm1068_vm4, %v5661_v15, %v2823_v48 }
 0x2c5   : > { %2872 = vrot.lane.b32.xlu0 %v5898_v62, %s4274_s28 }
 0x2c6   : > { %2808 = vrot.lane.b32.xlu1 %v5860_v34, %s4276_s17 }
 0x2c7   : > { %v2883_v5 = vpop.permute.xlu0 %2882 }
 0x2c8   : > { %v3103_v38 = vsel %vm1134_vm7, %v3069_v61, %v2883_v5  ;;  %v2729_v58 = vpop.permute.xlu1 %2728 }
 0x2c9   : > { %2842 = vrot.lane.b32.xlu0 %v5913_v3, %s4275_s29  ;;  %3392 = vmatprep.mubr.bf16.mxu1 %v3103_v38 }
 0x2ca   : > { %3393 = vmatmul.mubr.bf16.gmra.mrb[44].mxu1 %v2976_v20  ;;  %2778 = vrot.lane.b32.xlu1 %v5875_v10, %s4274_s28  ;;  %v2913_v10 = vsel %vm1068_vm4, %v5400_v24, %v2729_v58 }
 0x2cb   : > { %v2855_v41 = vpop.permute.xlu0 %2854  ;;  %v2943_v24 = vsel %vm1101_vm6, %v2913_v10, %v2759_v25 }
 0x2cc   : > { %v2791_v11 = vpop.permute.xlu1 %2790  ;;  %v3071_v4 = vsel %vm1101_vm6, %v3028_v2, %v2855_v41 }
 0x2cd   : > { %2902 = vrot.lane.b32.xlu0 %v6028_v51, %s4276_s17  ;;  %v2979_v15 = vsel %vm1134_vm7, %v2943_v24, %v2791_v11 }
 0x2ce   : > { %2748 = vrot.lane.b32.xlu1 %v5998_v44, %s4275_s29 }
 0x2cf   : > { %v2825_v21 = vpop.permute.xlu0 %2824 }
 0x2d0   : > { %v2761_v14 = vpop.permute.xlu1 %2760  ;;  %v3031_v27 = vsel %vm1068_vm4, %v5696_v6, %v2825_v21 }
 0x2d1   : > { %2874 = vrot.lane.b32.xlu0 %v2433_v22, %s4274_s28 }
 0x2d2   : > { %2810 = vrot.lane.b32.xlu1 %v5898_v62, %s4276_s17 }
 0x2d3   : > { %v2885_v12 = vpop.permute.xlu0 %2884 }
 0x2d4   : > { %v3106_v13 = vsel %vm1134_vm7, %v3071_v4, %v2885_v12  ;;  %v2731_v30 = vpop.permute.xlu1 %2730 }
 0x2d5   : > { %2904 = vrot.lane.b32.xlu0 %v6043_v39, %s4276_s17  ;;  %3400 = vmatprep.mubr.bf16.mxu1 %v3106_v13  ;;  %v2915_v48 = vsel %vm1068_vm4, %v5462_v32, %v2731_v30 }
 0x2d6   : > { %3401 = vmatmul.mubr.bf16.gmra.mrb[48].mxu1 %v2979_v15  ;;  %2750 = vrot.lane.b32.xlu1 %v6028_v51, %s4275_s29  ;;  %v2945_v61 = vsel %vm1101_vm6, %v2915_v48, %v2761_v14 }
 0x2d7   : > { %v2857_v40 = vpop.permute.xlu0 %2856 }
 0x2d8   : > { %v2793_v57 = vpop.permute.xlu1 %2792  ;;  %v3073_v25 = vsel %vm1101_vm6, %v3031_v27, %v2857_v40 }
 0x2d9   : > { %2844 = vrot.lane.b32.xlu0 %v6053_v50, %s4275_s29  ;;  %v2982_v32 = vsel %vm1134_vm7, %v2945_v61, %v2793_v57 }
 0x2da   : > { %2812 = vrot.lane.b32.xlu1 %v2433_v22, %s4276_s17 }
 0x2db   : > { %v2827_v23 = vpop.permute.xlu0 %2826 }
 0x2dc   : > { %v2763_v43 = vpop.permute.xlu1 %2762  ;;  %v3034_v20 = vsel %vm1068_vm4, %v5753_v31, %v2827_v23 }
 0x2dd   : > { %2780 = vrot.lane.b32.xlu0 %v5913_v3, %s4274_s28 }
 0x2df   : > { %v2887_v37 = vpop.permute.xlu0 %2886 }
 0x2e0   : > { %v6065_v59 = vpop.f32.mrb[64].mxu0  ;;  %v3109_v0 = vsel %vm1134_vm7, %v3073_v25, %v2887_v37  ;;  %v2733_v5 = vpop.permute.xlu1 %2732 }
 0x2e1   : > { %v6069_v22 = vpop.f32.mrb[65].mxu0  ;;  %3408 = vmatprep.mubr.bf16.mxu1 %v3109_v0  ;;  %v2917_v35 = vsel %vm1068_vm4, %v5520_v9, %v2733_v5 }
 0x2e2   : > { %3409 = vmatmul.mubr.bf16.gmra.mrb[52].mxu1 %v2982_v32  ;;  %v6072_v3 = vpop.f32.mrb[66].mxu0  ;;  %v2947_v60 = vsel %vm1101_vm6, %v2917_v35, %v2763_v43 }
 0x2e3   : > { %v6074_v38 = vpop.f32.mrb[67].mxu0  ;;  %v2859_v6 = vpop.permute.xlu0 %2858 }
 0x2e4   : > { %v2795_v1 = vpop.permute.xlu1 %2794  ;;  %v3075_v26 = vsel %vm1101_vm6, %v3034_v20, %v2859_v6 }
 0x2e5   : > { %v2985_v47 = vsel %vm1134_vm7, %v2947_v60, %v2795_v1 }
 0x2e7   : > { %v2829_v54 = vpop.permute.xlu0 %2828 }
 0x2e8   : > { %v2765_v58 = vpop.permute.xlu1 %2764  ;;  %v3037_v31 = vsel %vm1068_vm4, %v5788_v46, %v2829_v54 }
 0x2eb   : > { %v2889_v41 = vpop.permute.xlu0 %2888 }
 0x2ec   : > { %v3112_v29 = vsel %vm1134_vm7, %v3075_v26, %v2889_v41  ;;  %v2735_v11 = vpop.permute.xlu1 %2734 }
 0x2ed   : > { %3416 = vmatprep.mubr.bf16.mxu1 %v3112_v29  ;;  %v2919_v9 = vsel %vm1068_vm4, %v5563_v49, %v2735_v11 }
 0x2ee   : > { %3417 = vmatmul.mubr.bf16.gmra.mrb[56].mxu1 %v2985_v47  ;;  %v2949_v12 = vsel %vm1101_vm6, %v2919_v9, %v2765_v58 }
 0x2ef   : > { %v2861_v17 = vpop.permute.xlu0 %2860 }
 0x2f0   : > { %v2797_v21 = vpop.permute.xlu1 %2796  ;;  %v3077_v14 = vsel %vm1101_vm6, %v3037_v31, %v2861_v17 }
 0x2f1   : > { %v2988_v36 = vsel %vm1134_vm7, %v2949_v12, %v2797_v21 }
 0x2f3   : > { %v2831_v63 = vpop.permute.xlu0 %2830 }
 0x2f4   : > { %v2767_v10 = vpop.permute.xlu1 %2766  ;;  %v3040_v23 = vsel %vm1068_vm4, %v5835_v8, %v2831_v63 }
 0x2f7   : > { %v2891_v2 = vpop.permute.xlu0 %2890 }
 0x2f8   : > { %v6089_v56 = vpop.f32.mrb[68].mxu0  ;;  %v3115_v4 = vsel %vm1134_vm7, %v3077_v14, %v2891_v2  ;;  %v2737_v24 = vpop.permute.xlu1 %2736 }
 0x2f9   : > { %v6093_v13 = vpop.f32.mrb[69].mxu0  ;;  %3424 = vmatprep.mubr.bf16.mxu1 %v3115_v4  ;;  %v2921_v40 = vsel %vm1068_vm4, %v5604_v52, %v2737_v24 }
 0x2fa   : > { %3425 = vmatmul.mubr.bf16.gmra.mrb[60].mxu1 %v2988_v36  ;;  %v6096_v49 = vpop.f32.mrb[70].mxu0  ;;  %v2951_v25 = vsel %vm1101_vm6, %v2921_v40, %v2767_v10 }
 0x2fb   : > { %v6098_v30 = vpop.f32.mrb[71].mxu0  ;;  %v2863_v46 = vpop.permute.xlu0 %2862 }
 0x2fc   : > { %v2799_v15 = vpop.permute.xlu1 %2798  ;;  %v3079_v48 = vsel %vm1101_vm6, %v3040_v23, %v2863_v46 }
 0x2fd   : > { %v2991_v0 = vsel %vm1134_vm7, %v2951_v25, %v2799_v15 }
 0x2ff   : > { %v2833_v16 = vpop.permute.xlu0 %2832 }
 0x300   : > { %v2769_v57 = vpop.permute.xlu1 %2768  ;;  %v3043_v8 = vsel %vm1068_vm4, %v5870_v45, %v2833_v16 }
 0x303   : > { %v2893_v43 = vpop.permute.xlu0 %2892 }
 0x304   : > { %v3118_v27 = vsel %vm1134_vm7, %v3079_v48, %v2893_v43  ;;  %v2739_v37 = vpop.permute.xlu1 %2738 }
 0x305   : > { %3432 = vmatprep.mubr.bf16.mxu1 %v3118_v27  ;;  %v2923_v52 = vsel %vm1068_vm4, %v5645_v55, %v2739_v37 }
 0x306   : > { %3433 = vmatmul.mubr.bf16.gmra.mrb[64].mxu1 %v2991_v0  ;;  %v2953_v20 = vsel %vm1101_vm6, %v2923_v52, %v2769_v57 }
 0x307   : > { %v2865_v61 = vpop.permute.xlu0 %2864 }
 0x308   : > { %v2801_v5 = vpop.permute.xlu1 %2800  ;;  %v3081_v1 = vsel %vm1101_vm6, %v3043_v8, %v2865_v61 }
 0x309   : > { %v2994_v29 = vsel %vm1134_vm7, %v2953_v20, %v2801_v5 }
 0x30b   : > { %v2835_v32 = vpop.permute.xlu0 %2834 }
 0x30c   : > { %v2771_v6 = vpop.permute.xlu1 %2770  ;;  %v3046_v63 = vsel %vm1068_vm4, %v5907_v7, %v2835_v32 }
 0x30f   : > { %v2895_v54 = vpop.permute.xlu0 %2894  ;;  %v6113_v35 = vpop.f32.mrb[72].mxu0 }
 0x310   : > { %v3121_v58 = vsel %vm1134_vm7, %v3081_v1, %v2895_v54  ;;  %v6117_v26 = vpop.f32.mrb[73].mxu0  ;;  %v2741_v41 = vpop.permute.xlu1 %2740 }
 0x311   : > { %3440 = vmatprep.mubr.bf16.mxu1 %v3121_v58  ;;  %v6120_v55 = vpop.f32.mrb[74].mxu0  ;;  %v2925_v17 = vsel %vm1068_vm4, %v5686_v28, %v2741_v41 }
 0x312   : > { %3441 = vmatmul.mubr.bf16.gmra.mrb[68].mxu1 %v2994_v29  ;;  %v6122_v60 = vpop.f32.mrb[75].mxu0  ;;  %v2955_v14 = vsel %vm1101_vm6, %v2925_v17, %v2771_v6 }
 0x313   : > { %v2867_v45 = vpop.permute.xlu0 %2866 }
 0x314   : > { %v2803_v11 = vpop.permute.xlu1 %2802  ;;  %v3083_v9 = vsel %vm1101_vm6, %v3046_v63, %v2867_v45 }
 0x315   : > { %v2997_v4 = vsel %vm1134_vm7, %v2955_v14, %v2803_v11 }
 0x317   : > { %v2837_v47 = vpop.permute.xlu0 %2836 }
 0x318   : > { %v2773_v21 = vpop.permute.xlu1 %2772  ;;  %v3049_v7 = vsel %vm1068_vm4, %v5938_v53, %v2837_v47 }
 0x31b   : > { %v2897_v10 = vpop.permute.xlu0 %2896 }
 0x31c   : > { %v3124_v31 = vsel %vm1134_vm7, %v3083_v9, %v2897_v10  ;;  %v2743_v2 = vpop.permute.xlu1 %2742 }
 0x31d   : > { %3448 = vmatprep.mubr.bf16.mxu1 %v3124_v31  ;;  %v2927_v28 = vsel %vm1068_vm4, %v5732_v33, %v2743_v2 }
 0x31e   : > { %3449 = vmatmul.mubr.bf16.gmra.mrb[72].mxu1 %v2997_v4  ;;  %v2957_v23 = vsel %vm1101_vm6, %v2927_v28, %v2773_v21 }
 0x31f   : > { %v2869_v12 = vpop.permute.xlu0 %2868 }
 0x320   : > { %v2805_v24 = vpop.permute.xlu1 %2804  ;;  %v3085_v15 = vsel %vm1101_vm6, %v3049_v7, %v2869_v12 }
 0x321   : > { %v3000_v27 = vsel %vm1134_vm7, %v2957_v23, %v2805_v24 }
 0x323   : > { %v2839_v36 = vpop.permute.xlu0 %2838 }
 0x324   : > { %v2775_v46 = vpop.permute.xlu1 %2774  ;;  %v3052_v32 = vsel %vm1068_vm4, %v5970_v42, %v2839_v36 }
 0x327   : > { %v2899_v16 = vpop.permute.xlu0 %2898  ;;  %v6137_v40 = vpop.f32.mrb[76].mxu0 }
 0x328   : > { %v3127_v57 = vsel %vm1134_vm7, %v3085_v15, %v2899_v16  ;;  %v6141_v48 = vpop.f32.mrb[77].mxu0  ;;  %v2745_v43 = vpop.permute.xlu1 %2744 }
 0x329   : > { %3456 = vmatprep.mubr.bf16.mxu1 %v3127_v57  ;;  %v6144_v33 = vpop.f32.mrb[78].mxu0  ;;  %v2929_v61 = vsel %vm1068_vm4, %v5778_v18, %v2745_v43  ;;  %v6364_v57 = vld [vmem:[#allocation3_spill] sm:$0xff] }
 0x32a   : > { %3457 = vmatmul.mubr.bf16.gmra.mrb[76].mxu1 %v3000_v27  ;;  %v6146_v25 = vpop.f32.mrb[79].mxu0  ;;  %v2959_v1 = vsel %vm1101_vm6, %v2929_v61, %v2775_v46 }
 0x32b   : > { %v2871_v53 = vpop.permute.xlu0 %2870 }
 0x32c   : > { %v2807_v37 = vpop.permute.xlu1 %2806  ;;  %v3087_v52 = vsel %vm1101_vm6, %v3052_v32, %v2871_v53 }
 0x32d   : > { %v3003_v58 = vsel %vm1134_vm7, %v2959_v1, %v2807_v37 }
 0x32f   : > { %v2841_v0 = vpop.permute.xlu0 %2840 }
 0x330   : > { %v2777_v5 = vpop.permute.xlu1 %2776  ;;  %v3055_v42 = vsel %vm1068_vm4, %v5998_v44, %v2841_v0 }
 0x333   : > { %v2901_v6 = vpop.permute.xlu0 %2900 }
 0x334   : > { %v3130_v8 = vsel %vm1134_vm7, %v3087_v52, %v2901_v6  ;;  %v2747_v54 = vpop.permute.xlu1 %2746  ;;  %v6366_v52 = vld [vmem:[#allocation2_spill] sm:$0xff] }
 0x335   : > { %3464 = vmatprep.mubr.bf16.mxu1 %v3130_v8  ;;  %v2931_v18 = vsel %vm1068_vm4, %v5819_v19, %v2747_v54 }
 0x336   : > { %3465 = vmatmul.mubr.bf16.gmra.mrb[80].mxu1 %v3003_v58  ;;  %v2961_v63 = vsel %vm1101_vm6, %v2931_v18, %v2777_v5  ;;  %v6213_v58 = vld [vmem:[%s6354_s6] ss:$0 sm:$0xff] }
 0x337   : > { %v2873_v20 = vpop.permute.xlu0 %2872 }
 0x338   : > { %v2809_v41 = vpop.permute.xlu1 %2808  ;;  %v3089_v11 = vsel %vm1101_vm6, %v3055_v42, %v2873_v20 }
 0x339   : > { %v3006_v31 = vsel %vm1134_vm7, %v2961_v63, %v2809_v41 }
 0x33b   : > { %v2843_v29 = vpop.permute.xlu0 %2842 }
 0x33c   : > { %v2779_v45 = vpop.permute.xlu1 %2778  ;;  %v3058_v12 = vsel %vm1068_vm4, %v6028_v51, %v2843_v29  ;;  %v6365_v51 = vld [vmem:[#allocation4_spill] sm:$0xff] }
 0x33f   : > { %v2903_v47 = vpop.permute.xlu0 %2902  ;;  %v6161_v17 = vpop.f32.mrb[80].mxu0 }
 0x340   : > { %v3133_v21 = vsel %vm1134_vm7, %v3089_v11, %v2903_v47  ;;  %v6165_v9 = vpop.f32.mrb[81].mxu0  ;;  %v2749_v10 = vpop.permute.xlu1 %2748 }
 0x341   : > { %3472 = vmatprep.mubr.bf16.mxu1 %v3133_v21  ;;  %v6168_v19 = vpop.f32.mrb[82].mxu0  ;;  %v2933_v2 = vsel %vm1068_vm4, %v5860_v34, %v2749_v10 }
 0x342   : > { %3473 = vmatmul.mubr.bf16.gmra.mrb[84].mxu1 %v3006_v31  ;;  %v6170_v14 = vpop.f32.mrb[83].mxu0  ;;  %v2963_v46 = vsel %vm1101_vm6, %v2933_v2, %v2779_v45 }
 0x343   : > { %v2875_v44 = vpop.permute.xlu0 %2874 }
 0x344   : > { %v2811_v4 = vpop.permute.xlu1 %2810  ;;  %v3091_v24 = vsel %vm1101_vm6, %v3058_v12, %v2875_v44 }
 0x345   : > { %v3009_v7 = vsel %vm1134_vm7, %v2963_v46, %v2811_v4 }
 0x347   : > { %v2905_v36 = vpop.permute.xlu0 %2904 }
 0x348   : > { %v3136_v28 = vsel %vm1134_vm7, %v3091_v24, %v2905_v36  ;;  %v2751_v15 = vpop.permute.xlu1 %2750 }
 0x349   : > { %3480 = vmatprep.mubr.bf16.mxu1 %v3136_v28  ;;  %v2935_v27 = vsel %vm1068_vm4, %v5898_v62, %v2751_v15 }
 0x34a   : > { %3481 = vmatmul.mubr.bf16.gmra.mrb[88].mxu1 %v3009_v7 }
 0x34b   : > { %v2845_v16 = vpop.permute.xlu0 %2844 }
 0x34c   : > { %v3061_v34 = vsel %vm1068_vm4, %v6043_v39, %v2845_v16  ;;  %v2813_v37 = vpop.permute.xlu1 %2812 }
 0x34d   : > { %v3092_v23 = vsel %vm1101_vm6, %v3061_v34, %v6364_v57 }
 0x34e   : > { %v3138_v43 = vsel %vm1134_vm7, %v3092_v23, %v6365_v51 }
 0x34f   : > { %v2781_v53 = vpop.permute.xlu0 %2780  ;;  %3488 = vmatprep.mubr.bf16.mxu1 %v3138_v43 }
 0x350   : > { %v2965_v0 = vsel %vm1101_vm6, %v2935_v27, %v2781_v53 }
 0x351   : > { %v3012_v61 = vsel %vm1134_vm7, %v2965_v0, %v2813_v37 }
 0x352   : > { %3489 = vmatmul.mubr.bf16.gmra.mrb[92].mxu1 %v3012_v61 }
 0x353   : > { %4189 = vmatprep.mubr.msk.bf16.mxu1 %vm1068_vm4, %v6053_v50 }
 0x358   : > { %v6192_v39 = vpop.f32.mrb[84].mxu0 }
 0x359   : > { %v6194_v5 = vpop.f32.mrb[85].mxu0 }
 0x35a   : > { %v6196_v32 = vpop.f32.mrb[86].mxu0  ;;  %4190 = vmatmul.mubr.msk.bf16.vlgmr.msra.gmra.mrb[96].mxu1 %vm1068_vm4, %v6366_v52 }
 0x35b   : > { %v6200_v62 = vpop.f32.mrb[87].mxu0 }
 0x370   : > { %v6202_v6 = vpop.f32.mrb[88].mxu0 }
 0x371   : > { %v6204_v8 = vpop.f32.mrb[89].mxu0 }
 0x372   : > { %v6206_v1 = vpop.f32.mrb[90].mxu0 }
 0x373   : > { %v6208_v54 = vpop.f32.mrb[91].mxu0 }
 0x37b   : > { %v4007_v50 = vpop.f32.mrb[32].mxu1 }
 0x37c   : > { %v4008_v20 = vpop.f32.mrb[33].mxu1 }
 0x37d   : > { %v4009_v41 = vadd.f32 %v4008_v20, %v4007_v50  ;;  %v4010_v29 = vpop.f32.mrb[34].mxu1 }
 0x37e   : > { %v4011_v18 = vpop.f32.mrb[35].mxu1 }
 0x37f   : > { %v3371_v45 = vadd.f32 %v4009_v41, %v6213_v58  ;;  %v4012_v42 = vadd.f32 %v4011_v18, %v4010_v29 }
 0x381   : > { %v3532_v11 = vadd.f32 %v6069_v22, %v3371_v45  ;;  %v3374_v47 = vadd.f32 %v4012_v42, %v6213_v58 }
 0x383   : > { %3658 = vst.msk [vmem:[%s6220_s10] sm:$0xff] %vm1101_vm6, %v3532_v11  ;;  %v3535_v21 = vadd.f32 %v6074_v38, %v3374_v47 }
 0x385   : > { %v4013_v63 = vpop.f32.mrb[36].mxu1  ;;  %3659 = vst.msk [vmem:[%s6220_s10 + $0x8] sm:$0xff] %vm1101_vm6, %v3535_v21 }
 0x386   : > { %v4014_v10 = vpop.f32.mrb[37].mxu1 }
 0x387   : > { %v4015_v31 = vadd.f32 %v4014_v10, %v4013_v63  ;;  %v4016_v44 = vpop.f32.mrb[38].mxu1 }
 0x388   : > { %v4017_v2 = vpop.f32.mrb[39].mxu1 }
 0x389   : > { %v3379_v4 = vadd.f32 %v4015_v31, %v6213_v58  ;;  %v4018_v12 = vadd.f32 %v4017_v2, %v4016_v44 }
 0x38b   : > { %v3540_v22 = vadd.f32 %v6065_v59, %v3379_v4  ;;  %v3382_v24 = vadd.f32 %v4018_v12, %v6213_v58 }
 0x38d   : > { %3660 = vst.msk [vmem:[%s6220_s10 + $0x10] sm:$0xff] %vm1101_vm6, %v3540_v22  ;;  %v3543_v38 = vadd.f32 %v6072_v3, %v3382_v24 }
 0x38f   : > { %3661 = vst.msk [vmem:[%s6220_s10 + $0x18] sm:$0xff] %vm1101_vm6, %v3543_v38 }
 0x391   : > { %v4019_v36 = vpop.f32.mrb[40].mxu1 }
 0x392   : > { %v4020_v28 = vpop.f32.mrb[41].mxu1 }
 0x393   : > { %v4021_v46 = vadd.f32 %v4020_v28, %v4019_v36  ;;  %v4022_v7 = vpop.f32.mrb[42].mxu1 }
 0x394   : > { %v4023_v15 = vpop.f32.mrb[43].mxu1 }
 0x395   : > { %v3387_v16 = vadd.f32 %v4021_v46, %v6213_v58  ;;  %v4024_v34 = vadd.f32 %v4023_v15, %v4022_v7 }
 0x397   : > { %v3548_v59 = vadd.f32 %v6093_v13, %v3387_v16  ;;  %v3390_v57 = vadd.f32 %v4024_v34, %v6213_v58 }
 0x399   : > { %3662 = vst.msk [vmem:[%s6220_s10 + $0x20] sm:$0xff] %vm1101_vm6, %v3548_v59  ;;  %v3551_v3 = vadd.f32 %v6098_v30, %v3390_v57 }
 0x39b   : > { %3663 = vst.msk [vmem:[%s6220_s10 + $0x28] sm:$0xff] %vm1101_vm6, %v3551_v3 }
 0x39d   : > { %v4025_v23 = vpop.f32.mrb[44].mxu1 }
 0x39e   : > { %v4026_v51 = vpop.f32.mrb[45].mxu1 }
 0x39f   : > { %v4027_v43 = vadd.f32 %v4026_v51, %v4025_v23  ;;  %v4028_v27 = vpop.f32.mrb[46].mxu1 }
 0x3a0   : > { %v4029_v53 = vpop.f32.mrb[47].mxu1 }
 0x3a1   : > { %v3395_v37 = vadd.f32 %v4027_v43, %v6213_v58  ;;  %v4030_v0 = vadd.f32 %v4029_v53, %v4028_v27 }
 0x3a3   : > { %v3556_v13 = vadd.f32 %v6089_v56, %v3395_v37  ;;  %v3398_v61 = vadd.f32 %v4030_v0, %v6213_v58 }
 0x3a5   : > { %3664 = vst.msk [vmem:[%s6220_s10 + $0x30] sm:$0xff] %vm1101_vm6, %v3556_v13  ;;  %v3559_v30 = vadd.f32 %v6096_v49, %v3398_v61 }
 0x3a7   : > { %3665 = vst.msk [vmem:[%s6220_s10 + $0x38] sm:$0xff] %vm1101_vm6, %v3559_v30 }
 0x3a9   : > { %v4031_v52 = vpop.f32.mrb[48].mxu1 }
 0x3aa   : > { %v4032_v50 = vpop.f32.mrb[49].mxu1 }
 0x3ab   : > { %v4033_v20 = vadd.f32 %v4032_v50, %v4031_v52  ;;  %v4034_v41 = vpop.f32.mrb[50].mxu1 }
 0x3ac   : > { %v4035_v29 = vpop.f32.mrb[51].mxu1 }
 0x3ad   : > { %v3403_v18 = vadd.f32 %v4033_v20, %v6213_v58  ;;  %v4036_v45 = vadd.f32 %v4035_v29, %v4034_v41 }
 0x3af   : > { %v3564_v56 = vadd.f32 %v6117_v26, %v3403_v18  ;;  %v3406_v42 = vadd.f32 %v4036_v45, %v6213_v58 }
 0x3b1   : > { %3666 = vst.msk [vmem:[%s6220_s10 + $0x40] sm:$0xff] %vm1101_vm6, %v3564_v56  ;;  %v3567_v49 = vadd.f32 %v6122_v60, %v3406_v42 }
 0x3b3   : > { %3667 = vst.msk [vmem:[%s6220_s10 + $0x48] sm:$0xff] %vm1101_vm6, %v3567_v49 }
 0x3b5   : > { %v4037_v11 = vpop.f32.mrb[52].mxu1 }
 0x3b6   : > { %v4038_v47 = vpop.f32.mrb[53].mxu1 }
 0x3b7   : > { %v4039_v21 = vadd.f32 %v4038_v47, %v4037_v11  ;;  %v4040_v63 = vpop.f32.mrb[54].mxu1 }
 0x3b8   : > { %v4041_v10 = vpop.f32.mrb[55].mxu1 }
 0x3b9   : > { %v3411_v31 = vadd.f32 %v4039_v21, %v6213_v58  ;;  %v4042_v44 = vadd.f32 %v4041_v10, %v4040_v63 }
 0x3bb   : > { %v3572_v26 = vadd.f32 %v6113_v35, %v3411_v31  ;;  %v3414_v2 = vadd.f32 %v4042_v44, %v6213_v58 }
 0x3bd   : > { %3668 = vst.msk [vmem:[%s6220_s10 + $0x50] sm:$0xff] %vm1101_vm6, %v3572_v26  ;;  %v3575_v60 = vadd.f32 %v6120_v55, %v3414_v2 }
 0x3bf   : > { %3669 = vst.msk [vmem:[%s6220_s10 + $0x58] sm:$0xff] %vm1101_vm6, %v3575_v60 }
 0x3c1   : > { %v4043_v4 = vpop.f32.mrb[56].mxu1 }
 0x3c2   : > { %v4044_v12 = vpop.f32.mrb[57].mxu1 }
 0x3c3   : > { %v4045_v22 = vadd.f32 %v4044_v12, %v4043_v4  ;;  %v4046_v24 = vpop.f32.mrb[58].mxu1 }
 0x3c4   : > { %v4047_v38 = vpop.f32.mrb[59].mxu1 }
 0x3c5   : > { %v3419_v36 = vadd.f32 %v4045_v22, %v6213_v58  ;;  %v4048_v28 = vadd.f32 %v4047_v38, %v4046_v24 }
 0x3c7   : > { %v3580_v35 = vadd.f32 %v6141_v48, %v3419_v36  ;;  %v3422_v46 = vadd.f32 %v4048_v28, %v6213_v58 }
 0x3c9   : > { %3670 = vst.msk [vmem:[%s6220_s10 + $0x60] sm:$0xff] %vm1101_vm6, %v3580_v35  ;;  %v3583_v55 = vadd.f32 %v6146_v25, %v3422_v46 }
 0x3cb   : > { %3671 = vst.msk [vmem:[%s6220_s10 + $0x68] sm:$0xff] %vm1101_vm6, %v3583_v55 }
 0x3cd   : > { %v4049_v7 = vpop.f32.mrb[60].mxu1 }
 0x3ce   : > { %v4050_v15 = vpop.f32.mrb[61].mxu1 }
 0x3cf   : > { %v4051_v16 = vadd.f32 %v4050_v15, %v4049_v7  ;;  %v4052_v34 = vpop.f32.mrb[62].mxu1 }
 0x3d0   : > { %v4053_v59 = vpop.f32.mrb[63].mxu1 }
 0x3d1   : > { %v3427_v57 = vadd.f32 %v4051_v16, %v6213_v58  ;;  %v4054_v3 = vadd.f32 %v4053_v59, %v4052_v34 }
 0x3d3   : > { %v3588_v48 = vadd.f32 %v6137_v40, %v3427_v57  ;;  %v3430_v23 = vadd.f32 %v4054_v3, %v6213_v58 }
 0x3d5   : > { %3672 = vst.msk [vmem:[%s6220_s10 + $0x70] sm:$0xff] %vm1101_vm6, %v3588_v48  ;;  %v3591_v25 = vadd.f32 %v6144_v33, %v3430_v23 }
 0x3d7   : > { %3673 = vst.msk [vmem:[%s6220_s10 + $0x78] sm:$0xff] %vm1101_vm6, %v3591_v25 }
 0x3d9   : > { %v4055_v51 = vpop.f32.mrb[64].mxu1 }
 0x3da   : > { %v4056_v43 = vpop.f32.mrb[65].mxu1 }
 0x3db   : > { %v4057_v27 = vadd.f32 %v4056_v43, %v4055_v51  ;;  %v4058_v53 = vpop.f32.mrb[66].mxu1 }
 0x3dc   : > { %v4059_v37 = vpop.f32.mrb[67].mxu1 }
 0x3dd   : > { %v3435_v0 = vadd.f32 %v4057_v27, %v6213_v58  ;;  %v4060_v13 = vadd.f32 %v4059_v37, %v4058_v53 }
 0x3df   : > { %v3596_v40 = vadd.f32 %v6165_v9, %v3435_v0  ;;  %v3438_v61 = vadd.f32 %v4060_v13, %v6213_v58 }
 0x3e1   : > { %3674 = vst.msk [vmem:[%s6220_s10 + $0x80] sm:$0xff] %vm1101_vm6, %v3596_v40  ;;  %v3599_v33 = vadd.f32 %v6170_v14, %v3438_v61 }
 0x3e3   : > { %3675 = vst.msk [vmem:[%s6220_s10 + $0x88] sm:$0xff] %vm1101_vm6, %v3599_v33 }
 0x3e5   : > { %v4061_v30 = vpop.f32.mrb[68].mxu1 }
 0x3e6   : > { %v4062_v52 = vpop.f32.mrb[69].mxu1 }
 0x3e7   : > { %v4063_v50 = vadd.f32 %v4062_v52, %v4061_v30  ;;  %v4064_v20 = vpop.f32.mrb[70].mxu1 }
 0x3e8   : > { %v4065_v41 = vpop.f32.mrb[71].mxu1 }
 0x3e9   : > { %v3443_v29 = vadd.f32 %v4063_v50, %v6213_v58  ;;  %v4066_v18 = vadd.f32 %v4065_v41, %v4064_v20 }
 0x3eb   : > { %v3604_v9 = vadd.f32 %v6161_v17, %v3443_v29  ;;  %v3446_v45 = vadd.f32 %v4066_v18, %v6213_v58 }
 0x3ed   : > { %3676 = vst.msk [vmem:[%s6220_s10 + $0x90] sm:$0xff] %vm1101_vm6, %v3604_v9  ;;  %v3607_v14 = vadd.f32 %v6168_v19, %v3446_v45 }
 0x3ef   : > { %3677 = vst.msk [vmem:[%s6220_s10 + $0x98] sm:$0xff] %vm1101_vm6, %v3607_v14 }
 0x3f1   : > { %v4067_v56 = vpop.f32.mrb[72].mxu1 }
 0x3f2   : > { %v4068_v42 = vpop.f32.mrb[73].mxu1 }
 0x3f3   : > { %v4069_v49 = vadd.f32 %v4068_v42, %v4067_v56  ;;  %v4070_v11 = vpop.f32.mrb[74].mxu1 }
 0x3f4   : > { %v4071_v47 = vpop.f32.mrb[75].mxu1 }
 0x3f5   : > { %v3451_v21 = vadd.f32 %v4069_v49, %v6213_v58  ;;  %v4072_v63 = vadd.f32 %v4071_v47, %v4070_v11 }
 0x3f7   : > { %v3612_v17 = vadd.f32 %v6194_v5, %v3451_v21  ;;  %v3454_v10 = vadd.f32 %v4072_v63, %v6213_v58 }
 0x3f9   : > { %3678 = vst.msk [vmem:[%s6220_s10 + $0xa0] sm:$0xff] %vm1101_vm6, %v3612_v17  ;;  %v3615_v19 = vadd.f32 %v6200_v62, %v3454_v10 }
 0x3fb   : > { %3679 = vst.msk [vmem:[%s6220_s10 + $0xa8] sm:$0xff] %vm1101_vm6, %v3615_v19 }
 0x3fd   : > { %v4073_v31 = vpop.f32.mrb[76].mxu1 }
 0x3fe   : > { %v4074_v44 = vpop.f32.mrb[77].mxu1 }
 0x3ff   : > { %v4075_v26 = vadd.f32 %v4074_v44, %v4073_v31  ;;  %v4076_v2 = vpop.f32.mrb[78].mxu1 }
 0x400   : > { %v4077_v60 = vpop.f32.mrb[79].mxu1 }
 0x401   : > { %v3459_v4 = vadd.f32 %v4075_v26, %v6213_v58  ;;  %v4078_v12 = vadd.f32 %v4077_v60, %v4076_v2 }
 0x403   : > { %v3620_v5 = vadd.f32 %v6192_v39, %v3459_v4  ;;  %v3462_v22 = vadd.f32 %v4078_v12, %v6213_v58 }
 0x405   : > { %3680 = vst.msk [vmem:[%s6220_s10 + $0xb0] sm:$0xff] %vm1101_vm6, %v3620_v5  ;;  %v3623_v62 = vadd.f32 %v6196_v32, %v3462_v22 }
 0x407   : > { %3681 = vst.msk [vmem:[%s6220_s10 + $0xb8] sm:$0xff] %vm1101_vm6, %v3623_v62 }
 0x409   : > { %v4079_v24 = vpop.f32.mrb[80].mxu1 }
 0x40a   : > { %v4080_v38 = vpop.f32.mrb[81].mxu1 }
 0x40b   : > { %v4081_v36 = vadd.f32 %v4080_v38, %v4079_v24  ;;  %v4082_v28 = vpop.f32.mrb[82].mxu1 }
 0x40c   : > { %v4083_v35 = vpop.f32.mrb[83].mxu1 }
 0x40d   : > { %v3467_v46 = vadd.f32 %v4081_v36, %v6213_v58  ;;  %v4084_v55 = vadd.f32 %v4083_v35, %v4082_v28 }
 0x40f   : > { %v3628_v39 = vadd.f32 %v6204_v8, %v3467_v46  ;;  %v3470_v7 = vadd.f32 %v4084_v55, %v6213_v58 }
 0x411   : > { %3682 = vst.msk [vmem:[%s6220_s10 + $0xc0] sm:$0xff] %vm1101_vm6, %v3628_v39  ;;  %v3631_v32 = vadd.f32 %v6208_v54, %v3470_v7 }
 0x413   : > { %3683 = vst.msk [vmem:[%s6220_s10 + $0xc8] sm:$0xff] %vm1101_vm6, %v3631_v32 }
 0x415   : > { %v4085_v15 = vpop.f32.mrb[84].mxu1 }
 0x416   : > { %v4086_v16 = vpop.f32.mrb[85].mxu1 }
 0x417   : > { %v4087_v34 = vadd.f32 %v4086_v16, %v4085_v15  ;;  %v4088_v59 = vpop.f32.mrb[86].mxu1 }
 0x418   : > { %v4089_v57 = vpop.f32.mrb[87].mxu1 }
 0x419   : > { %v3475_v3 = vadd.f32 %v4087_v34, %v6213_v58  ;;  %v4090_v48 = vadd.f32 %v4089_v57, %v4088_v59 }
 0x41b   : > { %v3636_v23 = vadd.f32 %v6202_v6, %v3475_v3  ;;  %v3478_v8 = vadd.f32 %v4090_v48, %v6213_v58 }
 0x41d   : > { %3684 = vst.msk [vmem:[%s6220_s10 + $0xd0] sm:$0xff] %vm1101_vm6, %v3636_v23  ;;  %v3639_v25 = vadd.f32 %v6206_v1, %v3478_v8  ;;  %v4091_v51 = vpop.f32.mrb[88].mxu1 }
 0x41e   : > { %v4092_v54 = vpop.f32.mrb[89].mxu1 }
 0x41f   : > { %3685 = vst.msk [vmem:[%s6220_s10 + $0xd8] sm:$0xff] %vm1101_vm6, %v3639_v25  ;;  %v4093_v43 = vadd.f32 %v4092_v54, %v4091_v51  ;;  %v4094_v27 = vpop.f32.mrb[90].mxu1 }
 0x420   : > { %v4095_v53 = vpop.f32.mrb[91].mxu1 }
 0x421   : > { %v4096_v37 = vadd.f32 %v4095_v53, %v4094_v27  ;;  %v3483_v52 = vadd.f32 %v4093_v43, %v6213_v58 }
 0x423   : > { %v3486_v9 = vadd.f32 %v4096_v37, %v6213_v58 }
 0x425   : > { %v4097_v0 = vpop.f32.mrb[92].mxu1 }
 0x426   : > { %v4098_v13 = vpop.f32.mrb[93].mxu1 }
 0x427   : > { %v4099_v40 = vadd.f32 %v4098_v13, %v4097_v0  ;;  %v4100_v6 = vpop.f32.mrb[94].mxu1 }
 0x428   : > { %v4101_v61 = vpop.f32.mrb[95].mxu1 }
 0x429   : > { %v4102_v33 = vadd.f32 %v4101_v61, %v4100_v6  ;;  %v3491_v1 = vadd.f32 %v4099_v40, %v6213_v58 }
 0x42b   : > { %v3494_v41 = vadd.f32 %v4102_v33, %v6213_v58 }
 0x42d   : > { %v4191_v30 = vpop.f32.mrb[96].mxu1 }
 0x42e   : > { %v3652_v50 = vadd.f32 %v4191_v30, %v3491_v1  ;;  %v3643_v20 = vpop.f32.mrb[97].mxu1 }
 0x42f   : > { %v3644_v29 = vadd.f32 %v3643_v20, %v3483_v52  ;;  %v4192_v18 = vpop.f32.mrb[98].mxu1 }
 0x430   : > { %3688 = vst.msk [vmem:[%s6220_s10 + $0xf0] sm:$0xff] %vm1101_vm6, %v3652_v50  ;;  %v3655_v45 = vadd.f32 %v4192_v18, %v3494_v41  ;;  %v3646_v14 = vpop.f32.mrb[99].mxu1 }
 0x431   : > { %3686 = vst.msk [vmem:[%s6220_s10 + $0xe0] sm:$0xff] %vm1101_vm6, %v3644_v29  ;;  %v3647_v56 = vadd.f32 %v3646_v14, %v3486_v9 }
 0x432   : > { %3689 = vst.msk [vmem:[%s6220_s10 + $0xf8] sm:$0xff] %vm1101_vm6, %v3655_v45 }
 0x433   : > { %3687 = vst.msk [vmem:[%s6220_s10 + $0xe8] sm:$0xff] %vm1101_vm6, %v3647_v56 }
 0x434 PF: > { %s17_s24 = sadd.s32 1, %s4271_s24  }
 0x435   : > { %p14_p4 = scmp.ge.s32.totalorder %s17_s24, 4  }
 0x437   :  { %16 = sbr.rel (!%p14_p4) target bundleno = 1 (0x1), region = 81 }

// kernel: fused_block_forward.9
= control target key start
LH: loop header
LB: loop body
LE: loop exit
PB: predicated region body
PF: predicated region fallthrough
CT: control target
= control target key end

     0   :  { %13 = vsyncpa [#allocation3], 0  ;;  %s7136_s0 = inlined_call_operand.vmem [shape: f32[2,16,16,64], index: 0, kind: input, shape index: {}]   ;;  %s7137_s1 = inlined_call_operand.vmem [shape: bf16[2,2,16,16,32], index: 1, kind: input, shape index: {}]   ;;  %s7138_s2 = inlined_call_operand.vmem [shape: f32[2,64], index: 2, kind: input, shape index: {}]   ;;  %s7139_s3 = inlined_call_operand.vmem [shape: bf16[288,128], index: 3, kind: input, shape index: {}]   ;;  %s7140_s4 = inlined_call_operand.vmem [shape: f32[1,128], index: 4, kind: input, shape index: {}]   ;;  %s7141_s5 = inlined_call_operand.vmem [shape: bf16[576,32], index: 5, kind: input, shape index: {}]   ;;  %s7142_s6 = inlined_call_operand.vmem [shape: f32[1,32], index: 6, kind: input, shape index: {}]   ;;  %s7143_s7 = inlined_call_operand.vmem [shape: f32[2,16,16,32], index: 7, kind: input, shape index: {}]   ;;  %s7144_s8 = inlined_call_operand.hbm [shape: f32[2,16,16,32], index: 8, kind: output, shape index: {}]  }
   0x1   :  { %15 = vsyncpa [#allocation3 + $0x1], 0  ;;  %s4904_s27 = smov 0   ;;  %s4906_s28 = smov 0  }
   0x2   :  { %s4908_s29 = smov 0   ;;  %s4910_s30 = smov 0  }
   0x3 LB: > { %s4925_s9 = sadd.s32 4294967295, %s4850_s30   ;;  %s4059_s10 = sadd.s32 4294967294, %s4850_s30   ;;  %s4850_s30 = sphi %s4910_s30, %s7169_s30   ;;  %s4846_s29 = sphi %s4908_s29, %s7168_s29   ;;  %s4842_s28 = sphi %s4906_s28, %s7167_s28   ;;  %s4838_s27 = sphi %s4904_s27, %s7166_s27  }
   0x4   : > { %s4929_s11 = sadd.s32 1, %s4850_s30   ;;  %s211_s12 = sadd.s32 1, %s4846_s29 }
   0x5   : > { %s208_s13 = ssub.s32 %s4850_s30, %s4929_s11  ;;  %p221_p0 = scmp.ne.s32.totalorder %s4846_s29, %s4842_s28 }
   0x6   : > { %p209_p1 = scmp.eq.s32.totalorder %s208_s13, 0  ;;  %p222_p2 = scmp.eq.s32.totalorder %s4925_s9, 1 }
   0x7   : > { %p227_p3 = scmp.ne.s32.totalorder %s4842_s28, %s4838_s27  ;;  %p228_p4 = scmp.eq.s32.totalorder %s4059_s10, 1 }
   0x8   : > { %s4940_s14 = scalar_select %p209_p1, %s4846_s29, %s211_s12  }
   0x9   : > { %p4942_p5 = por %p222_p2, %p221_p0  ;;  %p4946_p6 = por %p228_p4, %p227_p3 }
   0xa   : > { %p4062_p7 = scmp.ge.s32.totalorder %s4850_s30, 1  ;;  %p286_p8 = scmp.lt.s32.totalorder %s4850_s30, 3 }
   0xc   : > { %p287_p9 = pnand %p4062_p7, %p286_p8 }
   0xe   : > { %290 = sbr.rel (%p287_p9) target bundleno = 1114 (0x45a), region = 52 }
  0x15   : > { %v4852_v0 = vmov 0   ;;  %p331_p10 = scmp.lt.s32.totalorder %s4925_s9, 1  ;;  %vm605_vm0 = vsmask.f32 256  ;;  %v4726_v2 = vld [vmem:[%s7139_s3 + $0x40] sm:$0xff]   ;;  %s4853_s19 = smov 64  }
  0x16   : > { %v4953_v1 = vrot.slane %v4852_v0, 1  ;;  %s4854_s20 = smov 32   ;;  %4221 = vmatprep.subr.bf16.mxu0 %v4726_v2  ;;  %v4727_v3 = vld [vmem:[%s7139_s3] sm:$0xff]   ;;  %v4728_v4 = vld [vmem:[%s7139_s3 + $0x48] sm:$0xff]   ;;  %vm604_vm1 = vcmask 1040384   ;;  %vm859_vm3 = vcmask 1046528  }
  0x17   : > { %s332_s21 = scalar_select %p331_p10, %s4925_s9, 1  ;;  %4222 = vmatpush3.bf16.msra.mxu0 %v4727_v3  ;;  %v4729_v5 = vld [vmem:[%s7139_s3 + $0x8] sm:$0xff]   ;;  %vm4985_vm2 = vmand %vm604_vm1, %vm605_vm0  ;;  %vm1116_vm4 = vcmask 261120   ;;  %vm639_vm5 = vsmask.f32 7424  ;;  %v4730_v48 = vld [vmem:[%s7139_s3 + $0x50] sm:$0xff]  }
  0x18   : > { %7152 = vst [vmem:[#allocation5_spill] sm:$0xff] %v4953_v1  ;;  %956 = vrot.lane.b32.xlu1 %v4953_v1, %s4853_s19  ;;  %924 = vrot.lane.b32.xlu0 %v4953_v1, %s4854_s20  ;;  %v4731_v53 = vld [vmem:[%s7139_s3 + $0x10] sm:$0xff]   ;;  %v4733_v56 = vld [vmem:[%s7139_s3 + $0x58] sm:$0xff]   ;;  %vm1149_vm6 = vcmask 523264   ;;  %vm1182_vm7 = vcmask 785408   ;;  %s328_s10 = sand.u32 1, %s4842_s28  }
  0x19   : > { %s4967_s24 = sshll.u32 %s332_s21, 8  ;;  %4223 = vmatprep.subr.bf16.mxu0 %v4728_v4  ;;  %s4855_s21 = smov 96   ;;  %v4734_v59 = vld [vmem:[%s7139_s3 + $0x18] sm:$0xff]   ;;  %v4735_v3 = vld [vmem:[%s7139_s3 + $0x60] sm:$0xff]  }
  0x1a   : > { %s4976_s13 = scalar_lea.vmem %s7137_s1, %s4967_s24  ;;  %s5888_s17 = scalar_lea.vmem %s7136_s0, %s4967_s24 }
  0x1b   : > { %v4716_v6 = vld [vmem:[%s4976_s13 + $0x90] sm:$0xff]   ;;  %v4717_v7 = vld [vmem:[%s4976_s13 + $0x88] sm:$0xff]   ;;  %v4718_v12 = vld [vmem:[%s4976_s13 + $0x80] sm:$0xff]   ;;  %4224 = vmatpush3.bf16.msra.mxu0 %v4729_v5  ;;  %s6906_s22 = scalar_lea.vmem %s7143_s7, %s4967_s24  ;;  %s4063_s23 = sshll.u32 %s328_s10, 8 }
  0x1c   : > { %v475_v8 = vshrl.u32 %v4716_v6, 16  ;;  %v478_v9 = vshll.u32 %v4716_v6, 16  ;;  %v468_v10 = vshrl.u32 %v4717_v7, 16  ;;  %v471_v11 = vshll.u32 %v4717_v7, 16  ;;  %v4719_v19 = vld [vmem:[%s4976_s13 + $0x98] sm:$0xff]   ;;  %v4720_v55 = vld [vmem:[%s4976_s13 + $0xa0] sm:$0xff]   ;;  %4225 = vmatprep.subr.bf16.mxu0 %v4730_v48 }
  0x1d   : > { %v461_v16 = vshrl.u32 %v4718_v12, 16  ;;  %v464_v17 = vshll.u32 %v4718_v12, 16  ;;  %v482_v31 = vshrl.u32 %v4719_v19, 16  ;;  %v485_v41 = vshll.u32 %v4719_v19, 16  ;;  %v4721_v6 = vld [vmem:[%s4976_s13 + $0xa8] sm:$0xff]   ;;  %s6926_s24 = scalar_lea.vmem [#allocation2], %s4063_s23 }
  0x1e   : > { %v477_v13 = vrot.slane %v475_v8, 7  ;;  %v470_v15 = vrot.slane %v468_v10, 7  ;;  %v489_v2 = vshrl.u32 %v4720_v55, 16  ;;  %s4220_s25 = sshll.u32 %s4925_s9, 12  ;;  %s3967_s26 = sshll.u32 %s6926_s24, 4  ;;  %s7085_s26 = int_to_ptr.vmem [resolvable:$true] %s3967_s26 }
  0x1f   : > { %v463_v21 = vrot.slane %v461_v16, 7  ;;  %v484_v44 = vrot.slane %v482_v31, 7  ;;  %4226 = vmatpush3.bf16.msra.mxu0 %v4731_v53  ;;  %v4738_v16 = vld [vmem:[%s7139_s3 + $0x28] sm:$0xff]   ;;  %s7095_s9 = scalar_lea.sflag [#allocation3], %s328_s10 }
  0x20   : > { %v480_v18 = vor.u32 %v478_v9, %v477_v13  ;;  %v473_v20 = vor.u32 %v471_v11, %v470_v15  ;;  %v624_v22 = vsel %vm4985_vm2, %v470_v15, 0  ;;  %v5015_v35 = vsel %vm4985_vm2, %v477_v13, 0  ;;  %4227 = vmatprep.subr.bf16.mxu0 %v4733_v56  ;;  %v4736_v11 = vld [vmem:[%s7139_s3 + $0x20] sm:$0xff]   ;;  %v4737_v15 = vld [vmem:[%s7139_s3 + $0x68] sm:$0xff]  }
  0x21   : > { %v866_v24 = vrot.slane %v624_v22, 1  ;;  %v466_v26 = vor.u32 %v464_v17, %v463_v21  ;;  %v623_v27 = vsel %vm4985_vm2, %v463_v21, 0  ;;  %v668_v34 = vshll.u32 %v624_v22, 16 }
  0x22   : > { %v4994_v23 = vsel %vm4985_vm2, 0, %v480_v18  ;;  %v5000_v25 = vsel %vm4985_vm2, 0, %v473_v20  ;;  %v863_v28 = vrot.slane %v623_v27, 1  ;;  %v680_v43 = vshll.u32 %v5015_v35, 16 }
  0x23   : > { %1054 = vrot.lane.b32.xlu0 %v4994_v23, %s4853_s19  ;;  %1052 = vrot.lane.b32.xlu1 %v5000_v25, %s4853_s19  ;;  %v865_v29 = vrot.slane %v5000_v25, 1  ;;  %v663_v30 = vshll.u32 %v5000_v25, 16  ;;  %v5010_v32 = vsel %vm4985_vm2, 0, %v466_v26  ;;  %v661_v33 = vshrl.u32 %v5000_v25, 16 }
  0x24   : > { %v862_v36 = vrot.slane %v5010_v32, 1  ;;  %v675_v39 = vshll.u32 %v4994_v23, 16  ;;  %v651_v40 = vshll.u32 %v5010_v32, 16  ;;  %v649_v45 = vshrl.u32 %v5010_v32, 16  ;;  %4228 = vmatpush3.bf16.msra.mxu0 %v4734_v59 }
  0x25   : > { %v5019_v37 = vsel %vm859_vm3, %v865_v29, %v866_v24  ;;  %v665_v38 = vrot.slane %v663_v30, 1  ;;  %v656_v47 = vshll.u32 %v623_v27, 16  ;;  %v670_v50 = vrot.slane %v668_v34, 1  ;;  %4229 = vmatprep.subr.bf16.mxu0 %v4735_v3  ;;  %v4740_v24 = vld [vmem:[%s7139_s3 + $0x70] sm:$0xff]   ;;  %v4723_v34 = vld [vmem:[%s4976_s13 + $0xb8] sm:$0xff]  }
  0x26   : > { %4599 = vmatprep.mubr.msk.bf16.mxu1 %vm1116_vm4, %v5019_v37  ;;  %v864_v42 = vsel %vm859_vm3, %v862_v36, %v863_v28  ;;  %v653_v46 = vrot.slane %v651_v40, 1  ;;  %v673_v51 = vshrl.u32 %v4994_v23, 16  ;;  %v677_v52 = vrot.slane %v675_v39, 1  ;;  %v4722_v28 = vld [vmem:[%s4976_s13 + $0xb0] sm:$0xff]   ;;  %v4743_v36 = vld [vmem:[%s7139_s3 + $0x80] sm:$0xff]  }
  0x27   : > { %988 = vrot.lane.b32.xlu1 %v5010_v32, %s4855_s21  ;;  %1020 = vrot.lane.b32.xlu0 %v864_v42, %s4854_s20  ;;  %v666_v49 = vor.u32 %v665_v38, %v661_v33  ;;  %v487_v54 = vor.u32 %v485_v41, %v484_v44  ;;  %v658_v58 = vrot.slane %v656_v47, 1  ;;  %v682_v62 = vrot.slane %v680_v43, 1  ;;  %v4741_v29 = vld [vmem:[%s7139_s3 + $0x30] sm:$0xff]  }
  0x28   : > { %v654_v57 = vor.u32 %v653_v46, %v649_v45  ;;  %v678_v61 = vor.u32 %v677_v52, %v673_v51  ;;  %v869_v5 = vrot.slane %v5015_v35, 1  ;;  %v868_v8 = vrot.slane %v4994_v23, 1  ;;  %4230 = vmatpush3.bf16.msra.mxu0 %v4736_v11  ;;  %v4742_v35 = vld [vmem:[%s7139_s3 + $0x78] sm:$0xff]   ;;  %4595 = vmatprep.subr.bf16.mxu1 %v4743_v36  ;;  %v4745_v46 = vld [vmem:[%s7139_s3 + $0x88] sm:$0xff]  }
  0x29   : > { %v5050_v60 = vsel %vm639_vm5, %v666_v49, %v670_v50  ;;  %v5054_v63 = vsel %vm4985_vm2, 0, %v487_v54  ;;  %v626_v9 = vsel %vm4985_vm2, %v484_v44, 0  ;;  %v491_v12 = vrot.slane %v489_v2, 7  ;;  %4231 = vmatprep.subr.bf16.mxu0 %v4737_v15  ;;  %4596 = vmatpush3.bf16.msra.mxu1 %v4743_v36  ;;  %v4746_v36 = vld [vmem:[%s4976_s13 + $0xe0] sm:$0xff]  }
  0x2a   : > { %v5063_v4 = vsel %vm639_vm5, %v654_v57, %v658_v58  ;;  %v5068_v7 = vsel %vm639_vm5, %v678_v61, %v682_v62  ;;  %v687_v10 = vshll.u32 %v5054_v63, 16  ;;  %v492_v13 = vshll.u32 %v4720_v55, 16  ;;  %4597 = vmatprep.subr.bf16.mxu1 %v4745_v46  ;;  %v4724_v58 = vld [vmem:[%s4976_s13 + $0xc0] sm:$0xff]   ;;  %v5151_v61 = vld [vmem:[%s4976_s13 + $0xc8] sm:$0xff]  }
  0x2b   : > { %990 = vrot.lane.b32.xlu1 %v5000_v25, %s4855_s21  ;;  %1022 = vrot.lane.b32.xlu0 %v5019_v37, %s4854_s20  ;;  %v692_v17 = vshll.u32 %v626_v9, 16  ;;  %v496_v18 = vshrl.u32 %v4721_v6, 16  ;;  %v5088_v19 = vsel %vm859_vm3, %v868_v8, %v869_v5  ;;  %v685_v20 = vshrl.u32 %v5054_v63, 16 }
  0x2c   : > { %v689_v21 = vrot.slane %v687_v10, 1  ;;  %v494_v22 = vor.u32 %v492_v13, %v491_v12  ;;  %4232 = vmatpush3.bf16.msra.mxu0 %v4738_v16  ;;  %v499_v27 = vshll.u32 %v4721_v6, 16  ;;  %v503_v39 = vshrl.u32 %v4722_v28, 16  ;;  %v4732_v6 = vld [vmem:[%s4976_s13 + $0xd0] sm:$0xff]  }
  0x2d   : > { %v498_v26 = vrot.slane %v496_v18, 7  ;;  %v694_v31 = vrot.slane %v692_v17, 1  ;;  %4233 = vmatprep.subr.bf16.mxu0 %v4740_v24  ;;  %v871_v41 = vrot.slane %v5054_v63, 1  ;;  %v627_v44 = vsel %vm4985_vm2, %v491_v12, 0  ;;  %4598 = vmatpush3.bf16.msra.mxu1 %v4745_v46  ;;  %v5166_v17 = vld [vmem:[%s4976_s13 + $0xd8] sm:$0xff]  }
  0x2e   : > { %v690_v30 = vor.u32 %v689_v21, %v685_v20  ;;  %v5104_v33 = vsel %vm4985_vm2, 0, %v494_v22  ;;  %v510_v45 = vshrl.u32 %v4723_v34, 16  ;;  %v505_v48 = vrot.slane %v503_v39, 7 }
  0x2f   : > { %958 = vrot.lane.b32.xlu1 %v864_v42, %s4853_s19  ;;  %1084 = vrot.lane.b32.xlu0 %v5050_v60, %s4855_s21  ;;  %v501_v38 = vor.u32 %v499_v27, %v498_v26  ;;  %v872_v42 = vrot.slane %v626_v9, 1  ;;  %v699_v43 = vshll.u32 %v5104_v33, 16  ;;  %v506_v49 = vshll.u32 %v4722_v28, 16 }
  0x30   : > { %4234 = vmatpush3.bf16.msra.mxu0 %v4741_v29  ;;  %v5118_v40 = vsel %vm639_vm5, %v690_v30, %v694_v31  ;;  %v697_v51 = vshrl.u32 %v5104_v33, 16  ;;  %v704_v53 = vshll.u32 %v627_v44, 16  ;;  %v512_v54 = vrot.slane %v510_v45, 7  ;;  %4600 = vmatmul.mubr.msk.bf16.vlgmr.msra.gmra.mrb[0].mxu1 %vm1116_vm4, %v5088_v19 }
  0x31   : > { %4235 = vmatprep.subr.bf16.mxu0 %v4742_v35  ;;  %v5136_v47 = vsel %vm4985_vm2, 0, %v501_v38  ;;  %v5139_v50 = vsel %vm859_vm3, %v871_v41, %v872_v42  ;;  %v701_v52 = vrot.slane %v699_v43, 1  ;;  %v513_v55 = vshll.u32 %v4723_v34, 16  ;;  %v4747_v43 = vld [vmem:[%s4976_s13 + $0xe8] sm:$0xff]  }
  0x32   : > { %v628_v56 = vsel %vm4985_vm2, %v498_v26, 0  ;;  %v711_v57 = vshll.u32 %v5136_v47, 16  ;;  %v508_v59 = vor.u32 %v506_v49, %v505_v48  ;;  %v706_v2 = vrot.slane %v704_v53, 1  ;;  %4603 = vmatprep.mubr.msk.bf16.mxu1 %vm1116_vm4, %v5139_v50 }
  0x33   : > { %926 = vrot.lane.b32.xlu1 %v5063_v4, %s4854_s20  ;;  %1086 = vrot.lane.b32.xlu0 %v5068_v7, %s4855_s21  ;;  %v702_v62 = vor.u32 %v701_v52, %v697_v51  ;;  %v874_v3 = vrot.slane %v5104_v33, 1  ;;  %v875_v5 = vrot.slane %v627_v44, 1  ;;  %v709_v8 = vshrl.u32 %v5136_v47, 16 }
  0x34   : > { %v716_v9 = vshll.u32 %v628_v56, 16  ;;  %v878_v10 = vrot.slane %v628_v56, 1  ;;  %v515_v11 = vor.u32 %v513_v55, %v512_v54  ;;  %v713_v12 = vrot.slane %v711_v57, 1 }
  0x35   : > { %v877_v13 = vrot.slane %v5136_v47, 1  ;;  %v629_v15 = vsel %vm4985_vm2, %v505_v48, 0  ;;  %v517_v16 = vshrl.u32 %v4724_v58, 16  ;;  %v5172_v18 = vsel %vm4985_vm2, 0, %v508_v59 }
  0x36   : > { %v5177_v20 = vsel %vm639_vm5, %v702_v62, %v706_v2  ;;  %v5180_v21 = vsel %vm859_vm3, %v874_v3, %v875_v5  ;;  %v524_v22 = vshrl.u32 %v5151_v61, 16  ;;  %v531_v24 = vshrl.u32 %v4732_v6, 16 }
  0x37   : > { %928 = vrot.lane.b32.xlu1 %v5050_v60, %s4854_s20  ;;  %1024 = vrot.lane.b32.xlu0 %v5088_v19, %s4854_s20  ;;  %v718_v26 = vrot.slane %v716_v9, 1  ;;  %v728_v27 = vshll.u32 %v629_v15, 16  ;;  %v881_v28 = vrot.slane %v629_v15, 1  ;;  %v5185_v29 = vsel %vm4985_vm2, 0, %v515_v11 }
  0x38   : > { %v714_v30 = vor.u32 %v713_v12, %v709_v8  ;;  %v519_v34 = vrot.slane %v517_v16, 7  ;;  %v520_v35 = vshll.u32 %v4724_v58, 16  ;;  %v5193_v38 = vsel %vm859_vm3, %v877_v13, %v878_v10  ;;  %4604 = vmatmul.mubr.msk.bf16.gmra.mrb[4].mxu1 %vm1116_vm4, %v5180_v21 }
  0x39   : > { %v721_v39 = vshrl.u32 %v5172_v18, 16  ;;  %v723_v41 = vshll.u32 %v5172_v18, 16  ;;  %v527_v42 = vshll.u32 %v5151_v61, 16  ;;  %v533_v44 = vrot.slane %v531_v24, 7  ;;  %4607 = vmatprep.mubr.msk.bf16.mxu1 %vm1116_vm4, %v5193_v38 }
  0x3a   : > { %v534_v45 = vshll.u32 %v4732_v6, 16  ;;  %v538_v46 = vshrl.u32 %v5166_v17, 16  ;;  %v5202_v48 = vrot.slane %v728_v27, 1  ;;  %v880_v49 = vrot.slane %v5172_v18, 1 }
  0x3b   : > { %960 = vrot.lane.b32.xlu1 %v5019_v37, %s4853_s19  ;;  %1056 = vrot.lane.b32.xlu0 %v5054_v63, %s4853_s19  ;;  %v4744_v37 = vld [vmem:[%s7139_s3 + $0x38] sm:$0xff]   ;;  %v733_v51 = vshrl.u32 %v5185_v29, 16  ;;  %v735_v52 = vshll.u32 %v5185_v29, 16  ;;  %v5212_v53 = vsel %vm639_vm5, %v714_v30, %v718_v26  ;;  %v522_v55 = vor.u32 %v520_v35, %v519_v34 }
  0x3c   : > { %4236 = vmatpush3.bf16.msra.mxu0 %v4744_v37  ;;  %v526_v37 = vrot.slane %v524_v22, 7  ;;  %v545_v56 = vshrl.u32 %v4746_v36, 16  ;;  %v883_v57 = vrot.slane %v5185_v29, 1  ;;  %v541_v59 = vshll.u32 %v5166_v17, 16 }
  0x3d   : > { %v552_v61 = vshrl.u32 %v4747_v43, 16  ;;  %v5222_v62 = vsel %vm4985_vm2, %v519_v34, 0  ;;  %v536_v3 = vor.u32 %v534_v45, %v533_v44  ;;  %v540_v5 = vrot.slane %v538_v46, 7 }
  0x3e   : > { %v529_v2 = vor.u32 %v527_v42, %v526_v37  ;;  %v725_v6 = vrot.slane %v723_v41, 1  ;;  %v5224_v8 = vrot.slane %v735_v52, 1  ;;  %v887_v9 = vrot.slane %v5222_v62, 1 }
  0x3f   : > { %992 = vrot.lane.b32.xlu1 %v4994_v23, %s4855_s21  ;;  %1088 = vrot.lane.b32.xlu0 %v5118_v40, %s4855_s21  ;;  %v5229_v10 = vsel %vm4985_vm2, %v526_v37, 0  ;;  %v5235_v11 = vsel %vm4985_vm2, 0, %v522_v55  ;;  %v547_v13 = vrot.slane %v545_v56, 7  ;;  %v548_v15 = vshll.u32 %v4746_v36, 16 }
  0x40   : > { %v890_v12 = vrot.slane %v5229_v10, 1  ;;  %v5241_v16 = vsel %vm859_vm3, %v880_v49, %v881_v28  ;;  %v886_v17 = vrot.slane %v5235_v11, 1  ;;  %v555_v22 = vshll.u32 %v4747_v43, 16 }
  0x41   : > { %v5250_v26 = vsel %vm4985_vm2, 0, %v529_v2  ;;  %v5254_v27 = vsel %vm4985_vm2, 0, %v536_v3  ;;  %v543_v30 = vor.u32 %v541_v59, %v540_v5  ;;  %4608 = vmatmul.mubr.msk.bf16.gmra.mrb[8].mxu1 %vm1116_vm4, %v5241_v16  ;;  %v5260_v28 = vsel %vm4985_vm2, %v533_v44, 0 }
  0x42   : > { %v889_v34 = vrot.slane %v5250_v26, 1  ;;  %v892_v35 = vrot.slane %v5254_v27, 1  ;;  %v550_v36 = vor.u32 %v548_v15, %v547_v13  ;;  %v893_v41 = vrot.slane %v5260_v28, 1 }
  0x43   : > { %930 = vrot.lane.b32.xlu1 %v5068_v7, %s4854_s20  ;;  %1026 = vrot.lane.b32.xlu0 %v5139_v50, %s4854_s20  ;;  %v5274_v42 = vsel %vm4985_vm2, %v540_v5, 0  ;;  %v5278_v44 = vsel %vm4985_vm2, 0, %v543_v30  ;;  %v5282_v45 = vsel %vm4985_vm2, %v547_v13, 0  ;;  %v5290_v56 = vsel %vm859_vm3, %v886_v17, %v887_v9 }
  0x44   : > { %v895_v46 = vrot.slane %v5278_v44, 1  ;;  %v896_v49 = vrot.slane %v5274_v42, 1  ;;  %v899_v52 = vrot.slane %v5282_v45, 1  ;;  %v726_v5 = vor.u32 %v725_v6, %v721_v39 }
  0x45   : > { %v5311_v9 = vsel %vm859_vm3, %v889_v34, %v890_v12  ;;  %v5331_v6 = vsel %vm859_vm3, %v892_v35, %v893_v41  ;;  %v745_v41 = vshrl.u32 %v5235_v11, 16 }
  0x46   : > { %v5324_v39 = vsel %vm639_vm5, %v726_v5, %v5202_v48  ;;  %v5334_v12 = vsel %vm859_vm3, %v895_v46, %v896_v49  ;;  %v757_v5 = vshrl.u32 %v5250_v26, 16 }
  0x47   : > { %962 = vrot.lane.b32.xlu1 %v5088_v19, %s4853_s19  ;;  %1058 = vrot.lane.b32.xlu0 %v5104_v33, %s4853_s19  ;;  %v630_v19 = vsel %vm4985_vm2, %v512_v54, 0 }
  0x48   : > { %v740_v31 = vshll.u32 %v630_v19, 16  ;;  %v884_v58 = vrot.slane %v630_v19, 1  ;;  %v554_v19 = vrot.slane %v552_v61, 7 }
  0x4a   : > { %v5214_v54 = vrot.slane %v740_v31, 1  ;;  %v5246_v24 = vsel %vm859_vm3, %v883_v57, %v884_v58  ;;  %v4749_v31 = vld [vmem:[%s4976_s13 + $0xf8] sm:$0xff]   ;;  %v557_v43 = vor.u32 %v555_v22, %v554_v19  ;;  %v5294_v57 = vsel %vm4985_vm2, 0, %v550_v36 }
  0x4b   : > { %994 = vrot.lane.b32.xlu1 %v5054_v63, %s4855_s21  ;;  %1090 = vrot.lane.b32.xlu0 %v5177_v20, %s4855_s21  ;;  %v566_v55 = vshrl.u32 %v4749_v31, 16  ;;  %v5298_v58 = vsel %vm4985_vm2, %v554_v19, 0  ;;  %v898_v59 = vrot.slane %v5294_v57, 1  ;;  %v569_v19 = vshll.u32 %v4749_v31, 16 }
  0x4c   : > { %4611 = vmatprep.mubr.msk.bf16.mxu1 %vm1116_vm4, %v5246_v24  ;;  %v5305_v61 = vsel %vm4985_vm2, 0, %v557_v43  ;;  %v902_v2 = vrot.slane %v5298_v58, 1  ;;  %v747_v31 = vshll.u32 %v5235_v11, 16 }
  0x4d   : > { %v901_v13 = vrot.slane %v5305_v61, 1  ;;  %4612 = vmatmul.mubr.msk.bf16.gmra.mrb[12].mxu1 %vm1116_vm4, %v5290_v56  ;;  %v568_v17 = vrot.slane %v566_v55, 7  ;;  %v5352_v22 = vsel %vm859_vm3, %v898_v59, %v899_v52 }
  0x4e   : > { %4615 = vmatprep.mubr.msk.bf16.mxu1 %vm1116_vm4, %v5311_v9  ;;  %v749_v43 = vrot.slane %v747_v31, 1 }
  0x4f   : > { %932 = vrot.lane.b32.xlu1 %v5118_v40, %s4854_s20  ;;  %1028 = vrot.lane.b32.xlu0 %v5180_v21, %s4854_s20  ;;  %v5360_v34 = vsel %vm859_vm3, %v901_v13, %v902_v2 }
  0x50   : > { %v750_v52 = vor.u32 %v749_v43, %v745_v41 }
  0x53   : > { %964 = vrot.lane.b32.xlu1 %v5139_v50, %s4853_s19  ;;  %1060 = vrot.lane.b32.xlu0 %v5136_v47, %s4853_s19  ;;  %v4748_v50 = vld [vmem:[%s4976_s13 + $0xf0] sm:$0xff]  }
  0x54   : > { %v559_v37 = vshrl.u32 %v4748_v50, 16  ;;  %v562_v15 = vshll.u32 %v4748_v50, 16  ;;  %v571_v50 = vor.u32 %v569_v19, %v568_v17 }
  0x55   : > { %4616 = vmatmul.mubr.msk.bf16.gmra.mrb[16].mxu1 %vm1116_vm4, %v5331_v6 }
  0x56   : > { %v561_v3 = vrot.slane %v559_v37, 7  ;;  %4619 = vmatprep.mubr.msk.bf16.mxu1 %vm1116_vm4, %v5334_v12  ;;  %v5383_v36 = vsel %vm4985_vm2, 0, %v571_v50  ;;  %v776_v50 = vshll.u32 %v5260_v28, 16  ;;  %v783_v28 = vshll.u32 %v5278_v44, 16 }
  0x57   : > { %996 = vrot.lane.b32.xlu1 %v5104_v33, %s4855_s21  ;;  %1092 = vrot.lane.b32.xlu0 %v5212_v53, %s4855_s21  ;;  %v921_v37 = vrot.slane %v5383_v36, 1 }
  0x58   : > { %v564_v48 = vor.u32 %v562_v15, %v561_v3  ;;  %v764_v15 = vshll.u32 %v5229_v10, 16  ;;  %v771_v10 = vshll.u32 %v5254_v27, 16  ;;  %v778_v31 = vrot.slane %v776_v50, 1 }
  0x59   : > { %v800_v50 = vshll.u32 %v5282_v45, 16 }
  0x5b   : > { %934 = vrot.lane.b32.xlu1 %v5177_v20, %s4854_s20  ;;  %1030 = vrot.lane.b32.xlu0 %v5193_v38, %s4854_s20 }
  0x5d   : > { %4620 = vmatmul.mubr.msk.bf16.gmra.mrb[20].mxu1 %vm1116_vm4, %v5352_v22 }
  0x5e   : > { %4623 = vmatprep.mubr.msk.bf16.mxu1 %vm1116_vm4, %v5360_v34 }
  0x5f   : > { %966 = vrot.lane.b32.xlu1 %v5180_v21, %s4853_s19  ;;  %1062 = vrot.lane.b32.xlu0 %v5172_v18, %s4853_s19  ;;  %v738_v21 = vor.u32 %v5224_v8, %v733_v51  ;;  %v5371_v51 = vsel %vm4985_vm2, 0, %v564_v48  ;;  %v773_v48 = vrot.slane %v771_v10, 1 }
  0x60   : > { %v904_v8 = vrot.slane %v5371_v51, 1 }
  0x61   : > { %v5356_v30 = vsel %vm639_vm5, %v738_v21, %v5214_v54  ;;  %v5375_v54 = vsel %vm4985_vm2, %v561_v3, 0  ;;  %v759_v3 = vshll.u32 %v5250_v26, 16  ;;  %v769_v21 = vshrl.u32 %v5254_v27, 16 }
  0x62   : > { %v905_v35 = vrot.slane %v5375_v54, 1 }
  0x63   : > { %998 = vrot.lane.b32.xlu1 %v5136_v47, %s4855_s21  ;;  %1094 = vrot.lane.b32.xlu0 %v5324_v39, %s4855_s21  ;;  %v761_v13 = vrot.slane %v759_v3, 1 }
  0x64   : > { %v5397_v49 = vsel %vm859_vm3, %v904_v8, %v905_v35 }
  0x65   : > { %4624 = vmatmul.mubr.msk.bf16.gmra.mrb[24].mxu1 %vm1116_vm4, %v5397_v49 }
  0x67   : > { %936 = vrot.lane.b32.xlu1 %v5212_v53, %s4854_s20  ;;  %1032 = vrot.lane.b32.xlu0 %v5241_v16, %s4854_s20 }
  0x6b   : > { %968 = vrot.lane.b32.xlu1 %v5193_v38, %s4853_s19  ;;  %1064 = vrot.lane.b32.xlu0 %v5185_v29, %s4853_s19  ;;  %v752_v38 = vshll.u32 %v5222_v62, 16  ;;  %v5387_v62 = vsel %vm4985_vm2, %v568_v17, 0  ;;  %v766_v17 = vrot.slane %v764_v15, 1 }
  0x6c   : > { %v922_v46 = vrot.slane %v5387_v62, 1 }
  0x6d   : > { %v754_v55 = vrot.slane %v752_v38, 1 }
  0x6e   : > { %v5400_v59 = vsel %vm859_vm3, %v921_v37, %v922_v46  ;;  %v781_v37 = vshrl.u32 %v5278_v44, 16  ;;  %v788_v46 = vshll.u32 %v5274_v42, 16  ;;  %v795_v42 = vshll.u32 %v5294_v57, 16 }
  0x6f   : > { %1000 = vrot.lane.b32.xlu1 %v5172_v18, %s4855_s21  ;;  %1096 = vrot.lane.b32.xlu0 %v5356_v30, %s4855_s21  ;;  %v5411_v2 = vsel %vm639_vm5, %v750_v52, %v754_v55 }
  0x70   : > { %4627 = vmatprep.mubr.msk.bf16.mxu1 %vm1116_vm4, %v5400_v59  ;;  %v790_v3 = vrot.slane %v788_v46, 1 }
  0x71   : > { %4628 = vmatmul.mubr.msk.bf16.gmra.mrb[28].mxu1 %vm1116_vm4, %v4953_v1 }
  0x73   : > { %938 = vrot.lane.b32.xlu1 %v5324_v39, %s4854_s20  ;;  %1034 = vrot.lane.b32.xlu0 %v5246_v24, %s4854_s20 }
  0x77   : > { %970 = vrot.lane.b32.xlu1 %v5241_v16, %s4853_s19  ;;  %1066 = vrot.lane.b32.xlu0 %v5235_v11, %s4853_s19  ;;  %v762_v16 = vor.u32 %v761_v13, %v757_v5 }
  0x79   : > { %v5431_v19 = vsel %vm639_vm5, %v762_v16, %v766_v17 }
  0x7b   : > { %1002 = vrot.lane.b32.xlu1 %v5185_v29, %s4855_s21  ;;  %1098 = vrot.lane.b32.xlu0 %v5411_v2, %s4855_s21 }
  0x7f   : > { %940 = vrot.lane.b32.xlu1 %v5356_v30, %s4854_s20  ;;  %1036 = vrot.lane.b32.xlu0 %v5290_v56, %s4854_s20 }
  0x83   : > { %972 = vrot.lane.b32.xlu1 %v5246_v24, %s4853_s19  ;;  %1068 = vrot.lane.b32.xlu0 %v5250_v26, %s4853_s19  ;;  %v774_v24 = vor.u32 %v773_v48, %v769_v21  ;;  %v793_v21 = vshrl.u32 %v5294_v57, 16  ;;  %v797_v48 = vrot.slane %v795_v42, 1  ;;  %v807_v42 = vshll.u32 %v5305_v61, 16 }
  0x85   : > { %v5449_v35 = vsel %vm639_vm5, %v774_v24, %v778_v31 }
  0x87   : > { %1004 = vrot.lane.b32.xlu1 %v5235_v11, %s4855_s21  ;;  %1100 = vrot.lane.b32.xlu0 %v5431_v19, %s4855_s21 }
  0x8a   : > { %v925_v38 = vpop.permute.xlu0 %924  ;;  %v957_v8 = vpop.permute.xlu1 %956 }
  0x8b   : > { %942 = vrot.lane.b32.xlu1 %v5411_v2, %s4854_s20  ;;  %1038 = vrot.lane.b32.xlu0 %v5311_v9, %s4854_s20  ;;  %v1118_v10 = vsel %vm1116_vm4, 0, %v925_v38 }
  0x8c   : > { %v1151_v38 = vsel %vm1149_vm6, %v1118_v10, %v957_v8  ;;  %v812_v10 = vshll.u32 %v5298_v58, 16 }
  0x8f   : > { %974 = vrot.lane.b32.xlu1 %v5290_v56, %s4853_s19  ;;  %1070 = vrot.lane.b32.xlu0 %v5254_v27, %s4853_s19  ;;  %v785_v56 = vrot.slane %v783_v28, 1 }
  0x91   : > { %v786_v55 = vor.u32 %v785_v56, %v781_v37  ;;  %v798_v56 = vor.u32 %v797_v48, %v793_v21 }
  0x93   : > { %1006 = vrot.lane.b32.xlu1 %v5250_v26, %s4855_s21  ;;  %1102 = vrot.lane.b32.xlu0 %v5449_v35, %s4855_s21  ;;  %v5467_v15 = vsel %vm639_vm5, %v786_v55, %v790_v3 }
  0x95   : > { %v1055_v41 = vpop.permute.xlu0 %1054  ;;  %v1053_v43 = vpop.permute.xlu1 %1052 }
  0x97   : > { %944 = vrot.lane.b32.xlu1 %v5431_v19, %s4854_s20  ;;  %1040 = vrot.lane.b32.xlu0 %v5331_v6, %s4854_s20 }
  0x99   : > { %v989_v52 = vpop.permute.xlu1 %988  ;;  %v1021_v5 = vpop.permute.xlu0 %1020 }
  0x9a   : > { %v1233_v17 = vsel %vm1116_vm4, %v5063_v4, %v1021_v5  ;;  %v1184_v37 = vsel %vm1182_vm7, %v1151_v38, %v989_v52 }
  0x9b   : > { %976 = vrot.lane.b32.xlu1 %v5311_v9, %s4853_s19  ;;  %1072 = vrot.lane.b32.xlu0 %v5278_v44, %s4853_s19  ;;  %v1280_v31 = vsel %vm1149_vm6, %v1233_v17, %v1053_v43  ;;  %v802_v43 = vrot.slane %v800_v50, 1  ;;  %v809_v17 = vrot.slane %v807_v42, 1 }
  0x9d   : > { %v991_v13 = vpop.permute.xlu1 %990  ;;  %v1023_v16 = vpop.permute.xlu0 %1022  ;;  %v5499_v5 = vsel %vm639_vm5, %v798_v56, %v802_v43 }
  0x9e   : > { %v1236_v4 = vsel %vm1116_vm4, %v5050_v60, %v1023_v16  ;;  %v805_v16 = vshrl.u32 %v5305_v61, 16 }
  0x9f   : > { %1008 = vrot.lane.b32.xlu1 %v5254_v27, %s4855_s21  ;;  %1104 = vrot.lane.b32.xlu0 %v5467_v15, %s4855_s21  ;;  %v1282_v55 = vsel %vm1149_vm6, %v1236_v4, %v1055_v41 }
  0xa1   : > { %v959_v9 = vpop.permute.xlu1 %958  ;;  %v1085_v24 = vpop.permute.xlu0 %1084 }
  0xa2   : > { %v1312_v28 = vsel %vm1182_vm7, %v1280_v31, %v1085_v24  ;;  %v810_v24 = vor.u32 %v809_v17, %v805_v16  ;;  %v814_v31 = vrot.slane %v812_v10, 1  ;;  %v910_v17 = vshll.u32 %v5383_v36, 16 }
  0xa3   : > { %946 = vrot.lane.b32.xlu1 %v5449_v35, %s4854_s20  ;;  %1590 = vmatprep.mubr.bf16.mxu0 %v1312_v28 }
  0xa4   : > { %1042 = vrot.lane.b32.xlu0 %v5334_v12, %s4854_s20  ;;  %1591 = vmatmul.mubr.bf16.vlgmr.msra.gmra.mrb[0].mxu0 %v1184_v37  ;;  %v819_v37 = vshll.u32 %v5371_v51, 16 }
  0xa5   : > { %v927_v45 = vpop.permute.xlu1 %926  ;;  %v1087_v46 = vpop.permute.xlu0 %1086 }
  0xa6   : > { %v1120_v60 = vsel %vm1116_vm4, %v5010_v32, %v927_v45  ;;  %v1315_v8 = vsel %vm1182_vm7, %v1282_v55, %v1087_v46  ;;  %v821_v43 = vrot.slane %v819_v37, 1  ;;  %v824_v46 = vshll.u32 %v5375_v54, 16 }
  0xa7   : > { %978 = vrot.lane.b32.xlu1 %v5331_v6, %s4853_s19  ;;  %1598 = vmatprep.mubr.bf16.mxu0 %v1315_v8  ;;  %v1153_v3 = vsel %vm1149_vm6, %v1120_v60, %v959_v9 }
  0xa8   : > { %1074 = vrot.lane.b32.xlu0 %v5294_v57, %s4853_s19  ;;  %v1187_v41 = vsel %vm1182_vm7, %v1153_v3, %v991_v13 }
  0xa9   : > { %v929_v52 = vpop.permute.xlu1 %928  ;;  %v1025_v32 = vpop.permute.xlu0 %1024 }
  0xaa   : > { %v1122_v21 = vsel %vm1116_vm4, %v5000_v25, %v929_v52  ;;  %v1239_v13 = vsel %vm1116_vm4, %v5068_v7, %v1025_v32  ;;  %v5526_v7 = vsel %vm639_vm5, %v810_v24, %v814_v31  ;;  %v826_v32 = vrot.slane %v824_v46, 1 }
  0xab   : > { %1010 = vrot.lane.b32.xlu1 %v5278_v44, %s4855_s21 }
  0xac   : > { %1106 = vrot.lane.b32.xlu0 %v5499_v5, %s4855_s21  ;;  %1599 = vmatmul.mubr.bf16.gmra.mrb[4].mxu0 %v1187_v41 }
  0xad   : > { %v961_v6 = vpop.permute.xlu1 %960  ;;  %v1057_v9 = vpop.permute.xlu0 %1056 }
  0xae   : > { %v1155_v48 = vsel %vm1149_vm6, %v1122_v21, %v961_v6  ;;  %v1284_v58 = vsel %vm1149_vm6, %v1239_v13, %v1057_v9  ;;  %v912_v21 = vrot.slane %v910_v17, 1  ;;  %v915_v13 = vshll.u32 %v5387_v62, 16 }
  0xaf   : > { %948 = vrot.lane.b32.xlu1 %v5467_v15, %s4854_s20 }
  0xb0   : > { %1044 = vrot.lane.b32.xlu0 %v5352_v22, %s4854_s20 }
  0xb1   : > { %v993_v50 = vpop.permute.xlu1 %992  ;;  %v1089_v4 = vpop.permute.xlu0 %1088 }
  0xb2   : > { %v1190_v28 = vsel %vm1182_vm7, %v1155_v48, %v993_v50  ;;  %v1318_v38 = vsel %vm1182_vm7, %v1284_v58, %v1089_v4 }
  0xb3   : > { %980 = vrot.lane.b32.xlu1 %v5334_v12, %s4853_s19  ;;  %1606 = vmatprep.mubr.bf16.mxu0 %v1318_v38  ;;  %v817_v12 = vshrl.u32 %v5371_v51, 16 }
  0xb4   : > { %1076 = vrot.lane.b32.xlu0 %v5305_v61, %s4853_s19  ;;  %1607 = vmatmul.mubr.bf16.gmra.mrb[8].mxu0 %v1190_v28  ;;  %v917_v28 = vrot.slane %v915_v13, 1 }
  0xb5   : > { %v931_v25 = vpop.permute.xlu1 %930  ;;  %v1027_v45 = vpop.permute.xlu0 %1026  ;;  %v822_v42 = vor.u32 %v821_v43, %v817_v12 }
  0xb6   : > { %v1124_v55 = vsel %vm1116_vm4, %v4994_v23, %v931_v25  ;;  %v1242_v8 = vsel %vm1116_vm4, %v5118_v40, %v1027_v45 }
  0xb7   : > { %1012 = vrot.lane.b32.xlu1 %v5294_v57, %s4855_s21  ;;  %v5552_v40 = vsel %vm639_vm5, %v822_v42, %v826_v32 }
  0xb8   : > { %1108 = vrot.lane.b32.xlu0 %v5526_v7, %s4855_s21 }
  0xb9   : > { %v963_v56 = vpop.permute.xlu1 %962  ;;  %v1059_v60 = vpop.permute.xlu0 %1058 }
  0xba   : > { %v1157_v52 = vsel %vm1149_vm6, %v1124_v55, %v963_v56  ;;  %v1286_v54 = vsel %vm1149_vm6, %v1242_v8, %v1059_v60 }
  0xbb   : > { %950 = vrot.lane.b32.xlu1 %v5499_v5, %s4854_s20 }
  0xbc   : > { %1046 = vrot.lane.b32.xlu0 %v5360_v34, %s4854_s20 }
  0xbd   : > { %v995_v3 = vpop.permute.xlu1 %994  ;;  %v1091_v41 = vpop.permute.xlu0 %1090 }
  0xbe   : > { %v1193_v6 = vsel %vm1182_vm7, %v1157_v52, %v995_v3  ;;  %v1321_v16 = vsel %vm1182_vm7, %v1286_v54, %v1091_v41 }
  0xbf   : > { %982 = vrot.lane.b32.xlu1 %v5352_v22, %s4853_s19  ;;  %1614 = vmatprep.mubr.bf16.mxu0 %v1321_v16  ;;  %v908_v22 = vshrl.u32 %v5383_v36, 16 }
  0xc0   : > { %1078 = vrot.lane.b32.xlu0 %v5371_v51, %s4853_s19  ;;  %1615 = vmatmul.mubr.bf16.gmra.mrb[12].mxu0 %v1193_v6 }
  0xc1   : > { %v933_v23 = vpop.permute.xlu1 %932  ;;  %v1029_v10 = vpop.permute.xlu0 %1028  ;;  %v913_v4 = vor.u32 %v912_v21, %v908_v22 }
  0xc2   : > { %v1126_v50 = vsel %vm1116_vm4, %v5054_v63, %v933_v23  ;;  %v1245_v24 = vsel %vm1116_vm4, %v5177_v20, %v1029_v10 }
  0xc3   : > { %1014 = vrot.lane.b32.xlu1 %v5305_v61, %s4855_s21  ;;  %v5578_v20 = vsel %vm639_vm5, %v913_v4, %v917_v28 }
  0xc4   : > { %1110 = vrot.lane.b32.xlu0 %v5552_v40, %s4855_s21 }
  0xc5   : > { %v965_v9 = vpop.permute.xlu1 %964  ;;  %v1061_v48 = vpop.permute.xlu0 %1060 }
  0xc6   : > { %v1159_v31 = vsel %vm1149_vm6, %v1126_v50, %v965_v9  ;;  %v1288_v62 = vsel %vm1149_vm6, %v1245_v24, %v1061_v48 }
  0xc7   : > { %952 = vrot.lane.b32.xlu1 %v5526_v7, %s4854_s20 }
  0xc8   : > { %1048 = vrot.lane.b32.xlu0 %v5397_v49, %s4854_s20 }
  0xc9   : > { %v997_v58 = vpop.permute.xlu1 %996  ;;  %v1093_v38 = vpop.permute.xlu0 %1092 }
  0xca   : > { %v1196_v25 = vsel %vm1182_vm7, %v1159_v31, %v997_v58  ;;  %v1324_v37 = vsel %vm1182_vm7, %v1288_v62, %v1093_v38 }
  0xcb   : > { %984 = vrot.lane.b32.xlu1 %v5360_v34, %s4853_s19  ;;  %1622 = vmatprep.mubr.bf16.mxu0 %v1324_v37 }
  0xcc   : > { %1080 = vrot.lane.b32.xlu0 %v5383_v36, %s4853_s19  ;;  %1623 = vmatmul.mubr.bf16.gmra.mrb[16].mxu0 %v1196_v25 }
  0xcd   : > { %v935_v63 = vpop.permute.xlu1 %934  ;;  %v1031_v45 = vpop.permute.xlu0 %1030 }
  0xce   : > { %v1128_v34 = vsel %vm1116_vm4, %v5104_v33, %v935_v63  ;;  %v1248_v43 = vsel %vm1116_vm4, %v5212_v53, %v1031_v45 }
  0xcf   : > { %1016 = vrot.lane.b32.xlu1 %v5371_v51, %s4855_s21 }
  0xd0   : > { %1112 = vrot.lane.b32.xlu0 %v5578_v20, %s4855_s21 }
  0xd1   : > { %v967_v56 = vpop.permute.xlu1 %966  ;;  %v1063_v12 = vpop.permute.xlu0 %1062 }
  0xd2   : > { %v1161_v46 = vsel %vm1149_vm6, %v1128_v34, %v967_v56  ;;  %v1290_v55 = vsel %vm1149_vm6, %v1248_v43, %v1063_v12 }
  0xd3   : > { %954 = vrot.lane.b32.xlu1 %v5552_v40, %s4854_s20 }
  0xd4   : > { %1050 = vrot.lane.b32.xlu0 %v5400_v59, %s4854_s20 }
  0xd5   : > { %v999_v60 = vpop.permute.xlu1 %998  ;;  %v1095_v8 = vpop.permute.xlu0 %1094 }
  0xd6   : > { %v1199_v52 = vsel %vm1182_vm7, %v1161_v46, %v999_v60  ;;  %v1327_v3 = vsel %vm1182_vm7, %v1290_v55, %v1095_v8 }
  0xd7   : > { %986 = vrot.lane.b32.xlu1 %v5397_v49, %s4853_s19  ;;  %1630 = vmatprep.mubr.bf16.mxu0 %v1327_v3 }
  0xd8   : > { %1082 = vrot.lane.b32.xlu0 %v4852_v0, %s4853_s19  ;;  %1631 = vmatmul.mubr.bf16.gmra.mrb[20].mxu0 %v1199_v52 }
  0xd9   : > { %v937_v33 = vpop.permute.xlu1 %936  ;;  %v1033_v53 = vpop.permute.xlu0 %1032 }
  0xda   : > { %v1130_v59 = vsel %vm1116_vm4, %v5136_v47, %v937_v33  ;;  %v1251_v42 = vsel %vm1116_vm4, %v5324_v39, %v1033_v53 }
  0xdb   : > { %1018 = vrot.lane.b32.xlu1 %v5383_v36, %s4855_s21 }
  0xdc   : > { %1114 = vrot.lane.b32.xlu0 %v4953_v1, %s4855_s21  ;;  %s7083_s21 = scalar_lea.hbm %s7144_s8, %s4220_s25 }
  0xdd   : > { %v969_v49 = vpop.permute.xlu1 %968  ;;  %v1065_v32 = vpop.permute.xlu0 %1064 }
  0xde   : > { %v1163_v54 = vsel %vm1149_vm6, %v1130_v59, %v969_v49  ;;  %v1292_v0 = vsel %vm1149_vm6, %v1251_v42, %v1065_v32 }
  0xe1   : > { %v1001_v41 = vpop.permute.xlu1 %1000  ;;  %v1097_v6 = vpop.permute.xlu0 %1096 }
  0xe2   : > { %v1202_v16 = vsel %vm1182_vm7, %v1163_v54, %v1001_v41  ;;  %v1330_v36 = vsel %vm1182_vm7, %v1292_v0, %v1097_v6 }
  0xe3   : > { %1638 = vmatprep.mubr.bf16.mxu0 %v1330_v36 }
  0xe4   : > { %1639 = vmatmul.mubr.bf16.gmra.mrb[24].mxu0 %v1202_v16 }
  0xe5   : > { %v939_v47 = vpop.permute.xlu1 %938  ;;  %v1035_v23 = vpop.permute.xlu0 %1034 }
  0xe6   : > { %v1132_v17 = vsel %vm1116_vm4, %v5172_v18, %v939_v47  ;;  %v1254_v39 = vsel %vm1116_vm4, %v5356_v30, %v1035_v23 }
  0xe9   : > { %v971_v10 = vpop.permute.xlu1 %970  ;;  %v1067_v9 = vpop.permute.xlu0 %1066 }
  0xea   : > { %v1165_v22 = vsel %vm1149_vm6, %v1132_v17, %v971_v10  ;;  %v1294_v21 = vsel %vm1149_vm6, %v1254_v39, %v1067_v9 }
  0xed   : > { %v1003_v13 = vpop.permute.xlu1 %1002  ;;  %v1099_v48 = vpop.permute.xlu0 %1098 }
  0xee   : > { %v1205_v50 = vsel %vm1182_vm7, %v1165_v22, %v1003_v13  ;;  %v1333_v24 = vsel %vm1182_vm7, %v1294_v21, %v1099_v48 }
  0xef   : > { %1646 = vmatprep.mubr.bf16.mxu0 %v1333_v24 }
  0xf0   : > { %1647 = vmatmul.mubr.bf16.gmra.mrb[28].mxu0 %v1205_v50 }
  0xf1   : > { %v941_v31 = vpop.permute.xlu1 %940  ;;  %v1037_v58 = vpop.permute.xlu0 %1036 }
  0xf2   : > { %v1134_v18 = vsel %vm1116_vm4, %v5185_v29, %v941_v31  ;;  %v1257_v30 = vsel %vm1116_vm4, %v5411_v2, %v1037_v58 }
  0xf5   : > { %v973_v4 = vpop.permute.xlu1 %972  ;;  %v1069_v28 = vpop.permute.xlu0 %1068 }
  0xf6   : > { %v1167_v62 = vsel %vm1149_vm6, %v1134_v18, %v973_v4  ;;  %v1296_v38 = vsel %vm1149_vm6, %v1257_v30, %v1069_v28 }
  0xf9   : > { %v1005_v25 = vpop.permute.xlu1 %1004  ;;  %v1101_v37 = vpop.permute.xlu0 %1100 }
  0xfa   : > { %v1208_v63 = vsel %vm1182_vm7, %v1167_v62, %v1005_v25  ;;  %v1336_v45 = vsel %vm1182_vm7, %v1296_v38, %v1101_v37 }
  0xfb   : > { %1654 = vmatprep.mubr.bf16.mxu0 %v1336_v45 }
  0xfc   : > { %1655 = vmatmul.mubr.bf16.gmra.mrb[32].mxu0 %v1208_v63 }
  0xfd   : > { %v943_v56 = vpop.permute.xlu1 %942  ;;  %v1039_v12 = vpop.permute.xlu0 %1038 }
  0xfe   : > { %v1136_v29 = vsel %vm1116_vm4, %v5235_v11, %v943_v56  ;;  %v1260_v2 = vsel %vm1116_vm4, %v5431_v19, %v1039_v12 }
 0x101   : > { %v975_v34 = vpop.permute.xlu1 %974  ;;  %v1071_v43 = vpop.permute.xlu0 %1070 }
 0x102   : > { %v1169_v46 = vsel %vm1149_vm6, %v1136_v29, %v975_v34  ;;  %v1298_v60 = vsel %vm1149_vm6, %v1260_v2, %v1071_v43 }
 0x105   : > { %v1007_v55 = vpop.permute.xlu1 %1006  ;;  %v1103_v8 = vpop.permute.xlu0 %1102 }
 0x106   : > { %v1211_v52 = vsel %vm1182_vm7, %v1169_v46, %v1007_v55  ;;  %v1339_v3 = vsel %vm1182_vm7, %v1298_v60, %v1103_v8 }
 0x107   : > { %1662 = vmatprep.mubr.bf16.mxu0 %v1339_v3 }
 0x108   : > { %1663 = vmatmul.mubr.bf16.gmra.mrb[36].mxu0 %v1211_v52 }
 0x109   : > { %v945_v33 = vpop.permute.xlu1 %944  ;;  %v1041_v53 = vpop.permute.xlu0 %1040 }
 0x10a   : > { %v1138_v11 = vsel %vm1116_vm4, %v5250_v26, %v945_v33  ;;  %v1263_v19 = vsel %vm1116_vm4, %v5449_v35, %v1041_v53  ;;  %v5646_v35 = vpop.f32.mrb[0].mxu1 }
 0x10b   : > { %v5650_v17 = vpop.f32.mrb[1].mxu1 }
 0x10c   : > { %v5652_v10 = vpop.f32.mrb[2].mxu1 }
 0x10d   : > { %v977_v59 = vpop.permute.xlu1 %976  ;;  %v1073_v42 = vpop.permute.xlu0 %1072 }
 0x10e   : > { %v1171_v49 = vsel %vm1149_vm6, %v1138_v11, %v977_v59  ;;  %v1300_v32 = vsel %vm1149_vm6, %v1263_v19, %v1073_v42  ;;  %v5655_v22 = vpop.f32.mrb[3].mxu1 }
 0x111   : > { %v1009_v54 = vpop.permute.xlu1 %1008  ;;  %v1105_v0 = vpop.permute.xlu0 %1104 }
 0x112   : > { %v1214_v41 = vsel %vm1182_vm7, %v1171_v49, %v1009_v54  ;;  %v1342_v6 = vsel %vm1182_vm7, %v1300_v32, %v1105_v0 }
 0x113   : > { %1670 = vmatprep.mubr.bf16.mxu0 %v1342_v6 }
 0x114   : > { %1671 = vmatmul.mubr.bf16.gmra.mrb[40].mxu0 %v1214_v41 }
 0x115   : > { %v947_v16 = vpop.permute.xlu1 %946 }
 0x116   : > { %v1043_v36 = vpop.permute.xlu0 %1042  ;;  %v1140_v26 = vsel %vm1116_vm4, %v5254_v27, %v947_v16 }
 0x117   : > { %v1266_v47 = vsel %vm1116_vm4, %v5467_v15, %v1043_v36  ;;  %v5660_v15 = vpop.f32.mrb[4].mxu1 }
 0x118   : > { %v5662_v31 = vpop.f32.mrb[5].mxu1 }
 0x119   : > { %v979_v23 = vpop.permute.xlu1 %978  ;;  %v5664_v18 = vpop.f32.mrb[6].mxu1 }
 0x11a   : > { %v1075_v39 = vpop.permute.xlu0 %1074  ;;  %v1173_v9 = vsel %vm1149_vm6, %v1140_v26, %v979_v23  ;;  %v5666_v30 = vpop.f32.mrb[7].mxu1 }
 0x11b   : > { %v1302_v21 = vsel %vm1149_vm6, %v1266_v47, %v1075_v39  ;;  %v5674_v63 = vpop.f32.mrb[8].mxu1 }
 0x11c   : > { %v5676_v56 = vpop.f32.mrb[9].mxu1 }
 0x11d   : > { %v1011_v13 = vpop.permute.xlu1 %1010  ;;  %v5679_v2 = vpop.f32.mrb[10].mxu1 }
 0x11e   : > { %v1107_v48 = vpop.permute.xlu0 %1106  ;;  %v1217_v27 = vsel %vm1182_vm7, %v1173_v9, %v1011_v13  ;;  %v5682_v34 = vpop.f32.mrb[11].mxu1 }
 0x11f   : > { %v1345_v50 = vsel %vm1182_vm7, %v1302_v21, %v1107_v48 }
 0x120   : > { %1678 = vmatprep.mubr.bf16.mxu0 %v1345_v50 }
 0x121   : > { %v949_v24 = vpop.permute.xlu1 %948  ;;  %1679 = vmatmul.mubr.bf16.gmra.mrb[44].mxu0 %v1217_v27 }
 0x122   : > { %v1045_v58 = vpop.permute.xlu0 %1044  ;;  %v1142_v4 = vsel %vm1116_vm4, %v5278_v44, %v949_v24 }
 0x123   : > { %v1269_v28 = vsel %vm1116_vm4, %v5499_v5, %v1045_v58 }
 0x125   : > { %v981_v62 = vpop.permute.xlu1 %980 }
 0x126   : > { %v1077_v38 = vpop.permute.xlu0 %1076  ;;  %v1175_v25 = vsel %vm1149_vm6, %v1142_v4, %v981_v62 }
 0x127   : > { %v1304_v37 = vsel %vm1149_vm6, %v1269_v28, %v1077_v38 }
 0x129   : > { %v1013_v45 = vpop.permute.xlu1 %1012 }
 0x12a   : > { %v1109_v12 = vpop.permute.xlu0 %1108  ;;  %v1220_v29 = vsel %vm1182_vm7, %v1175_v25, %v1013_v45 }
 0x12b   : > { %v1348_v44 = vsel %vm1182_vm7, %v1304_v37, %v1109_v12 }
 0x12c   : > { %1686 = vmatprep.mubr.bf16.mxu0 %v1348_v44 }
 0x12d   : > { %v951_v5 = vpop.permute.xlu1 %950  ;;  %1687 = vmatmul.mubr.bf16.gmra.mrb[48].mxu0 %v1220_v29 }
 0x12e   : > { %v1047_v43 = vpop.permute.xlu0 %1046  ;;  %v1144_v46 = vsel %vm1116_vm4, %v5294_v57, %v951_v5  ;;  %v5735_v5 = vld [vmem:[%s7140_s4] ss:$0 sm:$0xff] }
 0x12f   : > { %v1272_v60 = vsel %vm1116_vm4, %v5526_v7, %v1047_v43  ;;  %v5694_v7 = vpop.f32.mrb[12].mxu1 }
 0x130   : > { %v5698_v54 = vpop.f32.mrb[13].mxu1 }
 0x131   : > { %v983_v55 = vpop.permute.xlu1 %982  ;;  %v5700_v41 = vpop.f32.mrb[14].mxu1 }
 0x132   : > { %v1079_v8 = vpop.permute.xlu0 %1078  ;;  %v1177_v52 = vsel %vm1149_vm6, %v1144_v46, %v983_v55  ;;  %v5703_v16 = vpop.f32.mrb[15].mxu1 }
 0x133   : > { %v1306_v3 = vsel %vm1149_vm6, %v1272_v60, %v1079_v8  ;;  %v5716_v62 = vpop.f32.mrb[16].mxu1 }
 0x135   : > { %v1015_v33 = vpop.permute.xlu1 %1014 }
 0x136   : > { %v1111_v53 = vpop.permute.xlu0 %1110  ;;  %v1223_v11 = vsel %vm1182_vm7, %v1177_v52, %v1015_v33 }
 0x137   : > { %v1351_v19 = vsel %vm1182_vm7, %v1306_v3, %v1111_v53 }
 0x138   : > { %1694 = vmatprep.mubr.bf16.mxu0 %v1351_v19 }
 0x139   : > { %v953_v59 = vpop.permute.xlu1 %952  ;;  %1695 = vmatmul.mubr.bf16.gmra.mrb[52].mxu0 %v1223_v11 }
 0x13a   : > { %v1049_v42 = vpop.permute.xlu0 %1048  ;;  %v1146_v57 = vsel %vm1116_vm4, %v5305_v61, %v953_v59 }
 0x13b   : > { %v1275_v49 = vsel %vm1116_vm4, %v5552_v40, %v1049_v42 }
 0x13d   : > { %v985_v32 = vpop.permute.xlu1 %984 }
 0x13e   : > { %v1081_v0 = vpop.permute.xlu0 %1080  ;;  %v1179_v6 = vsel %vm1149_vm6, %v1146_v57, %v985_v32 }
 0x13f   : > { %v1308_v36 = vsel %vm1149_vm6, %v1275_v49, %v1081_v0 }
 0x141   : > { %v1017_v26 = vpop.permute.xlu1 %1016 }
 0x142   : > { %v1113_v47 = vpop.permute.xlu0 %1112  ;;  %v1226_v61 = vsel %vm1182_vm7, %v1179_v6, %v1017_v26 }
 0x143   : > { %v1354_v23 = vsel %vm1182_vm7, %v1308_v36, %v1113_v47 }
 0x144   : > { %1702 = vmatprep.mubr.bf16.mxu0 %v1354_v23 }
 0x145   : > { %v955_v40 = vpop.permute.xlu1 %954  ;;  %1703 = vmatmul.mubr.bf16.gmra.mrb[56].mxu0 %v1226_v61 }
 0x146   : > { %v1051_v39 = vpop.permute.xlu0 %1050  ;;  %v1148_v9 = vsel %vm1116_vm4, %v5371_v51, %v955_v40  ;;  %v5718_v51 = vpop.f32.mrb[17].mxu1 }
 0x147   : > { %v1278_v21 = vsel %vm1116_vm4, %v5578_v20, %v1051_v39  ;;  %v5720_v38 = vpop.f32.mrb[18].mxu1 }
 0x148   : > { %v5722_v20 = vpop.f32.mrb[19].mxu1 }
 0x149   : > { %v987_v13 = vpop.permute.xlu1 %986  ;;  %v5724_v25 = vpop.f32.mrb[20].mxu1 }
 0x14a   : > { %v1083_v48 = vpop.permute.xlu0 %1082  ;;  %v1181_v27 = vsel %vm1149_vm6, %v1148_v9, %v987_v13  ;;  %v5726_v37 = vpop.f32.mrb[21].mxu1 }
 0x14b   : > { %v1310_v50 = vsel %vm1149_vm6, %v1278_v21, %v1083_v48  ;;  %v5728_v45 = vpop.f32.mrb[22].mxu1 }
 0x14c   : > { %v5730_v12 = vpop.f32.mrb[23].mxu1 }
 0x14d   : > { %v1019_v24 = vpop.permute.xlu1 %1018  ;;  %v5759_v6 = vpop.f32.mrb[24].mxu1 }
 0x14e   : > { %v1115_v58 = vpop.permute.xlu0 %1114  ;;  %v1229_v4 = vsel %vm1182_vm7, %v1181_v27, %v1019_v24  ;;  %v5761_v26 = vpop.f32.mrb[25].mxu1 }
 0x14f   : > { %v1357_v28 = vsel %vm1182_vm7, %v1310_v50, %v1115_v58 }
 0x150   : > { %1710 = vmatprep.mubr.bf16.mxu0 %v1357_v28 }
 0x151   : > { %1711 = vmatmul.mubr.bf16.gmra.mrb[60].mxu0 %v1229_v4 }
 0x177   : > { %v4237_v29 = vpop.f32.mrb[0].mxu0 }
 0x178   : > { %v4238_v44 = vpop.f32.mrb[1].mxu0 }
 0x179   : > { %v4239_v43 = vadd.f32 %v4238_v44, %v4237_v29  ;;  %v4240_v46 = vpop.f32.mrb[2].mxu0 }
 0x17a   : > { %v4241_v60 = vpop.f32.mrb[3].mxu0 }
 0x17b   : > { %v4242_v55 = vadd.f32 %v4241_v60, %v4240_v46  ;;  %v1593_v8 = vadd.f32 %v4239_v43, %v5735_v5 }
 0x17d   : > { %v5739_v52 = vadd.f32 %v5650_v17, %v1593_v8  ;;  %v1596_v3 = vadd.f32 %v4242_v55, %v5735_v5 }
 0x17f   : > { %v5743_v33 = vadd.f32 %v5655_v22, %v1596_v3  ;;  %v4243_v53 = vpop.f32.mrb[4].mxu0  ;;  %2082 = vrot.lane.b32.xlu0 %v5739_v52, %s4853_s19 }
 0x180   : > { %v4244_v11 = vpop.f32.mrb[5].mxu0 }
 0x181   : > { %v4245_v19 = vadd.f32 %v4244_v11, %v4243_v53  ;;  %v4246_v59 = vpop.f32.mrb[6].mxu0  ;;  %2084 = vrot.lane.b32.xlu1 %v5743_v33, %s4853_s19 }
 0x182   : > { %v4247_v42 = vpop.f32.mrb[7].mxu0 }
 0x183   : > { %v1601_v57 = vadd.f32 %v4245_v19, %v5735_v5  ;;  %v4248_v17 = vadd.f32 %v4247_v42, %v4246_v59 }
 0x185   : > { %v5751_v49 = vadd.f32 %v5646_v35, %v1601_v57  ;;  %v1604_v22 = vadd.f32 %v4248_v17, %v5735_v5  ;;  %v5765_v35 = vpop.f32.mrb[26].mxu1 }
 0x186   : > { %v5767_v40 = vpop.f32.mrb[27].mxu1 }
 0x187   : > { %v5755_v32 = vadd.f32 %v5652_v10, %v1604_v22  ;;  %v4249_v0 = vpop.f32.mrb[8].mxu0  ;;  %2086 = vrot.lane.b32.xlu0 %v5751_v49, %s4853_s19  ;;  %v5793_v46 = vpop.f32.mrb[28].mxu1 }
 0x188   : > { %v4250_v36 = vpop.f32.mrb[9].mxu0  ;;  %v5795_v8 = vpop.f32.mrb[29].mxu1 }
 0x189   : > { %v4251_v47 = vadd.f32 %v4250_v36, %v4249_v0  ;;  %v4252_v61 = vpop.f32.mrb[10].mxu0  ;;  %2088 = vrot.lane.b32.xlu1 %v5755_v32, %s4853_s19  ;;  %v5797_v3 = vpop.f32.mrb[30].mxu1 }
 0x18a   : > { %v4253_v23 = vpop.f32.mrb[11].mxu0  ;;  %v5800_v11 = vpop.f32.mrb[31].mxu1 }
 0x18b   : > { %v4254_v10 = vadd.f32 %v4253_v23, %v4252_v61  ;;  %v1609_v39 = vadd.f32 %v4251_v47, %v5735_v5 }
 0x18d   : > { %v5771_v9 = vadd.f32 %v5662_v31, %v1609_v39  ;;  %v1612_v21 = vadd.f32 %v4254_v10, %v5735_v5 }
 0x18f   : > { %v5775_v13 = vadd.f32 %v5666_v30, %v1612_v21  ;;  %2090 = vrot.lane.b32.xlu0 %v5771_v9, %s4853_s19 }
 0x191   : > { %2092 = vrot.lane.b32.xlu1 %v5775_v13, %s4853_s19 }
 0x193   : > { %v4255_v48 = vpop.f32.mrb[12].mxu0 }
 0x194   : > { %v4256_v27 = vpop.f32.mrb[13].mxu0 }
 0x195   : > { %v4257_v50 = vadd.f32 %v4256_v27, %v4255_v48  ;;  %v4258_v24 = vpop.f32.mrb[14].mxu0 }
 0x196   : > { %v4259_v58 = vpop.f32.mrb[15].mxu0 }
 0x197   : > { %v1617_v4 = vadd.f32 %v4257_v50, %v5735_v5  ;;  %v4260_v31 = vadd.f32 %v4259_v58, %v4258_v24 }
 0x199   : > { %v5783_v28 = vadd.f32 %v5660_v15, %v1617_v4  ;;  %v1620_v30 = vadd.f32 %v4260_v31, %v5735_v5 }
 0x19b   : > { %v5787_v29 = vadd.f32 %v5664_v18, %v1620_v30  ;;  %2094 = vrot.lane.b32.xlu0 %v5783_v28, %s4853_s19 }
 0x19d   : > { %2096 = vrot.lane.b32.xlu1 %v5787_v29, %s4853_s19 }
 0x19f   : > { %v4261_v44 = vpop.f32.mrb[16].mxu0 }
 0x1a0   : > { %v4262_v43 = vpop.f32.mrb[17].mxu0 }
 0x1a1   : > { %v4263_v60 = vadd.f32 %v4262_v43, %v4261_v44  ;;  %v4264_v55 = vpop.f32.mrb[18].mxu0 }
 0x1a2   : > { %v4265_v15 = vpop.f32.mrb[19].mxu0 }
 0x1a3   : > { %v4266_v53 = vadd.f32 %v4265_v15, %v4264_v55  ;;  %v1625_v18 = vadd.f32 %v4263_v60, %v5735_v5 }
 0x1a5   : > { %v5803_v19 = vadd.f32 %v5676_v56, %v1625_v18  ;;  %v1628_v59 = vadd.f32 %v4266_v53, %v5735_v5 }
 0x1a7   : > { %v5807_v42 = vadd.f32 %v5682_v34, %v1628_v59  ;;  %2098 = vrot.lane.b32.xlu0 %v5803_v19, %s4853_s19 }
 0x1a9   : > { %2100 = vrot.lane.b32.xlu1 %v5807_v42, %s4853_s19 }
 0x1ab   : > { %v4267_v57 = vpop.f32.mrb[20].mxu0 }
 0x1ac   : > { %v4268_v17 = vpop.f32.mrb[21].mxu0 }
 0x1ad   : > { %v4269_v22 = vadd.f32 %v4268_v17, %v4267_v57  ;;  %v4270_v0 = vpop.f32.mrb[22].mxu0 }
 0x1ae   : > { %v4271_v36 = vpop.f32.mrb[23].mxu0 }
 0x1af   : > { %v1633_v47 = vadd.f32 %v4269_v22, %v5735_v5  ;;  %v4272_v56 = vadd.f32 %v4271_v36, %v4270_v0 }
 0x1b1   : > { %v5815_v61 = vadd.f32 %v5674_v63, %v1633_v47  ;;  %v1636_v34 = vadd.f32 %v4272_v56, %v5735_v5  ;;  %v4750_v47 = vld [vmem:[%s7141_s5 + $0x40] sm:$0xff]  }
 0x1b2   : > { %4351 = vmatprep.subr.bf16.mxu1 %v4750_v47  ;;  %v4760_v47 = vld [vmem:[%s7141_s5 + $0x68] sm:$0xff]  }
 0x1b3   : > { %v5819_v23 = vadd.f32 %v5679_v2, %v1636_v34  ;;  %2102 = vrot.lane.b32.xlu0 %v5815_v61, %s4853_s19 }
 0x1b5   : > { %2104 = vrot.lane.b32.xlu1 %v5819_v23, %s4853_s19 }
 0x1b7   : > { %v4273_v10 = vpop.f32.mrb[24].mxu0 }
 0x1b8   : > { %v4274_v39 = vpop.f32.mrb[25].mxu0 }
 0x1b9   : > { %v4275_v21 = vadd.f32 %v4274_v39, %v4273_v10  ;;  %v4276_v48 = vpop.f32.mrb[26].mxu0  ;;  %v4752_v39 = vld [vmem:[%s7141_s5 + $0x48] sm:$0xff]  }
 0x1ba   : > { %v4277_v27 = vpop.f32.mrb[27].mxu0 }
 0x1bb   : > { %v4278_v50 = vadd.f32 %v4277_v27, %v4276_v48  ;;  %v1641_v63 = vadd.f32 %v4275_v21, %v5735_v5  ;;  %v4753_v48 = vld [vmem:[%s7141_s5 + $0x8] sm:$0xff]  }
 0x1bd   : > { %v5827_v24 = vadd.f32 %v5698_v54, %v1641_v63  ;;  %v1644_v2 = vadd.f32 %v4278_v50, %v5735_v5 }
 0x1bf   : > { %v5831_v58 = vadd.f32 %v5703_v16, %v1644_v2  ;;  %2106 = vrot.lane.b32.xlu0 %v5827_v24, %s4853_s19 }
 0x1c1   : > { %2108 = vrot.lane.b32.xlu1 %v5831_v58, %s4853_s19 }
 0x1c3   : > { %v4279_v4 = vpop.f32.mrb[28].mxu0 }
 0x1c4   : > { %v4280_v31 = vpop.f32.mrb[29].mxu0 }
 0x1c5   : > { %v4281_v30 = vadd.f32 %v4280_v31, %v4279_v4  ;;  %v4282_v44 = vpop.f32.mrb[30].mxu0  ;;  %v4754_v4 = vld [vmem:[%s7141_s5 + $0x50] sm:$0xff]  }
 0x1c6   : > { %v4283_v43 = vpop.f32.mrb[31].mxu0  ;;  %v4755_v31 = vld [vmem:[%s7141_s5 + $0x10] sm:$0xff]  }
 0x1c7   : > { %v1649_v60 = vadd.f32 %v4281_v30, %v5735_v5  ;;  %v4284_v54 = vadd.f32 %v4283_v43, %v4282_v44  ;;  %v5903_v44 = vld [vmem:[%s7138_s2] ss:$0 sm:$0xff] }
 0x1c8   : > { %v1882_v43 = vld [vmem:[%s5888_s17] sm:$0xff] }
 0x1c9   : > { %v5839_v55 = vadd.f32 %v5694_v7, %v1649_v60  ;;  %v1652_v16 = vadd.f32 %v4284_v54, %v5735_v5  ;;  %v1883_v54 = vld [vmem:[%s5888_s17 + $0x8] sm:$0xff] }
 0x1cb   : > { %v5843_v15 = vadd.f32 %v5700_v41, %v1652_v16  ;;  %2110 = vrot.lane.b32.xlu0 %v5839_v55, %s4853_s19 }
 0x1cd   : > { %2112 = vrot.lane.b32.xlu1 %v5843_v15, %s4853_s19 }
 0x1cf   : > { %v4285_v53 = vpop.f32.mrb[32].mxu0 }
 0x1d0   : > { %v4286_v18 = vpop.f32.mrb[33].mxu0 }
 0x1d1   : > { %v4287_v59 = vadd.f32 %v4286_v18, %v4285_v53  ;;  %v4288_v57 = vpop.f32.mrb[34].mxu0  ;;  %v1918_v53 = vsub.f32 %v1882_v43, %v5903_v44  ;;  %v4758_v18 = vld [vmem:[%s7141_s5 + $0x60] sm:$0xff]   ;;  %v4763_v43 = vld [vmem:[%s7141_s5 + $0x30] sm:$0xff]  }
 0x1d2   : > { %v4289_v17 = vpop.f32.mrb[35].mxu0 }
 0x1d3   : > { %v4290_v22 = vadd.f32 %v4289_v17, %v4288_v57  ;;  %v1657_v7 = vadd.f32 %v4287_v59, %v5735_v5  ;;  %v4759_v59 = vld [vmem:[%s7141_s5 + $0x20] sm:$0xff]  }
 0x1d5   : > { %v5851_v0 = vadd.f32 %v5718_v51, %v1657_v7  ;;  %v1660_v41 = vadd.f32 %v4290_v22, %v5735_v5  ;;  %v4751_v51 = vld [vmem:[%s7141_s5] sm:$0xff]  }
 0x1d6   : > { %4352 = vmatpush3.bf16.msra.mxu1 %v4751_v51  ;;  %v5922_v22 = vld [vmem:[%s7138_s2 + $0x1] ss:$0 sm:$0xff] }
 0x1d7   : > { %v5855_v36 = vadd.f32 %v5722_v20, %v1660_v41  ;;  %2114 = vrot.lane.b32.xlu0 %v5851_v0, %s4853_s19  ;;  %4353 = vmatprep.subr.bf16.mxu1 %v4752_v39  ;;  %v1919_v41 = vsub.f32 %v1883_v54, %v5903_v44 }
 0x1d9   : > { %2116 = vrot.lane.b32.xlu1 %v5855_v36, %s4853_s19 }
 0x1da   : > { %4354 = vmatpush3.bf16.msra.mxu1 %v4753_v48  ;;  %v1884_v48 = vld [vmem:[%s5888_s17 + $0x10] sm:$0xff] }
 0x1db   : > { %v4291_v56 = vpop.f32.mrb[36].mxu0  ;;  %4355 = vmatprep.subr.bf16.mxu1 %v4754_v4  ;;  %v1885_v4 = vld [vmem:[%s5888_s17 + $0x18] sm:$0xff] }
 0x1dc   : > { %v4292_v34 = vpop.f32.mrb[37].mxu0 }
 0x1dd   : > { %v4293_v20 = vadd.f32 %v4292_v34, %v4291_v56  ;;  %v4294_v10 = vpop.f32.mrb[38].mxu0  ;;  %v1986_v34 = vadd.f32 1.0, %v5739_v52  ;;  %v4762_v52 = vld [vmem:[%s7141_s5 + $0x70] sm:$0xff]  }
 0x1de   : > { %v4295_v21 = vpop.f32.mrb[39].mxu0  ;;  %4356 = vmatpush3.bf16.msra.mxu1 %v4755_v31  ;;  %v4767_v31 = vld [vmem:[%s7141_s5 + $0x80] sm:$0xff]  }
 0x1df   : > { %v1665_v27 = vadd.f32 %v4293_v20, %v5735_v5  ;;  %v4296_v50 = vadd.f32 %v4295_v21, %v4294_v10  ;;  %v1954_v20 = vmul.f32 %v5922_v22, %v1918_v53  ;;  %v4761_v10 = vld [vmem:[%s7141_s5 + $0x28] sm:$0xff]  }
 0x1e1   : > { %v5875_v63 = vadd.f32 %v5716_v62, %v1665_v27  ;;  %v1668_v2 = vadd.f32 %v4296_v50, %v5735_v5  ;;  %v4756_v62 = vld [vmem:[%s7141_s5 + $0x58] sm:$0xff]   ;;  %v1987_v27 = vadd.f32 1.0, %v5743_v33  ;;  %v1955_v50 = vmul.f32 %v5922_v22, %v1919_v41 }
 0x1e2   : > { %4357 = vmatprep.subr.bf16.mxu1 %v4756_v62  ;;  %v2018_v62 = vmul.f32 %v1986_v34, %v1954_v20  ;;  %v1920_v33 = vsub.f32 %v1884_v48, %v5903_v44  ;;  %v1886_v34 = vld [vmem:[%s5888_s17 + $0x20] sm:$0xff] }
 0x1e3   : > { %v5894_v30 = vadd.f32 %v5720_v38, %v1668_v2  ;;  %2118 = vrot.lane.b32.xlu0 %v5875_v63, %s4853_s19  ;;  %v4757_v38 = vld [vmem:[%s7141_s5 + $0x18] sm:$0xff]   ;;  %v2019_v54 = vmul.f32 %v1987_v27, %v1955_v50  ;;  %v1887_v50 = vld [vmem:[%s5888_s17 + $0x28] sm:$0xff] }
 0x1e4   : > { %4358 = vmatpush3.bf16.msra.mxu1 %v4757_v38  ;;  %v4764_v38 = vld [vmem:[%s7141_s5 + $0x78] sm:$0xff]   ;;  %v1956_v41 = vmul.f32 %v5922_v22, %v1920_v33 }
 0x1e5   : > { %2120 = vrot.lane.b32.xlu1 %v5894_v30, %s4853_s19  ;;  %4359 = vmatprep.subr.bf16.mxu1 %v4758_v18 }
 0x1e7   : > { %v4297_v60 = vpop.f32.mrb[40].mxu0 }
 0x1e8   : > { %v4298_v16 = vpop.f32.mrb[41].mxu0  ;;  %4360 = vmatpush3.bf16.msra.mxu1 %v4759_v59 }
 0x1e9   : > { %v4299_v57 = vadd.f32 %v4298_v16, %v4297_v60  ;;  %v4300_v17 = vpop.f32.mrb[42].mxu0  ;;  %2770 = vrot.lane.b32.xlu1 %v4953_v1, %s4853_s19  ;;  %4361 = vmatprep.subr.bf16.mxu1 %v4760_v47  ;;  %v1921_v16 = vsub.f32 %v1885_v4, %v5903_v44  ;;  %v4766_v47 = vld [vmem:[%s7141_s5 + $0x38] sm:$0xff]  }
 0x1ea   : > { %v4301_v7 = vpop.f32.mrb[43].mxu0 }
 0x1eb   : > { %v4302_v51 = vadd.f32 %v4301_v7, %v4300_v17  ;;  %v1673_v56 = vadd.f32 %v4299_v57, %v5735_v5  ;;  %v1988_v7 = vadd.f32 1.0, %v5751_v49  ;;  %v1957_v49 = vmul.f32 %v5922_v22, %v1921_v16 }
 0x1ec   : > { %4362 = vmatpush3.bf16.msra.mxu1 %v4761_v10 }
 0x1ed   : > { %v5935_v39 = vadd.f32 %v5726_v37, %v1673_v56  ;;  %v1676_v21 = vadd.f32 %v4302_v51, %v5735_v5  ;;  %v4765_v37 = vld [vmem:[%s7141_s5 + $0xc0] sm:$0xff]   ;;  %4363 = vmatprep.subr.bf16.mxu1 %v4762_v52 }
 0x1ee   : > { %4463 = vmatprep.subr.bf16.mxu0 %v4765_v37  ;;  %v2020_v37 = vmul.f32 %v1988_v7, %v1956_v41  ;;  %v1888_v41 = vld [vmem:[%s5888_s17 + $0x30] sm:$0xff] }
 0x1ef   : > { %v5945_v2 = vadd.f32 %v5730_v12, %v1676_v21  ;;  %4464 = vmatpush3.bf16.msra.mxu0 %v4767_v31  ;;  %v1989_v21 = vadd.f32 1.0, %v5755_v32  ;;  %v1922_v31 = vsub.f32 %v1886_v34, %v5903_v44  ;;  %v1889_v34 = vld [vmem:[%s5888_s17 + $0x38] sm:$0xff] }
 0x1f0   : > { %4364 = vmatpush3.bf16.msra.mxu1 %v4763_v43 }
 0x1f1   : > { %2124 = vrot.lane.b32.xlu1 %v5945_v2, %s4853_s19  ;;  %v2083_v12 = vpop.permute.xlu0 %2082  ;;  %4365 = vmatprep.subr.bf16.mxu1 %v4764_v38  ;;  %v2021_v38 = vmul.f32 %v1989_v21, %v1957_v49 }
 0x1f2   : > { %v2178_v60 = vadd.f32 %v2083_v12, %v2018_v62 }
 0x1f3   : > { %v2085_v53 = vpop.permute.xlu1 %2084 }
 0x1f4   : > { %v4303_v18 = vpop.f32.mrb[44].mxu0  ;;  %v2242_v59 = vmul.f32 0.2, %v2178_v60  ;;  %v2179_v57 = vadd.f32 %v2085_v53, %v2019_v54  ;;  %vm2210_vm8 = vcmp.ge.f32.partialorder %v2178_v60, 0.0  ;;  %4366 = vmatpush3.bf16.msra.mxu1 %v4766_v47  ;;  %v1923_v54 = vsub.f32 %v1887_v50, %v5903_v44 }
 0x1f5   : > { %v4304_v17 = vpop.f32.mrb[45].mxu0  ;;  %v1991_v47 = vadd.f32 1.0, %v5775_v13 }
 0x1f6   : > { %v4305_v51 = vadd.f32 %v4304_v17, %v4303_v18  ;;  %v4306_v56 = vpop.f32.mrb[46].mxu0  ;;  %vm2211_vm9 = vcmp.ge.f32.partialorder %v2179_v57, 0.0  ;;  %v2243_v20 = vmul.f32 0.2, %v2179_v57  ;;  %v2274_v52 = vsel %vm2210_vm8, %v2178_v60, %v2242_v59 }
 0x1f7   : > { %v4307_v10 = vpop.f32.mrb[47].mxu0  ;;  %v1990_v18 = vadd.f32 1.0, %v5771_v9 }
 0x1f8   : > { %v1681_v48 = vadd.f32 %v4305_v51, %v5735_v5  ;;  %v4308_v27 = vadd.f32 %v4307_v10, %v4306_v56  ;;  %v2275_v4 = vsel %vm2211_vm9, %v2179_v57, %v2243_v20  ;;  %v1959_v56 = vmul.f32 %v5922_v22, %v1923_v54 }
 0x1f9   : > { %v2306_v62 = vpack.c.bf16 %v2275_v4, %v2274_v52  ;;  %v2087_v43 = vpop.permute.xlu0 %2086 }
 0x1fa   : > { %v5976_v33 = vadd.f32 %v5724_v25, %v1681_v48  ;;  %v1684_v32 = vadd.f32 %v4308_v27, %v5735_v5  ;;  %v2180_v12 = vadd.f32 %v2087_v43, %v2020_v37  ;;  %v1958_v25 = vmul.f32 %v5922_v22, %v1922_v31 }
 0x1fb   : > { %v2323_v16 = vshrl.u32 %v2306_v62, 16  ;;  %v2089_v53 = vpop.permute.xlu1 %2088  ;;  %v2326_v7 = vshll.u32 %v2306_v62, 16  ;;  %v1924_v27 = vsub.f32 %v1888_v41, %v5903_v44  ;;  %v1925_v31 = vsub.f32 %v1889_v34, %v5903_v44 }
 0x1fc   : > { %v5981_v60 = vadd.f32 %v5728_v45, %v1684_v32  ;;  %v2244_v59 = vmul.f32 0.2, %v2180_v12  ;;  %v2181_v57 = vadd.f32 %v2089_v53, %v2021_v38  ;;  %vm2212_vm10 = vcmp.ge.f32.partialorder %v2180_v12, 0.0 }
 0x1fd   : > { %v2325_v17 = vrot.slane %v2323_v16, 7  ;;  %v2022_v49 = vmul.f32 %v1990_v18, %v1958_v25  ;;  %v2023_v43 = vmul.f32 %v1991_v47, %v1959_v56 }
 0x1fe   : > { %vm2213_vm11 = vcmp.ge.f32.partialorder %v2181_v57, 0.0  ;;  %v2245_v51 = vmul.f32 0.2, %v2181_v57  ;;  %v2276_v10 = vsel %vm2212_vm10, %v2180_v12, %v2244_v59 }
 0x1ff   : > { %v2328_v45 = vor.u32 %v2326_v7, %v2325_v17  ;;  %v5991_v9 = vsel %vm4985_vm2, %v2325_v17, 0 }
 0x200   : > { %v4309_v20 = vpop.f32.mrb[48].mxu0  ;;  %v2277_v21 = vsel %vm2213_vm11, %v2181_v57, %v2245_v51  ;;  %v2506_v38 = vshll.u32 %v5991_v9, 16 }
 0x201   : > { %v4310_v48 = vpop.f32.mrb[49].mxu0  ;;  %v2307_v50 = vpack.c.bf16 %v2277_v21, %v2276_v10  ;;  %v2091_v52 = vpop.permute.xlu0 %2090  ;;  %v5996_v13 = vsel %vm4985_vm2, 0, %v2328_v45  ;;  %v1960_v21 = vmul.f32 %v5922_v22, %v1924_v27  ;;  %v1993_v27 = vadd.f32 1.0, %v5787_v29 }
 0x202   : > { %v4311_v4 = vadd.f32 %v4310_v48, %v4309_v20  ;;  %v4312_v37 = vpop.f32.mrb[50].mxu0  ;;  %v2182_v62 = vadd.f32 %v2091_v52, %v2022_v49  ;;  %2802 = vrot.lane.b32.xlu0 %v5996_v13, %s4853_s19  ;;  %v2501_v12 = vshll.u32 %v5996_v13, 16  ;;  %v2499_v59 = vshrl.u32 %v5996_v13, 16 }
 0x203   : > { %v4313_v32 = vpop.f32.mrb[51].mxu0  ;;  %v2330_v54 = vshrl.u32 %v2307_v50, 16  ;;  %v2093_v16 = vpop.permute.xlu1 %2092  ;;  %v2333_v57 = vshll.u32 %v2307_v50, 16  ;;  %v2508_v45 = vrot.slane %v2506_v38, 1  ;;  %v1992_v52 = vadd.f32 1.0, %v5783_v28 }
 0x204   : > { %v4314_v53 = vadd.f32 %v4313_v32, %v4312_v37  ;;  %v1689_v18 = vadd.f32 %v4311_v4, %v5735_v5  ;;  %v2246_v25 = vmul.f32 0.2, %v2182_v62  ;;  %v2183_v17 = vadd.f32 %v2093_v16, %v2023_v43  ;;  %v4768_v43 = vld [vmem:[%s7141_s5 + $0xc8] sm:$0xff]  }
 0x205   : > { %v2503_v7 = vrot.slane %v2501_v12, 1  ;;  %v2332_v41 = vrot.slane %v2330_v54, 7  ;;  %vm2214_vm12 = vcmp.ge.f32.partialorder %v2182_v62, 0.0  ;;  %v1961_v37 = vmul.f32 %v5922_v22, %v1925_v31  ;;  %v4769_v32 = vld [vmem:[%s7141_s5 + $0x88] sm:$0xff]   ;;  %v1890_v31 = vld [vmem:[%s5888_s17 + $0x40] sm:$0xff]  ;;  %4465 = vmatprep.subr.bf16.mxu0 %v4768_v43 }
 0x206   : > { %v6006_v47 = vadd.f32 %v5761_v26, %v1689_v18  ;;  %v1692_v51 = vadd.f32 %v4314_v53, %v5735_v5  ;;  %vm2215_vm13 = vcmp.ge.f32.partialorder %v2183_v17, 0.0  ;;  %v2247_v56 = vmul.f32 0.2, %v2183_v17  ;;  %2122 = vrot.lane.b32.xlu0 %v5935_v39, %s4853_s19  ;;  %4466 = vmatpush3.bf16.msra.mxu0 %v4769_v32 }
 0x207   : > { %v2504_v34 = vor.u32 %v2503_v7, %v2499_v59  ;;  %v2335_v10 = vor.u32 %v2333_v57, %v2332_v41  ;;  %v6017_v49 = vsel %vm4985_vm2, %v2332_v41, 0  ;;  %v2278_v26 = vsel %vm2214_vm12, %v2182_v62, %v2246_v25 }
 0x208   : > { %v6012_v20 = vadd.f32 %v5767_v40, %v1692_v51  ;;  %v2279_v48 = vsel %vm2215_vm13, %v2183_v17, %v2247_v56  ;;  %v2518_v28 = vshll.u32 %v6017_v49, 16  ;;  %v2024_v54 = vmul.f32 %v1992_v52, %v1960_v21  ;;  %v1891_v52 = vld [vmem:[%s5888_s17 + $0x48] sm:$0xff] }
 0x209   : > { %v6020_v50 = vsel %vm639_vm5, %v2504_v34, %v2508_v45  ;;  %v2308_v4 = vpack.c.bf16 %v2279_v48, %v2278_v26  ;;  %v6027_v40 = vsel %vm4985_vm2, 0, %v2335_v10  ;;  %v2025_v41 = vmul.f32 %v1993_v27, %v1961_v37 }
 0x20a   : > { %2772 = vrot.lane.b32.xlu1 %v6020_v50, %s4853_s19  ;;  %2804 = vrot.lane.b32.xlu0 %v6027_v40, %s4853_s19  ;;  %v2513_v62 = vshll.u32 %v6027_v40, 16  ;;  %v2511_v29 = vshrl.u32 %v6027_v40, 16  ;;  %v2520_v56 = vrot.slane %v2518_v28, 1  ;;  %v1926_v48 = vsub.f32 %v1890_v31, %v5903_v44 }
 0x20b   : > { %v2337_v12 = vshrl.u32 %v2308_v4, 16  ;;  %v2340_v59 = vshll.u32 %v2308_v4, 16 }
 0x20c   : > { %v4315_v38 = vpop.f32.mrb[52].mxu0  ;;  %v2515_v53 = vrot.slane %v2513_v62, 1 }
 0x20d   : > { %v4316_v16 = vpop.f32.mrb[53].mxu0  ;;  %v2339_v18 = vrot.slane %v2337_v12, 7  ;;  %v2095_v57 = vpop.permute.xlu0 %2094 }
 0x20e   : > { %2128 = vrot.lane.b32.xlu1 %v5981_v60, %s4853_s19  ;;  %v4317_v25 = vadd.f32 %v4316_v16, %v4315_v38  ;;  %v4318_v17 = vpop.f32.mrb[54].mxu0  ;;  %v2184_v7 = vadd.f32 %v2095_v57, %v2024_v54  ;;  %2126 = vrot.lane.b32.xlu0 %v5976_v33, %s4853_s19  ;;  %v2516_v51 = vor.u32 %v2515_v53, %v2511_v29  ;;  %v1994_v29 = vadd.f32 1.0, %v5803_v19 }
 0x20f   : > { %v4319_v34 = vpop.f32.mrb[55].mxu0  ;;  %v2097_v45 = vpop.permute.xlu1 %2096  ;;  %v2342_v26 = vor.u32 %v2340_v59, %v2339_v18  ;;  %v6055_v32 = vsel %vm4985_vm2, %v2339_v18, 0  ;;  %v1927_v38 = vsub.f32 %v1891_v52, %v5903_v44  ;;  %v1962_v18 = vmul.f32 %v5922_v22, %v1926_v48 }
 0x210   : > { %v1697_v10 = vadd.f32 %v4317_v25, %v5735_v5  ;;  %v4320_v21 = vadd.f32 %v4319_v34, %v4318_v17  ;;  %v2248_v4 = vmul.f32 0.2, %v2184_v7  ;;  %v2185_v62 = vadd.f32 %v2097_v45, %v2025_v41  ;;  %v4771_v17 = vld [vmem:[%s7141_s5 + $0x90] sm:$0xff]  }
 0x211   : > { %v6051_v43 = vsel %vm639_vm5, %v2516_v51, %v2520_v56  ;;  %vm2216_vm14 = vcmp.ge.f32.partialorder %v2184_v7, 0.0  ;;  %v6065_v28 = vsel %vm4985_vm2, 0, %v2342_v26  ;;  %v2530_v16 = vshll.u32 %v6055_v32, 16 }
 0x212   : > { %v6058_v27 = vadd.f32 %v5759_v6, %v1697_v10  ;;  %2774 = vrot.lane.b32.xlu1 %v6051_v43, %s4853_s19  ;;  %v1700_v37 = vadd.f32 %v4320_v21, %v5735_v5  ;;  %vm2217_vm15 = vcmp.ge.f32.partialorder %v2185_v62, 0.0  ;;  %v2249_v12 = vmul.f32 0.2, %v2185_v62  ;;  %2806 = vrot.lane.b32.xlu0 %v6065_v28, %s4853_s19 }
 0x213   : > { %v2525_v6 = vshll.u32 %v6065_v28, 16  ;;  %v2280_v53 = vsel %vm2216_vm14, %v2184_v7, %v2248_v4  ;;  %v2523_v57 = vshrl.u32 %v6065_v28, 16  ;;  %v1995_v19 = vadd.f32 1.0, %v5807_v42 }
 0x214   : > { %v6071_v54 = vadd.f32 %v5765_v35, %v1700_v37  ;;  %v2281_v31 = vsel %vm2217_vm15, %v2185_v62, %v2249_v12  ;;  %v4770_v35 = vld [vmem:[%s7141_s5 + $0xd0] sm:$0xff]   ;;  %v1963_v7 = vmul.f32 %v5922_v22, %v1927_v38  ;;  %v2532_v56 = vrot.slane %v2530_v16, 1 }
 0x215   : > { %v2309_v59 = vpack.c.bf16 %v2281_v31, %v2280_v53  ;;  %v2527_v25 = vrot.slane %v2525_v6, 1  ;;  %4467 = vmatprep.subr.bf16.mxu0 %v4770_v35  ;;  %v2026_v45 = vmul.f32 %v1994_v29, %v1962_v18  ;;  %v1892_v62 = vld [vmem:[%s5888_s17 + $0x50] sm:$0xff]  ;;  %v1893_v31 = vld [vmem:[%s5888_s17 + $0x58] sm:$0xff] }
 0x216   : > { %2132 = vrot.lane.b32.xlu1 %v6012_v20, %s4853_s19  ;;  %2130 = vrot.lane.b32.xlu0 %v6006_v47, %s4853_s19  ;;  %v2027_v12 = vmul.f32 %v1995_v19, %v1963_v7 }
 0x217   : > { %v2344_v41 = vshrl.u32 %v2309_v59, 16  ;;  %v2528_v51 = vor.u32 %v2527_v25, %v2523_v57  ;;  %4468 = vmatpush3.bf16.msra.mxu0 %v4771_v17  ;;  %v2347_v26 = vshll.u32 %v2309_v59, 16  ;;  %v1928_v57 = vsub.f32 %v1892_v62, %v5903_v44 }
 0x218   : > { %v4321_v34 = vpop.f32.mrb[56].mxu0 }
 0x219   : > { %v4322_v10 = vpop.f32.mrb[57].mxu0  ;;  %v2346_v21 = vrot.slane %v2344_v41, 7  ;;  %v2099_v48 = vpop.permute.xlu0 %2098  ;;  %v6091_v42 = vsel %vm639_vm5, %v2528_v51, %v2532_v56  ;;  %v1929_v41 = vsub.f32 %v1893_v31, %v5903_v44 }
 0x21a   : > { %v4323_v52 = vadd.f32 %v4322_v10, %v4321_v34  ;;  %v4324_v4 = vpop.f32.mrb[58].mxu0  ;;  %v2186_v37 = vadd.f32 %v2099_v48, %v2026_v45  ;;  %2776 = vrot.lane.b32.xlu1 %v6091_v42, %s4853_s19  ;;  %v1996_v10 = vadd.f32 1.0, %v5815_v61 }
 0x21b   : > { %v4325_v38 = vpop.f32.mrb[59].mxu0  ;;  %v2101_v6 = vpop.permute.xlu1 %2100  ;;  %v2349_v29 = vor.u32 %v2347_v26, %v2346_v21  ;;  %v6101_v25 = vsel %vm4985_vm2, %v2346_v21, 0  ;;  %v1964_v21 = vmul.f32 %v5922_v22, %v1928_v57  ;;  %v1894_v57 = vld [vmem:[%s5888_s17 + $0x60] sm:$0xff] }
 0x21c   : > { %v4326_v16 = vadd.f32 %v4325_v38, %v4324_v4  ;;  %v1705_v53 = vadd.f32 %v4323_v52, %v5735_v5  ;;  %v2250_v18 = vmul.f32 0.2, %v2186_v37  ;;  %v2187_v59 = vadd.f32 %v2101_v6, %v2027_v12 }
 0x21d   : > { %vm2218_vm0 = vcmp.ge.f32.partialorder %v2186_v37, 0.0  ;;  %v6105_v35 = vsel %vm4985_vm2, 0, %v2349_v29  ;;  %v1965_v4 = vmul.f32 %v5922_v22, %v1929_v41  ;;  %v2028_v6 = vmul.f32 %v1996_v10, %v1964_v21 }
 0x21e   : > { %v6108_v17 = vadd.f32 %v5795_v8, %v1705_v53  ;;  %v1708_v19 = vadd.f32 %v4326_v16, %v5735_v5  ;;  %vm2219_vm1 = vcmp.ge.f32.partialorder %v2187_v59, 0.0  ;;  %v2251_v7 = vmul.f32 0.2, %v2187_v59  ;;  %2136 = vrot.lane.b32.xlu1 %v6071_v54, %s4853_s19  ;;  %2808 = vrot.lane.b32.xlu0 %v6105_v35, %s4853_s19 }
 0x21f   : > { %v2537_v56 = vshll.u32 %v6105_v35, 16  ;;  %v2542_v8 = vshll.u32 %v6101_v25, 16  ;;  %v2282_v34 = vsel %vm2218_vm0, %v2186_v37, %v2250_v18  ;;  %v2535_v48 = vshrl.u32 %v6105_v35, 16 }
 0x220   : > { %v6117_v51 = vadd.f32 %v5800_v11, %v1708_v19  ;;  %v2283_v45 = vsel %vm2219_vm1, %v2187_v59, %v2251_v7  ;;  %v1997_v11 = vadd.f32 1.0, %v5819_v23  ;;  %vm6358_vm1 = vmneg %vm1149_vm6 }
 0x221   : > { %v2310_v26 = vpack.c.bf16 %v2283_v45, %v2282_v34  ;;  %v2539_v52 = vrot.slane %v2537_v56, 1  ;;  %v2544_v38 = vrot.slane %v2542_v8, 1  ;;  %v1895_v45 = vld [vmem:[%s5888_s17 + $0x68] sm:$0xff] }
 0x222   : > { %2134 = vrot.lane.b32.xlu0 %v6058_v27, %s4853_s19  ;;  %v2029_v23 = vmul.f32 %v1997_v11, %v1965_v4 }
 0x223   : > { %v2351_v62 = vshrl.u32 %v2310_v26, 16  ;;  %v2540_v37 = vor.u32 %v2539_v52, %v2535_v48  ;;  %v2354_v29 = vshll.u32 %v2310_v26, 16  ;;  %v1930_v26 = vsub.f32 %v1894_v57, %v5903_v44 }
 0x224   : > { %v4327_v12 = vpop.f32.mrb[60].mxu0 }
 0x225   : > { %v4328_v61 = vpop.f32.mrb[61].mxu0  ;;  %v2353_v16 = vrot.slane %v2351_v62, 7  ;;  %v2103_v53 = vpop.permute.xlu0 %2102  ;;  %v6129_v31 = vsel %vm639_vm5, %v2540_v37, %v2544_v38 }
 0x226   : > { %v4329_v18 = vadd.f32 %v4328_v61, %v4327_v12  ;;  %v4330_v59 = vpop.f32.mrb[62].mxu0  ;;  %v2188_v19 = vadd.f32 %v2103_v53, %v2028_v6  ;;  %2778 = vrot.lane.b32.xlu1 %v6129_v31, %s4853_s19  ;;  %v1931_v12 = vsub.f32 %v1895_v45, %v5903_v44  ;;  %v1998_v61 = vadd.f32 1.0, %v5827_v24 }
 0x227   : > { %v4331_v7 = vpop.f32.mrb[63].mxu0  ;;  %v2105_v56 = vpop.permute.xlu1 %2104  ;;  %v2356_v34 = vor.u32 %v2354_v29, %v2353_v16  ;;  %v6139_v48 = vsel %vm4985_vm2, %v2353_v16, 0  ;;  %v1966_v53 = vmul.f32 %v5922_v22, %v1930_v26 }
 0x228   : > { %v1713_v41 = vadd.f32 %v4329_v18, %v5735_v5  ;;  %v4332_v8 = vadd.f32 %v4331_v7, %v4330_v59  ;;  %v2252_v10 = vmul.f32 0.2, %v2188_v19  ;;  %v2189_v21 = vadd.f32 %v2105_v56, %v2029_v23 }
 0x229   : > { %vm2220_vm7 = vcmp.ge.f32.partialorder %v2188_v19, 0.0  ;;  %v6147_v4 = vsel %vm4985_vm2, 0, %v2356_v34  ;;  %v2554_v6 = vshll.u32 %v6139_v48, 16  ;;  %v1967_v23 = vmul.f32 %v5922_v22, %v1931_v12 }
 0x22a   : > { %v6142_v52 = vadd.f32 %v5793_v46, %v1713_v41  ;;  %v1716_v11 = vadd.f32 %v4332_v8, %v5735_v5  ;;  %vm2221_vm8 = vcmp.ge.f32.partialorder %v2189_v21, 0.0  ;;  %v2253_v62 = vmul.f32 0.2, %v2189_v21  ;;  %2140 = vrot.lane.b32.xlu1 %v6117_v51, %s4853_s19  ;;  %2810 = vrot.lane.b32.xlu0 %v6147_v4, %s4853_s19  ;;  %v4772_v46 = vld [vmem:[%s7141_s5 + $0xd8] sm:$0xff]  }
 0x22b   : > { %v4773_v5 = vld [vmem:[%s7141_s5 + $0x98] sm:$0xff]   ;;  %v2549_v38 = vshll.u32 %v6147_v4, 16  ;;  %v2284_v16 = vsel %vm2220_vm7, %v2188_v19, %v2252_v10  ;;  %4469 = vmatprep.subr.bf16.mxu0 %v4772_v46  ;;  %v2547_v59 = vshrl.u32 %v6147_v4, 16  ;;  %v2556_v7 = vrot.slane %v2554_v6, 1  ;;  %v1896_v10 = vld [vmem:[%s5888_s17 + $0x70] sm:$0xff] }
 0x22c   : > { %v6161_v37 = vadd.f32 %v5797_v3, %v1716_v11  ;;  %v2285_v29 = vsel %vm2221_vm8, %v2189_v21, %v2253_v62  ;;  %4470 = vmatpush3.bf16.msra.mxu0 %v4773_v5  ;;  %v1999_v3 = vadd.f32 1.0, %v5831_v58  ;;  %v2030_v41 = vmul.f32 %v1998_v61, %v1966_v53  ;;  %v1897_v62 = vld [vmem:[%s5888_s17 + $0x78] sm:$0xff]  ;;  %v4775_v53 = vld [vmem:[%s7141_s5 + $0xa0] sm:$0xff]  }
 0x22d   : > { %v2311_v18 = vpack.c.bf16 %v2285_v29, %v2284_v16  ;;  %v2551_v57 = vrot.slane %v2549_v38, 1  ;;  %v1932_v5 = vsub.f32 %v1896_v10, %v5903_v44  ;;  %v1933_v16 = vsub.f32 %v1897_v62, %v5903_v44  ;;  %v4774_v29 = vld [vmem:[%s7141_s5 + $0xe0] sm:$0xff]   ;;  %v4779_v62 = vld [vmem:[%s7141_s5 + $0xf0] sm:$0xff]  }
 0x22e   : > { %2138 = vrot.lane.b32.xlu0 %v6108_v17, %s4853_s19  ;;  %v2031_v58 = vmul.f32 %v1999_v3, %v1967_v23  ;;  %v4777_v3 = vld [vmem:[%s7141_s5 + $0xe8] sm:$0xff]   ;;  %4471 = vmatprep.subr.bf16.mxu0 %v4774_v29  ;;  %v1898_v29 = vld [vmem:[%s5888_s17 + $0x80] sm:$0xff] }
 0x22f   : > { %v2358_v24 = vshrl.u32 %v2311_v18, 16  ;;  %v2552_v19 = vor.u32 %v2551_v57, %v2547_v59  ;;  %v2361_v8 = vshll.u32 %v2311_v18, 16  ;;  %v6204_v57 = vld [vmem:[%s7141_s5 + $0x100] sm:$0xff]   ;;  %v1969_v10 = vmul.f32 %v5922_v22, %v1933_v16 }
 0x230   : > { %4472 = vmatpush3.bf16.msra.mxu0 %v4775_v53  ;;  %4631 = vmatprep.subr.bf16.mxu1 %v6204_v57 }
 0x231   : > { %v2360_v56 = vrot.slane %v2358_v24, 7  ;;  %v2107_v34 = vpop.permute.xlu0 %2106  ;;  %v6173_v45 = vsel %vm639_vm5, %v2552_v19, %v2556_v7  ;;  %v2000_v19 = vadd.f32 1.0, %v5839_v55  ;;  %v1968_v7 = vmul.f32 %v5922_v22, %v1932_v5  ;;  %4473 = vmatprep.subr.bf16.mxu0 %v4777_v3  ;;  %v1899_v3 = vld [vmem:[%s5888_s17 + $0x88] sm:$0xff] }
 0x232   : > { %v2190_v21 = vadd.f32 %v2107_v34, %v2030_v41  ;;  %2780 = vrot.lane.b32.xlu1 %v6173_v45, %s4853_s19  ;;  %v4778_v34 = vld [vmem:[%s7141_s5 + $0xa8] sm:$0xff]   ;;  %v2001_v55 = vadd.f32 1.0, %v5843_v15  ;;  %v4780_v15 = vld [vmem:[%s7141_s5 + $0xb0] sm:$0xff]  }
 0x233   : > { %v2109_v26 = vpop.permute.xlu1 %2108  ;;  %v2363_v11 = vor.u32 %v2361_v8, %v2360_v56  ;;  %v6182_v38 = vsel %vm4985_vm2, %v2360_v56, 0 }
 0x234   : > { %v2254_v12 = vmul.f32 0.2, %v2190_v21  ;;  %v2191_v46 = vadd.f32 %v2109_v26, %v2031_v58  ;;  %vm2222_vm9 = vcmp.ge.f32.partialorder %v2190_v21, 0.0  ;;  %v2566_v59 = vshll.u32 %v6182_v38, 16  ;;  %4474 = vmatpush3.bf16.msra.mxu0 %v4778_v34  ;;  %v4781_v34 = vld [vmem:[%s7141_s5 + $0xf8] sm:$0xff]  }
 0x235   : > { %v6186_v6 = vsel %vm4985_vm2, 0, %v2363_v11  ;;  %v2032_v11 = vmul.f32 %v2000_v19, %v1968_v7  ;;  %v2033_v53 = vmul.f32 %v2001_v55, %v1969_v10  ;;  %4475 = vmatprep.subr.bf16.mxu0 %v4779_v62  ;;  %v1934_v19 = vsub.f32 %v1898_v29, %v5903_v44  ;;  %v4782_v55 = vld [vmem:[%s7141_s5 + $0xb8] sm:$0xff]  }
 0x236   : > { %vm2223_vm10 = vcmp.ge.f32.partialorder %v2191_v46, 0.0  ;;  %v2255_v61 = vmul.f32 0.2, %v2191_v46  ;;  %2144 = vrot.lane.b32.xlu1 %v6161_v37, %s4853_s19  ;;  %2812 = vrot.lane.b32.xlu0 %v6186_v6, %s4853_s19  ;;  %v2561_v18 = vshll.u32 %v6186_v6, 16  ;;  %v2286_v23 = vsel %vm2222_vm9, %v2190_v21, %v2254_v12 }
 0x237   : > { %v2559_v56 = vshrl.u32 %v6186_v6, 16  ;;  %v2568_v26 = vrot.slane %v2566_v59, 1  ;;  %v1970_v62 = vmul.f32 %v5922_v22, %v1934_v19  ;;  %v2003_v29 = vadd.f32 1.0, %v5855_v36  ;;  %v1900_v19 = vld [vmem:[%s5888_s17 + $0x90] sm:$0xff] }
 0x238   : > { %v2287_v24 = vsel %vm2223_vm10, %v2191_v46, %v2255_v61  ;;  %v2563_v8 = vrot.slane %v2561_v18, 1  ;;  %4476 = vmatpush3.bf16.msra.mxu0 %v4780_v15 }
 0x239   : > { %v2312_v41 = vpack.c.bf16 %v2287_v24, %v2286_v23  ;;  %4477 = vmatprep.subr.bf16.mxu0 %v4781_v34 }
 0x23a   : > { %2142 = vrot.lane.b32.xlu0 %v6142_v52, %s4853_s19  ;;  %v2564_v58 = vor.u32 %v2563_v8, %v2559_v56  ;;  %v1935_v8 = vsub.f32 %v1899_v3, %v5903_v44 }
 0x23b   : > { %v2365_v21 = vshrl.u32 %v2312_v41, 16  ;;  %v2368_v46 = vshll.u32 %v2312_v41, 16 }
 0x23c   : > { %v6224_v61 = vsel %vm639_vm5, %v2564_v58, %v2568_v26  ;;  %v2002_v58 = vadd.f32 1.0, %v5851_v0  ;;  %4478 = vmatpush3.bf16.msra.mxu0 %v4782_v55  ;;  %v1971_v15 = vmul.f32 %v5922_v22, %v1935_v8 }
 0x23d   : > { %v2367_v12 = vrot.slane %v2365_v21, 7  ;;  %v2111_v5 = vpop.permute.xlu0 %2110  ;;  %2782 = vrot.lane.b32.xlu1 %v6224_v61, %s4853_s19 }
 0x23e   : > { %v2192_v16 = vadd.f32 %v2111_v5, %v2032_v11  ;;  %v2034_v0 = vmul.f32 %v2002_v58, %v1970_v62  ;;  %v2035_v34 = vmul.f32 %v2003_v29, %v1971_v15  ;;  %v2708_v62 = vrot.slane %v5996_v13, 1 }
 0x23f   : > { %v2113_v18 = vpop.permute.xlu1 %2112  ;;  %v2370_v59 = vor.u32 %v2368_v46, %v2367_v12  ;;  %v6236_v7 = vsel %vm4985_vm2, %v2367_v12, 0 }
 0x240   : > { %v2256_v23 = vmul.f32 0.2, %v2192_v16  ;;  %v2193_v24 = vadd.f32 %v2113_v18, %v2033_v53  ;;  %vm2224_vm11 = vcmp.ge.f32.partialorder %v2192_v16, 0.0  ;;  %v2578_v21 = vshll.u32 %v6236_v7, 16 }
 0x241   : > { %v6240_v41 = vsel %vm4985_vm2, 0, %v2370_v59 }
 0x242   : > { %vm2225_vm12 = vcmp.ge.f32.partialorder %v2193_v24, 0.0  ;;  %v2257_v56 = vmul.f32 0.2, %v2193_v24  ;;  %2814 = vrot.lane.b32.xlu0 %v6240_v41, %s4853_s19  ;;  %v2573_v10 = vshll.u32 %v6240_v41, 16  ;;  %v2288_v26 = vsel %vm2224_vm11, %v2192_v16, %v2256_v23 }
 0x243   : > { %v2571_v46 = vshrl.u32 %v6240_v41, 16  ;;  %v2580_v59 = vrot.slane %v2578_v21, 1  ;;  %v1936_v21 = vsub.f32 %v1900_v19, %v5903_v44 }
 0x244   : > { %v2289_v11 = vsel %vm2225_vm12, %v2193_v24, %v2257_v56  ;;  %v2575_v5 = vrot.slane %v2573_v10, 1  ;;  %v1901_v10 = vld [vmem:[%s5888_s17 + $0x98] sm:$0xff] }
 0x245   : > { %v2313_v12 = vpack.c.bf16 %v2289_v11, %v2288_v26 }
 0x246   : > { %v2576_v18 = vor.u32 %v2575_v5, %v2571_v46  ;;  %v1937_v46 = vsub.f32 %v1901_v10, %v5903_v44  ;;  %v2709_v5 = vrot.slane %v5991_v9, 1  ;;  %v2005_v9 = vadd.f32 1.0, %v5894_v30 }
 0x247   : > { %v2372_v53 = vshrl.u32 %v2313_v12, 16  ;;  %v2375_v3 = vshll.u32 %v2313_v12, 16 }
 0x248   : > { %v6259_v24 = vsel %vm639_vm5, %v2576_v18, %v2580_v59  ;;  %v2004_v59 = vadd.f32 1.0, %v5875_v63 }
 0x249   : > { %v2374_v16 = vrot.slane %v2372_v53, 7  ;;  %v2115_v23 = vpop.permute.xlu0 %2114  ;;  %2784 = vrot.lane.b32.xlu1 %v6259_v24, %s4853_s19 }
 0x24a   : > { %v2194_v56 = vadd.f32 %v2115_v23, %v2034_v0  ;;  %v1972_v0 = vmul.f32 %v5922_v22, %v1936_v21 }
 0x24b   : > { %v2117_v36 = vpop.permute.xlu1 %2116  ;;  %v2377_v55 = vor.u32 %v2375_v3, %v2374_v16  ;;  %v6268_v58 = vsel %vm4985_vm2, %v2374_v16, 0  ;;  %v6284_v3 = vsel %vm859_vm3, %v2708_v62, %v2709_v5 }
 0x24c   : > { %v2258_v8 = vmul.f32 0.2, %v2194_v56  ;;  %v2195_v26 = vadd.f32 %v2117_v36, %v2035_v34  ;;  %vm2226_vm13 = vcmp.ge.f32.partialorder %v2194_v56, 0.0  ;;  %v2590_v15 = vshll.u32 %v6268_v58, 16 }
 0x24d   : > { %v6272_v11 = vsel %vm4985_vm2, 0, %v2377_v55  ;;  %v1973_v34 = vmul.f32 %v5922_v22, %v1937_v46  ;;  %v2036_v63 = vmul.f32 %v2004_v59, %v1972_v0  ;;  %v2712_v0 = vrot.slane %v6017_v49, 1 }
 0x24e   : > { %vm2227_vm14 = vcmp.ge.f32.partialorder %v2195_v26, 0.0  ;;  %v2259_v12 = vmul.f32 0.2, %v2195_v26  ;;  %2816 = vrot.lane.b32.xlu0 %v6272_v11, %s4853_s19  ;;  %v2585_v29 = vshll.u32 %v6272_v11, 16  ;;  %v2290_v53 = vsel %vm2226_vm13, %v2194_v56, %v2258_v8 }
 0x24f   : > { %v2583_v23 = vshrl.u32 %v6272_v11, 16  ;;  %v2592_v55 = vrot.slane %v2590_v15, 1 }
 0x250   : > { %v2291_v18 = vsel %vm2227_vm14, %v2195_v26, %v2259_v12  ;;  %v2587_v19 = vrot.slane %v2585_v29, 1  ;;  %v2037_v12 = vmul.f32 %v2005_v9, %v1973_v34 }
 0x251   : > { %v2314_v16 = vpack.c.bf16 %v2291_v18, %v2290_v53  ;;  %v2711_v18 = vrot.slane %v6027_v40, 1 }
 0x252   : > { %2834 = vrot.lane.b32.xlu0 %v6284_v3, %s4853_s19  ;;  %v2588_v36 = vor.u32 %v2587_v19, %v2583_v23 }
 0x253   : > { %v2379_v56 = vshrl.u32 %v2314_v16, 16  ;;  %v2382_v8 = vshll.u32 %v2314_v16, 16 }
 0x254   : > { %v6292_v21 = vsel %vm639_vm5, %v2588_v36, %v2592_v55 }
 0x255   : > { %v2381_v10 = vrot.slane %v2379_v56, 7  ;;  %v2119_v26 = vpop.permute.xlu0 %2118  ;;  %v6311_v56 = vsel %vm859_vm3, %v2711_v18, %v2712_v0  ;;  %v1903_v0 = vld [vmem:[%s5888_s17 + $0xa8] sm:$0xff] }
 0x256   : > { %v2196_v62 = vadd.f32 %v2119_v26, %v2036_v63  ;;  %2786 = vrot.lane.b32.xlu0 %v6292_v21, %s4853_s19 }
 0x257   : > { %v2121_v5 = vpop.permute.xlu1 %2120  ;;  %v2384_v29 = vor.u32 %v2382_v8, %v2381_v10  ;;  %v6298_v46 = vsel %vm4985_vm2, %v2381_v10, 0 }
 0x258   : > { %v2260_v30 = vmul.f32 0.2, %v2196_v62  ;;  %v2197_v53 = vadd.f32 %v2121_v5, %v2037_v12  ;;  %vm2228_vm15 = vcmp.ge.f32.partialorder %v2196_v62, 0.0  ;;  %v2602_v23 = vshll.u32 %v6298_v46, 16 }
 0x259   : > { %v6302_v15 = vsel %vm4985_vm2, 0, %v2384_v29 }
 0x25a   : > { %vm2229_vm0 = vcmp.ge.f32.partialorder %v2197_v53, 0.0  ;;  %v2261_v59 = vmul.f32 0.2, %v2197_v53  ;;  %2818 = vrot.lane.b32.xlu1 %v6302_v15, %s4853_s19  ;;  %v2597_v16 = vshll.u32 %v6302_v15, 16  ;;  %v2292_v19 = vsel %vm2228_vm15, %v2196_v62, %v2260_v30 }
 0x25b   : > { %v2595_v36 = vshrl.u32 %v6302_v15, 16  ;;  %v2604_v49 = vrot.slane %v2602_v23, 1  ;;  %v2714_v30 = vrot.slane %v6065_v28, 1 }
 0x25c   : > { %v2293_v9 = vsel %vm2229_vm0, %v2197_v53, %v2261_v59  ;;  %v2599_v55 = vrot.slane %v2597_v16, 1  ;;  %v2715_v59 = vrot.slane %v6055_v32, 1 }
 0x25d   : > { %v2315_v34 = vpack.c.bf16 %v2293_v9, %v2292_v19 }
 0x25e   : > { %2836 = vrot.lane.b32.xlu1 %v6311_v56, %s4853_s19  ;;  %v2600_v10 = vor.u32 %v2599_v55, %v2595_v36  ;;  %v6338_v19 = vsel %vm859_vm3, %v2714_v30, %v2715_v59  ;;  %v1939_v36 = vsub.f32 %v1903_v0, %v5903_v44  ;;  %v6343_v55 = vpop.permute.xlu1 %2770  ;;  %v7158_v0 = vmov 0 }
 0x25f   : > { %v2386_v63 = vshrl.u32 %v2315_v34, 16  ;;  %v2389_v26 = vshll.u32 %v2315_v34, 16  ;;  %7156 = vst [vmem:[#allocation7_spill] sm:$0xff] %v6343_v55  ;;  %v7159_v0 = vsel %vm6358_vm1, 4294967295, %v7158_v0 }
 0x260   : > { %v6317_v12 = vsel %vm639_vm5, %v2600_v10, %v2604_v49  ;;  %v2007_v10 = vadd.f32 1.0, %v5945_v2  ;;  %v1975_v49 = vmul.f32 %v5922_v22, %v1939_v36  ;;  %7160 = vst [vmem:[#allocation9_spill] sm:$0xff] %v7159_v0 }
 0x261   : > { %v2388_v8 = vrot.slane %v2386_v63, 7  ;;  %7155 = vst [vmem:[#allocation6_spill] sm:$0xff] %v6317_v12  ;;  %v1902_v63 = vld [vmem:[%s5888_s17 + $0xa0] sm:$0xff] }
 0x262   : > { %2788 = vrot.lane.b32.xlu1 %v6317_v12, %s4853_s19  ;;  %v2039_v30 = vmul.f32 %v2007_v10, %v1975_v49  ;;  %v1907_v49 = vld [vmem:[%s5888_s17 + $0xc8] sm:$0xff] }
 0x263   : > { %v2391_v62 = vor.u32 %v2389_v26, %v2388_v8  ;;  %v6323_v5 = vsel %vm4985_vm2, %v2388_v8, 0  ;;  %v1938_v8 = vsub.f32 %v1902_v63, %v5903_v44  ;;  %v2125_v26 = vpop.permute.xlu1 %2124  ;;  %v4783_v44 = vld [vmem:[%s7141_s5 + $0x108] sm:$0xff]  }
 0x264   : > { %v2614_v18 = vshll.u32 %v6323_v5, 16  ;;  %v2199_v2 = vadd.f32 %v2125_v26, %v2039_v30  ;;  %v6386_v26 = vld [vmem:[%s7138_s2 + $0x1] ss:$0 sm:$0xff]  ;;  %v2009_v30 = vadd.f32 1.0, %v5981_v60 }
 0x265   : > { %v6327_v29 = vsel %vm4985_vm2, 0, %v2391_v62  ;;  %v2006_v62 = vadd.f32 1.0, %v5935_v39 }
 0x266   : > { %2820 = vrot.lane.b32.xlu0 %v6327_v29, %s4853_s19  ;;  %v2609_v53 = vshll.u32 %v6327_v29, 16  ;;  %v2607_v16 = vshrl.u32 %v6327_v29, 16  ;;  %v2616_v34 = vrot.slane %v2614_v18, 1  ;;  %v1905_v18 = vld [vmem:[%s5888_s17 + $0xb8] sm:$0xff]  ;;  %v2263_v63 = vmul.f32 0.2, %v2199_v2 }
 0x267   : > { %vm2231_vm7 = vcmp.ge.f32.partialorder %v2199_v2, 0.0 }
 0x268   : > { %v2611_v23 = vrot.slane %v2609_v53, 1  ;;  %v1974_v53 = vmul.f32 %v5922_v22, %v1938_v8  ;;  %v6371_v22 = vld [vmem:[%s7138_s2] ss:$0 sm:$0xff]  ;;  %v4784_v8 = vld [vmem:[%s7141_s5 + $0x110] sm:$0xff]  }
 0x269   : > { %v1941_v39 = vsub.f32 %v1905_v18, %v6371_v22 }
 0x26a   : > { %2838 = vrot.lane.b32.xlu0 %v6338_v19, %s4853_s19  ;;  %v2612_v9 = vor.u32 %v2611_v23, %v2607_v16  ;;  %v1904_v16 = vld [vmem:[%s5888_s17 + $0xb0] sm:$0xff] }
 0x26c   : > { %v6346_v32 = vsel %vm639_vm5, %v2612_v9, %v2616_v34  ;;  %v2038_v9 = vmul.f32 %v2006_v62, %v1974_v53  ;;  %v1940_v34 = vsub.f32 %v1904_v16, %v6371_v22  ;;  %v1977_v62 = vmul.f32 %v6386_v26, %v1941_v39  ;;  %v1906_v53 = vld [vmem:[%s5888_s17 + $0xc0] sm:$0xff] }
 0x26d   : > { %7157 = vst [vmem:[#allocation8_spill] sm:$0xff] %v6346_v32  ;;  %v2008_v16 = vadd.f32 1.0, %v5976_v33  ;;  %v1942_v60 = vsub.f32 %v1906_v53, %v6371_v22 }
 0x26e   : > { %2790 = vrot.lane.b32.xlu0 %v6346_v32, %s4853_s19 }
 0x274   : > { %v2803_v59 = vpop.permute.xlu0 %2802 }
 0x275   : > { %v2917_v23 = vsel %vm1149_vm6, %v4953_v1, %v2803_v59  ;;  %v1976_v59 = vmul.f32 %v6386_v26, %v1940_v34 }
 0x276   : > { %3406 = vmatprep.mubr.bf16.mxu1 %v2917_v23 }
 0x277   : > { %4193 = vmatmul.mubr.msk.bf16.vlgmr.msra.gmra.mrb[32].mxu1 %vm6358_vm1, %v6343_v55  ;;  %v2041_v55 = vmul.f32 %v2009_v30, %v1977_v62  ;;  %v2040_v32 = vmul.f32 %v2008_v16, %v1976_v59  ;;  %v2010_v62 = vadd.f32 1.0, %v6006_v47  ;;  %v1908_v59 = vld [vmem:[%s5888_s17 + $0xd0] sm:$0xff] }
 0x278   : > { %v2123_v36 = vpop.permute.xlu0 %2122  ;;  %4632 = vmatpush3.bf16.msra.mxu1 %v6204_v57 }
 0x279   : > { %v2198_v10 = vadd.f32 %v2123_v36, %v2038_v9  ;;  %4633 = vmatprep.subr.bf16.mxu1 %v4783_v44  ;;  %v1943_v9 = vsub.f32 %v1907_v49, %v6371_v22  ;;  %v2295_v36 = vsel %vm2231_vm7, %v2199_v2, %v2263_v63  ;;  %v1909_v2 = vld [vmem:[%s5888_s17 + $0xd8] sm:$0xff] }
 0x27b   : > { %vm2230_vm8 = vcmp.ge.f32.partialorder %v2198_v10, 0.0  ;;  %v2262_v57 = vmul.f32 0.2, %v2198_v10 }
 0x27c   : > { %v2773_v18 = vpop.permute.xlu1 %2772  ;;  %v2805_v23 = vpop.permute.xlu0 %2804  ;;  %4634 = vmatpush3.bf16.msra.mxu1 %v4783_v44 }
 0x27d   : > { %v2294_v1 = vsel %vm2230_vm8, %v2198_v10, %v2262_v57  ;;  %v2921_v39 = vsel %vm1149_vm6, %v6284_v3, %v2805_v23  ;;  %4635 = vmatprep.subr.bf16.mxu1 %v4784_v8  ;;  %v2872_v34 = vsel %vm1149_vm6, %v5996_v13, %v2773_v18  ;;  %v2011_v3 = vadd.f32 1.0, %v6012_v20 }
 0x27e   : > { %v2316_v0 = vpack.c.bf16 %v2295_v36, %v2294_v1  ;;  %3414 = vmatprep.mubr.bf16.mxu1 %v2921_v39  ;;  %v1979_v10 = vmul.f32 %v6386_v26, %v1943_v9  ;;  %v1978_v1 = vmul.f32 %v6386_v26, %v1942_v60  ;;  %v1945_v18 = vsub.f32 %v1909_v2, %v6371_v22 }
 0x27f   : > { %3415 = vmatmul.mubr.bf16.gmra.mrb[36].mxu1 %v2872_v34  ;;  %v2717_v23 = vrot.slane %v6105_v35, 1 }
 0x280   : > { %v2129_v33 = vpop.permute.xlu1 %2128  ;;  %v2393_v49 = vshrl.u32 %v2316_v0, 16  ;;  %v2127_v12 = vpop.permute.xlu0 %2126  ;;  %4636 = vmatpush3.bf16.msra.mxu1 %v4784_v8  ;;  %v2396_v57 = vshll.u32 %v2316_v0, 16  ;;  %v2043_v39 = vmul.f32 %v2011_v3, %v1979_v10  ;;  %v2042_v34 = vmul.f32 %v2010_v62, %v1978_v1 }
 0x281   : > { %v2201_v44 = vadd.f32 %v2129_v33, %v2041_v55  ;;  %v2200_v63 = vadd.f32 %v2127_v12, %v2040_v32  ;;  %v2718_v33 = vrot.slane %v6101_v25, 1  ;;  %v2013_v3 = vadd.f32 1.0, %v6071_v54 }
 0x282   : > { %v2395_v53 = vrot.slane %v2393_v49, 7 }
 0x283   : > { %vm2233_vm9 = vcmp.ge.f32.partialorder %v2201_v44, 0.0  ;;  %v2265_v13 = vmul.f32 0.2, %v2201_v44  ;;  %vm2232_vm10 = vcmp.ge.f32.partialorder %v2200_v63, 0.0  ;;  %v2264_v30 = vmul.f32 0.2, %v2200_v63 }
 0x284   : > { %v2775_v55 = vpop.permute.xlu1 %2774  ;;  %v2807_v16 = vpop.permute.xlu0 %2806  ;;  %v2398_v12 = vor.u32 %v2396_v57, %v2395_v53  ;;  %v6410_v32 = vsel %vm4985_vm2, %v2395_v53, 0  ;;  %v1981_v57 = vmul.f32 %v6386_v26, %v1945_v18 }
 0x285   : > { %v2297_v8 = vsel %vm2233_vm9, %v2201_v44, %v2265_v13  ;;  %v2875_v20 = vsel %vm1149_vm6, %v6027_v40, %v2775_v55  ;;  %v2296_v0 = vsel %vm2232_vm10, %v2200_v63, %v2264_v30  ;;  %v2925_v47 = vsel %vm1149_vm6, %v6311_v56, %v2807_v16 }
 0x286   : > { %3567 = vmatprep.mubr.bf16.mxu0 %v2875_v20  ;;  %v2317_v9 = vpack.c.bf16 %v2297_v8, %v2296_v0  ;;  %3422 = vmatprep.mubr.bf16.mxu1 %v2925_v47  ;;  %v6417_v36 = vsel %vm4985_vm2, 0, %v2398_v12  ;;  %v1944_v40 = vsub.f32 %v1908_v59, %v6371_v22  ;;  %v2626_v44 = vshll.u32 %v6410_v32, 16 }
 0x287   : > { %2822 = vrot.lane.b32.xlu1 %v6417_v36, %s4853_s19  ;;  %3423 = vmatmul.mubr.bf16.gmra.mrb[40].mxu1 %v2875_v20  ;;  %v2621_v49 = vshll.u32 %v6417_v36, 16  ;;  %v6428_v13 = vsel %vm859_vm3, %v2717_v23, %v2718_v33  ;;  %v2619_v30 = vshrl.u32 %v6417_v36, 16  ;;  %v1911_v23 = vld [vmem:[%s5888_s17 + $0xe8] sm:$0xff]  ;;  %v2045_v33 = vmul.f32 %v2013_v3, %v1981_v57  ;;  %v1910_v3 = vld [vmem:[%s5888_s17 + $0xe0] sm:$0xff] }
 0x288   : > { %v2133_v60 = vpop.permute.xlu1 %2132  ;;  %v2400_v2 = vshrl.u32 %v2317_v9, 16  ;;  %v2131_v53 = vpop.permute.xlu0 %2130  ;;  %v2403_v62 = vshll.u32 %v2317_v9, 16  ;;  %v2628_v8 = vrot.slane %v2626_v44, 1 }
 0x289   : > { %v2203_v63 = vadd.f32 %v2133_v60, %v2043_v39  ;;  %v2202_v10 = vadd.f32 %v2131_v53, %v2042_v34  ;;  %v2623_v1 = vrot.slane %v2621_v49, 1  ;;  %v2720_v60 = vrot.slane %v6147_v4, 1 }
 0x28a   : > { %v2402_v25 = vrot.slane %v2400_v2, 7  ;;  %v1980_v34 = vmul.f32 %v6386_v26, %v1944_v40  ;;  %v2012_v49 = vadd.f32 1.0, %v6058_v27  ;;  %v1947_v40 = vsub.f32 %v1911_v23, %v6371_v22 }
 0x28b   : > { %vm2235_vm11 = vcmp.ge.f32.partialorder %v2203_v63, 0.0  ;;  %v2267_v55 = vmul.f32 0.2, %v2203_v63  ;;  %vm2234_vm12 = vcmp.ge.f32.partialorder %v2202_v10, 0.0  ;;  %v2266_v59 = vmul.f32 0.2, %v2202_v10  ;;  %2840 = vrot.lane.b32.xlu1 %v6428_v13, %s4853_s19 }
 0x28c   : > { %v2624_v18 = vor.u32 %v2623_v1, %v2619_v30  ;;  %v2777_v16 = vpop.permute.xlu1 %2776  ;;  %v2405_v20 = vor.u32 %v2403_v62, %v2402_v25  ;;  %v6435_v12 = vsel %vm4985_vm2, %v2402_v25, 0  ;;  %v2721_v30 = vrot.slane %v6139_v48, 1 }
 0x28d   : > { %v2299_v54 = vsel %vm2235_vm11, %v2203_v63, %v2267_v55  ;;  %v2298_v0 = vsel %vm2234_vm12, %v2202_v10, %v2266_v59  ;;  %v2638_v2 = vshll.u32 %v6435_v12, 16  ;;  %v2044_v48 = vmul.f32 %v2012_v49, %v1980_v34 }
 0x28e   : > { %v6438_v47 = vsel %vm639_vm5, %v2624_v18, %v2628_v8  ;;  %v2318_v9 = vpack.c.bf16 %v2299_v54, %v2298_v0  ;;  %v6443_v39 = vsel %vm4985_vm2, 0, %v2405_v20  ;;  %v6461_v59 = vsel %vm859_vm3, %v2720_v60, %v2721_v30 }
 0x28f   : > { %2792 = vrot.lane.b32.xlu1 %v6438_v47, %s4853_s19  ;;  %2824 = vrot.lane.b32.xlu0 %v6443_v39, %s4853_s19  ;;  %v2633_v44 = vshll.u32 %v6443_v39, 16  ;;  %v2631_v62 = vshrl.u32 %v6443_v39, 16  ;;  %v6465_v18 = vsel %vm1149_vm6, %v6065_v28, %v2777_v16  ;;  %v2640_v54 = vrot.slane %v2638_v2, 1 }
 0x290   : > { %v2407_v63 = vshrl.u32 %v2318_v9, 16  ;;  %v2137_v53 = vpop.permute.xlu1 %2136  ;;  %v2809_v10 = vpop.permute.xlu0 %2808  ;;  %v2410_v55 = vshll.u32 %v2318_v9, 16  ;;  %v1946_v9 = vsub.f32 %v1910_v3, %v6371_v22  ;;  %v1983_v16 = vmul.f32 %v6386_v26, %v1947_v40 }
 0x291   : > { %v2205_v1 = vadd.f32 %v2137_v53, %v2045_v33  ;;  %v2929_v25 = vsel %vm1149_vm6, %v6338_v19, %v2809_v10  ;;  %v2635_v57 = vrot.slane %v2633_v44, 1  ;;  %v2015_v44 = vadd.f32 1.0, %v6117_v51  ;;  %v4785_v53 = vld [vmem:[%s7141_s5 + $0x118] sm:$0xff]  }
 0x292   : > { %v2409_v27 = vrot.slane %v2407_v63, 7  ;;  %3430 = vmatprep.mubr.bf16.mxu1 %v2929_v25  ;;  %v2723_v49 = vrot.slane %v6186_v6, 1  ;;  %v2724_v30 = vrot.slane %v6182_v38, 1  ;;  %4637 = vmatprep.subr.bf16.mxu1 %v4785_v53 }
 0x293   : > { %2842 = vrot.lane.b32.xlu0 %v6461_v59, %s4853_s19  ;;  %3431 = vmatmul.mubr.bf16.gmra.mrb[44].mxu1 %v6465_v18  ;;  %v2636_v8 = vor.u32 %v2635_v57, %v2631_v62  ;;  %v2269_v60 = vmul.f32 0.2, %v2205_v1  ;;  %vm2237_vm13 = vcmp.ge.f32.partialorder %v2205_v1, 0.0  ;;  %v2047_v38 = vmul.f32 %v2015_v44, %v1983_v16  ;;  %v1912_v44 = vld [vmem:[%s5888_s17 + $0xf0] sm:$0xff] }
 0x294   : > { %v2135_v20 = vpop.permute.xlu0 %2134  ;;  %v2412_v0 = vor.u32 %v2410_v55, %v2409_v27  ;;  %v6472_v23 = vsel %vm4985_vm2, %v2409_v27, 0  ;;  %v6497_v27 = vsel %vm859_vm3, %v2723_v49, %v2724_v30  ;;  %v1982_v55 = vmul.f32 %v6386_v26, %v1946_v9  ;;  %4638 = vmatpush3.bf16.msra.mxu1 %v4785_v53 }
 0x295   : > { %v2204_v33 = vadd.f32 %v2135_v20, %v2044_v48  ;;  %v6476_v28 = vsel %vm639_vm5, %v2636_v8, %v2640_v54  ;;  %v2650_v51 = vshll.u32 %v6472_v23, 16  ;;  %v2301_v40 = vsel %vm2237_vm13, %v2205_v1, %v2269_v60  ;;  %v1913_v48 = vld [vmem:[%s5888_s17 + $0xf8] sm:$0xff]  ;;  %s4856_s17 = smov [#allocation2]  }
 0x296   : > { %v6482_v34 = vsel %vm4985_vm2, 0, %v2412_v0  ;;  %v2014_v8 = vadd.f32 1.0, %v6108_v17  ;;  %s4792_s12 = sshll.u32 %s4856_s17, 4  ;;  %s4793_s12 = int_to_ptr.vmem [resolvable:$false] %s4792_s12 }
 0x297   : > { %vm2236_vm14 = vcmp.ge.f32.partialorder %v2204_v33, 0.0  ;;  %v2268_v2 = vmul.f32 0.2, %v2204_v33  ;;  %2794 = vrot.lane.b32.xlu0 %v6476_v28, %s4853_s19  ;;  %2826 = vrot.lane.b32.xlu1 %v6482_v34, %s4853_s19  ;;  %v2645_v63 = vshll.u32 %v6482_v34, 16  ;;  %v2643_v62 = vshrl.u32 %v6482_v34, 16  ;;  %s4794_s18 = scalar_lea.vmem %s4793_s12, 8192  ;;  %p4795_p0 = scmp.lt.s32.totalorder %s7085_s26, %s4793_s12 }
 0x298   : > { %v2779_v10 = vpop.permute.xlu1 %2778  ;;  %v2652_v54 = vrot.slane %v2650_v51, 1  ;;  %v2046_v51 = vmul.f32 %v2014_v8, %v1982_v55  ;;  %v2017_v55 = vadd.f32 1.0, %v6161_v37 }
 0x299   : > { %v2300_v25 = vsel %vm2236_vm14, %v2204_v33, %v2268_v2  ;;  %v2647_v57 = vrot.slane %v2645_v63, 1  ;;  %v1949_v2 = vsub.f32 %v1913_v48, %v6371_v22  ;;  %v6512_v16 = vsel %vm1149_vm6, %v6105_v35, %v2779_v10 }
 0x29a   : > { %v2319_v3 = vpack.c.bf16 %v2301_v40, %v2300_v25  ;;  %v1948_v35 = vsub.f32 %v1912_v44, %v6371_v22  ;;  %v2727_v22 = vrot.slane %v6236_v7, 1 }
 0x29b   : > { %2844 = vrot.lane.b32.xlu1 %v6497_v27, %s4853_s19  ;;  %v2648_v1 = vor.u32 %v2647_v57, %v2643_v62  ;;  %v1985_v57 = vmul.f32 %v6386_v26, %v1949_v2 }
 0x29c   : > { %v2414_v20 = vshrl.u32 %v2319_v3, 16  ;;  %v2141_v0 = vpop.permute.xlu1 %2140  ;;  %v2811_v60 = vpop.permute.xlu0 %2810  ;;  %v2417_v63 = vshll.u32 %v2319_v3, 16  ;;  %v2726_v3 = vrot.slane %v6240_v41, 1  ;;  %v1984_v2 = vmul.f32 %v6386_v26, %v1948_v35 }
 0x29d   : > { %v2207_v33 = vadd.f32 %v2141_v0, %v2047_v38  ;;  %v2933_v49 = vsel %vm1149_vm6, %v6428_v13, %v2811_v60  ;;  %v6507_v9 = vsel %vm639_vm5, %v2648_v1, %v2652_v54 }
 0x29e   : > { %v2416_v17 = vrot.slane %v2414_v20, 7  ;;  %3438 = vmatprep.mubr.bf16.mxu1 %v2933_v49  ;;  %v6537_v37 = vsel %vm859_vm3, %v2726_v3, %v2727_v22 }
 0x29f   : > { %2796 = vrot.lane.b32.xlu1 %v6507_v9, %s4853_s19  ;;  %3439 = vmatmul.mubr.bf16.gmra.mrb[48].mxu1 %v6512_v16  ;;  %v2271_v25 = vmul.f32 0.2, %v2207_v33  ;;  %vm2239_vm15 = vcmp.ge.f32.partialorder %v2207_v33, 0.0 }
 0x2a0   : > { %v2139_v53 = vpop.permute.xlu0 %2138  ;;  %v2419_v30 = vor.u32 %v2417_v63, %v2416_v17  ;;  %v6520_v40 = vsel %vm4985_vm2, %v2416_v17, 0  ;;  %v2049_v17 = vmul.f32 %v2017_v55, %v1985_v57 }
 0x2a1   : > { %v2206_v62 = vadd.f32 %v2139_v53, %v2046_v51  ;;  %v2662_v38 = vshll.u32 %v6520_v40, 16  ;;  %v2303_v54 = vsel %vm2239_vm15, %v2207_v33, %v2271_v25  ;;  %v2016_v51 = vadd.f32 1.0, %v6142_v52 }
 0x2a2   : > { %v6526_v10 = vsel %vm4985_vm2, 0, %v2419_v30 }
 0x2a3   : > { %vm2238_vm0 = vcmp.ge.f32.partialorder %v2206_v62, 0.0  ;;  %v2270_v48 = vmul.f32 0.2, %v2206_v62  ;;  %2828 = vrot.lane.b32.xlu0 %v6526_v10, %s4853_s19  ;;  %v2657_v8 = vshll.u32 %v6526_v10, 16  ;;  %v2655_v0 = vshrl.u32 %v6526_v10, 16 }
 0x2a4   : > { %v2781_v1 = vpop.permute.xlu1 %2780  ;;  %v2664_v44 = vrot.slane %v2662_v38, 1  ;;  %v2048_v52 = vmul.f32 %v2016_v51, %v1984_v2 }
 0x2a5   : > { %v2302_v20 = vsel %vm2238_vm0, %v2206_v62, %v2270_v48  ;;  %v2659_v60 = vrot.slane %v2657_v8, 1  ;;  %v6550_v57 = vsel %vm1149_vm6, %v6147_v4, %v2781_v1  ;;  %v2729_v4 = vrot.slane %v6272_v11, 1 }
 0x2a6   : > { %v2320_v49 = vpack.c.bf16 %v2303_v54, %v2302_v20 }
 0x2a7   : > { %2846 = vrot.lane.b32.xlu0 %v6537_v37, %s4853_s19  ;;  %v2660_v63 = vor.u32 %v2659_v60, %v2655_v0  ;;  %v2730_v0 = vrot.slane %v6268_v58, 1 }
 0x2a8   : > { %v2421_v7 = vshrl.u32 %v2320_v49, 16  ;;  %v2145_v33 = vpop.permute.xlu1 %2144  ;;  %v2813_v53 = vpop.permute.xlu0 %2812  ;;  %v2424_v26 = vshll.u32 %v2320_v49, 16 }
 0x2a9   : > { %v2209_v30 = vadd.f32 %v2145_v33, %v2049_v17  ;;  %v2937_v25 = vsel %vm1149_vm6, %v6461_v59, %v2813_v53  ;;  %v6546_v62 = vsel %vm639_vm5, %v2660_v63, %v2664_v44  ;;  %v6571_v44 = vsel %vm859_vm3, %v2729_v4, %v2730_v0 }
 0x2aa   : > { %v2423_v3 = vrot.slane %v2421_v7, 7  ;;  %3446 = vmatprep.mubr.bf16.mxu1 %v2937_v25 }
 0x2ab   : > { %2798 = vrot.lane.b32.xlu0 %v6546_v62, %s4853_s19  ;;  %3447 = vmatmul.mubr.bf16.gmra.mrb[52].mxu1 %v6550_v57  ;;  %v2273_v8 = vmul.f32 0.2, %v2209_v30  ;;  %vm2241_vm7 = vcmp.ge.f32.partialorder %v2209_v30, 0.0 }
 0x2ac   : > { %v2143_v35 = vpop.permute.xlu0 %2142  ;;  %v2426_v55 = vor.u32 %v2424_v26, %v2423_v3  ;;  %v6557_v48 = vsel %vm4985_vm2, %v2423_v3, 0 }
 0x2ad   : > { %v2208_v38 = vadd.f32 %v2143_v35, %v2048_v52  ;;  %v2674_v20 = vshll.u32 %v6557_v48, 16  ;;  %v2305_v60 = vsel %vm2241_vm7, %v2209_v30, %v2273_v8  ;;  %v2735_v35 = vrot.slane %v6327_v29, 1 }
 0x2ae   : > { %v6561_v22 = vsel %vm4985_vm2, 0, %v2426_v55  ;;  %v2736_v55 = vrot.slane %v6323_v5, 1  ;;  %v2742_v5 = vrot.slane %v6435_v12, 1 }
 0x2af   : > { %vm2240_vm8 = vcmp.ge.f32.partialorder %v2208_v38, 0.0  ;;  %v2272_v1 = vmul.f32 0.2, %v2208_v38  ;;  %2830 = vrot.lane.b32.xlu1 %v6561_v22, %s4853_s19  ;;  %v2669_v54 = vshll.u32 %v6561_v22, 16  ;;  %v2667_v2 = vshrl.u32 %v6561_v22, 16  ;;  %v2783_v51 = vpop.permute.xlu1 %2782 }
 0x2b0   : > { %v2676_v33 = vrot.slane %v2674_v20, 1  ;;  %v6582_v52 = vsel %vm1149_vm6, %v6186_v6, %v2783_v51  ;;  %v2741_v6 = vrot.slane %v6443_v39, 1  ;;  %v2738_v20 = vrot.slane %v6417_v36, 1 }
 0x2b1   : > { %v2304_v49 = vsel %vm2240_vm8, %v2208_v38, %v2272_v1  ;;  %v2671_v17 = vrot.slane %v2669_v54, 1  ;;  %v6590_v38 = vsel %vm859_vm3, %v2735_v35, %v2736_v55  ;;  %v2732_v1 = vrot.slane %v6302_v15, 1 }
 0x2b2   : > { %v2321_v63 = vpack.c.bf16 %v2305_v60, %v2304_v49  ;;  %v2733_v54 = vrot.slane %v6298_v46, 1  ;;  %v6606_v0 = vsel %vm859_vm3, %v2741_v6, %v2742_v5  ;;  %v2747_v49 = vrot.slane %v6526_v10, 1 }
 0x2b3   : > { %2848 = vrot.lane.b32.xlu1 %v6571_v44, %s4853_s19  ;;  %v2672_v7 = vor.u32 %v2671_v17, %v2667_v2  ;;  %v2739_v46 = vrot.slane %v6410_v32, 1  ;;  %v2744_v32 = vrot.slane %v6482_v34, 1 }
 0x2b4   : > { %v2428_v53 = vshrl.u32 %v2321_v63, 16  ;;  %v2815_v25 = vpop.permute.xlu0 %2814  ;;  %v2431_v26 = vshll.u32 %v2321_v63, 16  ;;  %v6609_v60 = vsel %vm859_vm3, %v2732_v1, %v2733_v54  ;;  %v2748_v63 = vrot.slane %v6520_v40, 1 }
 0x2b5   : > { %v2941_v58 = vsel %vm1149_vm6, %v6497_v27, %v2815_v25  ;;  %v6578_v30 = vsel %vm639_vm5, %v2672_v7, %v2676_v33  ;;  %v6622_v7 = vsel %vm859_vm3, %v2738_v20, %v2739_v46  ;;  %v2750_v25 = vrot.slane %v6561_v22, 1 }
 0x2b6   : > { %v2430_v3 = vrot.slane %v2428_v53, 7  ;;  %3454 = vmatprep.mubr.bf16.mxu1 %v2941_v58  ;;  %v6627_v53 = vsel %vm859_vm3, %v2747_v49, %v2748_v63 }
 0x2b7   : > { %2800 = vrot.lane.b32.xlu1 %v6578_v30, %s4853_s19  ;;  %3455 = vmatmul.mubr.bf16.gmra.mrb[56].mxu1 %v6582_v52 }
 0x2b8   : > { %v2433_v8 = vor.u32 %v2431_v26, %v2430_v3  ;;  %v2497_v33 = vsel %vm4985_vm2, %v2430_v3, 0  ;;  %v2751_v3 = vrot.slane %v6557_v48, 1  ;;  %v2745_v26 = vrot.slane %v6472_v23, 1 }
 0x2b9   : > { %v2761_v55 = vshll.u32 %v2497_v33, 16  ;;  %v2768_v20 = vrot.slane %v2497_v33, 1 }
 0x2ba   : > { %v6594_v4 = vsel %vm4985_vm2, 0, %v2433_v8  ;;  %v6643_v6 = vsel %vm859_vm3, %v2750_v25, %v2751_v3  ;;  %v6646_v1 = vsel %vm859_vm3, %v2744_v32, %v2745_v26 }
 0x2bb   : > { %2852 = vrot.lane.b32.xlu1 %v6590_v38, %s4853_s19  ;;  %2832 = vrot.lane.b32.xlu0 %v6594_v4, %s4853_s19  ;;  %v2756_v2 = vshll.u32 %v6594_v4, 16  ;;  %v2785_v12 = vpop.permute.xlu1 %2784  ;;  %v2754_v35 = vshrl.u32 %v6594_v4, 16  ;;  %v2763_v23 = vrot.slane %v2761_v55, 1 }
 0x2bc   : > { %v2890_v40 = vsel %vm1149_vm6, %v6240_v41, %v2785_v12 }
 0x2bd   : > { %v2758_v58 = vrot.slane %v2756_v2, 1 }
 0x2bf   : > { %2856 = vrot.lane.b32.xlu1 %v6606_v0, %s4853_s19  ;;  %2850 = vrot.lane.b32.xlu0 %v6609_v60, %s4853_s19  ;;  %v2759_v41 = vor.u32 %v2758_v58, %v2754_v35 }
 0x2c0   : > { %v2817_v17 = vpop.permute.xlu0 %2816 }
 0x2c1   : > { %v2945_v51 = vsel %vm1149_vm6, %v6537_v37, %v2817_v17  ;;  %v6654_v48 = vsel %vm639_vm5, %v2759_v41, %v2763_v23 }
 0x2c2   : > { %3462 = vmatprep.mubr.bf16.mxu1 %v2945_v51 }
 0x2c3   : > { %2860 = vrot.lane.b32.xlu1 %v6627_v53, %s4853_s19  ;;  %2854 = vrot.lane.b32.xlu0 %v6622_v7, %s4853_s19 }
 0x2c4   : > { %3463 = vmatmul.mubr.bf16.gmra.mrb[60].mxu1 %v2890_v40  ;;  %v2835_v14 = vpop.permute.xlu0 %2834 }
 0x2c5   : > { %v2981_v8 = vsel %vm1149_vm6, %v6020_v50, %v2835_v14  ;;  %v2767_v50 = vrot.slane %v6594_v4, 1 }
 0x2c6   : > { %3568 = vmatmul.mubr.bf16.vlgmr.msra.gmra.mrb[64].mxu0 %v2981_v8 }
 0x2c7   : > { %2862 = vrot.lane.b32.xlu1 %v6643_v6, %s4853_s19  ;;  %2858 = vrot.lane.b32.xlu0 %v6646_v1, %s4853_s19  ;;  %v6662_v2 = vsel %vm859_vm3, %v2767_v50, %v2768_v20 }
 0x2c8   : > { %3575 = vmatprep.mubr.bf16.mxu0 %v6465_v18  ;;  %v2787_v5 = vpop.permute.xlu0 %2786 }
 0x2c9   : > { %v2893_v18 = vsel %vm1149_vm6, %v6272_v11, %v2787_v5 }
 0x2cb   : > { %2866 = vrot.lane.b32.xlu0 %v6654_v48, %s4853_s19 }
 0x2cc   : > { %v2819_v54 = vpop.permute.xlu1 %2818 }
 0x2cd   : > { %v2949_v49 = vsel %vm1149_vm6, %v6571_v44, %v2819_v54 }
 0x2ce   : > { %3470 = vmatprep.mubr.bf16.mxu1 %v2949_v49 }
 0x2cf   : > { %2864 = vrot.lane.b32.xlu0 %v6662_v2, %s4853_s19  ;;  %3471 = vmatmul.mubr.bf16.gmra.mrb[64].mxu1 %v2893_v18  ;;  %s4788_s19 = scalar_lea.vmem %s7085_s26, 4096 }
 0x2d0   : > { %v2837_v46 = vpop.permute.xlu1 %2836  ;;  %p4789_p11 = scmp.ne.s32.totalorder %s7085_s26, %s4788_s19  ;;  %p4796_p1 = scmp.lt.s32.totalorder %s4794_s18, %s4788_s19 }
 0x2d1   : > { %v2985_v12 = vsel %vm1149_vm6, %v6051_v43, %v2837_v46 }
 0x2d2   : > { %3576 = vmatmul.mubr.bf16.gmra.mrb[68].mxu0 %v2985_v12  ;;  %p4790_p12 = pnand %p4789_p11, %p4942_p5  ;;  %p4797_p2 = por %p4796_p1, %p4795_p0 }
 0x2d3   : > { %3583 = vmatprep.mubr.bf16.mxu0 %v6512_v16 }
 0x2d4   : > { %v2789_v17 = vpop.permute.xlu1 %2788  ;;  %p4791_p13 = pneg %p4790_p12 }
 0x2d5   : > { %v2896_v11 = vsel %vm1149_vm6, %v6302_v15, %v2789_v17 }
 0x2d6   : > { %p4798_p3 = pnand %p4797_p2, %p4791_p13 }
 0x2d8   : > { %v2821_v63 = vpop.permute.xlu0 %2820 }
 0x2d9   : > { %v2953_v51 = vsel %vm1149_vm6, %v6609_v60, %v2821_v63 }
 0x2da   : > { %3478 = vmatprep.mubr.bf16.mxu1 %v2953_v51 }
 0x2db   : > { %3479 = vmatmul.mubr.bf16.gmra.mrb[68].mxu1 %v2896_v11 }
 0x2dc   : > { %v2839_v33 = vpop.permute.xlu0 %2838 }
 0x2dd   : > { %v2989_v25 = vsel %vm1149_vm6, %v6091_v42, %v2839_v33 }
 0x2de   : > { %3584 = vmatmul.mubr.bf16.gmra.mrb[72].mxu0 %v2989_v25 }
 0x2df   : > { %3591 = vmatprep.mubr.bf16.mxu0 %v6550_v57 }
 0x2e0   : > { %v2791_v43 = vpop.permute.xlu0 %2790 }
 0x2e1   : > { %v2899_v58 = vsel %vm1149_vm6, %v6327_v29, %v2791_v43 }
 0x2f9   : > { %v2823_v32 = vpop.permute.xlu1 %2822 }
 0x2fa   : > { %v2957_v16 = vsel %vm1149_vm6, %v6590_v38, %v2823_v32 }
 0x2fb   : > { %3486 = vmatprep.mubr.bf16.mxu1 %v2957_v16 }
 0x2fc   : > { %3487 = vmatmul.mubr.bf16.gmra.mrb[72].mxu1 %v2899_v58 }
 0x2fd   : > { %v2841_v14 = vpop.permute.xlu1 %2840 }
 0x2fe   : > { %v2993_v15 = vsel %vm1149_vm6, %v6129_v31, %v2841_v14 }
 0x2ff   : > { %3592 = vmatmul.mubr.bf16.gmra.mrb[76].mxu0 %v2993_v15 }
 0x300   : > { %3599 = vmatprep.mubr.bf16.mxu0 %v6582_v52 }
 0x301   : > { %v2825_v42 = vpop.permute.xlu0 %2824  ;;  %v2793_v3 = vpop.permute.xlu1 %2792 }
 0x302   : > { %v2961_v57 = vsel %vm1149_vm6, %v6622_v7, %v2825_v42  ;;  %v2902_v26 = vsel %vm1149_vm6, %v6417_v36, %v2793_v3 }
 0x303   : > { %3494 = vmatprep.mubr.bf16.mxu1 %v2961_v57 }
 0x304   : > { %3495 = vmatmul.mubr.bf16.gmra.mrb[76].mxu1 %v2902_v26 }
 0x305   : > { %v2843_v35 = vpop.permute.xlu0 %2842 }
 0x306   : > { %v2997_v29 = vsel %vm1149_vm6, %v6173_v45, %v2843_v35 }
 0x307   : > { %3600 = vmatmul.mubr.bf16.gmra.mrb[80].mxu0 %v2997_v29 }
 0x308   : > { %3607 = vmatprep.mubr.bf16.mxu0 %v2890_v40 }
 0x309   : > { %v2795_v31 = vpop.permute.xlu0 %2794  ;;  %v2827_v55 = vpop.permute.xlu1 %2826 }
 0x30a   : > { %v2965_v52 = vsel %vm1149_vm6, %v6606_v0, %v2827_v55  ;;  %v2905_v8 = vsel %vm1149_vm6, %v6443_v39, %v2795_v31 }
 0x30b   : > { %3502 = vmatprep.mubr.bf16.mxu1 %v2965_v52 }
 0x30c   : > { %3503 = vmatmul.mubr.bf16.gmra.mrb[80].mxu1 %v2905_v8 }
 0x30d   : > { %v2845_v41 = vpop.permute.xlu1 %2844 }
 0x30e   : > { %v3001_v36 = vsel %vm1149_vm6, %v6224_v61, %v2845_v41 }
 0x30f   : > { %3608 = vmatmul.mubr.bf16.gmra.mrb[84].mxu0 %v3001_v36 }
 0x310   : > { %3615 = vmatprep.mubr.bf16.mxu0 %v2893_v18 }
 0x311   : > { %v2797_v23 = vpop.permute.xlu1 %2796 }
 0x312   : > { %v2908_v50 = vsel %vm1149_vm6, %v6482_v34, %v2797_v23 }
 0x315   : > { %v2829_v45 = vpop.permute.xlu0 %2828 }
 0x316   : > { %v2969_v40 = vsel %vm1149_vm6, %v6646_v1, %v2829_v45  ;;  %v7165_v45 = vld [vmem:[#allocation5_spill] sm:$0xff] }
 0x317   : > { %3510 = vmatprep.mubr.bf16.mxu1 %v2969_v40 }
 0x318   : > { %3511 = vmatmul.mubr.bf16.gmra.mrb[84].mxu1 %v2908_v50 }
 0x319   : > { %v2847_v5 = vpop.permute.xlu0 %2846 }
 0x31a   : > { %v3005_v39 = vsel %vm1149_vm6, %v6259_v24, %v2847_v5 }
 0x31b   : > { %3616 = vmatmul.mubr.bf16.gmra.mrb[88].mxu0 %v3005_v39 }
 0x31c   : > { %3623 = vmatprep.mubr.bf16.mxu0 %v2896_v11  ;;  %v7162_v11 = vld [vmem:[#allocation8_spill] sm:$0xff] }
 0x31d   : > { %v2799_v54 = vpop.permute.xlu0 %2798 }
 0x31e   : > { %v2911_v49 = vsel %vm1149_vm6, %v6526_v10, %v2799_v54  ;;  %v7161_v10 = vld [vmem:[#allocation6_spill] sm:$0xff] }
 0x321   : > { %v2831_v61 = vpop.permute.xlu1 %2830 }
 0x322   : > { %v2973_v20 = vsel %vm1149_vm6, %v6627_v53, %v2831_v61 }
 0x323   : > { %3518 = vmatprep.mubr.bf16.mxu1 %v2973_v20 }
 0x324   : > { %3519 = vmatmul.mubr.bf16.gmra.mrb[88].mxu1 %v2911_v49 }
 0x325   : > { %v2849_v18 = vpop.permute.xlu1 %2848 }
 0x326   : > { %v3009_v34 = vsel %vm1149_vm6, %v6292_v21, %v2849_v18 }
 0x327   : > { %3624 = vmatmul.mubr.bf16.gmra.mrb[92].mxu0 %v3009_v34 }
 0x328   : > { %3631 = vmatprep.mubr.bf16.mxu0 %v2899_v58 }
 0x329   : > { %v2801_v46 = vpop.permute.xlu1 %2800 }
 0x32a   : > { %v2914_v17 = vsel %vm1149_vm6, %v6561_v22, %v2801_v46 }
 0x32d   : > { %v2833_v24 = vpop.permute.xlu0 %2832  ;;  %v2853_v21 = vpop.permute.xlu1 %2852 }
 0x32e   : > { %v2977_v12 = vsel %vm1149_vm6, %v6643_v6, %v2833_v24  ;;  %v3017_v22 = vsel %vm1149_vm6, %v7162_v11, %v2853_v21 }
 0x32f   : > { %3526 = vmatprep.mubr.bf16.mxu1 %v2977_v12 }
 0x330   : > { %3527 = vmatmul.mubr.bf16.gmra.mrb[92].mxu1 %v2914_v17 }
 0x331   : > { %v2851_v63 = vpop.permute.xlu0 %2850  ;;  %4639 = vmatprep.mubr.msk.bf16.mxu1 %vm1149_vm6, %v6311_v56 }
 0x332   : > { %v3013_v51 = vsel %vm1149_vm6, %v7161_v10, %v2851_v63 }
 0x333   : > { %3632 = vmatmul.mubr.bf16.gmra.mrb[96].mxu0 %v3013_v51  ;;  %v6797_v51 = vld [vmem:[%s7142_s6] ss:$0 sm:$0xff] }
 0x334   : > { %3639 = vmatprep.mubr.bf16.mxu0 %v2902_v26 }
 0x335   : > { %v2855_v33 = vpop.permute.xlu0 %2854 }
 0x336   : > { %v3021_v56 = vsel %vm1149_vm6, %v6438_v47, %v2855_v33 }
 0x338   : > { %4640 = vmatmul.mubr.msk.bf16.vlgmr.msra.gmra.mrb[96].mxu1 %vm1149_vm6, %v6338_v19  ;;  %v2857_v19 = vpop.permute.xlu1 %2856 }
 0x339   : > { %4643 = vmatprep.mubr.msk.bf16.mxu1 %vm1149_vm6, %v6428_v13  ;;  %v3025_v13 = vsel %vm1149_vm6, %v6476_v28, %v2857_v19  ;;  %v2859_v16 = vpop.permute.xlu0 %2858 }
 0x33a   : > { %v3029_v28 = vsel %vm1149_vm6, %v6507_v9, %v2859_v16 }
 0x33b   : > { %3640 = vmatmul.mubr.bf16.gmra.mrb[100].mxu0 %v3017_v22 }
 0x33c   : > { %3647 = vmatprep.mubr.bf16.mxu0 %v2905_v8  ;;  %v2861_v3 = vpop.permute.xlu1 %2860 }
 0x33d   : > { %v2867_v57 = vpop.permute.xlu0 %2866  ;;  %v3033_v9 = vsel %vm1149_vm6, %v6546_v62, %v2861_v3 }
 0x33e   : > { %v3044_v26 = vsel %vm1149_vm6, %v6594_v4, %v2867_v57 }
 0x340   : > { %4644 = vmatmul.mubr.msk.bf16.gmra.mrb[100].mxu1 %vm1149_vm6, %v6461_v59 }
 0x341   : > { %4647 = vmatprep.mubr.msk.bf16.mxu1 %vm1149_vm6, %v6497_v27  ;;  %v2865_v8 = vpop.permute.xlu0 %2864 }
 0x343   : > { %3648 = vmatmul.mubr.bf16.gmra.mrb[104].mxu0 %v3021_v56 }
 0x344   : > { %3655 = vmatprep.mubr.bf16.mxu0 %v2908_v50 }
 0x348   : > { %4648 = vmatmul.mubr.msk.bf16.gmra.mrb[104].mxu1 %vm1149_vm6, %v6537_v37 }
 0x349   : > { %4651 = vmatprep.mubr.msk.bf16.mxu1 %vm1149_vm6, %v6571_v44 }
 0x34a   : > { %v4367_v25 = vpop.f32.mrb[32].mxu1 }
 0x34b   : > { %3656 = vmatmul.mubr.bf16.gmra.mrb[108].mxu0 %v3025_v13  ;;  %v4368_v59 = vpop.f32.mrb[33].mxu1 }
 0x34c   : > { %3663 = vmatprep.mubr.bf16.mxu0 %v2911_v49  ;;  %v6735_v27 = vadd.f32 %v4368_v59, %v4367_v25  ;;  %v4370_v43 = vpop.f32.mrb[34].mxu1 }
 0x34d   : > { %v4371_v47 = vpop.f32.mrb[35].mxu1 }
 0x34e   : > { %v6737_v32 = vadd.f32 %v4371_v47, %v4370_v43  ;;  %v3409_v13 = vadd.f32 %v6735_v27, %v6797_v51 }
 0x350   : > { %4652 = vmatmul.mubr.msk.bf16.gmra.mrb[108].mxu1 %vm1149_vm6, %v6609_v60  ;;  %v3412_v16 = vadd.f32 %v6737_v32, %v6797_v51 }
 0x351   : > { %4655 = vmatprep.mubr.msk.bf16.mxu1 %vm1149_vm6, %v6590_v38 }
 0x352   : > { %v4373_v37 = vpop.f32.mrb[36].mxu1 }
 0x353   : > { %v4374_v44 = vpop.f32.mrb[37].mxu1  ;;  %3664 = vmatmul.mubr.bf16.gmra.mrb[112].mxu0 %v3029_v28 }
 0x354   : > { %v6745_v58 = vadd.f32 %v4374_v44, %v4373_v37  ;;  %v4376_v14 = vpop.f32.mrb[38].mxu1  ;;  %3671 = vmatprep.mubr.bf16.mxu0 %v2914_v17 }
 0x355   : > { %v4377_v15 = vpop.f32.mrb[39].mxu1 }
 0x356   : > { %v6747_v42 = vadd.f32 %v4377_v15, %v4376_v14 }
 0x358   : > { %4656 = vmatmul.mubr.msk.bf16.gmra.mrb[112].mxu1 %vm1149_vm6, %v6622_v7  ;;  %v2863_v7 = vpop.permute.xlu1 %2862 }
 0x359   : > { %4659 = vmatprep.mubr.msk.bf16.mxu1 %vm1149_vm6, %v6606_v0  ;;  %v3037_v62 = vsel %vm1149_vm6, %v6578_v30, %v2863_v7  ;;  %v7163_v0 = vld [vmem:[#allocation7_spill] sm:$0xff]  ;;  %v3041_v30 = vsel %vm1149_vm6, %v6654_v48, %v2865_v8  ;;  %v3420_v7 = vadd.f32 %v6747_v42, %v6797_v51 }
 0x35a   : > { %v4379_v38 = vpop.f32.mrb[40].mxu1 }
 0x35b   : > { %v4380_v60 = vpop.f32.mrb[41].mxu1  ;;  %3672 = vmatmul.mubr.bf16.gmra.mrb[116].mxu0 %v3033_v9 }
 0x35c   : > { %v6757_v35 = vadd.f32 %v4380_v60, %v4379_v38  ;;  %v4382_v29 = vpop.f32.mrb[42].mxu1  ;;  %3679 = vmatprep.mubr.bf16.mxu0 %v3044_v26  ;;  %v3417_v26 = vadd.f32 %v6745_v58, %v6797_v51 }
 0x35d   : > { %v4383_v31 = vpop.f32.mrb[43].mxu1 }
 0x35e   : > { %v6759_v55 = vadd.f32 %v4383_v31, %v4382_v29 }
 0x360   : > { %4660 = vmatmul.mubr.msk.bf16.gmra.mrb[116].mxu1 %vm1149_vm6, %v6646_v1 }
 0x361   : > { %4663 = vmatprep.mubr.msk.bf16.mxu1 %vm1149_vm6, %v6627_v53 }
 0x363   : > { %3680 = vmatmul.mubr.bf16.gmra.mrb[120].mxu0 %v3037_v62 }
 0x364   : > { %4195 = vmatprep.mubr.msk.bf16.mxu0 %vm6358_vm1, %v7163_v0 }
 0x366   : > { %v4385_v52 = vpop.f32.mrb[44].mxu1 }
 0x367   : > { %v4386_v41 = vpop.f32.mrb[45].mxu1 }
 0x368   : > { %v6770_v36 = vadd.f32 %v4386_v41, %v4385_v52  ;;  %v4388_v23 = vpop.f32.mrb[46].mxu1  ;;  %4664 = vmatmul.mubr.msk.bf16.gmra.mrb[120].mxu1 %vm1149_vm6, %v6643_v6 }
 0x369   : > { %v4389_v1 = vpop.f32.mrb[47].mxu1  ;;  %4667 = vmatprep.mubr.msk.bf16.mxu1 %vm1149_vm6, %v6662_v2 }
 0x36a   : > { %v6776_v53 = vadd.f32 %v4389_v1, %v4388_v23 }
 0x36b   : > { %3688 = vmatmul.mubr.bf16.gmra.mrb[124].mxu0 %v3041_v30 }
 0x370   : > { %4668 = vmatmul.mubr.msk.bf16.gmra.mrb[124].mxu1 %vm1149_vm6, %v7165_v45 }
 0x372   : > { %v4391_v40 = vpop.f32.mrb[48].mxu1 }
 0x373   : > { %v4392_v50 = vpop.f32.mrb[49].mxu1 }
 0x374   : > { %v6782_v5 = vadd.f32 %v4392_v50, %v4391_v40  ;;  %v4394_v39 = vpop.f32.mrb[50].mxu1  ;;  %v3425_v40 = vadd.f32 %v6757_v35, %v6797_v51 }
 0x375   : > { %v4395_v54 = vpop.f32.mrb[51].mxu1 }
 0x376   : > { %v6784_v6 = vadd.f32 %v4395_v54, %v4394_v39  ;;  %v3428_v54 = vadd.f32 %v6759_v55, %v6797_v51 }
 0x37e   : > { %v4397_v61 = vpop.f32.mrb[52].mxu1 }
 0x37f   : > { %v4398_v20 = vpop.f32.mrb[53].mxu1 }
 0x380   : > { %v6786_v2 = vadd.f32 %v4398_v20, %v4397_v61  ;;  %v4400_v49 = vpop.f32.mrb[54].mxu1 }
 0x381   : > { %v4401_v18 = vpop.f32.mrb[55].mxu1 }
 0x382   : > { %v6788_v34 = vadd.f32 %v4401_v18, %v4400_v49 }
 0x38a   : > { %v4403_v48 = vpop.f32.mrb[56].mxu1 }
 0x38b   : > { %v4404_v46 = vpop.f32.mrb[57].mxu1 }
 0x38c   : > { %v6790_v24 = vadd.f32 %v4404_v46, %v4403_v48  ;;  %v4406_v12 = vpop.f32.mrb[58].mxu1 }
 0x38d   : > { %v4407_v17 = vpop.f32.mrb[59].mxu1 }
 0x38e   : > { %v6792_v63 = vadd.f32 %v4407_v17, %v4406_v12 }
 0x397   : > { %v4409_v10 = vpop.f32.mrb[60].mxu1 }
 0x398   : > { %v4410_v21 = vpop.f32.mrb[61].mxu1 }
 0x399   : > { %v6799_v11 = vadd.f32 %v4410_v21, %v4409_v10  ;;  %v4412_v22 = vpop.f32.mrb[62].mxu1  ;;  %v4479_v33 = vpop.f32.mrb[64].mxu0 }
 0x39a   : > { %v4413_v56 = vpop.f32.mrb[63].mxu1  ;;  %v4480_v19 = vpop.f32.mrb[65].mxu0 }
 0x39b   : > { %v6803_v25 = vadd.f32 %v4413_v56, %v4412_v22  ;;  %v4481_v59 = vadd.f32 %v4480_v19, %v4479_v33  ;;  %v4482_v43 = vpop.f32.mrb[66].mxu0  ;;  %v3433_v22 = vadd.f32 %v6770_v36, %v6797_v51  ;;  %v3436_v19 = vadd.f32 %v6776_v53, %v6797_v51 }
 0x39c   : > { %v4483_v47 = vpop.f32.mrb[67].mxu0 }
 0x39d   : > { %v4484_v37 = vadd.f32 %v4483_v47, %v4482_v43  ;;  %v6807_v28 = vadd.f32 %v4481_v59, %v3409_v13 }
 0x39f   : > { %v6809_v44 = vadd.f32 %v4484_v37, %v3412_v16 }
 0x3a2   : > { %v4415_v14 = vpop.f32.mrb[64].mxu1 }
 0x3a3   : > { %v4416_v15 = vpop.f32.mrb[65].mxu1 }
 0x3a4   : > { %v6811_v3 = vadd.f32 %v4416_v15, %v4415_v14  ;;  %v4418_v57 = vpop.f32.mrb[66].mxu1 }
 0x3a5   : > { %v4419_v38 = vpop.f32.mrb[67].mxu1  ;;  %v4485_v27 = vpop.f32.mrb[68].mxu0 }
 0x3a6   : > { %v6813_v9 = vadd.f32 %v4419_v38, %v4418_v57  ;;  %v4486_v60 = vpop.f32.mrb[69].mxu0 }
 0x3a7   : > { %v4487_v29 = vadd.f32 %v4486_v60, %v4485_v27  ;;  %v4488_v32 = vpop.f32.mrb[70].mxu0  ;;  %v3441_v27 = vadd.f32 %v6782_v5, %v6797_v51 }
 0x3a8   : > { %v4489_v31 = vpop.f32.mrb[71].mxu0 }
 0x3a9   : > { %v4490_v62 = vadd.f32 %v4489_v31, %v4488_v32  ;;  %v6819_v0 = vadd.f32 %v4487_v29, %v3417_v26  ;;  %v3444_v29 = vadd.f32 %v6784_v6, %v6797_v51 }
 0x3ab   : > { %v6821_v4 = vadd.f32 %v4490_v62, %v3420_v7 }
 0x3ae   : > { %v4421_v52 = vpop.f32.mrb[68].mxu1 }
 0x3af   : > { %v4422_v8 = vpop.f32.mrb[69].mxu1 }
 0x3b0   : > { %v6823_v41 = vadd.f32 %v4422_v8, %v4421_v52  ;;  %v4424_v23 = vpop.f32.mrb[70].mxu1 }
 0x3b1   : > { %v4425_v1 = vpop.f32.mrb[71].mxu1  ;;  %v4491_v30 = vpop.f32.mrb[72].mxu0 }
 0x3b2   : > { %v6825_v45 = vadd.f32 %v4425_v1, %v4424_v23  ;;  %v4492_v58 = vpop.f32.mrb[73].mxu0 }
 0x3b3   : > { %v4493_v50 = vadd.f32 %v4492_v58, %v4491_v30  ;;  %v4494_v42 = vpop.f32.mrb[74].mxu0 }
 0x3b4   : > { %v4495_v39 = vpop.f32.mrb[75].mxu0 }
 0x3b5   : > { %v4496_v61 = vadd.f32 %v4495_v39, %v4494_v42  ;;  %v6831_v20 = vadd.f32 %v4493_v50, %v3425_v40  ;;  %v3449_v40 = vadd.f32 %v6786_v2, %v6797_v51  ;;  %v3452_v39 = vadd.f32 %v6788_v34, %v6797_v51 }
 0x3b7   : > { %v6833_v49 = vadd.f32 %v4496_v61, %v3428_v54 }
 0x3cf   : > { %v4427_v18 = vpop.f32.mrb[72].mxu1 }
 0x3d0   : > { %v4428_v48 = vpop.f32.mrb[73].mxu1 }
 0x3d1   : > { %v6835_v46 = vadd.f32 %v4428_v48, %v4427_v18  ;;  %v4430_v12 = vpop.f32.mrb[74].mxu1 }
 0x3d2   : > { %v4431_v17 = vpop.f32.mrb[75].mxu1  ;;  %v4497_v10 = vpop.f32.mrb[76].mxu0 }
 0x3d3   : > { %v6837_v21 = vadd.f32 %v4431_v17, %v4430_v12  ;;  %v4498_v35 = vpop.f32.mrb[77].mxu0 }
 0x3d4   : > { %v4499_v33 = vadd.f32 %v4498_v35, %v4497_v10  ;;  %v4500_v55 = vpop.f32.mrb[78].mxu0 }
 0x3d5   : > { %v4501_v56 = vpop.f32.mrb[79].mxu0 }
 0x3d6   : > { %v4502_v13 = vadd.f32 %v4501_v56, %v4500_v55  ;;  %v6843_v59 = vadd.f32 %v4499_v33, %v3433_v22  ;;  %v3457_v55 = vadd.f32 %v6790_v24, %v6797_v51 }
 0x3d7   : > { %v4433_v43 = vpop.f32.mrb[76].mxu1 }
 0x3d8   : > { %v4434_v47 = vpop.f32.mrb[77].mxu1  ;;  %v6845_v16 = vadd.f32 %v4502_v13, %v3436_v19  ;;  %v3460_v13 = vadd.f32 %v6792_v63, %v6797_v51 }
 0x3d9   : > { %v6847_v37 = vadd.f32 %v4434_v47, %v4433_v43  ;;  %v4436_v14 = vpop.f32.mrb[78].mxu1 }
 0x3da   : > { %v4437_v15 = vpop.f32.mrb[79].mxu1  ;;  %v4503_v57 = vpop.f32.mrb[80].mxu0 }
 0x3db   : > { %v6849_v38 = vadd.f32 %v4437_v15, %v4436_v14  ;;  %v4504_v36 = vpop.f32.mrb[81].mxu0 }
 0x3dc   : > { %v4505_v60 = vadd.f32 %v4504_v36, %v4503_v57  ;;  %v4506_v53 = vpop.f32.mrb[82].mxu0 }
 0x3dd   : > { %v4507_v26 = vpop.f32.mrb[83].mxu0 }
 0x3de   : > { %v4508_v32 = vadd.f32 %v4507_v26, %v4506_v53  ;;  %v6855_v31 = vadd.f32 %v4505_v60, %v3441_v27 }
 0x3df   : > { %v4439_v7 = vpop.f32.mrb[80].mxu1 }
 0x3e0   : > { %v4440_v62 = vpop.f32.mrb[81].mxu1  ;;  %v6857_v52 = vadd.f32 %v4508_v32, %v3444_v29  ;;  %v3465_v29 = vadd.f32 %v6799_v11, %v6797_v51 }
 0x3e1   : > { %v6859_v8 = vadd.f32 %v4440_v62, %v4439_v7  ;;  %v4442_v23 = vpop.f32.mrb[82].mxu1  ;;  %v3468_v62 = vadd.f32 %v6803_v25, %v6797_v51  ;;  %v3473_v25 = vadd.f32 %v6811_v3, %v6797_v51 }
 0x3e2   : > { %v4443_v1 = vpop.f32.mrb[83].mxu1  ;;  %v4509_v30 = vpop.f32.mrb[84].mxu0 }
 0x3e3   : > { %v6861_v58 = vadd.f32 %v4443_v1, %v4442_v23  ;;  %v4510_v5 = vpop.f32.mrb[85].mxu0 }
 0x3e4   : > { %v4511_v50 = vadd.f32 %v4510_v5, %v4509_v30  ;;  %v4512_v6 = vpop.f32.mrb[86].mxu0 }
 0x3e5   : > { %v4513_v42 = vpop.f32.mrb[87].mxu0 }
 0x3e6   : > { %v4514_v54 = vadd.f32 %v4513_v42, %v4512_v6  ;;  %v6867_v61 = vadd.f32 %v4511_v50, %v3449_v40 }
 0x3e8   : > { %v6869_v18 = vadd.f32 %v4514_v54, %v3452_v39 }
 0x3eb   : > { %v4445_v48 = vpop.f32.mrb[84].mxu1 }
 0x3ec   : > { %v4446_v12 = vpop.f32.mrb[85].mxu1 }
 0x3ed   : > { %v6871_v17 = vadd.f32 %v4446_v12, %v4445_v48  ;;  %v4448_v10 = vpop.f32.mrb[86].mxu1 }
 0x3ee   : > { %v4449_v35 = vpop.f32.mrb[87].mxu1  ;;  %v4515_v22 = vpop.f32.mrb[88].mxu0 }
 0x3ef   : > { %v6873_v33 = vadd.f32 %v4449_v35, %v4448_v10  ;;  %v4516_v2 = vpop.f32.mrb[89].mxu0  ;;  %v3476_v35 = vadd.f32 %v6813_v9, %v6797_v51 }
 0x3f0   : > { %v4517_v56 = vadd.f32 %v4516_v2, %v4515_v22  ;;  %v4518_v34 = vpop.f32.mrb[90].mxu0 }
 0x3f1   : > { %v4519_v19 = vpop.f32.mrb[91].mxu0 }
 0x3f2   : > { %v4520_v43 = vadd.f32 %v4519_v19, %v4518_v34  ;;  %v6879_v47 = vadd.f32 %v4517_v56, %v3457_v55  ;;  %v3859_v55 = vld [vmem:[%s6906_s22 + $0x10] sm:$0xff]  ;;  %v3857_v19 = vld [vmem:[%s6906_s22] sm:$0xff] }
 0x3f4   : > { %v6881_v14 = vadd.f32 %v4520_v43, %v3460_v13 }
 0x3f7   : > { %v4451_v15 = vpop.f32.mrb[88].mxu1 }
 0x3f8   : > { %v4452_v57 = vpop.f32.mrb[89].mxu1 }
 0x3f9   : > { %v6883_v36 = vadd.f32 %v4452_v57, %v4451_v15  ;;  %v4454_v27 = vpop.f32.mrb[90].mxu1  ;;  %v3860_v57 = vld [vmem:[%s6906_s22 + $0x18] sm:$0xff] }
 0x3fa   : > { %v4455_v60 = vpop.f32.mrb[91].mxu1  ;;  %v4521_v53 = vpop.f32.mrb[92].mxu0 }
 0x3fb   : > { %v6885_v26 = vadd.f32 %v4455_v60, %v4454_v27  ;;  %v4522_v24 = vpop.f32.mrb[93].mxu0 }
 0x3fc   : > { %v4523_v63 = vadd.f32 %v4522_v24, %v4521_v53  ;;  %v4524_v32 = vpop.f32.mrb[94].mxu0  ;;  %v3858_v24 = vld [vmem:[%s6906_s22 + $0x8] sm:$0xff] }
 0x3fd   : > { %v4525_v7 = vpop.f32.mrb[95].mxu0 }
 0x3fe   : > { %v4526_v23 = vadd.f32 %v4525_v7, %v4524_v32  ;;  %v6891_v1 = vadd.f32 %v4523_v63, %v3465_v29 }
 0x400   : > { %v6893_v30 = vadd.f32 %v4526_v23, %v3468_v62 }
 0x403   : > { %v4457_v5 = vpop.f32.mrb[92].mxu1 }
 0x404   : > { %v4458_v40 = vpop.f32.mrb[93].mxu1 }
 0x405   : > { %v6895_v50 = vadd.f32 %v4458_v40, %v4457_v5  ;;  %v4460_v6 = vpop.f32.mrb[94].mxu1 }
 0x406   : > { %v4461_v11 = vpop.f32.mrb[95].mxu1  ;;  %v4527_v42 = vpop.f32.mrb[96].mxu0 }
 0x407   : > { %v6897_v39 = vadd.f32 %v4461_v11, %v4460_v6  ;;  %v4528_v54 = vpop.f32.mrb[97].mxu0  ;;  %v3863_v6 = vld [vmem:[%s6906_s22 + $0x30] sm:$0xff] }
 0x408   : > { %v4529_v48 = vadd.f32 %v4528_v54, %v4527_v42  ;;  %v4530_v12 = vpop.f32.mrb[98].mxu0  ;;  %v3861_v54 = vld [vmem:[%s6906_s22 + $0x20] sm:$0xff] }
 0x409   : > { %v4531_v10 = vpop.f32.mrb[99].mxu0 }
 0x40a   : > { %v4532_v22 = vadd.f32 %v4531_v10, %v4530_v12  ;;  %v6912_v2 = vadd.f32 %v4529_v48, %v3473_v25  ;;  %v3864_v12 = vld [vmem:[%s6906_s22 + $0x38] sm:$0xff] }
 0x40b   : > { %v4641_v3 = vpop.f32.mrb[96].mxu1 }
 0x40c   : > { %v3739_v56 = vadd.f32 %v4641_v3, %v6819_v0  ;;  %v3730_v34 = vpop.f32.mrb[97].mxu1  ;;  %v6917_v13 = vadd.f32 %v4532_v22, %v3476_v35  ;;  %v3481_v0 = vadd.f32 %v6823_v41, %v6797_v51  ;;  %v3484_v41 = vadd.f32 %v6825_v45, %v6797_v51 }
 0x40d   : > { %v3731_v43 = vadd.f32 %v3730_v34, %v6807_v28  ;;  %v4642_v15 = vpop.f32.mrb[98].mxu1 }
 0x40e   : > { %v3891_v27 = vadd.f32 %v3859_v55, %v3739_v56  ;;  %v3742_v9 = vadd.f32 %v4642_v15, %v6821_v4  ;;  %v4533_v60 = vpop.f32.mrb[100].mxu0  ;;  %v3733_v53 = vpop.f32.mrb[99].mxu1  ;;  %v3862_v55 = vld [vmem:[%s6906_s22 + $0x28] sm:$0xff] }
 0x40f   : > { %v3889_v29 = vadd.f32 %v3857_v19, %v3731_v43  ;;  %v3734_v63 = vadd.f32 %v3733_v53, %v6809_v44  ;;  %v4534_v32 = vpop.f32.mrb[101].mxu0  ;;  %v3489_v19 = vadd.f32 %v6835_v46, %v6797_v51 }
 0x410   : > { %3923 = vst.msk [vmem:[%s6926_s24 + $0x10] sm:$0xff] %vm1116_vm4, %v3891_v27  ;;  %v3892_v28 = vadd.f32 %v3860_v57, %v3742_v9  ;;  %v4535_v4 = vadd.f32 %v4534_v32, %v4533_v60  ;;  %v4536_v7 = vpop.f32.mrb[102].mxu0  ;;  %v3492_v27 = vadd.f32 %v6837_v21, %v6797_v51  ;;  %v3867_v60 = vld [vmem:[%s6906_s22 + $0x50] sm:$0xff] }
 0x411   : > { %3921 = vst.msk [vmem:[%s6926_s24] sm:$0xff] %vm1116_vm4, %v3889_v29  ;;  %v3890_v44 = vadd.f32 %v3858_v24, %v3734_v63  ;;  %v4537_v62 = vpop.f32.mrb[103].mxu0  ;;  %v3865_v29 = vld [vmem:[%s6906_s22 + $0x40] sm:$0xff] }
 0x412   : > { %3924 = vst.msk [vmem:[%s6926_s24 + $0x18] sm:$0xff] %vm1116_vm4, %v3892_v28  ;;  %v4538_v23 = vadd.f32 %v4537_v62, %v4536_v7  ;;  %v6936_v5 = vadd.f32 %v4535_v4, %v3481_v0  ;;  %v3868_v0 = vld [vmem:[%s6906_s22 + $0x58] sm:$0xff]  ;;  %v3866_v62 = vld [vmem:[%s6906_s22 + $0x48] sm:$0xff] }
 0x413   : > { %3922 = vst.msk [vmem:[%s6926_s24 + $0x8] sm:$0xff] %vm1116_vm4, %v3890_v44  ;;  %v4645_v40 = vpop.f32.mrb[100].mxu1 }
 0x414   : > { %v3755_v11 = vadd.f32 %v4645_v40, %v6843_v59  ;;  %v3746_v42 = vpop.f32.mrb[101].mxu1  ;;  %v6943_v25 = vadd.f32 %v4538_v23, %v3484_v41  ;;  %v3497_v40 = vadd.f32 %v6847_v37, %v6797_v51 }
 0x415   : > { %v3747_v48 = vadd.f32 %v3746_v42, %v6831_v20  ;;  %v4646_v45 = vpop.f32.mrb[102].mxu1 }
 0x416   : > { %v3895_v10 = vadd.f32 %v3863_v6, %v3755_v11  ;;  %v3758_v35 = vadd.f32 %v4646_v45, %v6845_v16  ;;  %v4539_v22 = vpop.f32.mrb[104].mxu0  ;;  %v3749_v3 = vpop.f32.mrb[103].mxu1  ;;  %v3871_v45 = vld [vmem:[%s6906_s22 + $0x70] sm:$0xff] }
 0x417   : > { %v3893_v56 = vadd.f32 %v3861_v54, %v3747_v48  ;;  %v3750_v59 = vadd.f32 %v3749_v3, %v6833_v49  ;;  %v4540_v34 = vpop.f32.mrb[105].mxu0  ;;  %v3500_v54 = vadd.f32 %v6849_v38, %v6797_v51 }
 0x418   : > { %3927 = vst.msk [vmem:[%s6926_s24 + $0x30] sm:$0xff] %vm1116_vm4, %v3895_v10  ;;  %v3896_v20 = vadd.f32 %v3864_v12, %v3758_v35  ;;  %v4541_v43 = vadd.f32 %v4540_v34, %v4539_v22  ;;  %v4542_v15 = vpop.f32.mrb[106].mxu0  ;;  %v3869_v35 = vld [vmem:[%s6906_s22 + $0x60] sm:$0xff] }
 0x419   : > { %3925 = vst.msk [vmem:[%s6926_s24 + $0x20] sm:$0xff] %vm1116_vm4, %v3893_v56  ;;  %v3894_v16 = vadd.f32 %v3862_v55, %v3750_v59  ;;  %v4543_v57 = vpop.f32.mrb[107].mxu0  ;;  %v3872_v55 = vld [vmem:[%s6906_s22 + $0x78] sm:$0xff] }
 0x41a   : > { %3928 = vst.msk [vmem:[%s6926_s24 + $0x38] sm:$0xff] %vm1116_vm4, %v3896_v20  ;;  %v4544_v49 = vadd.f32 %v4543_v57, %v4542_v15  ;;  %v6960_v9 = vadd.f32 %v4541_v43, %v3489_v19  ;;  %v3870_v20 = vld [vmem:[%s6906_s22 + $0x68] sm:$0xff] }
 0x41b   : > { %3926 = vst.msk [vmem:[%s6926_s24 + $0x28] sm:$0xff] %vm1116_vm4, %v3894_v16  ;;  %v4649_v46 = vpop.f32.mrb[104].mxu1  ;;  %v3505_v16 = vadd.f32 %v6859_v8, %v6797_v51 }
 0x41c   : > { %v3771_v53 = vadd.f32 %v4649_v46, %v6867_v61  ;;  %v3762_v24 = vpop.f32.mrb[105].mxu1  ;;  %v6967_v63 = vadd.f32 %v4544_v49, %v3492_v27  ;;  %v3508_v46 = vadd.f32 %v6861_v58, %v6797_v51 }
 0x41d   : > { %v3763_v32 = vadd.f32 %v3762_v24, %v6855_v31  ;;  %v4650_v21 = vpop.f32.mrb[106].mxu1 }
 0x41e   : > { %v3899_v28 = vadd.f32 %v3867_v60, %v3771_v53  ;;  %v3774_v4 = vadd.f32 %v4650_v21, %v6869_v18  ;;  %v4545_v7 = vpop.f32.mrb[108].mxu0  ;;  %v3765_v44 = vpop.f32.mrb[107].mxu1  ;;  %v3875_v53 = vld [vmem:[%s6906_s22 + $0x90] sm:$0xff] }
 0x41f   : > { %v3897_v41 = vadd.f32 %v3865_v29, %v3763_v32  ;;  %v3766_v61 = vadd.f32 %v3765_v44, %v6857_v52  ;;  %v4546_v23 = vpop.f32.mrb[109].mxu0  ;;  %v3873_v32 = vld [vmem:[%s6906_s22 + $0x80] sm:$0xff] }
 0x420   : > { %3931 = vst.msk [vmem:[%s6926_s24 + $0x50] sm:$0xff] %vm1116_vm4, %v3899_v28  ;;  %v3900_v31 = vadd.f32 %v3868_v0, %v3774_v4  ;;  %v4547_v6 = vadd.f32 %v4546_v23, %v4545_v7  ;;  %v4548_v11 = vpop.f32.mrb[110].mxu0  ;;  %v3876_v28 = vld [vmem:[%s6906_s22 + $0x98] sm:$0xff] }
 0x421   : > { %3929 = vst.msk [vmem:[%s6926_s24 + $0x40] sm:$0xff] %vm1116_vm4, %v3897_v41  ;;  %v3898_v18 = vadd.f32 %v3866_v62, %v3766_v61  ;;  %v4549_v42 = vpop.f32.mrb[111].mxu0  ;;  %v3874_v41 = vld [vmem:[%s6906_s22 + $0x88] sm:$0xff] }
 0x422   : > { %3932 = vst.msk [vmem:[%s6926_s24 + $0x58] sm:$0xff] %vm1116_vm4, %v3900_v31  ;;  %v4550_v52 = vadd.f32 %v4549_v42, %v4548_v11  ;;  %v6984_v48 = vadd.f32 %v4547_v6, %v3497_v40  ;;  %v3513_v40 = vadd.f32 %v6871_v17, %v6797_v51 }
 0x423   : > { %3930 = vst.msk [vmem:[%s6926_s24 + $0x48] sm:$0xff] %vm1116_vm4, %v3898_v18  ;;  %v4653_v37 = vpop.f32.mrb[108].mxu1  ;;  %v3516_v18 = vadd.f32 %v6873_v33, %v6797_v51  ;;  %v3880_v33 = vld [vmem:[%s6906_s22 + $0xb8] sm:$0xff] }
 0x424   : > { %v3787_v12 = vadd.f32 %v4653_v37, %v6891_v1  ;;  %v3778_v10 = vpop.f32.mrb[109].mxu1  ;;  %v6991_v22 = vadd.f32 %v4550_v52, %v3500_v54  ;;  %v3879_v54 = vld [vmem:[%s6906_s22 + $0xb0] sm:$0xff] }
 0x425   : > { %v3779_v3 = vadd.f32 %v3778_v10, %v6879_v47  ;;  %v4654_v38 = vpop.f32.mrb[110].mxu1 }
 0x426   : > { %v3903_v56 = vadd.f32 %v3871_v45, %v3787_v12  ;;  %v3790_v59 = vadd.f32 %v4654_v38, %v6893_v30  ;;  %v4551_v34 = vpop.f32.mrb[112].mxu0  ;;  %v3781_v19 = vpop.f32.mrb[111].mxu1  ;;  %v3877_v45 = vld [vmem:[%s6906_s22 + $0xa0] sm:$0xff] }
 0x427   : > { %v3901_v43 = vadd.f32 %v3869_v35, %v3779_v3  ;;  %v3782_v1 = vadd.f32 %v3781_v19, %v6881_v14  ;;  %v4552_v15 = vpop.f32.mrb[113].mxu0 }
 0x428   : > { %3935 = vst.msk [vmem:[%s6926_s24 + $0x70] sm:$0xff] %vm1116_vm4, %v3903_v56  ;;  %v3904_v47 = vadd.f32 %v3872_v55, %v3790_v59  ;;  %v4553_v57 = vadd.f32 %v4552_v15, %v4551_v34  ;;  %v4554_v27 = vpop.f32.mrb[114].mxu0  ;;  %v3878_v59 = vld [vmem:[%s6906_s22 + $0xa8] sm:$0xff] }
 0x429   : > { %3933 = vst.msk [vmem:[%s6926_s24 + $0x60] sm:$0xff] %vm1116_vm4, %v3901_v43  ;;  %v3902_v30 = vadd.f32 %v3870_v20, %v3782_v1  ;;  %v4555_v49 = vpop.f32.mrb[115].mxu0  ;;  %v3521_v20 = vadd.f32 %v6883_v36, %v6797_v51 }
 0x42a   : > { %3936 = vst.msk [vmem:[%s6926_s24 + $0x78] sm:$0xff] %vm1116_vm4, %v3904_v47  ;;  %v4556_v14 = vadd.f32 %v4555_v49, %v4554_v27  ;;  %v7008_v60 = vadd.f32 %v4553_v57, %v3505_v16  ;;  %v3524_v16 = vadd.f32 %v6885_v26, %v6797_v51  ;;  %v3883_v57 = vld [vmem:[%s6906_s22 + $0xd0] sm:$0xff]  ;;  %v3881_v49 = vld [vmem:[%s6906_s22 + $0xc0] sm:$0xff] }
 0x42b   : > { %3934 = vst.msk [vmem:[%s6926_s24 + $0x68] sm:$0xff] %vm1116_vm4, %v3902_v30  ;;  %v4657_v8 = vpop.f32.mrb[112].mxu1 }
 0x42c   : > { %v3803_v24 = vadd.f32 %v4657_v8, %v6936_v5  ;;  %v3794_v29 = vpop.f32.mrb[113].mxu1  ;;  %v7015_v21 = vadd.f32 %v4556_v14, %v3508_v46 }
 0x42d   : > { %v3795_v0 = vadd.f32 %v3794_v29, %v6912_v2  ;;  %v4658_v58 = vpop.f32.mrb[114].mxu1 }
 0x42e   : > { %v3907_v4 = vadd.f32 %v3875_v53, %v3803_v24  ;;  %v3806_v7 = vadd.f32 %v4658_v58, %v6943_v25  ;;  %v4557_v44 = vpop.f32.mrb[116].mxu0  ;;  %v3797_v62 = vpop.f32.mrb[115].mxu1  ;;  %v3884_v53 = vld [vmem:[%s6906_s22 + $0xd8] sm:$0xff] }
 0x42f   : > { %v3905_v61 = vadd.f32 %v3873_v32, %v3795_v0  ;;  %v3798_v5 = vadd.f32 %v3797_v62, %v6917_v13  ;;  %v4558_v23 = vpop.f32.mrb[117].mxu0  ;;  %v3882_v0 = vld [vmem:[%s6906_s22 + $0xc8] sm:$0xff] }
 0x430   : > { %3939 = vst.msk [vmem:[%s6926_s24 + $0x90] sm:$0xff] %vm1116_vm4, %v3907_v4  ;;  %v3908_v2 = vadd.f32 %v3876_v28, %v3806_v7  ;;  %v4559_v31 = vadd.f32 %v4558_v23, %v4557_v44  ;;  %v4560_v6 = vpop.f32.mrb[118].mxu0  ;;  %v3529_v7 = vadd.f32 %v6895_v50, %v6797_v51 }
 0x431   : > { %3937 = vst.msk [vmem:[%s6926_s24 + $0x80] sm:$0xff] %vm1116_vm4, %v3905_v61  ;;  %v3906_v25 = vadd.f32 %v3874_v41, %v3798_v5  ;;  %v4561_v11 = vpop.f32.mrb[119].mxu0 }
 0x432   : > { %3940 = vst.msk [vmem:[%s6926_s24 + $0x98] sm:$0xff] %vm1116_vm4, %v3908_v2  ;;  %v4562_v13 = vadd.f32 %v4561_v11, %v4560_v6  ;;  %v3674_v42 = vadd.f32 %v4559_v31, %v3513_v40  ;;  %v3887_v40 = vld [vmem:[%s6906_s22 + $0xf0] sm:$0xff]  ;;  %v3885_v6 = vld [vmem:[%s6906_s22 + $0xe0] sm:$0xff] }
 0x433   : > { %3938 = vst.msk [vmem:[%s6926_s24 + $0x88] sm:$0xff] %vm1116_vm4, %v3906_v25  ;;  %v4661_v17 = vpop.f32.mrb[116].mxu1 }
 0x434   : > { %v3819_v52 = vadd.f32 %v4661_v17, %v6984_v48  ;;  %v3810_v37 = vpop.f32.mrb[117].mxu1  ;;  %v3677_v12 = vadd.f32 %v4562_v13, %v3516_v18  ;;  %v3888_v13 = vld [vmem:[%s6906_s22 + $0xf8] sm:$0xff]  ;;  %v3886_v17 = vld [vmem:[%s6906_s22 + $0xe8] sm:$0xff] }
 0x435   : > { %v3811_v10 = vadd.f32 %v3810_v37, %v6960_v9  ;;  %v4662_v35 = vpop.f32.mrb[118].mxu1 }
 0x436   : > { %v3911_v3 = vadd.f32 %v3879_v54, %v3819_v52  ;;  %v3822_v38 = vadd.f32 %v4662_v35, %v6991_v22  ;;  %v4563_v55 = vpop.f32.mrb[120].mxu0  ;;  %v3813_v56 = vpop.f32.mrb[119].mxu1 }
 0x437   : > { %v3909_v34 = vadd.f32 %v3877_v45, %v3811_v10  ;;  %v3814_v48 = vadd.f32 %v3813_v56, %v6967_v63  ;;  %v4564_v19 = vpop.f32.mrb[121].mxu0 }
 0x438   : > { %3943 = vst.msk [vmem:[%s6926_s24 + $0xb0] sm:$0xff] %vm1116_vm4, %v3911_v3  ;;  %v3912_v9 = vadd.f32 %v3880_v33, %v3822_v38  ;;  %v4565_v43 = vadd.f32 %v4564_v19, %v4563_v55  ;;  %v4566_v1 = vpop.f32.mrb[122].mxu0 }
 0x439   : > { %3941 = vst.msk [vmem:[%s6926_s24 + $0xa0] sm:$0xff] %vm1116_vm4, %v3909_v34  ;;  %v3910_v22 = vadd.f32 %v3878_v59, %v3814_v48  ;;  %v4567_v15 = vpop.f32.mrb[123].mxu0 }
 0x43a   : > { %3944 = vst.msk [vmem:[%s6926_s24 + $0xb8] sm:$0xff] %vm1116_vm4, %v3912_v9  ;;  %v4568_v63 = vadd.f32 %v4567_v15, %v4566_v1  ;;  %v3682_v47 = vadd.f32 %v4565_v43, %v3521_v20 }
 0x43b   : > { %3942 = vst.msk [vmem:[%s6926_s24 + $0xa8] sm:$0xff] %vm1116_vm4, %v3910_v22  ;;  %v4665_v36 = vpop.f32.mrb[120].mxu1 }
 0x43c   : > { %v3835_v27 = vadd.f32 %v4665_v36, %v3674_v42  ;;  %v3826_v30 = vpop.f32.mrb[121].mxu1  ;;  %v3685_v46 = vadd.f32 %v4568_v63, %v3524_v16 }
 0x43d   : > { %v3827_v14 = vadd.f32 %v3826_v30, %v7008_v60  ;;  %v4666_v8 = vpop.f32.mrb[122].mxu1 }
 0x43e   : > { %v3915_v26 = vadd.f32 %v3883_v57, %v3835_v27  ;;  %v3838_v24 = vadd.f32 %v4666_v8, %v3677_v12  ;;  %v4569_v29 = vpop.f32.mrb[124].mxu0  ;;  %v3829_v32 = vpop.f32.mrb[123].mxu1 }
 0x43f   : > { %v3913_v58 = vadd.f32 %v3881_v49, %v3827_v14  ;;  %v3830_v28 = vadd.f32 %v3829_v32, %v7015_v21  ;;  %v4570_v4 = vpop.f32.mrb[125].mxu0  ;;  %v3532_v21 = vadd.f32 %v6897_v39, %v6797_v51 }
 0x440   : > { %3947 = vst.msk [vmem:[%s6926_s24 + $0xd0] sm:$0xff] %vm1116_vm4, %v3915_v26  ;;  %v3916_v60 = vadd.f32 %v3884_v53, %v3838_v24  ;;  %v4571_v44 = vadd.f32 %v4570_v4, %v4569_v29  ;;  %v4572_v62 = vpop.f32.mrb[126].mxu0 }
 0x441   : > { %3945 = vst.msk [vmem:[%s6926_s24 + $0xc0] sm:$0xff] %vm1116_vm4, %v3913_v58  ;;  %v3914_v41 = vadd.f32 %v3882_v0, %v3830_v28  ;;  %v4573_v61 = vpop.f32.mrb[127].mxu0 }
 0x442   : > { %3948 = vst.msk [vmem:[%s6926_s24 + $0xd8] sm:$0xff] %vm1116_vm4, %v3916_v60  ;;  %v4574_v5 = vadd.f32 %v4573_v61, %v4572_v62  ;;  %v3690_v50 = vadd.f32 %v4571_v44, %v3529_v7 }
 0x443   : > { %3946 = vst.msk [vmem:[%s6926_s24 + $0xc8] sm:$0xff] %vm1116_vm4, %v3914_v41  ;;  %v4669_v23 = vpop.f32.mrb[124].mxu1 }
 0x444   : > { %v3851_v2 = vadd.f32 %v4669_v23, %v3690_v50  ;;  %v3842_v31 = vpop.f32.mrb[125].mxu1  ;;  %v3693_v25 = vadd.f32 %v4574_v5, %v3532_v21 }
 0x445   : > { %v3843_v11 = vadd.f32 %v3842_v31, %v3682_v47  ;;  %v4670_v18 = vpop.f32.mrb[126].mxu1 }
 0x446   : > { %v3919_v51 = vadd.f32 %v3887_v40, %v3851_v2  ;;  %v3854_v39 = vadd.f32 %v4670_v18, %v3693_v25  ;;  %v3845_v42 = vpop.f32.mrb[127].mxu1 }
 0x447   : > { %v3917_v54 = vadd.f32 %v3885_v6, %v3843_v11  ;;  %v3846_v52 = vadd.f32 %v3845_v42, %v3685_v46 }
 0x448   : > { %3951 = vst.msk [vmem:[%s6926_s24 + $0xf0] sm:$0xff] %vm1116_vm4, %v3919_v51  ;;  %v3920_v37 = vadd.f32 %v3888_v13, %v3854_v39 }
 0x449   : > { %3949 = vst.msk [vmem:[%s6926_s24 + $0xe0] sm:$0xff] %vm1116_vm4, %v3917_v54  ;;  %v3918_v45 = vadd.f32 %v3886_v17, %v3846_v52 }
 0x44a   : > { %3952 = vst.msk [vmem:[%s6926_s24 + $0xf8] sm:$0xff] %vm1116_vm4, %v3920_v37 }
 0x44b   : > { %3950 = vst.msk [vmem:[%s6926_s24 + $0xe8] sm:$0xff] %vm1116_vm4, %v3918_v45 }
 0x44c   : > { %4801 = shalt.err (!%p4798_p3)
}
 0x44d   : > { %s4802_s10 = scalar_lea.hbm %s7083_s21, 4096  ;;  %s4806_s24 = scalar_lea.hbm %s7144_s8, 8192 }
 0x44e   : > { %p4803_p4 = scmp.ne.s32.totalorder %s7083_s21, %s4802_s10  ;;  %p4807_p9 = scmp.lt.u32.totalorder %s7083_s21, %s7144_s8 }
 0x44f   : > { %p4808_p10 = scmp.lt.u32.totalorder %s4806_s24, %s4802_s10  ;;  %p4810_p12 = scmp.lt.u32.totalorder %s4802_s10, %s7083_s21 }
 0x450   : > { %p4804_p7 = pnand %p4803_p4, %p4942_p5 }
 0x451   : > { %p4809_p11 = por %p4808_p10, %p4807_p9 }
 0x452   : > { %p4805_p8 = pneg %p4804_p7 }
 0x453   : > { %p4811_p13 = por %p4810_p12, %p4809_p11 }
 0x455   : > { %p4812_p0 = pnand %p4811_p13, %p4805_p8 }
 0x457   : > { %4815 = shalt.err (!%p4812_p0)
}
 0x458   : > { %s4857_s13 = smov 128   ;;  %s4858_s19 = smov 8  }
 0x459   : > { %4671 = dma.vmem_to_hbm [thread:$0]  (%p4942_p5), %s7085_s26, 4096, %s7083_s21, %s7095_s9, %s4857_s13, %s4857_s13, %s4858_s19  }
 0x45a PF: > { %p4677_p1 = scmp.ge.s32.totalorder %s4850_s30, 2  ;;  %s3982_s17 = sand.u32 1, %s4838_s27  }
 0x45b   : > { %s3983_s12 = scalar_lea.sflag [#allocation3], %s3982_s17 }
 0x45c   : > { %p4674_p2 = pnand %p4677_p1, %p4946_p6 }
 0x45e   : > { %4833 = dma.done.wait (!%p4674_p2), %s3983_s12, 4096  }
 0x45f   : > { %4835 = vsyncadd (!%p4674_p2), %s3983_s12, 4294963200  ;;  %p18_p3 = scmp.ge.s32.totalorder %s4929_s11, 4   ;;  %s7166_s27 = smov %s4842_s28 }
 0x460   : > { %s7167_s28 = smov %s4846_s29  ;;  %s7168_s29 = smov %s4940_s14 }
 0x461   : > { %s7169_s30 = smov %s4929_s11  ;;  %20 = sbr.rel (!%p18_p3) target bundleno = 3 (0x3), region = 93 }
 0x468   :  { %3988 = vsyncpa [#allocation3], 1 }
 0x469   :  { %3990 = vsyncpa [#allocation3 + $0x1], 1 }

</bundles_post_ra>
